<compile_context>
chip_gen: v6e
topology: v6e:2x2x1
jax: 0.10.0
libtpu: 0.0.40
codegen_flags: <defaults>
</compile_context>

<pallas_src>
import functools
import math

import jax
import jax.numpy as jnp
from jax.experimental import pallas as pl
from jax.experimental.pallas import tpu as pltpu

ATOM_IN = 92                 # raw atom feature length (hard-coded in the reference)
NBR_FEA_LEN = 41
ATOM_FEA_LEN = 64            # F
N_CONV = 3
H_FEA_LEN = 128
H_HALF = H_FEA_LEN // 2      # 64
HEAD_PAD = 8                 # 4 scalar heads padded to 8 lanes (was 128 -> 16x less writeback)
FEAT_SLAB = ATOM_FEA_LEN + H_HALF   # 128-lane-dense output slab [raw | atomic_features]
PROP_NAMES = ("bond_strength", "local_charge", "coordination_energy", "migration_barrier")


def _bdot(a, b):
    """MXU matmul with bf16 inputs and f32 accumulation."""
    return jnp.dot(a.astype(jnp.bfloat16), b.astype(jnp.bfloat16),
                   preferred_element_type=jnp.float32)


def atomic_scale_kernel(
    atom_fea_ref, nbr_idx_ref,
    w_ae_ref, b_ae_ref,
    mw1s_ref, mw1n_ref, mb1_ref, mw2_ref, mb2_ref,
    uw1s_ref, uw1a_ref, ub1_ref, uw2_ref, ub2_ref,
    fe1w_ref, fe1b_ref, fe2w_ref, fe2b_ref,
    hw_ref, hb_ref,
    feat_ref, prop_ref,
    *, bt, n_atoms, max_nbrs, n_conv):
    F = ATOM_FEA_LEN
    rows = bt * n_atoms
    nm = n_atoms * max_nbrs

    # ---- atom embedding for all bt*N rows at once ------------------------------
    x = atom_fea_ref[...].reshape(rows, ATOM_IN)
    atom_features = _bdot(x, w_ae_ref[...]) + b_ae_ref[...]          # [rows, F] f32

    # ---- per-structure one-hot gather masks, built once per grid step ----------
    # (indices are layer-invariant; 0/1 values are exact in bf16)
    col = jax.lax.broadcasted_iota(jnp.int32, (nm, n_atoms), 1)      # [NM, N]
    onehots = [(nbr_idx_ref[b] == col).astype(jnp.bfloat16) for b in range(bt)]

    # ---- n_conv AtomicConvLayers -----------------------------------------------
    for l in range(n_conv):
        # gather neighbor features per structure, stack along rows
        parts = []
        for b in range(bt):
            af_b = atom_features[b * n_atoms:(b + 1) * n_atoms, :]   # [N, F]
            parts.append(_bdot(onehots[b], af_b))                    # [NM, F] = af[nbr_idx]
        nbr_feat = parts[0] if bt == 1 else jnp.concatenate(parts, axis=0)   # [bt*NM, F]

        # message_net[0]: split-weight form of Linear(cat([self, nbr])) + ReLU.
        # Self projection is computed once per atom and broadcast over neighbors
        # (replaces the old O(N^2*M*F) `expand` mask matmul).
        a_proj = _bdot(atom_features, mw1s_ref[l]) + mb1_ref[l]      # [rows, F]
        n_proj = _bdot(nbr_feat, mw1n_ref[l])                        # [bt*NM, F]
        h1 = jnp.maximum(a_proj[:, None, :]
                         + n_proj.reshape(rows, max_nbrs, F), 0.0)   # [rows, M, F]

        # neighbor sum: sublane-group reduction (replaces the `pool` mask matmul).
        # NOTE: like the PyTorch reference, ALL max_nbrs slots are summed (no
        # padding mask), so the M*b2 linearity trick below matches exactly:
        #   sum_m(h1_m @ W2 + b2) == (sum_m h1_m) @ W2 + M*b2
        h1_sum = jnp.sum(h1, axis=1)                                 # [rows, F]
        agg = _bdot(h1_sum, mw2_ref[l]) + float(max_nbrs) * mb2_ref[l]

        # update_net (split weights) + residual ReLU
        g1 = jnp.maximum(_bdot(atom_features, uw1s_ref[l])
                         + _bdot(agg, uw1a_ref[l]) + ub1_ref[l], 0.0)
        updated = _bdot(g1, uw2_ref[l]) + ub2_ref[l]
        atom_features = jnp.maximum(atom_features + updated, 0.0)

    # ---- atomic_feature_extractor: Linear -> ReLU -> (Dropout: eval id) -> Linear
    h = jnp.maximum(_bdot(atom_features, fe1w_ref[...]) + fe1b_ref[...], 0.0)
    af = _bdot(h, fe2w_ref[...]) + fe2b_ref[...]                     # [rows, 64]

    # ---- lane-dense outputs -----------------------------------------------------
    feat_ref[...] = jnp.concatenate([atom_features, af], axis=-1) \
                       .reshape(bt, n_atoms, FEAT_SLAB)              # [raw | atomic_features]
    prop_ref[...] = (_bdot(af, hw_ref[...]) + hb_ref[...]) \
                       .reshape(bt, n_atoms, HEAD_PAD)               # 4 heads fused (+4 pad)


def _choose_batch_tile(batch, n_atoms, max_nbrs):
    """Pick bt (structures per grid step): aim for >=256 MXU rows, cap by VMEM."""
    nm = n_atoms * max_nbrs
    per_struct = (nm * n_atoms * 2                 # bf16 one-hot mask
                  + 3 * nm * ATOM_FEA_LEN * 4      # nbr_feat / n_proj / h1 (f32)
                  + 8 * n_atoms * ATOM_FEA_LEN * 4)
    target = max(1, 256 // max(n_atoms, 1))
    cap = max(1, (24 * 2 ** 20) // max(per_struct, 1))
    bt = max(1, min(batch, target, cap))
    while batch % bt:
        bt -= 1
    return bt


def _vmem_limit_bytes(bt, n_atoms, max_nbrs, weights):
    nm = n_atoms * max_nbrs
    blocks = (bt * n_atoms * ATOM_IN * 4
              + bt * nm * 128 * 4                  # idx block (lane dim 1 padded to 128)
              + bt * n_atoms * FEAT_SLAB * 4
              + bt * n_atoms * 128 * 4)
    w_bytes = sum(int(w.size) * w.dtype.itemsize for w in weights)
    inter = (bt * nm * n_atoms * 2
             + 3 * bt * nm * ATOM_FEA_LEN * 4
             + 10 * bt * n_atoms * 128 * 4)
    est = 2 * blocks + 2 * w_bytes + inter
    # generous, but never above v7x's 64 MiB physical VMEM per core
    return int(min(max(2 * est, 32 * 2 ** 20), 64 * 2 ** 20))


@jax.jit
def atomic_scale_forward_batched(params, atom_fea, nbr_fea_idx):
    """Batched forward: atom_fea [B, N, 92] f32, nbr_fea_idx [B, N, M] int in [0, N)."""
    batch, n_atoms, _ = atom_fea.shape
    max_nbrs = nbr_fea_idx.shape[-1]
    nm = n_atoms * max_nbrs

    bt = _choose_batch_tile(batch, n_atoms, max_nbrs)
    grid = (batch // bt,)

    atom_fea = atom_fea.astype(jnp.float32)
    idx = nbr_fea_idx.reshape(batch, nm, 1).astype(jnp.int32)

    bf16 = jnp.bfloat16
    weights = (
        params["w_atom_emb"].astype(bf16), params["b_atom_emb"],
        params["msg_w1_self"].astype(bf16), params["msg_w1_nbr"].astype(bf16), params["msg_b1"],
        params["msg_w2"].astype(bf16), params["msg_b2"],
        params["upd_w1_self"].astype(bf16), params["upd_w1_agg"].astype(bf16), params["upd_b1"],
        params["upd_w2"].astype(bf16), params["upd_b2"],
        params["fe1_w"].astype(bf16), params["fe1_b"],
        params["fe2_w"].astype(bf16), params["fe2_b"],
        params["head_w"].astype(bf16), params["head_b"],
    )

    kernel = functools.partial(atomic_scale_kernel, bt=bt, n_atoms=n_atoms,
                               max_nbrs=max_nbrs, n_conv=N_CONV)

    def tiled(shape):
        nd = len(shape)
        return pl.BlockSpec((bt,) + tuple(shape),
                            lambda i, _nd=nd: (i,) + (0,) * _nd)

    def shared(arr):
        nd = arr.ndim
        return pl.BlockSpec(arr.shape, lambda i, _nd=nd: (0,) * _nd)

    in_specs = [tiled((n_atoms, ATOM_IN)), tiled((nm, 1))]
    in_specs += [shared(w) for w in weights]
    out_specs = (tiled((n_atoms, FEAT_SLAB)), tiled((n_atoms, HEAD_PAD)))
    out_shape = (jax.ShapeDtypeStruct((batch, n_atoms, FEAT_SLAB), jnp.float32),
                 jax.ShapeDtypeStruct((batch, n_atoms, HEAD_PAD), jnp.float32))

    feat, props = pl.pallas_call(
        kernel,
        out_shape=out_shape,
        grid=grid,
        in_specs=in_specs,
        out_specs=out_specs,
        compiler_params=pltpu.CompilerParams(
            dimension_semantics=("parallel",),
            vmem_limit_bytes=_vmem_limit_bytes(bt, n_atoms, max_nbrs, weights)),
    )(atom_fea, idx, *weights)

    out = {name: props[..., i:i + 1] for i, name in enumerate(PROP_NAMES)}
    out["raw_atom_features"] = feat[..., :ATOM_FEA_LEN]
    out["atomic_features"] = feat[..., ATOM_FEA_LEN:]
    return out


def atomic_scale_forward(params, atom_fea, nbr_fea, nbr_fea_idx):
    """Single-structure forward matching the PyTorch module signature.

    The reference computes nbr_embedding(nbr_fea) but AtomicConvLayer.forward
    never uses its nbr_features argument and the result is not returned, so the
    dead matmul / HBM read is dropped.
    """
    del nbr_fea
    out = atomic_scale_forward_batched(params, atom_fea[None], nbr_fea_idx[None])
    return {k: v[0] for k, v in out.items()}


# ---------------- deterministic parameter construction (no checkpoints) ---------
def _linear(key, fan_in, fan_out):
    kw, kb = jax.random.split(key)
    bound = 1.0 / math.sqrt(fan_in)
    w = jax.random.uniform(kw, (fan_in, fan_out), jnp.float32, -bound, bound)
    b = jax.random.uniform(kb, (1, fan_out), jnp.float32, -bound, bound)
    return w, b


def init_params(key):
    keys = jax.random.split(key, 16)
    p = {}
    p["w_atom_emb"], p["b_atom_emb"] = _linear(keys[0], ATOM_IN, ATOM_FEA_LEN)
    # nbr_embedding exists in the reference module but its output is never consumed.

    m1s, m1n, m1b, m2w, m2b = [], [], [], [], []
    u1s, u1a, u1b, u2w, u2b = [], [], [], [], []
    for l in range(N_CONV):
        k = jax.random.split(keys[2 + l], 4)
        w, b = _linear(k[0], 2 * ATOM_FEA_LEN, ATOM_FEA_LEN)      # message_net[0], split
        m1s.append(w[:ATOM_FEA_LEN]); m1n.append(w[ATOM_FEA_LEN:]); m1b.append(b)
        w, b = _linear(k[1], ATOM_FEA_LEN, ATOM_FEA_LEN)          # message_net[2]
        m2w.append(w); m2b.append(b)
        w, b = _linear(k[2], 2 * ATOM_FEA_LEN, ATOM_FEA_LEN)      # update_net[0], split
        u1s.append(w[:ATOM_FEA_LEN]); u1a.append(w[ATOM_FEA_LEN:]); u1b.append(b)
        w, b = _linear(k[3], ATOM_FEA_LEN, ATOM_FEA_LEN)          # update_net[2]
        u2w.append(w); u2b.append(b)
    p["msg_w1_self"] = jnp.stack(m1s); p["msg_w1_nbr"] = jnp.stack(m1n); p["msg_b1"] = jnp.stack(m1b)
    p["msg_w2"] = jnp.stack(m2w); p["msg_b2"] = jnp.stack(m2b)
    p["upd_w1_self"] = jnp.stack(u1s); p["upd_w1_agg"] = jnp.stack(u1a); p["upd_b1"] = jnp.stack(u1b)
    p["upd_w2"] = jnp.stack(u2w); p["upd_b2"] = jnp.stack(u2b)

    p["fe1_w"], p["fe1_b"] = _linear(keys[5], ATOM_FEA_LEN, H_FEA_LEN)
    p["fe2_w"], p["fe2_b"] = _linear(keys[6], H_FEA_LEN, H_HALF)

    hw, hb = [], []
    for i in range(len(PROP_NAMES)):
        w, b = _linear(keys[7 + i], H_HALF, 1)
        hw.append(w); hb.append(b)
    head_w = jnp.concatenate(hw, axis=1)                          # [H_HALF, 4]
    head_b = jnp.concatenate(hb, axis=1)                          # [1, 4]
    pad = HEAD_PAD - len(PROP_NAMES)
    p["head_w"] = jnp.pad(head_w, ((0, 0), (0, pad)))             # [H_HALF, 8]
    p["head_b"] = jnp.pad(head_b, ((0, 0), (0, pad)))             # [1, 8]
    return p


if __name__ == "__main__":
    key = jax.random.PRNGKey(0)
    k_param, k_atom, k_nbr, k_idx = jax.random.split(key, 4)

    B, N_ATOMS, MAX_NBRS = 4, 16, 8
    params = init_params(k_param)
    atom_fea = jax.random.normal(k_atom, (B, N_ATOMS, ATOM_IN), jnp.float32)
    nbr_fea = jax.random.normal(k_nbr, (B, N_ATOMS, MAX_NBRS, NBR_FEA_LEN), jnp.float32)
    nbr_fea_idx = jax.random.randint(k_idx, (B, N_ATOMS, MAX_NBRS), 0, N_ATOMS, jnp.int32)

    # Batched (grid over batch tiles, "parallel" axis).
    out_b = atomic_scale_forward_batched(params, atom_fea, nbr_fea_idx)
    jax.block_until_ready(out_b)
    assert out_b["bond_strength"].shape == (B, N_ATOMS, 1)
    assert out_b["local_charge"].shape == (B, N_ATOMS, 1)
    assert out_b["coordination_energy"].shape == (B, N_ATOMS, 1)
    assert out_b["migration_barrier"].shape == (B, N_ATOMS, 1)
    assert out_b["atomic_features"].shape == (B, N_ATOMS, H_HALF)
    assert out_b["raw_atom_features"].shape == (B, N_ATOMS, ATOM_FEA_LEN)

    # Single structure (matches the PyTorch module signature / output shapes).
    out_s = atomic_scale_forward(params, atom_fea[0], nbr_fea[0], nbr_fea_idx[0])
    jax.block_until_ready(out_s)
    assert out_s["bond_strength"].shape == (N_ATOMS, 1)
    assert out_s["local_charge"].shape == (N_ATOMS, 1)
    assert out_s["coordination_energy"].shape == (N_ATOMS, 1)
    assert out_s["migration_barrier"].shape == (N_ATOMS, 1)
    assert out_s["atomic_features"].shape == (N_ATOMS, H_HALF)
    assert out_s["raw_atom_features"].shape == (N_ATOMS, ATOM_FEA_LEN)

    print("KERNEL_OK")
</pallas_src>

<mosaic_0001>
module attributes {stable_mosaic.version = 11 : i64} {
  func.func @atomic_scale_kernel(%arg0: i32, %arg1: memref<4x16x92xf32, #tpu.memory_space<vmem>>, %arg2: memref<4x128x1xi32, #tpu.memory_space<vmem>>, %arg3: memref<92x64xbf16, #tpu.memory_space<vmem>>, %arg4: memref<1x64xf32, #tpu.memory_space<vmem>>, %arg5: memref<3x64x64xbf16, #tpu.memory_space<vmem>>, %arg6: memref<3x64x64xbf16, #tpu.memory_space<vmem>>, %arg7: memref<3x1x64xf32, #tpu.memory_space<vmem>>, %arg8: memref<3x64x64xbf16, #tpu.memory_space<vmem>>, %arg9: memref<3x1x64xf32, #tpu.memory_space<vmem>>, %arg10: memref<3x64x64xbf16, #tpu.memory_space<vmem>>, %arg11: memref<3x64x64xbf16, #tpu.memory_space<vmem>>, %arg12: memref<3x1x64xf32, #tpu.memory_space<vmem>>, %arg13: memref<3x64x64xbf16, #tpu.memory_space<vmem>>, %arg14: memref<3x1x64xf32, #tpu.memory_space<vmem>>, %arg15: memref<64x128xbf16, #tpu.memory_space<vmem>>, %arg16: memref<1x128xf32, #tpu.memory_space<vmem>>, %arg17: memref<128x64xbf16, #tpu.memory_space<vmem>>, %arg18: memref<1x64xf32, #tpu.memory_space<vmem>>, %arg19: memref<64x8xbf16, #tpu.memory_space<vmem>>, %arg20: memref<1x8xf32, #tpu.memory_space<vmem>>, %arg21: memref<4x16x128xf32, #tpu.memory_space<vmem>>, %arg22: memref<4x16x8xf32, #tpu.memory_space<vmem>>) attributes {dimension_semantics = [#tpu.dimension_semantics<parallel>], iteration_bounds = array<i64: 1>, scalar_prefetch = 0 : i64, scratch_operands = 0 : i64, tpu.core_type = #tpu.core_type<tc>, window_params = [{transform_indices = @transform_0, window_bounds = array<i64: 4, 16, 92>}, {transform_indices = @transform_1, window_bounds = array<i64: 4, 128, 1>}, {pipeline_mode = #tpu.pipeline_mode<synchronous>, transform_indices = @transform_2, window_bounds = array<i64: 92, 64>}, {pipeline_mode = #tpu.pipeline_mode<synchronous>, transform_indices = @transform_3, window_bounds = array<i64: 1, 64>}, {pipeline_mode = #tpu.pipeline_mode<synchronous>, transform_indices = @transform_4, window_bounds = array<i64: 3, 64, 64>}, {pipeline_mode = #tpu.pipeline_mode<synchronous>, transform_indices = @transform_5, window_bounds = array<i64: 3, 64, 64>}, {pipeline_mode = #tpu.pipeline_mode<synchronous>, transform_indices = @transform_6, window_bounds = array<i64: 3, 1, 64>}, {pipeline_mode = #tpu.pipeline_mode<synchronous>, transform_indices = @transform_7, window_bounds = array<i64: 3, 64, 64>}, {pipeline_mode = #tpu.pipeline_mode<synchronous>, transform_indices = @transform_8, window_bounds = array<i64: 3, 1, 64>}, {pipeline_mode = #tpu.pipeline_mode<synchronous>, transform_indices = @transform_9, window_bounds = array<i64: 3, 64, 64>}, {pipeline_mode = #tpu.pipeline_mode<synchronous>, transform_indices = @transform_10, window_bounds = array<i64: 3, 64, 64>}, {pipeline_mode = #tpu.pipeline_mode<synchronous>, transform_indices = @transform_11, window_bounds = array<i64: 3, 1, 64>}, {pipeline_mode = #tpu.pipeline_mode<synchronous>, transform_indices = @transform_12, window_bounds = array<i64: 3, 64, 64>}, {pipeline_mode = #tpu.pipeline_mode<synchronous>, transform_indices = @transform_13, window_bounds = array<i64: 3, 1, 64>}, {pipeline_mode = #tpu.pipeline_mode<synchronous>, transform_indices = @transform_14, window_bounds = array<i64: 64, 128>}, {pipeline_mode = #tpu.pipeline_mode<synchronous>, transform_indices = @transform_15, window_bounds = array<i64: 1, 128>}, {pipeline_mode = #tpu.pipeline_mode<synchronous>, transform_indices = @transform_16, window_bounds = array<i64: 128, 64>}, {pipeline_mode = #tpu.pipeline_mode<synchronous>, transform_indices = @transform_17, window_bounds = array<i64: 1, 64>}, {pipeline_mode = #tpu.pipeline_mode<synchronous>, transform_indices = @transform_18, window_bounds = array<i64: 64, 8>}, {pipeline_mode = #tpu.pipeline_mode<synchronous>, transform_indices = @transform_19, window_bounds = array<i64: 1, 8>}, {transform_indices = @transform_20, window_bounds = array<i64: 4, 16, 128>}, {transform_indices = @transform_21, window_bounds = array<i64: 4, 16, 8>}]} {
    %c0 = arith.constant 0 : index
    %c0_0 = arith.constant 0 : index
    %c0_1 = arith.constant 0 : index
    %0 = vector.load %arg1[%c0, %c0_0, %c0_1] : memref<4x16x92xf32, #tpu.memory_space<vmem>>, vector<4x16x92xf32>
    %1 = vector.shape_cast %0 : vector<4x16x92xf32> to vector<64x92xf32>
    %c0_2 = arith.constant 0 : index
    %c0_3 = arith.constant 0 : index
    %2 = vector.load %arg3[%c0_2, %c0_3] : memref<92x64xbf16, #tpu.memory_space<vmem>>, vector<92x64xbf16>
    %3 = arith.truncf %1 : vector<64x92xf32> to vector<64x92xbf16>
    %cst = arith.constant dense<0.000000e+00> : vector<64x64xf32>
    %4 = tpu.matmul %3, %2, %cst {dimension_numbers = #tpu.dot_dimension_numbers<[1], [0], [0], [1], [0, 0, 1, 1], [], []>} : vector<64x92xbf16>, vector<92x64xbf16>, vector<64x64xf32> -> vector<64x64xf32>
    %c0_4 = arith.constant 0 : index
    %c0_5 = arith.constant 0 : index
    %5 = vector.load %arg4[%c0_4, %c0_5] : memref<1x64xf32, #tpu.memory_space<vmem>>, vector<1x64xf32>
    %6 = vector.broadcast %5 : vector<1x64xf32> to vector<64x64xf32>
    %7 = arith.addf %4, %6 : vector<64x64xf32>
    %8 = tpu.iota {dimensions = array<i32: 1>} : vector<128x16xi32>
    %c0_6 = arith.constant 0 : index
    %c0_7 = arith.constant 0 : index
    %c0_8 = arith.constant 0 : index
    %9 = vector.load %arg2[%c0_6, %c0_7, %c0_8] : memref<4x128x1xi32, #tpu.memory_space<vmem>>, vector<1x128x1xi32>
    %10 = vector.shape_cast %9 : vector<1x128x1xi32> to vector<128x1xi32>
    %11 = vector.broadcast %10 : vector<128x1xi32> to vector<128x16xi32>
    %12 = arith.cmpi eq, %11, %8 : vector<128x16xi32>
    %13 = arith.extui %12 : vector<128x16xi1> to vector<128x16xi32>
    %14 = arith.sitofp %13 : vector<128x16xi32> to vector<128x16xf32>
    %15 = arith.truncf %14 : vector<128x16xf32> to vector<128x16xbf16>
    %c1 = arith.constant 1 : index
    %c0_9 = arith.constant 0 : index
    %c0_10 = arith.constant 0 : index
    %16 = vector.load %arg2[%c1, %c0_9, %c0_10] : memref<4x128x1xi32, #tpu.memory_space<vmem>>, vector<1x128x1xi32>
    %17 = vector.shape_cast %16 : vector<1x128x1xi32> to vector<128x1xi32>
    %18 = vector.broadcast %17 : vector<128x1xi32> to vector<128x16xi32>
    %19 = arith.cmpi eq, %18, %8 : vector<128x16xi32>
    %20 = arith.extui %19 : vector<128x16xi1> to vector<128x16xi32>
    %21 = arith.sitofp %20 : vector<128x16xi32> to vector<128x16xf32>
    %22 = arith.truncf %21 : vector<128x16xf32> to vector<128x16xbf16>
    %c2 = arith.constant 2 : index
    %c0_11 = arith.constant 0 : index
    %c0_12 = arith.constant 0 : index
    %23 = vector.load %arg2[%c2, %c0_11, %c0_12] : memref<4x128x1xi32, #tpu.memory_space<vmem>>, vector<1x128x1xi32>
    %24 = vector.shape_cast %23 : vector<1x128x1xi32> to vector<128x1xi32>
    %25 = vector.broadcast %24 : vector<128x1xi32> to vector<128x16xi32>
    %26 = arith.cmpi eq, %25, %8 : vector<128x16xi32>
    %27 = arith.extui %26 : vector<128x16xi1> to vector<128x16xi32>
    %28 = arith.sitofp %27 : vector<128x16xi32> to vector<128x16xf32>
    %29 = arith.truncf %28 : vector<128x16xf32> to vector<128x16xbf16>
    %c3 = arith.constant 3 : index
    %c0_13 = arith.constant 0 : index
    %c0_14 = arith.constant 0 : index
    %30 = vector.load %arg2[%c3, %c0_13, %c0_14] : memref<4x128x1xi32, #tpu.memory_space<vmem>>, vector<1x128x1xi32>
    %31 = vector.shape_cast %30 : vector<1x128x1xi32> to vector<128x1xi32>
    %32 = vector.broadcast %31 : vector<128x1xi32> to vector<128x16xi32>
    %33 = arith.cmpi eq, %32, %8 : vector<128x16xi32>
    %34 = arith.extui %33 : vector<128x16xi1> to vector<128x16xi32>
    %35 = arith.sitofp %34 : vector<128x16xi32> to vector<128x16xf32>
    %36 = arith.truncf %35 : vector<128x16xf32> to vector<128x16xbf16>
    %37 = vector.extract_strided_slice %7 {offsets = [0, 0], sizes = [16, 64], strides = [1, 1]} : vector<64x64xf32> to vector<16x64xf32>
    %38 = arith.truncf %37 : vector<16x64xf32> to vector<16x64xbf16>
    %cst_15 = arith.constant dense<0.000000e+00> : vector<128x64xf32>
    %39 = tpu.matmul %15, %38, %cst_15 {dimension_numbers = #tpu.dot_dimension_numbers<[1], [0], [0], [1], [0, 0, 1, 1], [], []>} : vector<128x16xbf16>, vector<16x64xbf16>, vector<128x64xf32> -> vector<128x64xf32>
    %40 = vector.extract_strided_slice %7 {offsets = [16, 0], sizes = [16, 64], strides = [1, 1]} : vector<64x64xf32> to vector<16x64xf32>
    %41 = arith.truncf %40 : vector<16x64xf32> to vector<16x64xbf16>
    %cst_16 = arith.constant dense<0.000000e+00> : vector<128x64xf32>
    %42 = tpu.matmul %22, %41, %cst_16 {dimension_numbers = #tpu.dot_dimension_numbers<[1], [0], [0], [1], [0, 0, 1, 1], [], []>} : vector<128x16xbf16>, vector<16x64xbf16>, vector<128x64xf32> -> vector<128x64xf32>
    %43 = vector.extract_strided_slice %7 {offsets = [32, 0], sizes = [16, 64], strides = [1, 1]} : vector<64x64xf32> to vector<16x64xf32>
    %44 = arith.truncf %43 : vector<16x64xf32> to vector<16x64xbf16>
    %cst_17 = arith.constant dense<0.000000e+00> : vector<128x64xf32>
    %45 = tpu.matmul %29, %44, %cst_17 {dimension_numbers = #tpu.dot_dimension_numbers<[1], [0], [0], [1], [0, 0, 1, 1], [], []>} : vector<128x16xbf16>, vector<16x64xbf16>, vector<128x64xf32> -> vector<128x64xf32>
    %46 = vector.extract_strided_slice %7 {offsets = [48, 0], sizes = [16, 64], strides = [1, 1]} : vector<64x64xf32> to vector<16x64xf32>
    %47 = arith.truncf %46 : vector<16x64xf32> to vector<16x64xbf16>
    %cst_18 = arith.constant dense<0.000000e+00> : vector<128x64xf32>
    %48 = tpu.matmul %36, %47, %cst_18 {dimension_numbers = #tpu.dot_dimension_numbers<[1], [0], [0], [1], [0, 0, 1, 1], [], []>} : vector<128x16xbf16>, vector<16x64xbf16>, vector<128x64xf32> -> vector<128x64xf32>
    %49 = tpu.concatenate %39, %42, %45, %48 in 0 : vector<128x64xf32>, vector<128x64xf32>, vector<128x64xf32>, vector<128x64xf32> -> vector<512x64xf32>
    %c0_19 = arith.constant 0 : index
    %c0_20 = arith.constant 0 : index
    %c0_21 = arith.constant 0 : index
    %50 = vector.load %arg5[%c0_19, %c0_20, %c0_21] : memref<3x64x64xbf16, #tpu.memory_space<vmem>>, vector<1x64x64xbf16>
    %51 = vector.shape_cast %50 : vector<1x64x64xbf16> to vector<64x64xbf16>
    %52 = arith.truncf %7 : vector<64x64xf32> to vector<64x64xbf16>
    %cst_22 = arith.constant dense<0.000000e+00> : vector<64x64xf32>
    %53 = tpu.matmul %52, %51, %cst_22 {dimension_numbers = #tpu.dot_dimension_numbers<[1], [0], [0], [1], [0, 0, 1, 1], [], []>} : vector<64x64xbf16>, vector<64x64xbf16>, vector<64x64xf32> -> vector<64x64xf32>
    %c0_23 = arith.constant 0 : index
    %c0_24 = arith.constant 0 : index
    %c0_25 = arith.constant 0 : index
    %54 = vector.load %arg7[%c0_23, %c0_24, %c0_25] : memref<3x1x64xf32, #tpu.memory_space<vmem>>, vector<1x1x64xf32>
    %55 = vector.shape_cast %54 : vector<1x1x64xf32> to vector<1x64xf32>
    %56 = vector.broadcast %55 : vector<1x64xf32> to vector<64x64xf32>
    %57 = arith.addf %53, %56 : vector<64x64xf32>
    %c0_26 = arith.constant 0 : index
    %c0_27 = arith.constant 0 : index
    %c0_28 = arith.constant 0 : index
    %58 = vector.load %arg6[%c0_26, %c0_27, %c0_28] : memref<3x64x64xbf16, #tpu.memory_space<vmem>>, vector<1x64x64xbf16>
    %59 = vector.shape_cast %58 : vector<1x64x64xbf16> to vector<64x64xbf16>
    %60 = arith.truncf %49 : vector<512x64xf32> to vector<512x64xbf16>
    %cst_29 = arith.constant dense<0.000000e+00> : vector<512x64xf32>
    %61 = tpu.matmul %60, %59, %cst_29 {dimension_numbers = #tpu.dot_dimension_numbers<[1], [0], [0], [1], [0, 0, 1, 1], [], []>} : vector<512x64xbf16>, vector<64x64xbf16>, vector<512x64xf32> -> vector<512x64xf32>
    %62 = vector.shape_cast %57 : vector<64x64xf32> to vector<64x1x64xf32>
    %63 = vector.shape_cast %61 : vector<512x64xf32> to vector<64x8x64xf32>
    %64 = vector.broadcast %62 : vector<64x1x64xf32> to vector<64x8x64xf32>
    %65 = arith.addf %64, %63 : vector<64x8x64xf32>
    %cst_30 = arith.constant 0.000000e+00 : f32
    %66 = vector.broadcast %cst_30 : f32 to vector<64x8x64xf32>
    %67 = arith.maximumf %65, %66 : vector<64x8x64xf32>
    %cst_31 = arith.constant dense<0.000000e+00> : vector<64x64xf32>
    %68 = vector.multi_reduction <add>, %67, %cst_31 [1] : vector<64x8x64xf32> to vector<64x64xf32>
    %c0_32 = arith.constant 0 : index
    %c0_33 = arith.constant 0 : index
    %c0_34 = arith.constant 0 : index
    %69 = vector.load %arg8[%c0_32, %c0_33, %c0_34] : memref<3x64x64xbf16, #tpu.memory_space<vmem>>, vector<1x64x64xbf16>
    %70 = vector.shape_cast %69 : vector<1x64x64xbf16> to vector<64x64xbf16>
    %71 = arith.truncf %68 : vector<64x64xf32> to vector<64x64xbf16>
    %cst_35 = arith.constant dense<0.000000e+00> : vector<64x64xf32>
    %72 = tpu.matmul %71, %70, %cst_35 {dimension_numbers = #tpu.dot_dimension_numbers<[1], [0], [0], [1], [0, 0, 1, 1], [], []>} : vector<64x64xbf16>, vector<64x64xbf16>, vector<64x64xf32> -> vector<64x64xf32>
    %c0_36 = arith.constant 0 : index
    %c0_37 = arith.constant 0 : index
    %c0_38 = arith.constant 0 : index
    %73 = vector.load %arg9[%c0_36, %c0_37, %c0_38] : memref<3x1x64xf32, #tpu.memory_space<vmem>>, vector<1x1x64xf32>
    %74 = vector.shape_cast %73 : vector<1x1x64xf32> to vector<1x64xf32>
    %cst_39 = arith.constant 8.000000e+00 : f32
    %75 = vector.broadcast %cst_39 : f32 to vector<1x64xf32>
    %76 = arith.mulf %75, %74 : vector<1x64xf32>
    %77 = vector.broadcast %76 : vector<1x64xf32> to vector<64x64xf32>
    %78 = arith.addf %72, %77 : vector<64x64xf32>
    %c0_40 = arith.constant 0 : index
    %c0_41 = arith.constant 0 : index
    %c0_42 = arith.constant 0 : index
    %79 = vector.load %arg10[%c0_40, %c0_41, %c0_42] : memref<3x64x64xbf16, #tpu.memory_space<vmem>>, vector<1x64x64xbf16>
    %80 = vector.shape_cast %79 : vector<1x64x64xbf16> to vector<64x64xbf16>
    %81 = arith.truncf %7 : vector<64x64xf32> to vector<64x64xbf16>
    %cst_43 = arith.constant dense<0.000000e+00> : vector<64x64xf32>
    %82 = tpu.matmul %81, %80, %cst_43 {dimension_numbers = #tpu.dot_dimension_numbers<[1], [0], [0], [1], [0, 0, 1, 1], [], []>} : vector<64x64xbf16>, vector<64x64xbf16>, vector<64x64xf32> -> vector<64x64xf32>
    %c0_44 = arith.constant 0 : index
    %c0_45 = arith.constant 0 : index
    %c0_46 = arith.constant 0 : index
    %83 = vector.load %arg11[%c0_44, %c0_45, %c0_46] : memref<3x64x64xbf16, #tpu.memory_space<vmem>>, vector<1x64x64xbf16>
    %84 = vector.shape_cast %83 : vector<1x64x64xbf16> to vector<64x64xbf16>
    %85 = arith.truncf %78 : vector<64x64xf32> to vector<64x64xbf16>
    %cst_47 = arith.constant dense<0.000000e+00> : vector<64x64xf32>
    %86 = tpu.matmul %85, %84, %cst_47 {dimension_numbers = #tpu.dot_dimension_numbers<[1], [0], [0], [1], [0, 0, 1, 1], [], []>} : vector<64x64xbf16>, vector<64x64xbf16>, vector<64x64xf32> -> vector<64x64xf32>
    %87 = arith.addf %82, %86 : vector<64x64xf32>
    %c0_48 = arith.constant 0 : index
    %c0_49 = arith.constant 0 : index
    %c0_50 = arith.constant 0 : index
    %88 = vector.load %arg12[%c0_48, %c0_49, %c0_50] : memref<3x1x64xf32, #tpu.memory_space<vmem>>, vector<1x1x64xf32>
    %89 = vector.shape_cast %88 : vector<1x1x64xf32> to vector<1x64xf32>
    %90 = vector.broadcast %89 : vector<1x64xf32> to vector<64x64xf32>
    %91 = arith.addf %87, %90 : vector<64x64xf32>
    %cst_51 = arith.constant 0.000000e+00 : f32
    %92 = vector.broadcast %cst_51 : f32 to vector<64x64xf32>
    %93 = arith.maximumf %91, %92 : vector<64x64xf32>
    %c0_52 = arith.constant 0 : index
    %c0_53 = arith.constant 0 : index
    %c0_54 = arith.constant 0 : index
    %94 = vector.load %arg13[%c0_52, %c0_53, %c0_54] : memref<3x64x64xbf16, #tpu.memory_space<vmem>>, vector<1x64x64xbf16>
    %95 = vector.shape_cast %94 : vector<1x64x64xbf16> to vector<64x64xbf16>
    %96 = arith.truncf %93 : vector<64x64xf32> to vector<64x64xbf16>
    %cst_55 = arith.constant dense<0.000000e+00> : vector<64x64xf32>
    %97 = tpu.matmul %96, %95, %cst_55 {dimension_numbers = #tpu.dot_dimension_numbers<[1], [0], [0], [1], [0, 0, 1, 1], [], []>} : vector<64x64xbf16>, vector<64x64xbf16>, vector<64x64xf32> -> vector<64x64xf32>
    %c0_56 = arith.constant 0 : index
    %c0_57 = arith.constant 0 : index
    %c0_58 = arith.constant 0 : index
    %98 = vector.load %arg14[%c0_56, %c0_57, %c0_58] : memref<3x1x64xf32, #tpu.memory_space<vmem>>, vector<1x1x64xf32>
    %99 = vector.shape_cast %98 : vector<1x1x64xf32> to vector<1x64xf32>
    %100 = vector.broadcast %99 : vector<1x64xf32> to vector<64x64xf32>
    %101 = arith.addf %97, %100 : vector<64x64xf32>
    %102 = arith.addf %7, %101 : vector<64x64xf32>
    %cst_59 = arith.constant 0.000000e+00 : f32
    %103 = vector.broadcast %cst_59 : f32 to vector<64x64xf32>
    %104 = arith.maximumf %102, %103 : vector<64x64xf32>
    %105 = vector.extract_strided_slice %104 {offsets = [0, 0], sizes = [16, 64], strides = [1, 1]} : vector<64x64xf32> to vector<16x64xf32>
    %106 = arith.truncf %105 : vector<16x64xf32> to vector<16x64xbf16>
    %cst_60 = arith.constant dense<0.000000e+00> : vector<128x64xf32>
    %107 = tpu.matmul %15, %106, %cst_60 {dimension_numbers = #tpu.dot_dimension_numbers<[1], [0], [0], [1], [0, 0, 1, 1], [], []>} : vector<128x16xbf16>, vector<16x64xbf16>, vector<128x64xf32> -> vector<128x64xf32>
    %108 = vector.extract_strided_slice %104 {offsets = [16, 0], sizes = [16, 64], strides = [1, 1]} : vector<64x64xf32> to vector<16x64xf32>
    %109 = arith.truncf %108 : vector<16x64xf32> to vector<16x64xbf16>
    %cst_61 = arith.constant dense<0.000000e+00> : vector<128x64xf32>
    %110 = tpu.matmul %22, %109, %cst_61 {dimension_numbers = #tpu.dot_dimension_numbers<[1], [0], [0], [1], [0, 0, 1, 1], [], []>} : vector<128x16xbf16>, vector<16x64xbf16>, vector<128x64xf32> -> vector<128x64xf32>
    %111 = vector.extract_strided_slice %104 {offsets = [32, 0], sizes = [16, 64], strides = [1, 1]} : vector<64x64xf32> to vector<16x64xf32>
    %112 = arith.truncf %111 : vector<16x64xf32> to vector<16x64xbf16>
    %cst_62 = arith.constant dense<0.000000e+00> : vector<128x64xf32>
    %113 = tpu.matmul %29, %112, %cst_62 {dimension_numbers = #tpu.dot_dimension_numbers<[1], [0], [0], [1], [0, 0, 1, 1], [], []>} : vector<128x16xbf16>, vector<16x64xbf16>, vector<128x64xf32> -> vector<128x64xf32>
    %114 = vector.extract_strided_slice %104 {offsets = [48, 0], sizes = [16, 64], strides = [1, 1]} : vector<64x64xf32> to vector<16x64xf32>
    %115 = arith.truncf %114 : vector<16x64xf32> to vector<16x64xbf16>
    %cst_63 = arith.constant dense<0.000000e+00> : vector<128x64xf32>
    %116 = tpu.matmul %36, %115, %cst_63 {dimension_numbers = #tpu.dot_dimension_numbers<[1], [0], [0], [1], [0, 0, 1, 1], [], []>} : vector<128x16xbf16>, vector<16x64xbf16>, vector<128x64xf32> -> vector<128x64xf32>
    %117 = tpu.concatenate %107, %110, %113, %116 in 0 : vector<128x64xf32>, vector<128x64xf32>, vector<128x64xf32>, vector<128x64xf32> -> vector<512x64xf32>
    %c1_64 = arith.constant 1 : index
    %c0_65 = arith.constant 0 : index
    %c0_66 = arith.constant 0 : index
    %118 = vector.load %arg5[%c1_64, %c0_65, %c0_66] : memref<3x64x64xbf16, #tpu.memory_space<vmem>>, vector<1x64x64xbf16>
    %119 = vector.shape_cast %118 : vector<1x64x64xbf16> to vector<64x64xbf16>
    %120 = arith.truncf %104 : vector<64x64xf32> to vector<64x64xbf16>
    %cst_67 = arith.constant dense<0.000000e+00> : vector<64x64xf32>
    %121 = tpu.matmul %120, %119, %cst_67 {dimension_numbers = #tpu.dot_dimension_numbers<[1], [0], [0], [1], [0, 0, 1, 1], [], []>} : vector<64x64xbf16>, vector<64x64xbf16>, vector<64x64xf32> -> vector<64x64xf32>
    %c1_68 = arith.constant 1 : index
    %c0_69 = arith.constant 0 : index
    %c0_70 = arith.constant 0 : index
    %122 = vector.load %arg7[%c1_68, %c0_69, %c0_70] : memref<3x1x64xf32, #tpu.memory_space<vmem>>, vector<1x1x64xf32>
    %123 = vector.shape_cast %122 : vector<1x1x64xf32> to vector<1x64xf32>
    %124 = vector.broadcast %123 : vector<1x64xf32> to vector<64x64xf32>
    %125 = arith.addf %121, %124 : vector<64x64xf32>
    %c1_71 = arith.constant 1 : index
    %c0_72 = arith.constant 0 : index
    %c0_73 = arith.constant 0 : index
    %126 = vector.load %arg6[%c1_71, %c0_72, %c0_73] : memref<3x64x64xbf16, #tpu.memory_space<vmem>>, vector<1x64x64xbf16>
    %127 = vector.shape_cast %126 : vector<1x64x64xbf16> to vector<64x64xbf16>
    %128 = arith.truncf %117 : vector<512x64xf32> to vector<512x64xbf16>
    %cst_74 = arith.constant dense<0.000000e+00> : vector<512x64xf32>
    %129 = tpu.matmul %128, %127, %cst_74 {dimension_numbers = #tpu.dot_dimension_numbers<[1], [0], [0], [1], [0, 0, 1, 1], [], []>} : vector<512x64xbf16>, vector<64x64xbf16>, vector<512x64xf32> -> vector<512x64xf32>
    %130 = vector.shape_cast %125 : vector<64x64xf32> to vector<64x1x64xf32>
    %131 = vector.shape_cast %129 : vector<512x64xf32> to vector<64x8x64xf32>
    %132 = vector.broadcast %130 : vector<64x1x64xf32> to vector<64x8x64xf32>
    %133 = arith.addf %132, %131 : vector<64x8x64xf32>
    %cst_75 = arith.constant 0.000000e+00 : f32
    %134 = vector.broadcast %cst_75 : f32 to vector<64x8x64xf32>
    %135 = arith.maximumf %133, %134 : vector<64x8x64xf32>
    %cst_76 = arith.constant dense<0.000000e+00> : vector<64x64xf32>
    %136 = vector.multi_reduction <add>, %135, %cst_76 [1] : vector<64x8x64xf32> to vector<64x64xf32>
    %c1_77 = arith.constant 1 : index
    %c0_78 = arith.constant 0 : index
    %c0_79 = arith.constant 0 : index
    %137 = vector.load %arg8[%c1_77, %c0_78, %c0_79] : memref<3x64x64xbf16, #tpu.memory_space<vmem>>, vector<1x64x64xbf16>
    %138 = vector.shape_cast %137 : vector<1x64x64xbf16> to vector<64x64xbf16>
    %139 = arith.truncf %136 : vector<64x64xf32> to vector<64x64xbf16>
    %cst_80 = arith.constant dense<0.000000e+00> : vector<64x64xf32>
    %140 = tpu.matmul %139, %138, %cst_80 {dimension_numbers = #tpu.dot_dimension_numbers<[1], [0], [0], [1], [0, 0, 1, 1], [], []>} : vector<64x64xbf16>, vector<64x64xbf16>, vector<64x64xf32> -> vector<64x64xf32>
    %c1_81 = arith.constant 1 : index
    %c0_82 = arith.constant 0 : index
    %c0_83 = arith.constant 0 : index
    %141 = vector.load %arg9[%c1_81, %c0_82, %c0_83] : memref<3x1x64xf32, #tpu.memory_space<vmem>>, vector<1x1x64xf32>
    %142 = vector.shape_cast %141 : vector<1x1x64xf32> to vector<1x64xf32>
    %cst_84 = arith.constant 8.000000e+00 : f32
    %143 = vector.broadcast %cst_84 : f32 to vector<1x64xf32>
    %144 = arith.mulf %143, %142 : vector<1x64xf32>
    %145 = vector.broadcast %144 : vector<1x64xf32> to vector<64x64xf32>
    %146 = arith.addf %140, %145 : vector<64x64xf32>
    %c1_85 = arith.constant 1 : index
    %c0_86 = arith.constant 0 : index
    %c0_87 = arith.constant 0 : index
    %147 = vector.load %arg10[%c1_85, %c0_86, %c0_87] : memref<3x64x64xbf16, #tpu.memory_space<vmem>>, vector<1x64x64xbf16>
    %148 = vector.shape_cast %147 : vector<1x64x64xbf16> to vector<64x64xbf16>
    %149 = arith.truncf %104 : vector<64x64xf32> to vector<64x64xbf16>
    %cst_88 = arith.constant dense<0.000000e+00> : vector<64x64xf32>
    %150 = tpu.matmul %149, %148, %cst_88 {dimension_numbers = #tpu.dot_dimension_numbers<[1], [0], [0], [1], [0, 0, 1, 1], [], []>} : vector<64x64xbf16>, vector<64x64xbf16>, vector<64x64xf32> -> vector<64x64xf32>
    %c1_89 = arith.constant 1 : index
    %c0_90 = arith.constant 0 : index
    %c0_91 = arith.constant 0 : index
    %151 = vector.load %arg11[%c1_89, %c0_90, %c0_91] : memref<3x64x64xbf16, #tpu.memory_space<vmem>>, vector<1x64x64xbf16>
    %152 = vector.shape_cast %151 : vector<1x64x64xbf16> to vector<64x64xbf16>
    %153 = arith.truncf %146 : vector<64x64xf32> to vector<64x64xbf16>
    %cst_92 = arith.constant dense<0.000000e+00> : vector<64x64xf32>
    %154 = tpu.matmul %153, %152, %cst_92 {dimension_numbers = #tpu.dot_dimension_numbers<[1], [0], [0], [1], [0, 0, 1, 1], [], []>} : vector<64x64xbf16>, vector<64x64xbf16>, vector<64x64xf32> -> vector<64x64xf32>
    %155 = arith.addf %150, %154 : vector<64x64xf32>
    %c1_93 = arith.constant 1 : index
    %c0_94 = arith.constant 0 : index
    %c0_95 = arith.constant 0 : index
    %156 = vector.load %arg12[%c1_93, %c0_94, %c0_95] : memref<3x1x64xf32, #tpu.memory_space<vmem>>, vector<1x1x64xf32>
    %157 = vector.shape_cast %156 : vector<1x1x64xf32> to vector<1x64xf32>
    %158 = vector.broadcast %157 : vector<1x64xf32> to vector<64x64xf32>
    %159 = arith.addf %155, %158 : vector<64x64xf32>
    %cst_96 = arith.constant 0.000000e+00 : f32
    %160 = vector.broadcast %cst_96 : f32 to vector<64x64xf32>
    %161 = arith.maximumf %159, %160 : vector<64x64xf32>
    %c1_97 = arith.constant 1 : index
    %c0_98 = arith.constant 0 : index
    %c0_99 = arith.constant 0 : index
    %162 = vector.load %arg13[%c1_97, %c0_98, %c0_99] : memref<3x64x64xbf16, #tpu.memory_space<vmem>>, vector<1x64x64xbf16>
    %163 = vector.shape_cast %162 : vector<1x64x64xbf16> to vector<64x64xbf16>
    %164 = arith.truncf %161 : vector<64x64xf32> to vector<64x64xbf16>
    %cst_100 = arith.constant dense<0.000000e+00> : vector<64x64xf32>
    %165 = tpu.matmul %164, %163, %cst_100 {dimension_numbers = #tpu.dot_dimension_numbers<[1], [0], [0], [1], [0, 0, 1, 1], [], []>} : vector<64x64xbf16>, vector<64x64xbf16>, vector<64x64xf32> -> vector<64x64xf32>
    %c1_101 = arith.constant 1 : index
    %c0_102 = arith.constant 0 : index
    %c0_103 = arith.constant 0 : index
    %166 = vector.load %arg14[%c1_101, %c0_102, %c0_103] : memref<3x1x64xf32, #tpu.memory_space<vmem>>, vector<1x1x64xf32>
    %167 = vector.shape_cast %166 : vector<1x1x64xf32> to vector<1x64xf32>
    %168 = vector.broadcast %167 : vector<1x64xf32> to vector<64x64xf32>
    %169 = arith.addf %165, %168 : vector<64x64xf32>
    %170 = arith.addf %104, %169 : vector<64x64xf32>
    %cst_104 = arith.constant 0.000000e+00 : f32
    %171 = vector.broadcast %cst_104 : f32 to vector<64x64xf32>
    %172 = arith.maximumf %170, %171 : vector<64x64xf32>
    %173 = vector.extract_strided_slice %172 {offsets = [0, 0], sizes = [16, 64], strides = [1, 1]} : vector<64x64xf32> to vector<16x64xf32>
    %174 = arith.truncf %173 : vector<16x64xf32> to vector<16x64xbf16>
    %cst_105 = arith.constant dense<0.000000e+00> : vector<128x64xf32>
    %175 = tpu.matmul %15, %174, %cst_105 {dimension_numbers = #tpu.dot_dimension_numbers<[1], [0], [0], [1], [0, 0, 1, 1], [], []>} : vector<128x16xbf16>, vector<16x64xbf16>, vector<128x64xf32> -> vector<128x64xf32>
    %176 = vector.extract_strided_slice %172 {offsets = [16, 0], sizes = [16, 64], strides = [1, 1]} : vector<64x64xf32> to vector<16x64xf32>
    %177 = arith.truncf %176 : vector<16x64xf32> to vector<16x64xbf16>
    %cst_106 = arith.constant dense<0.000000e+00> : vector<128x64xf32>
    %178 = tpu.matmul %22, %177, %cst_106 {dimension_numbers = #tpu.dot_dimension_numbers<[1], [0], [0], [1], [0, 0, 1, 1], [], []>} : vector<128x16xbf16>, vector<16x64xbf16>, vector<128x64xf32> -> vector<128x64xf32>
    %179 = vector.extract_strided_slice %172 {offsets = [32, 0], sizes = [16, 64], strides = [1, 1]} : vector<64x64xf32> to vector<16x64xf32>
    %180 = arith.truncf %179 : vector<16x64xf32> to vector<16x64xbf16>
    %cst_107 = arith.constant dense<0.000000e+00> : vector<128x64xf32>
    %181 = tpu.matmul %29, %180, %cst_107 {dimension_numbers = #tpu.dot_dimension_numbers<[1], [0], [0], [1], [0, 0, 1, 1], [], []>} : vector<128x16xbf16>, vector<16x64xbf16>, vector<128x64xf32> -> vector<128x64xf32>
    %182 = vector.extract_strided_slice %172 {offsets = [48, 0], sizes = [16, 64], strides = [1, 1]} : vector<64x64xf32> to vector<16x64xf32>
    %183 = arith.truncf %182 : vector<16x64xf32> to vector<16x64xbf16>
    %cst_108 = arith.constant dense<0.000000e+00> : vector<128x64xf32>
    %184 = tpu.matmul %36, %183, %cst_108 {dimension_numbers = #tpu.dot_dimension_numbers<[1], [0], [0], [1], [0, 0, 1, 1], [], []>} : vector<128x16xbf16>, vector<16x64xbf16>, vector<128x64xf32> -> vector<128x64xf32>
    %185 = tpu.concatenate %175, %178, %181, %184 in 0 : vector<128x64xf32>, vector<128x64xf32>, vector<128x64xf32>, vector<128x64xf32> -> vector<512x64xf32>
    %c2_109 = arith.constant 2 : index
    %c0_110 = arith.constant 0 : index
    %c0_111 = arith.constant 0 : index
    %186 = vector.load %arg5[%c2_109, %c0_110, %c0_111] : memref<3x64x64xbf16, #tpu.memory_space<vmem>>, vector<1x64x64xbf16>
    %187 = vector.shape_cast %186 : vector<1x64x64xbf16> to vector<64x64xbf16>
    %188 = arith.truncf %172 : vector<64x64xf32> to vector<64x64xbf16>
    %cst_112 = arith.constant dense<0.000000e+00> : vector<64x64xf32>
    %189 = tpu.matmul %188, %187, %cst_112 {dimension_numbers = #tpu.dot_dimension_numbers<[1], [0], [0], [1], [0, 0, 1, 1], [], []>} : vector<64x64xbf16>, vector<64x64xbf16>, vector<64x64xf32> -> vector<64x64xf32>
    %c2_113 = arith.constant 2 : index
    %c0_114 = arith.constant 0 : index
    %c0_115 = arith.constant 0 : index
    %190 = vector.load %arg7[%c2_113, %c0_114, %c0_115] : memref<3x1x64xf32, #tpu.memory_space<vmem>>, vector<1x1x64xf32>
    %191 = vector.shape_cast %190 : vector<1x1x64xf32> to vector<1x64xf32>
    %192 = vector.broadcast %191 : vector<1x64xf32> to vector<64x64xf32>
    %193 = arith.addf %189, %192 : vector<64x64xf32>
    %c2_116 = arith.constant 2 : index
    %c0_117 = arith.constant 0 : index
    %c0_118 = arith.constant 0 : index
    %194 = vector.load %arg6[%c2_116, %c0_117, %c0_118] : memref<3x64x64xbf16, #tpu.memory_space<vmem>>, vector<1x64x64xbf16>
    %195 = vector.shape_cast %194 : vector<1x64x64xbf16> to vector<64x64xbf16>
    %196 = arith.truncf %185 : vector<512x64xf32> to vector<512x64xbf16>
    %cst_119 = arith.constant dense<0.000000e+00> : vector<512x64xf32>
    %197 = tpu.matmul %196, %195, %cst_119 {dimension_numbers = #tpu.dot_dimension_numbers<[1], [0], [0], [1], [0, 0, 1, 1], [], []>} : vector<512x64xbf16>, vector<64x64xbf16>, vector<512x64xf32> -> vector<512x64xf32>
    %198 = vector.shape_cast %193 : vector<64x64xf32> to vector<64x1x64xf32>
    %199 = vector.shape_cast %197 : vector<512x64xf32> to vector<64x8x64xf32>
    %200 = vector.broadcast %198 : vector<64x1x64xf32> to vector<64x8x64xf32>
    %201 = arith.addf %200, %199 : vector<64x8x64xf32>
    %cst_120 = arith.constant 0.000000e+00 : f32
    %202 = vector.broadcast %cst_120 : f32 to vector<64x8x64xf32>
    %203 = arith.maximumf %201, %202 : vector<64x8x64xf32>
    %cst_121 = arith.constant dense<0.000000e+00> : vector<64x64xf32>
    %204 = vector.multi_reduction <add>, %203, %cst_121 [1] : vector<64x8x64xf32> to vector<64x64xf32>
    %c2_122 = arith.constant 2 : index
    %c0_123 = arith.constant 0 : index
    %c0_124 = arith.constant 0 : index
    %205 = vector.load %arg8[%c2_122, %c0_123, %c0_124] : memref<3x64x64xbf16, #tpu.memory_space<vmem>>, vector<1x64x64xbf16>
    %206 = vector.shape_cast %205 : vector<1x64x64xbf16> to vector<64x64xbf16>
    %207 = arith.truncf %204 : vector<64x64xf32> to vector<64x64xbf16>
    %cst_125 = arith.constant dense<0.000000e+00> : vector<64x64xf32>
    %208 = tpu.matmul %207, %206, %cst_125 {dimension_numbers = #tpu.dot_dimension_numbers<[1], [0], [0], [1], [0, 0, 1, 1], [], []>} : vector<64x64xbf16>, vector<64x64xbf16>, vector<64x64xf32> -> vector<64x64xf32>
    %c2_126 = arith.constant 2 : index
    %c0_127 = arith.constant 0 : index
    %c0_128 = arith.constant 0 : index
    %209 = vector.load %arg9[%c2_126, %c0_127, %c0_128] : memref<3x1x64xf32, #tpu.memory_space<vmem>>, vector<1x1x64xf32>
    %210 = vector.shape_cast %209 : vector<1x1x64xf32> to vector<1x64xf32>
    %cst_129 = arith.constant 8.000000e+00 : f32
    %211 = vector.broadcast %cst_129 : f32 to vector<1x64xf32>
    %212 = arith.mulf %211, %210 : vector<1x64xf32>
    %213 = vector.broadcast %212 : vector<1x64xf32> to vector<64x64xf32>
    %214 = arith.addf %208, %213 : vector<64x64xf32>
    %c2_130 = arith.constant 2 : index
    %c0_131 = arith.constant 0 : index
    %c0_132 = arith.constant 0 : index
    %215 = vector.load %arg10[%c2_130, %c0_131, %c0_132] : memref<3x64x64xbf16, #tpu.memory_space<vmem>>, vector<1x64x64xbf16>
    %216 = vector.shape_cast %215 : vector<1x64x64xbf16> to vector<64x64xbf16>
    %217 = arith.truncf %172 : vector<64x64xf32> to vector<64x64xbf16>
    %cst_133 = arith.constant dense<0.000000e+00> : vector<64x64xf32>
    %218 = tpu.matmul %217, %216, %cst_133 {dimension_numbers = #tpu.dot_dimension_numbers<[1], [0], [0], [1], [0, 0, 1, 1], [], []>} : vector<64x64xbf16>, vector<64x64xbf16>, vector<64x64xf32> -> vector<64x64xf32>
    %c2_134 = arith.constant 2 : index
    %c0_135 = arith.constant 0 : index
    %c0_136 = arith.constant 0 : index
    %219 = vector.load %arg11[%c2_134, %c0_135, %c0_136] : memref<3x64x64xbf16, #tpu.memory_space<vmem>>, vector<1x64x64xbf16>
    %220 = vector.shape_cast %219 : vector<1x64x64xbf16> to vector<64x64xbf16>
    %221 = arith.truncf %214 : vector<64x64xf32> to vector<64x64xbf16>
    %cst_137 = arith.constant dense<0.000000e+00> : vector<64x64xf32>
    %222 = tpu.matmul %221, %220, %cst_137 {dimension_numbers = #tpu.dot_dimension_numbers<[1], [0], [0], [1], [0, 0, 1, 1], [], []>} : vector<64x64xbf16>, vector<64x64xbf16>, vector<64x64xf32> -> vector<64x64xf32>
    %223 = arith.addf %218, %222 : vector<64x64xf32>
    %c2_138 = arith.constant 2 : index
    %c0_139 = arith.constant 0 : index
    %c0_140 = arith.constant 0 : index
    %224 = vector.load %arg12[%c2_138, %c0_139, %c0_140] : memref<3x1x64xf32, #tpu.memory_space<vmem>>, vector<1x1x64xf32>
    %225 = vector.shape_cast %224 : vector<1x1x64xf32> to vector<1x64xf32>
    %226 = vector.broadcast %225 : vector<1x64xf32> to vector<64x64xf32>
    %227 = arith.addf %223, %226 : vector<64x64xf32>
    %cst_141 = arith.constant 0.000000e+00 : f32
    %228 = vector.broadcast %cst_141 : f32 to vector<64x64xf32>
    %229 = arith.maximumf %227, %228 : vector<64x64xf32>
    %c2_142 = arith.constant 2 : index
    %c0_143 = arith.constant 0 : index
    %c0_144 = arith.constant 0 : index
    %230 = vector.load %arg13[%c2_142, %c0_143, %c0_144] : memref<3x64x64xbf16, #tpu.memory_space<vmem>>, vector<1x64x64xbf16>
    %231 = vector.shape_cast %230 : vector<1x64x64xbf16> to vector<64x64xbf16>
    %232 = arith.truncf %229 : vector<64x64xf32> to vector<64x64xbf16>
    %cst_145 = arith.constant dense<0.000000e+00> : vector<64x64xf32>
    %233 = tpu.matmul %232, %231, %cst_145 {dimension_numbers = #tpu.dot_dimension_numbers<[1], [0], [0], [1], [0, 0, 1, 1], [], []>} : vector<64x64xbf16>, vector<64x64xbf16>, vector<64x64xf32> -> vector<64x64xf32>
    %c2_146 = arith.constant 2 : index
    %c0_147 = arith.constant 0 : index
    %c0_148 = arith.constant 0 : index
    %234 = vector.load %arg14[%c2_146, %c0_147, %c0_148] : memref<3x1x64xf32, #tpu.memory_space<vmem>>, vector<1x1x64xf32>
    %235 = vector.shape_cast %234 : vector<1x1x64xf32> to vector<1x64xf32>
    %236 = vector.broadcast %235 : vector<1x64xf32> to vector<64x64xf32>
    %237 = arith.addf %233, %236 : vector<64x64xf32>
    %238 = arith.addf %172, %237 : vector<64x64xf32>
    %cst_149 = arith.constant 0.000000e+00 : f32
    %239 = vector.broadcast %cst_149 : f32 to vector<64x64xf32>
    %240 = arith.maximumf %238, %239 : vector<64x64xf32>
    %c0_150 = arith.constant 0 : index
    %c0_151 = arith.constant 0 : index
    %241 = vector.load %arg15[%c0_150, %c0_151] : memref<64x128xbf16, #tpu.memory_space<vmem>>, vector<64x128xbf16>
    %242 = arith.truncf %240 : vector<64x64xf32> to vector<64x64xbf16>
    %cst_152 = arith.constant dense<0.000000e+00> : vector<64x128xf32>
    %243 = tpu.matmul %242, %241, %cst_152 {dimension_numbers = #tpu.dot_dimension_numbers<[1], [0], [0], [1], [0, 0, 1, 1], [], []>} : vector<64x64xbf16>, vector<64x128xbf16>, vector<64x128xf32> -> vector<64x128xf32>
    %c0_153 = arith.constant 0 : index
    %c0_154 = arith.constant 0 : index
    %244 = vector.load %arg16[%c0_153, %c0_154] : memref<1x128xf32, #tpu.memory_space<vmem>>, vector<1x128xf32>
    %245 = vector.broadcast %244 : vector<1x128xf32> to vector<64x128xf32>
    %246 = arith.addf %243, %245 : vector<64x128xf32>
    %cst_155 = arith.constant 0.000000e+00 : f32
    %247 = vector.broadcast %cst_155 : f32 to vector<64x128xf32>
    %248 = arith.maximumf %246, %247 : vector<64x128xf32>
    %c0_156 = arith.constant 0 : index
    %c0_157 = arith.constant 0 : index
    %249 = vector.load %arg17[%c0_156, %c0_157] : memref<128x64xbf16, #tpu.memory_space<vmem>>, vector<128x64xbf16>
    %250 = arith.truncf %248 : vector<64x128xf32> to vector<64x128xbf16>
    %cst_158 = arith.constant dense<0.000000e+00> : vector<64x64xf32>
    %251 = tpu.matmul %250, %249, %cst_158 {dimension_numbers = #tpu.dot_dimension_numbers<[1], [0], [0], [1], [0, 0, 1, 1], [], []>} : vector<64x128xbf16>, vector<128x64xbf16>, vector<64x64xf32> -> vector<64x64xf32>
    %c0_159 = arith.constant 0 : index
    %c0_160 = arith.constant 0 : index
    %252 = vector.load %arg18[%c0_159, %c0_160] : memref<1x64xf32, #tpu.memory_space<vmem>>, vector<1x64xf32>
    %253 = vector.broadcast %252 : vector<1x64xf32> to vector<64x64xf32>
    %254 = arith.addf %251, %253 : vector<64x64xf32>
    %255 = tpu.concatenate %240, %254 in 1 : vector<64x64xf32>, vector<64x64xf32> -> vector<64x128xf32>
    %256 = vector.shape_cast %255 : vector<64x128xf32> to vector<4x16x128xf32>
    %c0_161 = arith.constant 0 : index
    %c0_162 = arith.constant 0 : index
    %c0_163 = arith.constant 0 : index
    %257 = vector.load %arg21[%c0_161, %c0_162, %c0_163] : memref<4x16x128xf32, #tpu.memory_space<vmem>>, vector<4x16x128xf32>
    tpu.vector_store %arg21[%c0_161, %c0_162, %c0_163], %256 {strides = array<i32>} : memref<4x16x128xf32, #tpu.memory_space<vmem>>, vector<4x16x128xf32>,
    %c0_164 = arith.constant 0 : index
    %c0_165 = arith.constant 0 : index
    %258 = vector.load %arg19[%c0_164, %c0_165] : memref<64x8xbf16, #tpu.memory_space<vmem>>, vector<64x8xbf16>
    %259 = arith.truncf %254 : vector<64x64xf32> to vector<64x64xbf16>
    %cst_166 = arith.constant dense<0.000000e+00> : vector<64x8xf32>
    %260 = tpu.matmul %259, %258, %cst_166 {dimension_numbers = #tpu.dot_dimension_numbers<[1], [0], [0], [1], [0, 0, 1, 1], [], []>} : vector<64x64xbf16>, vector<64x8xbf16>, vector<64x8xf32> -> vector<64x8xf32>
    %c0_167 = arith.constant 0 : index
    %c0_168 = arith.constant 0 : index
    %261 = vector.load %arg20[%c0_167, %c0_168] : memref<1x8xf32, #tpu.memory_space<vmem>>, vector<1x8xf32>
    %262 = vector.broadcast %261 : vector<1x8xf32> to vector<64x8xf32>
    %263 = arith.addf %260, %262 : vector<64x8xf32>
    %264 = vector.shape_cast %263 : vector<64x8xf32> to vector<4x16x8xf32>
    %c0_169 = arith.constant 0 : index
    %c0_170 = arith.constant 0 : index
    %c0_171 = arith.constant 0 : index
    %265 = vector.load %arg22[%c0_169, %c0_170, %c0_171] : memref<4x16x8xf32, #tpu.memory_space<vmem>>, vector<4x16x8xf32>
    tpu.vector_store %arg22[%c0_169, %c0_170, %c0_171], %264 {strides = array<i32>} : memref<4x16x8xf32, #tpu.memory_space<vmem>>, vector<4x16x8xf32>,
    return
  }
  func.func @transform_0(%arg0: i32) -> (i32, i32, i32) {
    %c0_i32 = arith.constant 0 : i32
    %c0_i32_0 = arith.constant 0 : i32
    %c0_i32_1 = arith.constant 0 : i32
    return %arg0, %c0_i32, %c0_i32_0 : i32, i32, i32
  }
  func.func @transform_1(%arg0: i32) -> (i32, i32, i32) {
    %c0_i32 = arith.constant 0 : i32
    %c0_i32_0 = arith.constant 0 : i32
    %c0_i32_1 = arith.constant 0 : i32
    return %arg0, %c0_i32, %c0_i32_0 : i32, i32, i32
  }
  func.func @transform_2(%arg0: i32) -> (i32, i32) {
    %c0_i32 = arith.constant 0 : i32
    %c0_i32_0 = arith.constant 0 : i32
    %c0_i32_1 = arith.constant 0 : i32
    return %c0_i32, %c0_i32_0 : i32, i32
  }
  func.func @transform_3(%arg0: i32) -> (i32, i32) {
    %c0_i32 = arith.constant 0 : i32
    %c0_i32_0 = arith.constant 0 : i32
    %c0_i32_1 = arith.constant 0 : i32
    return %c0_i32, %c0_i32_0 : i32, i32
  }
  func.func @transform_4(%arg0: i32) -> (i32, i32, i32) {
    %c0_i32 = arith.constant 0 : i32
    %c0_i32_0 = arith.constant 0 : i32
    %c0_i32_1 = arith.constant 0 : i32
    %c0_i32_2 = arith.constant 0 : i32
    return %c0_i32, %c0_i32_0, %c0_i32_1 : i32, i32, i32
  }
  func.func @transform_5(%arg0: i32) -> (i32, i32, i32) {
    %c0_i32 = arith.constant 0 : i32
    %c0_i32_0 = arith.constant 0 : i32
    %c0_i32_1 = arith.constant 0 : i32
    %c0_i32_2 = arith.constant 0 : i32
    return %c0_i32, %c0_i32_0, %c0_i32_1 : i32, i32, i32
  }
  func.func @transform_6(%arg0: i32) -> (i32, i32, i32) {
    %c0_i32 = arith.constant 0 : i32
    %c0_i32_0 = arith.constant 0 : i32
    %c0_i32_1 = arith.constant 0 : i32
    %c0_i32_2 = arith.constant 0 : i32
    return %c0_i32, %c0_i32_0, %c0_i32_1 : i32, i32, i32
  }
  func.func @transform_7(%arg0: i32) -> (i32, i32, i32) {
    %c0_i32 = arith.constant 0 : i32
    %c0_i32_0 = arith.constant 0 : i32
    %c0_i32_1 = arith.constant 0 : i32
    %c0_i32_2 = arith.constant 0 : i32
    return %c0_i32, %c0_i32_0, %c0_i32_1 : i32, i32, i32
  }
  func.func @transform_8(%arg0: i32) -> (i32, i32, i32) {
    %c0_i32 = arith.constant 0 : i32
    %c0_i32_0 = arith.constant 0 : i32
    %c0_i32_1 = arith.constant 0 : i32
    %c0_i32_2 = arith.constant 0 : i32
    return %c0_i32, %c0_i32_0, %c0_i32_1 : i32, i32, i32
  }
  func.func @transform_9(%arg0: i32) -> (i32, i32, i32) {
    %c0_i32 = arith.constant 0 : i32
    %c0_i32_0 = arith.constant 0 : i32
    %c0_i32_1 = arith.constant 0 : i32
    %c0_i32_2 = arith.constant 0 : i32
    return %c0_i32, %c0_i32_0, %c0_i32_1 : i32, i32, i32
  }
  func.func @transform_10(%arg0: i32) -> (i32, i32, i32) {
    %c0_i32 = arith.constant 0 : i32
    %c0_i32_0 = arith.constant 0 : i32
    %c0_i32_1 = arith.constant 0 : i32
    %c0_i32_2 = arith.constant 0 : i32
    return %c0_i32, %c0_i32_0, %c0_i32_1 : i32, i32, i32
  }
  func.func @transform_11(%arg0: i32) -> (i32, i32, i32) {
    %c0_i32 = arith.constant 0 : i32
    %c0_i32_0 = arith.constant 0 : i32
    %c0_i32_1 = arith.constant 0 : i32
    %c0_i32_2 = arith.constant 0 : i32
    return %c0_i32, %c0_i32_0, %c0_i32_1 : i32, i32, i32
  }
  func.func @transform_12(%arg0: i32) -> (i32, i32, i32) {
    %c0_i32 = arith.constant 0 : i32
    %c0_i32_0 = arith.constant 0 : i32
    %c0_i32_1 = arith.constant 0 : i32
    %c0_i32_2 = arith.constant 0 : i32
    return %c0_i32, %c0_i32_0, %c0_i32_1 : i32, i32, i32
  }
  func.func @transform_13(%arg0: i32) -> (i32, i32, i32) {
    %c0_i32 = arith.constant 0 : i32
    %c0_i32_0 = arith.constant 0 : i32
    %c0_i32_1 = arith.constant 0 : i32
    %c0_i32_2 = arith.constant 0 : i32
    return %c0_i32, %c0_i32_0, %c0_i32_1 : i32, i32, i32
  }
  func.func @transform_14(%arg0: i32) -> (i32, i32) {
    %c0_i32 = arith.constant 0 : i32
    %c0_i32_0 = arith.constant 0 : i32
    %c0_i32_1 = arith.constant 0 : i32
    return %c0_i32, %c0_i32_0 : i32, i32
  }
  func.func @transform_15(%arg0: i32) -> (i32, i32) {
    %c0_i32 = arith.constant 0 : i32
    %c0_i32_0 = arith.constant 0 : i32
    %c0_i32_1 = arith.constant 0 : i32
    return %c0_i32, %c0_i32_0 : i32, i32
  }
  func.func @transform_16(%arg0: i32) -> (i32, i32) {
    %c0_i32 = arith.constant 0 : i32
    %c0_i32_0 = arith.constant 0 : i32
    %c0_i32_1 = arith.constant 0 : i32
    return %c0_i32, %c0_i32_0 : i32, i32
  }
  func.func @transform_17(%arg0: i32) -> (i32, i32) {
    %c0_i32 = arith.constant 0 : i32
    %c0_i32_0 = arith.constant 0 : i32
    %c0_i32_1 = arith.constant 0 : i32
    return %c0_i32, %c0_i32_0 : i32, i32
  }
  func.func @transform_18(%arg0: i32) -> (i32, i32) {
    %c0_i32 = arith.constant 0 : i32
    %c0_i32_0 = arith.constant 0 : i32
    %c0_i32_1 = arith.constant 0 : i32
    return %c0_i32, %c0_i32_0 : i32, i32
  }
  func.func @transform_19(%arg0: i32) -> (i32, i32) {
    %c0_i32 = arith.constant 0 : i32
    %c0_i32_0 = arith.constant 0 : i32
    %c0_i32_1 = arith.constant 0 : i32
    return %c0_i32, %c0_i32_0 : i32, i32
  }
  func.func @transform_20(%arg0: i32) -> (i32, i32, i32) {
    %c0_i32 = arith.constant 0 : i32
    %c0_i32_0 = arith.constant 0 : i32
    %c0_i32_1 = arith.constant 0 : i32
    return %arg0, %c0_i32, %c0_i32_0 : i32, i32, i32
  }
  func.func @transform_21(%arg0: i32) -> (i32, i32, i32) {
    %c0_i32 = arith.constant 0 : i32
    %c0_i32_0 = arith.constant 0 : i32
    %c0_i32_1 = arith.constant 0 : i32
    return %arg0, %c0_i32, %c0_i32_0 : i32, i32, i32
  }
}

</mosaic_0001>

<bundles_post_ra>
// kernel: atomic_scale_forward_batched.1
= control target key start
LH: loop header
LB: loop body
LE: loop exit
PB: predicated region body
PF: predicated region fallthrough
CT: control target
= control target key end

     0   :  { %v12070_v0 = vmov 0   ;;  %vm147_vm0 = vcmask 1045504   ;;  %vm134_vm1 = vcmask 752640   ;;  %vm702_vm4 = vcmask 130048   ;;  %s16272_s1 = inlined_call_operand.vmem [shape: s32[4,128,1], index: 1, kind: input, shape index: {}]   ;;  %s16273_s2 = inlined_call_operand.vmem [shape: bf16[92,64], index: 2, kind: input, shape index: {}]   ;;  %s16274_s0 = inlined_call_operand.vmem [shape: f32[4,16,92], index: 0, kind: input, shape index: {}]   ;;  %s16275_s4 = inlined_call_operand.vmem [shape: bf16[3,64,64], index: 4, kind: input, shape index: {}]   ;;  %s16276_s5 = inlined_call_operand.vmem [shape: bf16[3,64,64], index: 5, kind: input, shape index: {}]   ;;  %s16277_s3 = inlined_call_operand.vmem [shape: f32[1,64], index: 3, kind: input, shape index: {}]   ;;  %s16278_s6 = inlined_call_operand.vmem [shape: f32[3,1,64], index: 6, kind: input, shape index: {}]   ;;  %s16279_s7 = inlined_call_operand.vmem [shape: bf16[3,64,64], index: 7, kind: input, shape index: {}]   ;;  %s16280_s10 = inlined_call_operand.vmem [shape: bf16[3,64,64], index: 10, kind: input, shape index: {}]   ;;  %s16281_s9 = inlined_call_operand.vmem [shape: bf16[3,64,64], index: 9, kind: input, shape index: {}]   ;;  %s16282_s8 = inlined_call_operand.vmem [shape: f32[3,1,64], index: 8, kind: input, shape index: {}]   ;;  %s16283_s12 = inlined_call_operand.vmem [shape: bf16[3,64,64], index: 12, kind: input, shape index: {}]   ;;  %s16284_s11 = inlined_call_operand.vmem [shape: f32[3,1,64], index: 11, kind: input, shape index: {}]   ;;  %s16285_s13 = inlined_call_operand.vmem [shape: f32[3,1,64], index: 13, kind: input, shape index: {}]   ;;  %s16286_s14 = inlined_call_operand.vmem [shape: bf16[64,128], index: 14, kind: input, shape index: {}]   ;;  %s16287_s16 = inlined_call_operand.vmem [shape: bf16[128,64], index: 16, kind: input, shape index: {}]   ;;  %s16288_s18 = inlined_call_operand.vmem [shape: bf16[64,8], index: 18, kind: input, shape index: {}]   ;;  %s16289_s15 = inlined_call_operand.vmem [shape: f32[1,128], index: 15, kind: input, shape index: {}]   ;;  %s16290_s17 = inlined_call_operand.vmem [shape: f32[1,64], index: 17, kind: input, shape index: {}]   ;;  %s16291_s20 = inlined_call_operand.vmem [shape: f32[4,16,128], index: 20, kind: output, shape index: {0}]   ;;  %s16292_s19 = inlined_call_operand.vmem [shape: f32[1,8], index: 19, kind: input, shape index: {}]   ;;  %s16293_s21 = inlined_call_operand.vmem [shape: f32[4,16,8], index: 21, kind: output, shape index: {1}]  }
   0x1   :  { %16464 = sst [smem:[#allocation75_spill]] %s16272_s1  ;;  %11975 = vset.pattern.permute.xlu1 %v12070_v0  ;;  %11974 = vset.pattern.permute.xlu0 %v12070_v0 }
   0x2   :  { %16465 = sst [smem:[#allocation76_spill]] %s16273_s2 }
   0x3   :  { %16466 = sst [smem:[#allocation77_spill]] %s16274_s0 }
   0x4   :  { %16467 = sst [smem:[#allocation78_spill]] %s16275_s4 }
   0x5   :  { %16468 = sst [smem:[#allocation79_spill]] %s16276_s5 }
   0x6   :  { %16469 = sst [smem:[#allocation80_spill]] %s16277_s3 }
   0x7   :  { %s16470_s26 = sld [smem:[#allocation75_spill]] }
   0x8   :  { %s16471_s1 = sld [smem:[#allocation76_spill]] }
   0x9   :  { %s16472_s0 = sld [smem:[#allocation77_spill]] }
   0xa   :  { %s16490_s22 = sld [smem:[#allocation80_spill]] }
   0xb   :  { %s16503_s2 = sld [smem:[#allocation78_spill]] }
   0xc   :  { %s16508_s30 = sld [smem:[#allocation79_spill]] }
   0xd   :  { %v220_v1 = vld [vmem:[%s16470_s26 + $0x10] sm:$0xff]  ;;  %v218_v2 = vld [vmem:[%s16470_s26] sm:$0xff]  ;;  %v221_v4 = vld [vmem:[%s16470_s26 + $0x18] sm:$0xff] }
   0xe   :  { %241 = vperm.xlu1 %11975, %v220_v1   ;;  %235 = vperm.xlu0 %11974, %v218_v2   ;;  %v11976_v3 = vld [vmem:[%s16471_s1 + $0x28] sm:$0x3f]   ;;  %v11977_v7 = vld [vmem:[%s16471_s1 + $0x20] sm:$0xff]   ;;  %v11978_v10 = vld [vmem:[%s16471_s1 + $0x18] sm:$0xff]  }
   0xf   :  { %v219_v5 = vld [vmem:[%s16470_s26 + $0x8] sm:$0xff]  ;;  %11969 = vmatprep.subr.msk.bf16.mxu0 %vm147_vm0, %v11976_v3  ;;  %v149_v6 = vsel %vm147_vm0, %v11976_v3, 0  ;;  %v222_v9 = vld [vmem:[%s16470_s26 + $0x20] sm:$0xff]  ;;  %v225_v11 = vld [vmem:[%s16470_s26 + $0x38] sm:$0xff] }
  0x10   :  { %11214 = vmatpush3.bf16.msra.mxu0 %v149_v6  ;;  %v223_v8 = vld [vmem:[%s16470_s26 + $0x28] sm:$0xff]  ;;  %v224_v12 = vld [vmem:[%s16470_s26 + $0x30] sm:$0xff]  ;;  %v68_v14 = vld [vmem:[%s16472_s0] sm:$0xff] }
  0x11   :  { %11215 = vmatprep.subr.bf16.mxu0 %v11977_v7  ;;  %v11979_v13 = vld [vmem:[%s16471_s1 + $0x10] sm:$0xff]   ;;  %v69_v15 = vld [vmem:[%s16472_s0 + $0x8] sm:$0xff]  ;;  %v226_v18 = vld [vmem:[%s16470_s26 + $0x40] sm:$0xff] }
  0x12   :  { %244 = vperm.xlu1 %11975, %v221_v4   ;;  %238 = vperm.xlu0 %11974, %v219_v5   ;;  %v88_v16 = vpack.c.bf16 %v69_v15, %v68_v14  ;;  %v227_v17 = vld [vmem:[%s16470_s26 + $0x48] sm:$0xff]  ;;  %v229_v20 = vld [vmem:[%s16470_s26 + $0x58] sm:$0xff]  ;;  %v228_v21 = vld [vmem:[%s16470_s26 + $0x50] sm:$0xff] }
  0x13   :  { %v11980_v19 = vld [vmem:[%s16471_s1 + $0x8] sm:$0xff]   ;;  %v11981_v22 = vld [vmem:[%s16471_s1] sm:$0xff]   ;;  %v70_v23 = vld [vmem:[%s16472_s0 + $0x10] sm:$0xff] }
  0x14   :  { %11216 = vmatpush3.bf16.msra.mxu0 %v11977_v7  ;;  %11225 = vmatprep.mubr.msk.bf16.mxu0 %vm134_vm1, %v88_v16  ;;  %v71_v24 = vld [vmem:[%s16472_s0 + $0x18] sm:$0xff]  ;;  %v72_v25 = vld [vmem:[%s16472_s0 + $0x20] sm:$0xff]  ;;  %v73_v26 = vld [vmem:[%s16472_s0 + $0x28] sm:$0xff]  ;;  %v16299_v16 = vlaneseq }
  0x15   :  { %11217 = vmatprep.subr.bf16.mxu0 %v11978_v10  ;;  %v231_v27 = vld [vmem:[%s16470_s26 + $0x68] sm:$0xff]  ;;  %v230_v28 = vld [vmem:[%s16470_s26 + $0x60] sm:$0xff]  ;;  %v89_v29 = vpack.c.bf16 %v71_v24, %v70_v23  ;;  %v90_v30 = vpack.c.bf16 %v73_v26, %v72_v25  ;;  %v233_v31 = vld [vmem:[%s16470_s26 + $0x78] sm:$0xff]  ;;  %v12071_v24 = vmov 0.0  }
  0x16   :  { %250 = vperm.xlu1 %11975, %v223_v8   ;;  %247 = vperm.xlu0 %11974, %v222_v9   ;;  %v232_v32 = vld [vmem:[%s16470_s26 + $0x70] sm:$0xff]  ;;  %v75_v34 = vld [vmem:[%s16472_s0 + $0x38] sm:$0xff]  ;;  %v10280_v35 = vld [vmem:[%s16470_s26 + $0x88] sm:$0xff] }
  0x17   :  { %v74_v33 = vld [vmem:[%s16472_s0 + $0x30] sm:$0xff]  ;;  %v10279_v36 = vld [vmem:[%s16470_s26 + $0x80] sm:$0xff]  ;;  %v10282_v38 = vld [vmem:[%s16470_s26 + $0x98] sm:$0xff] }
  0x18   :  { %11218 = vmatpush3.bf16.msra.mxu0 %v11978_v10  ;;  %v91_v37 = vpack.c.bf16 %v75_v34, %v74_v33  ;;  %v10281_v39 = vld [vmem:[%s16470_s26 + $0x90] sm:$0xff]  ;;  %v10284_v40 = vld [vmem:[%s16470_s26 + $0xa8] sm:$0xff]  ;;  %v10283_v41 = vld [vmem:[%s16470_s26 + $0xa0] sm:$0xff] }
  0x19   :  { %11219 = vmatprep.subr.bf16.mxu0 %v11979_v13  ;;  %v10286_v42 = vld [vmem:[%s16470_s26 + $0xb8] sm:$0xff]  ;;  %v10285_v43 = vld [vmem:[%s16470_s26 + $0xb0] sm:$0xff]  ;;  %v10288_v44 = vld [vmem:[%s16470_s26 + $0xc8] sm:$0xff] }
  0x1a   :  { %256 = vperm.xlu1 %11975, %v225_v11   ;;  %253 = vperm.xlu0 %11974, %v224_v12   ;;  %v10287_v45 = vld [vmem:[%s16470_s26 + $0xc0] sm:$0xff]  ;;  %v10290_v46 = vld [vmem:[%s16470_s26 + $0xd8] sm:$0xff]  ;;  %v10289_v47 = vld [vmem:[%s16470_s26 + $0xd0] sm:$0xff] }
  0x1b   :  { %v10292_v48 = vld [vmem:[%s16470_s26 + $0xe8] sm:$0xff]  ;;  %v10291_v49 = vld [vmem:[%s16470_s26 + $0xe0] sm:$0xff]  ;;  %v10294_v50 = vld [vmem:[%s16470_s26 + $0xf8] sm:$0xff] }
  0x1c   :  { %11220 = vmatpush3.bf16.msra.mxu0 %v11979_v13  ;;  %v10293_v51 = vld [vmem:[%s16470_s26 + $0xf0] sm:$0xff]  ;;  %v10312_v52 = vld [vmem:[%s16470_s26 + $0x108] sm:$0xff]  ;;  %v10311_v53 = vld [vmem:[%s16470_s26 + $0x100] sm:$0xff] }
  0x1d   :  { %11221 = vmatprep.subr.bf16.mxu0 %v11980_v19  ;;  %v10314_v54 = vld [vmem:[%s16470_s26 + $0x118] sm:$0xff]  ;;  %v10313_v55 = vld [vmem:[%s16470_s26 + $0x110] sm:$0xff]  ;;  %v10316_v56 = vld [vmem:[%s16470_s26 + $0x128] sm:$0xff] }
  0x1e   :  { %262 = vperm.xlu1 %11975, %v227_v17   ;;  %259 = vperm.xlu0 %11974, %v226_v18   ;;  %v10315_v57 = vld [vmem:[%s16470_s26 + $0x120] sm:$0xff]  ;;  %v10318_v58 = vld [vmem:[%s16470_s26 + $0x138] sm:$0xff]  ;;  %v10317_v59 = vld [vmem:[%s16470_s26 + $0x130] sm:$0xff] }
  0x1f   :  { %v10320_v60 = vld [vmem:[%s16470_s26 + $0x148] sm:$0xff]  ;;  %v10319_v61 = vld [vmem:[%s16470_s26 + $0x140] sm:$0xff]  ;;  %v10322_v62 = vld [vmem:[%s16470_s26 + $0x158] sm:$0xff] }
  0x20   :  { %11222 = vmatpush3.bf16.msra.mxu0 %v11980_v19  ;;  %v10321_v63 = vld [vmem:[%s16470_s26 + $0x150] sm:$0xff]  ;;  %v10324_v0 = vld [vmem:[%s16470_s26 + $0x168] sm:$0xff]  ;;  %v10323_v1 = vld [vmem:[%s16470_s26 + $0x160] sm:$0xff]  ;;  %v12417_v19 = vand.u32 127, %v16299_v16 }
  0x21   :  { %11223 = vmatprep.subr.bf16.mxu0 %v11981_v22  ;;  %v10326_v2 = vld [vmem:[%s16470_s26 + $0x178] sm:$0xff]  ;;  %v10325_v3 = vld [vmem:[%s16470_s26 + $0x170] sm:$0xff]  ;;  %v10344_v4 = vld [vmem:[%s16470_s26 + $0x188] sm:$0xff] }
  0x22   :  { %268 = vperm.xlu1 %11975, %v229_v20   ;;  %265 = vperm.xlu0 %11974, %v228_v21   ;;  %v10343_v5 = vld [vmem:[%s16470_s26 + $0x180] sm:$0xff]  ;;  %v10346_v6 = vld [vmem:[%s16470_s26 + $0x198] sm:$0xff]  ;;  %v10345_v7 = vld [vmem:[%s16470_s26 + $0x190] sm:$0xff] }
  0x23   :  { %v10348_v8 = vld [vmem:[%s16470_s26 + $0x1a8] sm:$0xff]  ;;  %v10347_v9 = vld [vmem:[%s16470_s26 + $0x1a0] sm:$0xff]  ;;  %v10350_v10 = vld [vmem:[%s16470_s26 + $0x1b8] sm:$0xff] }
  0x24   :  { %11224 = vmatpush3.bf16.msra.mxu0 %v11981_v22  ;;  %v10349_v11 = vld [vmem:[%s16470_s26 + $0x1b0] sm:$0xff]  ;;  %v10352_v12 = vld [vmem:[%s16470_s26 + $0x1c8] sm:$0xff]  ;;  %v10351_v13 = vld [vmem:[%s16470_s26 + $0x1c0] sm:$0xff] }
  0x25   :  { %v10354_v14 = vld [vmem:[%s16470_s26 + $0x1d8] sm:$0xff]  ;;  %v10353_v15 = vld [vmem:[%s16470_s26 + $0x1d0] sm:$0xff]  ;;  %v10356_v17 = vld [vmem:[%s16470_s26 + $0x1e8] sm:$0xff] }
  0x26   :  { %274 = vperm.xlu1 %11975, %v231_v27   ;;  %271 = vperm.xlu0 %11974, %v230_v28   ;;  %v10355_v18 = vld [vmem:[%s16470_s26 + $0x1e0] sm:$0xff]  ;;  %v10358_v20 = vld [vmem:[%s16470_s26 + $0x1f8] sm:$0xff]  ;;  %v10357_v21 = vld [vmem:[%s16470_s26 + $0x1f0] sm:$0xff] }
  0x27   :  { %11226 = vmatmul.mubr.msk.bf16.vlgmr.msra.gmra.mxu0 %vm134_vm1, %v89_v29 }
  0x28   :  { %11229 = vmatprep.mubr.msk.bf16.mxu0 %vm134_vm1, %v90_v30 }
  0x2a   :  { %280 = vperm.xlu1 %11975, %v233_v31   ;;  %277 = vperm.xlu0 %11974, %v232_v32  }
  0x2e   :  { %359 = vperm.xlu1 %11975, %v10280_v35   ;;  %356 = vperm.xlu0 %11974, %v10279_v36  }
  0x2f   :  { %11230 = vmatmul.mubr.msk.bf16.gmra.mxu0 %vm134_vm1, %v91_v37 }
  0x32   :  { %365 = vperm.xlu1 %11975, %v10282_v38   ;;  %362 = vperm.xlu0 %11974, %v10281_v39  }
  0x36   :  { %371 = vperm.xlu1 %11975, %v10284_v40   ;;  %368 = vperm.xlu0 %11974, %v10283_v41  }
  0x3a   :  { %377 = vperm.xlu1 %11975, %v10286_v42   ;;  %374 = vperm.xlu0 %11974, %v10285_v43  }
  0x3e   :  { %383 = vperm.xlu1 %11975, %v10288_v44   ;;  %380 = vperm.xlu0 %11974, %v10287_v45  }
  0x42   :  { %389 = vperm.xlu1 %11975, %v10290_v46   ;;  %386 = vperm.xlu0 %11974, %v10289_v47  }
  0x46   :  { %395 = vperm.xlu1 %11975, %v10292_v48   ;;  %392 = vperm.xlu0 %11974, %v10291_v49  }
  0x4a   :  { %401 = vperm.xlu1 %11975, %v10294_v50   ;;  %398 = vperm.xlu0 %11974, %v10293_v51  }
  0x4e   :  { %480 = vperm.xlu1 %11975, %v10312_v52   ;;  %477 = vperm.xlu0 %11974, %v10311_v53  }
  0x52   :  { %486 = vperm.xlu1 %11975, %v10314_v54   ;;  %483 = vperm.xlu0 %11974, %v10313_v55  }
  0x56   :  { %492 = vperm.xlu1 %11975, %v10316_v56   ;;  %489 = vperm.xlu0 %11974, %v10315_v57  }
  0x5a   :  { %498 = vperm.xlu1 %11975, %v10318_v58   ;;  %495 = vperm.xlu0 %11974, %v10317_v59  }
  0x5e   :  { %504 = vperm.xlu1 %11975, %v10320_v60   ;;  %501 = vperm.xlu0 %11974, %v10319_v61  }
  0x62   :  { %510 = vperm.xlu1 %11975, %v10322_v62   ;;  %507 = vperm.xlu0 %11974, %v10321_v63  }
  0x66   :  { %516 = vperm.xlu1 %11975, %v10324_v0   ;;  %513 = vperm.xlu0 %11974, %v10323_v1  }
  0x6a   :  { %522 = vperm.xlu1 %11975, %v10326_v2   ;;  %519 = vperm.xlu0 %11974, %v10325_v3  }
  0x6e   :  { %601 = vperm.xlu1 %11975, %v10344_v4   ;;  %598 = vperm.xlu0 %11974, %v10343_v5  }
  0x72   :  { %607 = vperm.xlu1 %11975, %v10346_v6   ;;  %604 = vperm.xlu0 %11974, %v10345_v7  }
  0x76   :  { %613 = vperm.xlu1 %11975, %v10348_v8   ;;  %610 = vperm.xlu0 %11974, %v10347_v9  }
  0x7a   :  { %619 = vperm.xlu1 %11975, %v10350_v10   ;;  %616 = vperm.xlu0 %11974, %v10349_v11  }
  0x7e   :  { %625 = vperm.xlu1 %11975, %v10352_v12   ;;  %622 = vperm.xlu0 %11974, %v10351_v13  }
  0x82   :  { %631 = vperm.xlu1 %11975, %v10354_v14   ;;  %628 = vperm.xlu0 %11974, %v10353_v15  }
  0x86   :  { %637 = vperm.xlu1 %11975, %v10356_v17   ;;  %634 = vperm.xlu0 %11974, %v10355_v18  }
  0x89   :  { %v242_v22 = vpop.permute.xlu1 %241  ;;  %v236_v23 = vpop.permute.xlu0 %235 }
  0x8a   :  { %vm284_vm2 = vcmp.eq.s32.totalorder %v242_v22, %v12417_v19  ;;  %vm282_vm3 = vcmp.eq.s32.totalorder %v236_v23, %v12417_v19  ;;  %643 = vperm.xlu1 %11975, %v10358_v20   ;;  %640 = vperm.xlu0 %11974, %v10357_v21  }
  0x8b   :  { %v10265_v25 = vsel %vm284_vm2, 1.0, %v12071_v24  ;;  %v10263_v26 = vsel %vm282_vm3, 1.0, %v12071_v24 }
  0x8d   :  { %v245_v27 = vpop.permute.xlu1 %244  ;;  %v239_v28 = vpop.permute.xlu0 %238 }
  0x8e   :  { %vm285_vm5 = vcmp.eq.s32.totalorder %v245_v27, %v12417_v19  ;;  %vm283_vm6 = vcmp.eq.s32.totalorder %v239_v28, %v12417_v19 }
  0x8f   :  { %v10266_v29 = vsel %vm285_vm5, 1.0, %v12071_v24  ;;  %v10264_v30 = vsel %vm283_vm6, 1.0, %v12071_v24 }
  0x90   :  { %v12433_v31 = vpack.c.bf16 %v10266_v29, %v10265_v25  ;;  %v12435_v32 = vpack.c.bf16 %v10264_v30, %v10263_v26 }
  0x91   :  { %v251_v33 = vpop.permute.xlu1 %250  ;;  %v248_v34 = vpop.permute.xlu0 %247 }
  0x92   :  { %16473 = vst [vmem:[#allocation2_spill] sm:$0xff] %v12433_v31  ;;  %16474 = vst [vmem:[#allocation3_spill] sm:$0xff] %v12435_v32  ;;  %vm287_vm7 = vcmp.eq.s32.totalorder %v251_v33, %v12417_v19  ;;  %vm286_vm8 = vcmp.eq.s32.totalorder %v248_v34, %v12417_v19  ;;  %11235 = vmatprep.mubr.msk.bf16.mxu1 %vm702_vm4, %v12435_v32 }
  0x93   :  { %v10268_v35 = vsel %vm287_vm7, 1.0, %v12071_v24  ;;  %v10267_v36 = vsel %vm286_vm8, 1.0, %v12071_v24 }
  0x94   :  { %v12443_v37 = vpack.c.bf16 %v10268_v35, %v10267_v36 }
  0x95   :  { %v257_v38 = vpop.permute.xlu1 %256  ;;  %v254_v39 = vpop.permute.xlu0 %253 }
  0x96   :  { %16475 = vst [vmem:[#allocation4_spill] sm:$0xff] %v12443_v37  ;;  %vm289_vm9 = vcmp.eq.s32.totalorder %v257_v38, %v12417_v19  ;;  %vm288_vm10 = vcmp.eq.s32.totalorder %v254_v39, %v12417_v19 }
  0x97   :  { %v10270_v40 = vsel %vm289_vm9, 1.0, %v12071_v24  ;;  %v10269_v41 = vsel %vm288_vm10, 1.0, %v12071_v24 }
  0x98   :  { %v12449_v42 = vpack.c.bf16 %v10270_v40, %v10269_v41 }
  0x99   :  { %v263_v43 = vpop.permute.xlu1 %262  ;;  %v260_v44 = vpop.permute.xlu0 %259 }
  0x9a   :  { %16476 = vst [vmem:[#allocation5_spill] sm:$0xff] %v12449_v42  ;;  %vm291_vm11 = vcmp.eq.s32.totalorder %v263_v43, %v12417_v19  ;;  %vm290_vm12 = vcmp.eq.s32.totalorder %v260_v44, %v12417_v19 }
  0x9b   :  { %v10272_v45 = vsel %vm291_vm11, 1.0, %v12071_v24  ;;  %v10271_v46 = vsel %vm290_vm12, 1.0, %v12071_v24 }
  0x9c   :  { %v12455_v47 = vpack.c.bf16 %v10272_v45, %v10271_v46 }
  0x9d   :  { %v269_v48 = vpop.permute.xlu1 %268  ;;  %v266_v49 = vpop.permute.xlu0 %265 }
  0x9e   :  { %16477 = vst [vmem:[#allocation6_spill] sm:$0xff] %v12455_v47  ;;  %vm293_vm13 = vcmp.eq.s32.totalorder %v269_v48, %v12417_v19  ;;  %vm292_vm14 = vcmp.eq.s32.totalorder %v266_v49, %v12417_v19 }
  0x9f   :  { %v10274_v50 = vsel %vm293_vm13, 1.0, %v12071_v24  ;;  %v10273_v51 = vsel %vm292_vm14, 1.0, %v12071_v24 }
  0xa0   :  { %v12461_v52 = vpack.c.bf16 %v10274_v50, %v10273_v51 }
  0xa1   :  { %v275_v53 = vpop.permute.xlu1 %274  ;;  %v272_v54 = vpop.permute.xlu0 %271 }
  0xa2   :  { %16478 = vst [vmem:[#allocation7_spill] sm:$0xff] %v12461_v52  ;;  %vm295_vm15 = vcmp.eq.s32.totalorder %v275_v53, %v12417_v19  ;;  %vm294_vm0 = vcmp.eq.s32.totalorder %v272_v54, %v12417_v19 }
  0xa3   :  { %v10276_v55 = vsel %vm295_vm15, 1.0, %v12071_v24  ;;  %v10275_v56 = vsel %vm294_vm0, 1.0, %v12071_v24 }
  0xa4   :  { %v12467_v57 = vpack.c.bf16 %v10276_v55, %v10275_v56 }
  0xa5   :  { %v281_v58 = vpop.permute.xlu1 %280  ;;  %v278_v59 = vpop.permute.xlu0 %277 }
  0xa6   :  { %16479 = vst [vmem:[#allocation8_spill] sm:$0xff] %v12467_v57  ;;  %vm297_vm1 = vcmp.eq.s32.totalorder %v281_v58, %v12417_v19  ;;  %vm296_vm2 = vcmp.eq.s32.totalorder %v278_v59, %v12417_v19  ;;  %v10252_v59 = vld [vmem:[%s16490_s22] ss:$0 sm:$0xff] }
  0xa7   :  { %v10278_v60 = vsel %vm297_vm1, 1.0, %v12071_v24  ;;  %v10277_v61 = vsel %vm296_vm2, 1.0, %v12071_v24 }
  0xa8   :  { %v12473_v62 = vpack.c.bf16 %v10278_v60, %v10277_v61 }
  0xa9   :  { %v360_v63 = vpop.permute.xlu1 %359  ;;  %v357_v0 = vpop.permute.xlu0 %356 }
  0xaa   :  { %16480 = vst [vmem:[#allocation9_spill] sm:$0xff] %v12473_v62  ;;  %vm404_vm3 = vcmp.eq.s32.totalorder %v360_v63, %v12417_v19  ;;  %vm403_vm5 = vcmp.eq.s32.totalorder %v357_v0, %v12417_v19 }
  0xab   :  { %v10296_v1 = vsel %vm404_vm3, 1.0, %v12071_v24  ;;  %v10295_v2 = vsel %vm403_vm5, 1.0, %v12071_v24 }
  0xac   :  { %v12479_v3 = vpack.c.bf16 %v10296_v1, %v10295_v2 }
  0xad   :  { %v366_v4 = vpop.permute.xlu1 %365  ;;  %v363_v5 = vpop.permute.xlu0 %362 }
  0xae   :  { %16481 = vst [vmem:[#allocation10_spill] sm:$0xff] %v12479_v3  ;;  %vm406_vm6 = vcmp.eq.s32.totalorder %v366_v4, %v12417_v19  ;;  %vm405_vm7 = vcmp.eq.s32.totalorder %v363_v5, %v12417_v19 }
  0xaf   :  { %v10298_v6 = vsel %vm406_vm6, 1.0, %v12071_v24  ;;  %v10297_v7 = vsel %vm405_vm7, 1.0, %v12071_v24 }
  0xb0   :  { %v12485_v8 = vpack.c.bf16 %v10298_v6, %v10297_v7 }
  0xb1   :  { %v372_v9 = vpop.permute.xlu1 %371  ;;  %v369_v10 = vpop.permute.xlu0 %368 }
  0xb2   :  { %16482 = vst [vmem:[#allocation11_spill] sm:$0xff] %v12485_v8  ;;  %vm408_vm8 = vcmp.eq.s32.totalorder %v372_v9, %v12417_v19  ;;  %vm407_vm9 = vcmp.eq.s32.totalorder %v369_v10, %v12417_v19 }
  0xb3   :  { %v10300_v11 = vsel %vm408_vm8, 1.0, %v12071_v24  ;;  %v10299_v12 = vsel %vm407_vm9, 1.0, %v12071_v24 }
  0xb4   :  { %v12491_v13 = vpack.c.bf16 %v10300_v11, %v10299_v12 }
  0xb5   :  { %v378_v14 = vpop.permute.xlu1 %377  ;;  %v375_v15 = vpop.permute.xlu0 %374 }
  0xb6   :  { %16483 = vst [vmem:[#allocation12_spill] sm:$0xff] %v12491_v13  ;;  %vm410_vm10 = vcmp.eq.s32.totalorder %v378_v14, %v12417_v19  ;;  %vm409_vm11 = vcmp.eq.s32.totalorder %v375_v15, %v12417_v19 }
  0xb7   :  { %v10302_v17 = vsel %vm410_vm10, 1.0, %v12071_v24  ;;  %v10301_v18 = vsel %vm409_vm11, 1.0, %v12071_v24 }
  0xb8   :  { %v12497_v20 = vpack.c.bf16 %v10302_v17, %v10301_v18 }
  0xb9   :  { %v384_v21 = vpop.permute.xlu1 %383  ;;  %v381_v22 = vpop.permute.xlu0 %380 }
  0xba   :  { %16484 = vst [vmem:[#allocation13_spill] sm:$0xff] %v12497_v20  ;;  %vm412_vm12 = vcmp.eq.s32.totalorder %v384_v21, %v12417_v19  ;;  %vm411_vm13 = vcmp.eq.s32.totalorder %v381_v22, %v12417_v19 }
  0xbb   :  { %v10304_v23 = vsel %vm412_vm12, 1.0, %v12071_v24  ;;  %v10303_v25 = vsel %vm411_vm13, 1.0, %v12071_v24 }
  0xbc   :  { %v12503_v26 = vpack.c.bf16 %v10304_v23, %v10303_v25  ;;  %v11982_v25 = vld [vmem:[%s16503_s2 + $0x18] sm:$0xff]  }
  0xbd   :  { %v390_v27 = vpop.permute.xlu1 %389  ;;  %v387_v28 = vpop.permute.xlu0 %386 }
  0xbe   :  { %16485 = vst [vmem:[#allocation14_spill] sm:$0xff] %v12503_v26  ;;  %vm414_vm14 = vcmp.eq.s32.totalorder %v390_v27, %v12417_v19  ;;  %vm413_vm15 = vcmp.eq.s32.totalorder %v387_v28, %v12417_v19 }
  0xbf   :  { %v10306_v29 = vsel %vm414_vm14, 1.0, %v12071_v24  ;;  %v10305_v30 = vsel %vm413_vm15, 1.0, %v12071_v24 }
  0xc0   :  { %v12509_v33 = vpack.c.bf16 %v10306_v29, %v10305_v30 }
  0xc1   :  { %v396_v34 = vpop.permute.xlu1 %395  ;;  %v393_v35 = vpop.permute.xlu0 %392 }
  0xc2   :  { %16486 = vst [vmem:[#allocation15_spill] sm:$0xff] %v12509_v33  ;;  %vm416_vm0 = vcmp.eq.s32.totalorder %v396_v34, %v12417_v19  ;;  %vm415_vm1 = vcmp.eq.s32.totalorder %v393_v35, %v12417_v19 }
  0xc3   :  { %v10308_v36 = vsel %vm416_vm0, 1.0, %v12071_v24  ;;  %v10307_v38 = vsel %vm415_vm1, 1.0, %v12071_v24 }
  0xc4   :  { %v12515_v39 = vpack.c.bf16 %v10308_v36, %v10307_v38 }
  0xc5   :  { %v402_v40 = vpop.permute.xlu1 %401  ;;  %v399_v41 = vpop.permute.xlu0 %398 }
  0xc6   :  { %16487 = vst [vmem:[#allocation16_spill] sm:$0xff] %v12515_v39  ;;  %vm418_vm2 = vcmp.eq.s32.totalorder %v402_v40, %v12417_v19  ;;  %vm417_vm3 = vcmp.eq.s32.totalorder %v399_v41, %v12417_v19  ;;  %v11983_v40 = vld [vmem:[%s16503_s2 + $0x10] sm:$0xff]  }
  0xc7   :  { %v10310_v43 = vsel %vm418_vm2, 1.0, %v12071_v24  ;;  %v10309_v44 = vsel %vm417_vm3, 1.0, %v12071_v24 }
  0xc8   :  { %v12521_v45 = vpack.c.bf16 %v10310_v43, %v10309_v44 }
  0xc9   :  { %v481_v46 = vpop.permute.xlu1 %480  ;;  %v478_v48 = vpop.permute.xlu0 %477 }
  0xca   :  { %16488 = vst [vmem:[#allocation17_spill] sm:$0xff] %v12521_v45  ;;  %vm525_vm5 = vcmp.eq.s32.totalorder %v481_v46, %v12417_v19  ;;  %vm524_vm6 = vcmp.eq.s32.totalorder %v478_v48, %v12417_v19  ;;  %v11984_v48 = vld [vmem:[%s16503_s2 + $0x8] sm:$0xff]  }
  0xcb   :  { %v10328_v49 = vsel %vm525_vm5, 1.0, %v12071_v24  ;;  %v10327_v50 = vsel %vm524_vm6, 1.0, %v12071_v24  ;;  %vm1229_vm6 = vcmask 523264  }
  0xcc   :  { %v12527_v51 = vpack.c.bf16 %v10328_v49, %v10327_v50 }
  0xcd   :  { %v487_v54 = vpop.permute.xlu1 %486  ;;  %v484_v55 = vpop.permute.xlu0 %483 }
  0xce   :  { %16489 = vst [vmem:[#allocation18_spill] sm:$0xff] %v12527_v51  ;;  %11271 = vmatprep.mubr.msk.bf16.mxu0 %vm702_vm4, %v12527_v51  ;;  %vm527_vm7 = vcmp.eq.s32.totalorder %v487_v54, %v12417_v19  ;;  %vm526_vm8 = vcmp.eq.s32.totalorder %v484_v55, %v12417_v19  ;;  %v11985_v55 = vld [vmem:[%s16503_s2] sm:$0xff]  }
  0xcf   :  { %v10330_v27 = vsel %vm527_vm7, 1.0, %v12071_v24  ;;  %v10329_v28 = vsel %vm526_vm8, 1.0, %v12071_v24 }
  0xd0   :  { %v12588_v36 = vpack.c.bf16 %v10330_v27, %v10329_v28 }
  0xd1   :  { %v493_v61 = vpop.permute.xlu1 %492  ;;  %v490_v63 = vpop.permute.xlu0 %489 }
  0xd2   :  { %vm529_vm9 = vcmp.eq.s32.totalorder %v493_v61, %v12417_v19  ;;  %vm528_vm10 = vcmp.eq.s32.totalorder %v490_v63, %v12417_v19  ;;  %16504 = vst [vmem:[#allocation31_spill] sm:$0xff] %v12588_v36  ;;  %v11986_v61 = vld [vmem:[%s16508_s30 + $0x18] sm:$0xff]  }
  0xd3   :  { %v10332_v29 = vsel %vm529_vm9, 1.0, %v12071_v24  ;;  %v10331_v30 = vsel %vm528_vm10, 1.0, %v12071_v24 }
  0xd4   :  { %v12590_v38 = vpack.c.bf16 %v10332_v29, %v10331_v30  ;;  %v11987_v30 = vld [vmem:[%s16508_s30 + $0x10] sm:$0xff]  }
  0xd5   :  { %v499_v12 = vpop.permute.xlu1 %498  ;;  %v496_v14 = vpop.permute.xlu0 %495 }
  0xd6   :  { %16505 = vst [vmem:[#allocation32_spill] sm:$0xff] %v12590_v38  ;;  %vm531_vm11 = vcmp.eq.s32.totalorder %v499_v12, %v12417_v19  ;;  %vm530_vm12 = vcmp.eq.s32.totalorder %v496_v14, %v12417_v19 }
  0xd7   :  { %v10334_v44 = vsel %vm531_vm11, 1.0, %v12071_v24  ;;  %v10333_v46 = vsel %vm530_vm12, 1.0, %v12071_v24 }
  0xd9   :  { %v505_v34 = vpop.permute.xlu1 %504  ;;  %v502_v35 = vpop.permute.xlu0 %501 }
  0xda   :  { %vm533_vm13 = vcmp.eq.s32.totalorder %v505_v34, %v12417_v19  ;;  %vm532_vm14 = vcmp.eq.s32.totalorder %v502_v35, %v12417_v19 }
  0xdb   :  { %v10336_v49 = vsel %vm533_vm13, 1.0, %v12071_v24  ;;  %v10335_v50 = vsel %vm532_vm14, 1.0, %v12071_v24 }
  0xdc   :  { %v12616_v54 = vpack.c.bf16 %v10336_v49, %v10335_v50 }
  0xdd   :  { %v511_v41 = vpop.permute.xlu1 %510  ;;  %v508_v43 = vpop.permute.xlu0 %507 }
  0xde   :  { %16507 = vst [vmem:[#allocation34_spill] sm:$0xff] %v12616_v54  ;;  %vm535_vm15 = vcmp.eq.s32.totalorder %v511_v41, %v12417_v19  ;;  %vm534_vm0 = vcmp.eq.s32.totalorder %v508_v43, %v12417_v19 }
  0xe7   :  { %v11227_v53 = vpop.f32.mrf.mxu0 }
  0xe8   :  { %v12540_v5 = vadd.f32 %v11227_v53, %v10252_v59  ;;  %v12614_v53 = vpack.c.bf16 %v10334_v44, %v10333_v46 }
  0xe9   :  { %v185_v56 = vpop.f32.mrf.mxu0 }
  0xea   :  { %v12534_v0 = vadd.f32 %v10252_v59, %v185_v56  ;;  %16494 = vst [vmem:[#allocation22_spill] sm:$0xff] %v12540_v5  ;;  %16506 = vst [vmem:[#allocation33_spill] sm:$0xff] %v12614_v53  ;;  %v517_v56 = vpop.permute.xlu1 %516 }
  0xeb   :  { %v11228_v58 = vpop.f32.mrf.mxu0  ;;  %vm537_vm1 = vcmp.eq.s32.totalorder %v517_v56, %v12417_v19 }
  0xec   :  { %16491 = vst [vmem:[#allocation19_spill] sm:$0xff] %v12534_v0  ;;  %v12536_v1 = vadd.f32 %v11228_v58, %v10252_v59  ;;  %v514_v58 = vpop.permute.xlu0 %513  ;;  %v10340_v63 = vsel %vm537_vm1, 1.0, %v12071_v24 }
  0xed   :  { %v188_v60 = vpop.f32.mrf.mxu0  ;;  %vm536_vm2 = vcmp.eq.s32.totalorder %v514_v58, %v12417_v19 }
  0xee   :  { %16492 = vst [vmem:[#allocation20_spill] sm:$0xff] %v12536_v1  ;;  %v12538_v2 = vadd.f32 %v10252_v59, %v188_v60  ;;  %v12548_v9 = vpack.c.bf16 %v12536_v1, %v12540_v5  ;;  %v10337_v60 = vsel %vm534_vm0, 1.0, %v12071_v24  ;;  %v523_v12 = vpop.permute.xlu1 %522 }
  0xef   :  { %v11231_v4 = vpop.f32.mrf.mxu0  ;;  %vm539_vm3 = vcmp.eq.s32.totalorder %v523_v12, %v12417_v19 }
  0xf0   :  { %16493 = vst [vmem:[#allocation21_spill] sm:$0xff] %v12538_v2  ;;  %v12544_v6 = vpack.c.bf16 %v12538_v2, %v12534_v0  ;;  %16496 = vst [vmem:[#allocation24_spill] sm:$0xff] %v12548_v9  ;;  %v12550_v10 = vadd.f32 %v11231_v4, %v10252_v59  ;;  %v10339_v4 = vsel %vm536_vm2, 1.0, %v12071_v24  ;;  %v520_v14 = vpop.permute.xlu0 %519 }
  0xf1   :  { %v201_v7 = vpop.f32.mrf.mxu0  ;;  %vm538_vm5 = vcmp.eq.s32.totalorder %v520_v14, %v12417_v19  ;;  %v11988_v14 = vld [vmem:[%s16508_s30 + $0x8] sm:$0xff]  }
  0xf2   :  { %16495 = vst [vmem:[#allocation23_spill] sm:$0xff] %v12544_v6  ;;  %16497 = vst [vmem:[#allocation25_spill] sm:$0xff] %v12550_v10  ;;  %11233 = vmatprep.subr.bf16.mxu1 %v12544_v6  ;;  %v12554_v15 = vadd.f32 %v10252_v59, %v201_v7  ;;  %v602_v28 = vpop.permute.xlu1 %601 }
  0xf3   :  { %v11232_v11 = vpop.f32.mrf.mxu0  ;;  %11234 = vmatpush3.bf16.msra.mxu1 %v12544_v6  ;;  %vm646_vm7 = vcmp.eq.s32.totalorder %v602_v28, %v12417_v19 }
  0xf4   :  { %16498 = vst [vmem:[#allocation26_spill] sm:$0xff] %v12554_v15  ;;  %v12556_v17 = vadd.f32 %v11232_v11, %v10252_v59  ;;  %11251 = vmatprep.subr.bf16.mxu1 %v12548_v9  ;;  %v12642_v11 = vpack.c.bf16 %v10340_v63, %v10339_v4  ;;  %v599_v29 = vpop.permute.xlu0 %598  ;;  %v10360_v43 = vsel %vm646_vm7, 1.0, %v12071_v24 }
  0xf5   :  { %v204_v18 = vpop.f32.mrf.mxu0  ;;  %vm645_vm8 = vcmp.eq.s32.totalorder %v599_v29, %v12417_v19 }
  0xf6   :  { %16499 = vst [vmem:[#allocation27_spill] sm:$0xff] %v12556_v17  ;;  %v12563_v21 = vpack.c.bf16 %v12556_v17, %v12550_v10  ;;  %v12565_v22 = vadd.f32 %v10252_v59, %v204_v18  ;;  %11236 = vmatmul.mubr.msk.bf16.vlgmr.msra.gmra.mxu1 %vm702_vm4, %v12433_v31  ;;  %v10338_v59 = vsel %vm535_vm15, 1.0, %v12071_v24  ;;  %16510 = vst [vmem:[#allocation36_spill] sm:$0xff] %v12642_v11  ;;  %v10342_v18 = vsel %vm539_vm3, 1.0, %v12071_v24  ;;  %v608_v34 = vpop.permute.xlu1 %607  ;;  %v11991_v10 = vld [vmem:[%s16279_s7 + $0x10] sm:$0xff]  }
  0xf7   :  { %11239 = vmatprep.mubr.msk.bf16.mxu1 %vm702_vm4, %v12443_v37  ;;  %11252 = vmatpush3.bf16.msra.mxu1 %v12548_v9  ;;  %v12640_v7 = vpack.c.bf16 %v10338_v59, %v10337_v60  ;;  %v10359_v44 = vsel %vm645_vm8, 1.0, %v12071_v24  ;;  %vm648_vm9 = vcmp.eq.s32.totalorder %v608_v34, %v12417_v19 }
  0xf8   :  { %16500 = vst [vmem:[#allocation28_spill] sm:$0xff] %v12563_v21  ;;  %16501 = vst [vmem:[#allocation29_spill] sm:$0xff] %v12565_v22  ;;  %v12576_v23 = vpack.c.bf16 %v12565_v22, %v12554_v15  ;;  %11287 = vmatprep.subr.bf16.mxu1 %v12563_v21  ;;  %v605_v35 = vpop.permute.xlu0 %604  ;;  %v12688_v49 = vpack.c.bf16 %v10360_v43, %v10359_v44  ;;  %v10362_v56 = vsel %vm648_vm9, 1.0, %v12071_v24  ;;  %vm3260_vm9 = vcmask 1041409  }
  0xf9   :  { %16509 = vst [vmem:[#allocation35_spill] sm:$0xff] %v12640_v7  ;;  %vm647_vm10 = vcmp.eq.s32.totalorder %v605_v35, %v12417_v19 }
  0xfa   :  { %16502 = vst [vmem:[#allocation30_spill] sm:$0xff] %v12576_v23  ;;  %11269 = vmatprep.subr.bf16.mxu0 %v12576_v23  ;;  %16512 = vst [vmem:[#allocation38_spill] sm:$0xff] %v12688_v49  ;;  %v10361_v58 = vsel %vm647_vm10, 1.0, %v12071_v24  ;;  %vm3262_vm10 = vcmask 1042434  }
  0xfb   :  { %11270 = vmatpush3.bf16.msra.mxu0 %v12576_v23 }
  0xfc   :  { %11305 = vmatprep.subr.bf16.mxu0 %v11982_v25  ;;  %v611_v41 = vpop.permute.xlu0 %610 }
  0xfd   :  { %vm649_vm12 = vcmp.eq.s32.totalorder %v611_v41, %v12417_v19 }
  0xfe   :  { %11240 = vmatmul.mubr.msk.bf16.gmra.mxu1 %vm702_vm4, %v12449_v42  ;;  %11272 = vmatmul.mubr.msk.bf16.vlgmr.msra.gmra.mxu0 %vm702_vm4, %v12588_v36  ;;  %v10363_v60 = vsel %vm649_vm12, 1.0, %v12071_v24  ;;  %vm3266_vm12 = vcmask 1044484  }
  0xff   :  { %11243 = vmatprep.mubr.msk.bf16.mxu1 %vm702_vm4, %v12455_v47  ;;  %11275 = vmatprep.mubr.msk.bf16.mxu0 %vm702_vm4, %v12590_v38 }
 0x100   :  { %11306 = vmatpush3.bf16.msra.mxu0 %v11982_v25  ;;  %v10341_v25 = vsel %vm538_vm5, 1.0, %v12071_v24 }
 0x101   :  { %11307 = vmatprep.subr.bf16.mxu0 %v11983_v40  ;;  %v12656_v27 = vpack.c.bf16 %v10342_v18, %v10341_v25 }
 0x103   :  { %16511 = vst [vmem:[#allocation37_spill] sm:$0xff] %v12656_v27 }
 0x104   :  { %11308 = vmatpush3.bf16.msra.mxu0 %v11983_v40  ;;  %v614_v40 = vpop.permute.xlu1 %613 }
 0x105   :  { %11309 = vmatprep.subr.bf16.mxu0 %v11984_v48  ;;  %vm650_vm11 = vcmp.eq.s32.totalorder %v614_v40, %v12417_v19 }
 0x106   :  { %11244 = vmatmul.mubr.msk.bf16.gmra.mxu1 %vm702_vm4, %v12461_v52  ;;  %11276 = vmatmul.mubr.msk.bf16.gmra.mxu0 %vm702_vm4, %v12614_v53  ;;  %v10364_v59 = vsel %vm650_vm11, 1.0, %v12071_v24  ;;  %vm3264_vm11 = vcmask 1043459  }
 0x107   :  { %11247 = vmatprep.mubr.msk.bf16.mxu1 %vm702_vm4, %v12467_v57  ;;  %11279 = vmatprep.mubr.msk.bf16.mxu0 %vm702_vm4, %v12616_v54  ;;  %v12704_v63 = vpack.c.bf16 %v10364_v59, %v10363_v60 }
 0x108   :  { %11310 = vmatpush3.bf16.msra.mxu0 %v11984_v48  ;;  %v620_v46 = vpop.permute.xlu1 %619  ;;  %v617_v48 = vpop.permute.xlu0 %616 }
 0x109   :  { %11311 = vmatprep.subr.bf16.mxu0 %v11985_v55  ;;  %16514 = vst [vmem:[#allocation40_spill] sm:$0xff] %v12704_v63  ;;  %vm652_vm13 = vcmp.eq.s32.totalorder %v620_v46, %v12417_v19  ;;  %vm651_vm14 = vcmp.eq.s32.totalorder %v617_v48, %v12417_v19 }
 0x10a   :  { %v10366_v18 = vsel %vm652_vm13, 1.0, %v12071_v24  ;;  %v10365_v25 = vsel %vm651_vm14, 1.0, %v12071_v24  ;;  %vm3268_vm13 = vcmask 1045509   ;;  %vm3270_vm14 = vcmask 1046534  }
 0x10b   :  { %v12724_v34 = vpack.c.bf16 %v10366_v18, %v10365_v25 }
 0x10c   :  { %11312 = vmatpush3.bf16.msra.mxu0 %v11985_v55  ;;  %v626_v50 = vpop.permute.xlu1 %625  ;;  %v623_v55 = vpop.permute.xlu0 %622 }
 0x10d   :  { %11321 = vmatprep.subr.bf16.mxu0 %v11986_v61  ;;  %vm654_vm15 = vcmp.eq.s32.totalorder %v626_v50, %v12417_v19  ;;  %vm653_vm0 = vcmp.eq.s32.totalorder %v623_v55, %v12417_v19  ;;  %16515 = vst [vmem:[#allocation41_spill] sm:$0xff] %v12724_v34 }
 0x10e   :  { %11248 = vmatmul.mubr.msk.bf16.gmra.mxu1 %vm702_vm4, %v12473_v62  ;;  %11280 = vmatmul.mubr.msk.bf16.gmra.mxu0 %vm702_vm4, %v12640_v7  ;;  %v10368_v28 = vsel %vm654_vm15, 1.0, %v12071_v24  ;;  %v10367_v29 = vsel %vm653_vm0, 1.0, %v12071_v24  ;;  %vm3272_vm15 = vcmask 1047559  }
 0x10f   :  { %11253 = vmatprep.mubr.msk.bf16.mxu1 %vm702_vm4, %v12479_v3  ;;  %11283 = vmatprep.mubr.msk.bf16.mxu0 %vm702_vm4, %v12642_v11  ;;  %v12726_v41 = vpack.c.bf16 %v10368_v28, %v10367_v29 }
 0x110   :  { %v632_v4 = vpop.permute.xlu1 %631  ;;  %v629_v12 = vpop.permute.xlu0 %628 }
 0x111   :  { %16516 = vst [vmem:[#allocation42_spill] sm:$0xff] %v12726_v41  ;;  %vm656_vm1 = vcmp.eq.s32.totalorder %v632_v4, %v12417_v19  ;;  %vm655_vm2 = vcmp.eq.s32.totalorder %v629_v12, %v12417_v19 }
 0x112   :  { %v10370_v43 = vsel %vm656_vm1, 1.0, %v12071_v24  ;;  %v10369_v44 = vsel %vm655_vm2, 1.0, %v12071_v24 }
 0x114   :  { %v638_v35 = vpop.permute.xlu1 %637  ;;  %v635_v40 = vpop.permute.xlu0 %634 }
 0x115   :  { %vm658_vm3 = vcmp.eq.s32.totalorder %v638_v35, %v12417_v19  ;;  %vm657_vm5 = vcmp.eq.s32.totalorder %v635_v40, %v12417_v19 }
 0x116   :  { %11254 = vmatmul.mubr.msk.bf16.vlgmr.msra.gmra.mxu1 %vm702_vm4, %v12485_v8  ;;  %11284 = vmatmul.mubr.msk.bf16.gmra.mxu0 %vm702_vm4, %v12656_v27  ;;  %v10372_v46 = vsel %vm658_vm3, 1.0, %v12071_v24  ;;  %v10371_v48 = vsel %vm657_vm5, 1.0, %v12071_v24 }
 0x117   :  { %11257 = vmatprep.mubr.msk.bf16.mxu1 %vm702_vm4, %v12491_v13  ;;  %11313 = vmatprep.mubr.msk.bf16.mxu0 %vm1229_vm6, %v12544_v6 }
 0x118   :  { %11288 = vmatpush3.bf16.msra.mxu1 %v12563_v21  ;;  %v644_v50 = vpop.permute.xlu1 %643  ;;  %v641_v55 = vpop.permute.xlu0 %640 }
 0x119   :  { %vm660_vm7 = vcmp.eq.s32.totalorder %v644_v50, %v12417_v19  ;;  %vm659_vm8 = vcmp.eq.s32.totalorder %v641_v55, %v12417_v19 }
 0x11a   :  { %v10374_v59 = vsel %vm660_vm7, 1.0, %v12071_v24  ;;  %v10373_v60 = vsel %vm659_vm8, 1.0, %v12071_v24 }
 0x11b   :  { %v12752_v4 = vpack.c.bf16 %v10374_v59, %v10373_v60 }
 0x11d   :  { %16519 = vst [vmem:[#allocation45_spill] sm:$0xff] %v12752_v4 }
 0x11e   :  { %11258 = vmatmul.mubr.msk.bf16.gmra.mxu1 %vm702_vm4, %v12497_v20  ;;  %11314 = vmatmul.mubr.msk.bf16.vlgmr.msra.gmra.mxu0 %vm1229_vm6, %v12548_v9 }
 0x11f   :  { %11261 = vmatprep.mubr.msk.bf16.mxu1 %vm702_vm4, %v12503_v26  ;;  %11317 = vmatprep.mubr.msk.bf16.mxu0 %vm1229_vm6, %v12576_v23 }
 0x120   :  { %11322 = vmatpush3.bf16.msra.mxu0 %v11986_v61  ;;  %v12702_v61 = vpack.c.bf16 %v10362_v56, %v10361_v58  ;;  %v12740_v56 = vpack.c.bf16 %v10370_v43, %v10369_v44  ;;  %v12742_v58 = vpack.c.bf16 %v10372_v46, %v10371_v48 }
 0x121   :  { %11323 = vmatprep.subr.bf16.mxu0 %v11987_v30 }
 0x122   :  { %16513 = vst [vmem:[#allocation39_spill] sm:$0xff] %v12702_v61  ;;  %16517 = vst [vmem:[#allocation43_spill] sm:$0xff] %v12740_v56 }
 0x123   :  { %16518 = vst [vmem:[#allocation44_spill] sm:$0xff] %v12742_v58 }
 0x124   :  { %11324 = vmatpush3.bf16.msra.mxu0 %v11987_v30  ;;  %v11989_v30 = vld [vmem:[%s16508_s30] sm:$0xff]  }
 0x125   :  { %11325 = vmatprep.subr.bf16.mxu0 %v11988_v14 }
 0x126   :  { %11262 = vmatmul.mubr.msk.bf16.gmra.mxu1 %vm702_vm4, %v12509_v33  ;;  %11318 = vmatmul.mubr.msk.bf16.gmra.mxu0 %vm1229_vm6, %v12563_v21 }
 0x127   :  { %11265 = vmatprep.mubr.msk.bf16.mxu1 %vm702_vm4, %v12515_v39 }
 0x128   :  { %11326 = vmatpush3.bf16.msra.mxu0 %v11988_v14 }
 0x129   :  { %11327 = vmatprep.subr.bf16.mxu0 %v11989_v30 }
 0x12c   :  { %11328 = vmatpush3.bf16.msra.mxu0 %v11989_v30 }
 0x12e   :  { %11266 = vmatmul.mubr.msk.bf16.gmra.mxu1 %vm702_vm4, %v12521_v45 }
 0x12f   :  { %11289 = vmatprep.mubr.msk.bf16.mxu1 %vm702_vm4, %v12688_v49 }
 0x136   :  { %11290 = vmatmul.mubr.msk.bf16.vlgmr.msra.gmra.mxu1 %vm702_vm4, %v12702_v61 }
 0x137   :  { %11293 = vmatprep.mubr.msk.bf16.mxu1 %vm702_vm4, %v12704_v63 }
 0x13e   :  { %11294 = vmatmul.mubr.msk.bf16.gmra.mxu1 %vm702_vm4, %v12724_v34 }
 0x13f   :  { %11297 = vmatprep.mubr.msk.bf16.mxu1 %vm702_vm4, %v12726_v41 }
 0x146   :  { %11298 = vmatmul.mubr.msk.bf16.gmra.mxu1 %vm702_vm4, %v12740_v56 }
 0x147   :  { %11301 = vmatprep.mubr.msk.bf16.mxu1 %vm702_vm4, %v12742_v58 }
 0x14e   :  { %11302 = vmatmul.mubr.msk.bf16.gmra.mxu1 %vm702_vm4, %v12752_v4 }
 0x1b6   :  { %v11237_v12 = vpop.f32.mrf.mxu1 }
 0x1b8   :  { %v761_v14 = vpop.f32.mrf.mxu1 }
 0x1ba   :  { %v11238_v18 = vpop.f32.mrf.mxu1 }
 0x1bb   :  { %v1316_v28 = vpack.c.bf16 %v11238_v18, %v11237_v12 }
 0x1bc   :  { %v764_v25 = vpop.f32.mrf.mxu1 }
 0x1bd   :  { %v1315_v19 = vpack.c.bf16 %v764_v25, %v761_v14 }
 0x1be   :  { %v11241_v29 = vpop.f32.mrf.mxu1  ;;  %v12756_v30 = vpop.f32.mrf.mxu0 }
 0x1bf   :  { %11329 = vmatprep.mubr.msk.bf16.mxu0 %vm1229_vm6, %v1315_v19 }
 0x1c0   :  { %v777_v35 = vpop.f32.mrf.mxu1  ;;  %v12759_v40 = vpop.f32.mrf.mxu0  ;;  %11330 = vmatmul.mubr.msk.bf16.vlgmr.msra.gmra.mxu0 %vm1229_vm6, %v1316_v28 }
 0x1c2   :  { %v11242_v24 = vpop.f32.mrf.mxu1  ;;  %v12762_v43 = vpop.f32.mrf.mxu0 }
 0x1c3   :  { %v1318_v50 = vpack.c.bf16 %v11242_v24, %v11241_v29 }
 0x1c4   :  { %v780_v44 = vpop.f32.mrf.mxu1  ;;  %v12764_v46 = vpop.f32.mrf.mxu0 }
 0x1c5   :  { %v1317_v48 = vpack.c.bf16 %v780_v44, %v777_v35  ;;  %v1331_v7 = vpack.c.bf16 %v12764_v46, %v12759_v40 }
 0x1c6   :  { %v11245_v55 = vpop.f32.mrf.mxu1  ;;  %v12766_v59 = vpop.f32.mrf.mxu0 }
 0x1c7   :  { %11333 = vmatprep.mubr.msk.bf16.mxu0 %vm1229_vm6, %v1317_v48 }
 0x1c8   :  { %v793_v60 = vpop.f32.mrf.mxu1  ;;  %v12769_v12 = vpop.f32.mrf.mxu0  ;;  %11334 = vmatmul.mubr.msk.bf16.gmra.mxu0 %vm1229_vm6, %v1318_v50 }
 0x1ca   :  { %v11246_v14 = vpop.f32.mrf.mxu1  ;;  %v12772_v18 = vpop.f32.mrf.mxu0 }
 0x1cb   :  { %v1320_v16 = vpack.c.bf16 %v11246_v14, %v11245_v55  ;;  %v1334_v46 = vpack.c.bf16 %v12772_v18, %v12766_v59 }
 0x1cc   :  { %v796_v25 = vpop.f32.mrf.mxu1  ;;  %v12774_v19 = vpop.f32.mrf.mxu0 }
 0x1cd   :  { %v1319_v28 = vpack.c.bf16 %v796_v25, %v793_v60 }
 0x1ce   :  { %v11249_v35 = vpop.f32.mrf.mxu1  ;;  %v12776_v29 = vpop.f32.mrf.mxu0 }
 0x1cf   :  { %11337 = vmatprep.mubr.msk.bf16.mxu0 %vm1229_vm6, %v1319_v28 }
 0x1d0   :  { %v809_v24 = vpop.f32.mrf.mxu1  ;;  %v12779_v44 = vpop.f32.mrf.mxu0  ;;  %11338 = vmatmul.mubr.msk.bf16.gmra.mxu0 %vm1229_vm6, %v1320_v16 }
 0x1d2   :  { %v11250_v48 = vpop.f32.mrf.mxu1  ;;  %v12782_v50 = vpop.f32.mrf.mxu0 }
 0x1d3   :  { %v1322_v41 = vpack.c.bf16 %v11250_v48, %v11249_v35 }
 0x1d4   :  { %v812_v4 = vpop.f32.mrf.mxu1  ;;  %v12784_v58 = vpop.f32.mrf.mxu0 }
 0x1d5   :  { %v1321_v56 = vpack.c.bf16 %v812_v4, %v809_v24 }
 0x1d6   :  { %v11255_v60 = vpop.f32.mrf.mxu1  ;;  %v12786_v55 = vpop.f32.mrf.mxu0 }
 0x1d7   :  { %11341 = vmatprep.mubr.msk.bf16.mxu0 %vm1229_vm6, %v1321_v56 }
 0x1d8   :  { %v883_v14 = vpop.f32.mrf.mxu1  ;;  %v12789_v25 = vpop.f32.mrf.mxu0  ;;  %11342 = vmatmul.mubr.msk.bf16.gmra.mxu0 %vm1229_vm6, %v1322_v41 }
 0x1da   :  { %v11256_v28 = vpop.f32.mrf.mxu1  ;;  %v12792_v16 = vpop.f32.mrf.mxu0 }
 0x1db   :  { %v1324_v49 = vpack.c.bf16 %v11256_v28, %v11255_v60 }
 0x1dc   :  { %v886_v34 = vpop.f32.mrf.mxu1  ;;  %v12794_v63 = vpop.f32.mrf.mxu0 }
 0x1dd   :  { %v1323_v61 = vpack.c.bf16 %v886_v34, %v883_v14  ;;  %v12809_v34 = vld [vmem:[%s16278_s6] ss:$0 sm:$0xff] }
 0x1de   :  { %v11259_v4 = vpop.f32.mrf.mxu1  ;;  %v12796_v35 = vpop.f32.mrf.mxu0 }
 0x1df   :  { %11345 = vmatprep.mubr.msk.bf16.mxu0 %vm1229_vm6, %v1323_v61 }
 0x1e0   :  { %v899_v24 = vpop.f32.mrf.mxu1  ;;  %v12799_v56 = vpop.f32.mrf.mxu0  ;;  %11346 = vmatmul.mubr.msk.bf16.gmra.mxu0 %vm1229_vm6, %v1324_v49 }
 0x1e2   :  { %v11260_v48 = vpop.f32.mrf.mxu1  ;;  %v12802_v41 = vpop.f32.mrf.mxu0 }
 0x1e3   :  { %v1326_v60 = vpack.c.bf16 %v11260_v48, %v11259_v4 }
 0x1e4   :  { %v902_v45 = vpop.f32.mrf.mxu1  ;;  %v12804_v39 = vpop.f32.mrf.mxu0 }
 0x1e5   :  { %v1325_v33 = vpack.c.bf16 %v902_v45, %v899_v24 }
 0x1e6   :  { %v11263_v14 = vpop.f32.mrf.mxu1  ;;  %v11319_v61 = vpop.f32.mrf.mxu0 }
 0x1e7   :  { %v12812_v28 = vadd.f32 %v11319_v61, %v12809_v34  ;;  %11349 = vmatprep.mubr.msk.bf16.mxu0 %vm1229_vm6, %v1325_v33 }
 0x1e8   :  { %v915_v49 = vpop.f32.mrf.mxu1  ;;  %v1292_v26 = vpop.f32.mrf.mxu0  ;;  %11350 = vmatmul.mubr.msk.bf16.gmra.mxu0 %vm1229_vm6, %v1326_v60 }
 0x1e9   :  { %v12817_v20 = vadd.f32 %v12809_v34, %v1292_v26 }
 0x1ea   :  { %v11264_v45 = vpop.f32.mrf.mxu1  ;;  %v11320_v24 = vpop.f32.mrf.mxu0 }
 0x1eb   :  { %v12820_v13 = vadd.f32 %v11320_v24, %v12809_v34  ;;  %v1328_v27 = vpack.c.bf16 %v11264_v45, %v11263_v14 }
 0x1ec   :  { %v918_v4 = vpop.f32.mrf.mxu1 }
 0x1ed   :  { %v1327_v48 = vpack.c.bf16 %v918_v4, %v915_v49 }
 0x1ee   :  { %v11267_v8 = vpop.f32.mrf.mxu1 }
 0x1ef   :  { %11353 = vmatprep.mubr.msk.bf16.mxu0 %vm1229_vm6, %v1327_v48 }
 0x1f0   :  { %v931_v61 = vpop.f32.mrf.mxu1  ;;  %11354 = vmatmul.mubr.msk.bf16.gmra.mxu0 %vm1229_vm6, %v1328_v27  ;;  %v1332_v27 = vpack.c.bf16 %v12762_v43, %v12756_v30  ;;  %v1336_v43 = vpack.c.bf16 %v12782_v50, %v12776_v29 }
 0x1f2   :  { %v11268_v33 = vpop.f32.mrf.mxu1 }
 0x1f3   :  { %v1330_v3 = vpack.c.bf16 %v11268_v33, %v11267_v8 }
 0x1f4   :  { %v934_v11 = vpop.f32.mrf.mxu1 }
 0x1f5   :  { %v1329_v60 = vpack.c.bf16 %v934_v11, %v931_v61  ;;  %v1333_v11 = vpack.c.bf16 %v12774_v19, %v12769_v12  ;;  %v1337_v12 = vpack.c.bf16 %v12794_v63, %v12789_v25 }
 0x1f6   :  { %v11291_v26 = vpop.f32.mrf.mxu1 }
 0x1f7   :  { %11357 = vmatprep.mubr.msk.bf16.mxu0 %vm1229_vm6, %v1329_v60 }
 0x1f8   :  { %v1127_v24 = vpop.f32.mrf.mxu1  ;;  %11358 = vmatmul.mubr.msk.bf16.gmra.mxu0 %vm1229_vm6, %v1330_v3  ;;  %v1335_v3 = vpack.c.bf16 %v12784_v58, %v12779_v44  ;;  %v1338_v58 = vpack.c.bf16 %v12792_v16, %v12786_v55 }
 0x1f9   :  { %11361 = vmatprep.mubr.msk.bf16.mxu0 %vm1229_vm6, %v1331_v7 }
 0x1fa   :  { %v11292_v14 = vpop.f32.mrf.mxu1 }
 0x1fb   :  { %v1340_v29 = vpack.c.bf16 %v11292_v14, %v11291_v26  ;;  %v12072_v26 = vmov 1966171168  }
 0x1fc   :  { %v1130_v49 = vpop.f32.mrf.mxu1 }
 0x1fd   :  { %v1339_v18 = vpack.c.bf16 %v1130_v49, %v1127_v24  ;;  %v1766_v24 = vunpack.c.l.s4 %v12072_v26  ;;  %v16520_v49 = vlaneseq }
 0x1fe   :  { %v11295_v8 = vpop.f32.mrf.mxu1 }
 0x1ff   :  { %v1767_v14 = vunpack.c.0.s8 %v1766_v24 }
 0x200   :  { %11362 = vmatmul.mubr.msk.bf16.gmra.mxu0 %vm1229_vm6, %v1332_v27  ;;  %v1143_v40 = vpop.f32.mrf.mxu1  ;;  %v1769_v27 = vshrl.u32 %v16520_v49, 7 }
 0x201   :  { %11365 = vmatprep.mubr.msk.bf16.mxu0 %vm1229_vm6, %v1333_v11  ;;  %v1285_v11 = vadd.f32 %v12796_v35, %v12809_v34 }
 0x202   :  { %v11296_v7 = vpop.f32.mrf.mxu1 }
 0x203   :  { %v1342_v25 = vpack.c.bf16 %v11296_v7, %v11295_v8  ;;  %v1277_v8 = vadd.f32 %v12809_v34, %v12799_v56  ;;  %v1288_v7 = vadd.f32 %v12802_v41, %v12809_v34 }
 0x204   :  { %v1146_v30 = vpop.f32.mrf.mxu1 }
 0x205   :  { %v1341_v50 = vpack.c.bf16 %v1146_v30, %v1143_v40  ;;  %v12863_v40 = vsub.s32 %v1767_v14, %v1769_v27  ;;  %v1764_v30 = vcombine.high %v1277_v8, %v1277_v8  ;;  %v1911_v56 = vcombine.high %v1288_v7, %v1288_v7 }
 0x206   :  { %v11299_v19 = vpop.f32.mrf.mxu1 }
 0x207   :  { %16521 = vst [vmem:[#allocation46_spill] sm:$0xff] %v12863_v40  ;;  %v12881_v41 = vrot.slane %v1288_v7, %v12863_v40  ;;  %v12910_v24 = vrot.slane %v12812_v28, %v12863_v40 }
 0x208   :  { %11366 = vmatmul.mubr.msk.bf16.gmra.mxu0 %vm1229_vm6, %v1334_v46  ;;  %v1159_v59 = vpop.f32.mrf.mxu1  ;;  %v1862_v46 = vcombine.high %v1285_v11, %v1285_v11 }
 0x209   :  { %11369 = vmatprep.mubr.msk.bf16.mxu0 %vm1229_vm6, %v1335_v3  ;;  %v1771_v3 = vrot.slane %v1277_v8, %v12863_v40  ;;  %v12905_v26 = vrot.slane %v12881_v41, %v12863_v40 }
 0x20a   :  { %v11300_v44 = vpop.f32.mrf.mxu1 }
 0x20b   :  { %v1344_v16 = vpack.c.bf16 %v11300_v44, %v11299_v19  ;;  %v12872_v19 = vrot.slane %v1862_v46, %v12863_v40  ;;  %v12875_v35 = vrot.slane %v1771_v3, %v12863_v40  ;;  %v12926_v46 = vrot.slane %v12820_v13, %v12863_v40 }
 0x20c   :  { %v1162_v45 = vpop.f32.mrf.mxu1  ;;  %v1956_v38 = vcombine.high %v12905_v26, %v12905_v26 }
 0x20d   :  { %v1343_v48 = vpack.c.bf16 %v1162_v45, %v1159_v59  ;;  %v1778_v59 = vrot.slane %v1764_v30, %v12863_v40  ;;  %v13012_v54 = vrot.slane %v12872_v19, %v12863_v40 }
 0x20e   :  { %v11303_v4 = vpop.f32.mrf.mxu1 }
 0x20f   :  { %v1908_v36 = vcombine.high %v13012_v54, %v13012_v54 }
 0x210   :  { %11370 = vmatmul.mubr.msk.bf16.gmra.mxu0 %vm1229_vm6, %v1336_v43  ;;  %v1175_v63 = vpop.f32.mrf.mxu1  ;;  %v1280_v43 = vadd.f32 %v12809_v34, %v12804_v39 }
 0x211   :  { %11373 = vmatprep.mubr.msk.bf16.mxu0 %vm1229_vm6, %v1337_v12  ;;  %v1869_v12 = vrot.slane %v1285_v11, %v12863_v40  ;;  %v12920_v11 = vrot.slane %v12817_v20, %v12863_v40 }
 0x212   :  { %v11304_v61 = vpop.f32.mrf.mxu1  ;;  %v1813_v44 = vcombine.high %v1280_v43, %v1280_v43 }
 0x213   :  { %v1346_v60 = vpack.c.bf16 %v11304_v61, %v11303_v4  ;;  %v1877_v45 = vcombine.high %v1869_v12, %v1869_v12  ;;  %v12884_v39 = vrot.slane %v1869_v12, %v12863_v40  ;;  %v1779_v61 = vcombine.high %v1771_v3, %v1771_v3 }
 0x214   :  { %v1178_v55 = vpop.f32.mrf.mxu1 }
 0x215   :  { %v1345_v33 = vpack.c.bf16 %v1178_v55, %v1175_v63  ;;  %v12892_v63 = vrot.slane %v1911_v56, %v12863_v40  ;;  %v1780_v55 = vcombine.high %v1778_v59, %v1778_v59  ;;  %v12947_v56 = vrot.slane %v12910_v24, %v12863_v40 }
 0x217   :  { %v1927_v8 = vcombine.high %v12892_v63, %v12892_v63  ;;  %16522 = vst [vmem:[#allocation47_spill] sm:$0xff] %v12947_v56 }
 0x218   :  { %11374 = vmatmul.mubr.msk.bf16.gmra.mxu0 %vm1229_vm6, %v1338_v58  ;;  %v1295_v58 = vpop.f32.mrf.mxu0 }
 0x219   :  { %11377 = vmatprep.mubr.msk.bf16.mxu0 %vm1229_vm6, %v1339_v18  ;;  %v12878_v18 = vsub.s32 0, %v1769_v27  ;;  %v13075_v42 = vrot.slane %v1927_v8, %v12863_v40 }
 0x21b   :  { %v13091_v31 = vrot.slane %v1908_v36, %v12878_v18 }
 0x220   :  { %11378 = vmatmul.mubr.msk.bf16.gmra.mxu0 %vm1229_vm6, %v1340_v29  ;;  %v1820_v29 = vrot.slane %v1280_v43, %v12863_v40  ;;  %v12941_v43 = vrot.slane %v1778_v59, %v12863_v40  ;;  %v12958_v59 = vrot.slane %v12920_v11, %v12863_v40 }
 0x221   :  { %11381 = vmatprep.mubr.msk.bf16.mxu0 %vm1229_vm6, %v1341_v50  ;;  %v2058_v50 = vcombine.high %v12812_v28, %v12812_v28 }
 0x222   :  { %v1828_v14 = vcombine.high %v1820_v29, %v1820_v29  ;;  %v12913_v49 = vrot.slane %v1820_v29, %v12863_v40  ;;  %v12961_v29 = vrot.slane %v1780_v55, %v12863_v40  ;;  %v2005_v22 = vcombine.high %v12958_v59, %v12958_v59 }
 0x223   :  { %v12916_v27 = vrot.slane %v2058_v50, %v12863_v40  ;;  %v13002_v50 = vrot.slane %v1877_v45, %v12863_v40 }
 0x224   :  { %v13133_v2 = vrot.slane %v2005_v22, %v12878_v18 }
 0x225   :  { %v1909_v52 = vcombine.high %v13002_v50, %v13002_v50 }
 0x228   :  { %11382 = vmatmul.mubr.msk.bf16.gmra.mxu0 %vm1229_vm6, %v1342_v25  ;;  %v1296_v25 = vadd.f32 %v12809_v34, %v1295_v58  ;;  %v1827_v34 = vrot.slane %v1813_v44, %v12863_v40  ;;  %v1975_v44 = vcombine.high %v12920_v11, %v12920_v11  ;;  %v1810_v11 = vcombine.high %v12941_v43, %v12941_v43 }
 0x229   :  { %11385 = vmatprep.mubr.msk.bf16.mxu0 %vm1229_vm6, %v1343_v48  ;;  %v1809_v48 = vcombine.high %v12875_v35, %v12875_v35 }
 0x22a   :  { %v2009_v28 = vcombine.high %v1296_v25, %v1296_v25  ;;  %v1829_v12 = vcombine.high %v1827_v34, %v1827_v34  ;;  %v12950_v58 = vrot.slane %v1296_v25, %v12863_v40  ;;  %v12967_v25 = vrot.slane %v12926_v46, %v12863_v40 }
 0x22b   :  { %v12929_v3 = vrot.slane %v1809_v48, %v12878_v18 }
 0x22c   :  { %16523 = vst [vmem:[#allocation48_spill] sm:$0xff] %v12967_v25  ;;  %v12970_v48 = vrot.slane %v2009_v28, %v12863_v40  ;;  %v1858_v28 = vcombine.high %v12913_v49, %v12913_v49  ;;  %v12994_v55 = vrot.slane %v12950_v58, %v12863_v40  ;;  %v12999_v4 = vrot.slane %v1829_v12, %v12863_v40 }
 0x22d   :  { %v13018_v12 = vrot.slane %v1810_v11, %v12878_v18 }
 0x22e   :  { %16524 = vst [vmem:[#allocation49_spill] sm:$0xff] %v12994_v55  ;;  %v1861_v45 = vcombine.high %v12999_v4, %v12999_v4 }
 0x230   :  { %11386 = vmatmul.mubr.msk.bf16.gmra.mxu0 %vm1229_vm6, %v1344_v16  ;;  %v1960_v16 = vcombine.high %v12817_v20, %v12817_v20  ;;  %v12938_v20 = vrot.slane %v1779_v61, %v12863_v40  ;;  %v1812_v61 = vcombine.high %v12961_v29, %v12961_v29 }
 0x231   :  { %11389 = vmatprep.mubr.msk.bf16.mxu0 %vm1229_vm6, %v1345_v33  ;;  %v2107_v33 = vcombine.high %v12820_v13, %v12820_v13  ;;  %v12990_v13 = vrot.slane %v1827_v34, %v12863_v40  ;;  %v13025_v34 = vrot.slane %v1858_v28, %v12878_v18  ;;  %v16525_v28 = vcombine.high %v12872_v19, %v12872_v19 }
 0x232   :  { %v12932_v7 = vrot.slane %v1960_v16, %v12863_v40  ;;  %v13034_v11 = vrot.slane %v1812_v61, %v12878_v18 }
 0x233   :  { %v12935_v30 = vrot.slane %v2107_v33, %v12863_v40  ;;  %v1811_v33 = vcombine.high %v12938_v20, %v12938_v20  ;;  %v13044_v62 = vrot.slane %v16525_v28, %v12863_v40  ;;  %v13064_v28 = vrot.slane %v12892_v63, %v12863_v40 }
 0x234   :  { %v1976_v16 = vcombine.high %v12932_v7, %v12932_v7  ;;  %v13084_v63 = vrot.slane %v1909_v52, %v12878_v18  ;;  %v13108_v17 = vrot.slane %v12932_v7, %v12863_v40  ;;  %v1959_v52 = vcombine.high %v13075_v42, %v13075_v42 }
 0x235   :  { %v13015_v57 = vrot.slane %v1811_v33, %v12878_v18  ;;  %v1859_v33 = vcombine.high %v12990_v13, %v12990_v13  ;;  %v1957_v36 = vcombine.high %v13064_v28, %v13064_v28 }
 0x236   :  { %16526 = vst [vmem:[#allocation50_spill] sm:$0xff] %v13108_v17  ;;  %v13118_v15 = vrot.slane %v1976_v16, %v12863_v40  ;;  %v2006_v1 = vcombine.high %v13108_v17, %v13108_v17  ;;  %v13156_v32 = vrot.slane %v1959_v52, %v12878_v18 }
 0x237   :  { %v13070_v61 = vrot.slane %v1859_v33, %v12878_v18  ;;  %v1910_v33 = vcombine.high %v13044_v62, %v13044_v62  ;;  %v13149_v8 = vrot.slane %v1957_v36, %v12878_v18  ;;  %v11992_v36 = vld [vmem:[%s16279_s7 + $0x8] sm:$0xff]  }
 0x238   :  { %11390 = vmatmul.mubr.msk.bf16.gmra.mxu0 %vm1229_vm6, %v1346_v60  ;;  %v1926_v60 = vcombine.high %v12881_v41, %v12881_v41  ;;  %v12987_v41 = vrot.slane %v1828_v14, %v12863_v40  ;;  %v1907_v14 = vcombine.high %v12884_v39, %v12884_v39  ;;  %16527 = vst [vmem:[#allocation51_spill] sm:$0xff] %v13118_v15 }
 0x239   :  { %v13124_v7 = vrot.slane %v1910_v33, %v12878_v18  ;;  %v2054_v33 = vcombine.high %v12994_v55, %v12994_v55 }
 0x23a   :  { %v1860_v53 = vcombine.high %v12987_v41, %v12987_v41  ;;  %v13057_v37 = vrot.slane %v1907_v14, %v12878_v18  ;;  %v13060_v19 = vrot.slane %v1926_v60, %v12863_v40  ;;  %v11990_v60 = vld [vmem:[%s16279_s7 + $0x18] sm:$0xff]   ;;  %v13081_v14 = vrot.slane %v1861_v45, %v12878_v18 }
 0x23b   :  { %v13098_v45 = vrot.slane %v1975_v44, %v12863_v40  ;;  %11393 = vmatprep.subr.bf16.mxu1 %v11990_v60  ;;  %v13113_v44 = vrot.slane %v1956_v38, %v12878_v18  ;;  %v13180_v23 = vrot.slane %v2054_v33, %v12878_v18  ;;  %v2103_v33 = vcombine.high %v12947_v56, %v12947_v56 }
 0x23c   :  { %v13067_v47 = vrot.slane %v1860_v53, %v12878_v18  ;;  %v1958_v53 = vcombine.high %v13060_v19, %v13060_v19  ;;  %11394 = vmatpush3.bf16.msra.mxu1 %v11990_v60  ;;  %v16528_v60 = vcombine.high %v12950_v58, %v12950_v58  ;;  %v16534_v58 = vrot.slane %v12875_v35, %v12878_v18 }
 0x23d   :  { %v2007_v16 = vcombine.high %v13098_v45, %v13098_v45  ;;  %11395 = vmatprep.subr.bf16.mxu1 %v11991_v10  ;;  %16531 = vst [vmem:[#allocation54_spill] sm:$0xff] %v13180_v23 }
 0x23e   :  { %v13143_v5 = vrot.slane %v16528_v60, %v12863_v40  ;;  %v13146_v38 = vrot.slane %v1958_v53, %v12878_v18  ;;  %v2008_v53 = vcombine.high %v13118_v15, %v13118_v15  ;;  %v13167_v60 = vrot.slane %v12970_v48, %v12863_v40 }
 0x23f   :  { %v13177_v21 = vrot.slane %v2007_v16, %v12878_v18  ;;  %v13194_v16 = vrot.slane %v2006_v1, %v12878_v18 }
 0x240   :  { %16529 = vst [vmem:[#allocation52_spill] sm:$0xff] %v13143_v5  ;;  %11396 = vmatpush3.bf16.msra.mxu1 %v11991_v10  ;;  %16530 = vst [vmem:[#allocation53_spill] sm:$0xff] %v13167_v60  ;;  %v13199_v55 = vrot.slane %v2008_v53, %v12878_v18  ;;  %v13226_v53 = vrot.slane %v2103_v33, %v12878_v18 }
 0x241   :  { %11397 = vmatprep.subr.bf16.mxu1 %v11992_v36  ;;  %16535 = vst [vmem:[#allocation56_spill] sm:$0xff] %v13194_v16 }
 0x242   :  { %16536 = vst [vmem:[#allocation57_spill] sm:$0xff] %v13199_v55  ;;  %16539 = vst [vmem:[#allocation59_spill] sm:$0xff] %v13226_v53 }
 0x244   :  { %11398 = vmatpush3.bf16.msra.mxu1 %v11992_v36 }
 0x280   :  { %v11331_v0 = vpop.f32.mrf.mxu0 }
 0x281   :  { %v2478_v10 = vadd.f32 %v11331_v0, %v12929_v3  ;;  %v2056_v0 = vcombine.high %v13143_v5, %v13143_v5  ;;  %v16532_v3 = vcombine.high %v12970_v48, %v12970_v48  ;;  %v11993_v48 = vld [vmem:[%s16279_s7] sm:$0xff]   ;;  %v16540_v5 = vcombine.high %v12910_v24, %v12910_v24 }
 0x282   :  { %v1501_v51 = vpop.f32.mrf.mxu0  ;;  %11399 = vmatprep.subr.bf16.mxu1 %v11993_v48 }
 0x283   :  { %v13188_v52 = vrot.slane %v16532_v3, %v12863_v40  ;;  %v2542_v22 = vmax.f32 %v2478_v10, 0.0  ;;  %v2476_v9 = vadd.f32 %v16534_v58, %v1501_v51  ;;  %v2055_v51 = vcombine.high %v13167_v60, %v13167_v60  ;;  %11400 = vmatpush3.bf16.msra.mxu1 %v11993_v48 }
 0x284   :  { %v11332_v6 = vpop.f32.mrf.mxu0  ;;  %v13215_v15 = vrot.slane %v2056_v0, %v12878_v18 }
 0x285   :  { %16533 = vst [vmem:[#allocation55_spill] sm:$0xff] %v13188_v52  ;;  %v2618_v35 = vsel %vm1229_vm6, %v2542_v22, 0.0  ;;  %v2540_v58 = vmax.f32 %v2476_v9, 0.0  ;;  %v2479_v36 = vadd.f32 %v11332_v6, %v13015_v57  ;;  %v2057_v10 = vcombine.high %v13188_v52, %v13188_v52 }
 0x286   :  { %v2619_v3 = vrot.slane %v2618_v35, 4  ;;  %v1504_v23 = vpop.f32.mrf.mxu0  ;;  %16537 = vst [vmem:[#allocation58_spill] sm:$0xff] %v13215_v15  ;;  %v16538_v57 = vrot.slane %v12938_v20, %v12878_v18  ;;  %v13232_v15 = vrot.slane %v16540_v5, %v12863_v40  ;;  %v13241_v33 = vrot.slane %v2055_v51, %v12878_v18 }
 0x287   :  { %v2604_v22 = vsel %vm1229_vm6, %v2540_v58, 0.0  ;;  %v2543_v9 = vmax.f32 %v2479_v36, 0.0  ;;  %v13236_v58 = vrot.slane %v12916_v27, %v12863_v40  ;;  %v16545_v5 = vcombine.high %v12916_v27, %v12916_v27 }
 0x288   :  { %v2477_v6 = vadd.f32 %v16538_v57, %v1504_v23  ;;  %v2620_v0 = vadd.f32 %v2619_v3, %v2618_v35  ;;  %v2605_v56 = vrot.slane %v2604_v22, 4  ;;  %v11335_v60 = vpop.f32.mrf.mxu0  ;;  %16541 = vst [vmem:[#allocation60_spill] sm:$0xff] %v13232_v15  ;;  %16543 = vst [vmem:[#allocation62_spill] sm:$0xff] %v13241_v33  ;;  %v13244_v57 = vrot.slane %v2057_v10, %v12878_v18 }
 0x289   :  { %16542 = vst [vmem:[#allocation61_spill] sm:$0xff] %v13236_v58  ;;  %v2625_v20 = vsel %vm1229_vm6, %v2543_v9, 0.0  ;;  %v2482_v48 = vadd.f32 %v11335_v60, %v13018_v12  ;;  %v13250_v24 = vrot.slane %v16545_v5, %v12863_v40  ;;  %v16547_v12 = vrot.slane %v12941_v43, %v12878_v18 }
 0x28a   :  { %v2541_v23 = vmax.f32 %v2477_v6, 0.0  ;;  %v2621_v35 = vrot.slane %v2620_v0, 2  ;;  %v2606_v36 = vadd.f32 %v2605_v56, %v2604_v22  ;;  %v1517_v3 = vpop.f32.mrf.mxu0  ;;  %16544 = vst [vmem:[#allocation63_spill] sm:$0xff] %v13244_v57  ;;  %v2626_v1 = vrot.slane %v2625_v20, 4 }
 0x28b   :  { %16546 = vst [vmem:[#allocation64_spill] sm:$0xff] %v13250_v24  ;;  %v2480_v60 = vadd.f32 %v16547_v12, %v1517_v3  ;;  %v2152_v56 = vcombine.high %v12967_v25, %v12967_v25  ;;  %v2546_v22 = vmax.f32 %v2482_v48, 0.0  ;;  %v2105_v6 = vcombine.high %v13232_v15, %v13232_v15 }
 0x28c   :  { %v2611_v9 = vsel %vm1229_vm6, %v2541_v23, 0.0  ;;  %v11336_v10 = vpop.f32.mrf.mxu0  ;;  %v2622_v5 = vadd.f32 %v2621_v35, %v2620_v0  ;;  %v2607_v53 = vrot.slane %v2606_v36, 2  ;;  %v2104_v3 = vcombine.high %v13236_v58, %v13236_v58 }
 0x28d   :  { %v2612_v51 = vrot.slane %v2611_v9, 4  ;;  %v2544_v52 = vmax.f32 %v2480_v60, 0.0  ;;  %v2483_v23 = vadd.f32 %v11336_v10, %v13034_v11  ;;  %v2106_v12 = vcombine.high %v13250_v24, %v13250_v24 }
 0x28e   :  { %v1520_v43 = vpop.f32.mrf.mxu0  ;;  %v2627_v33 = vadd.f32 %v2626_v1, %v2625_v20  ;;  %v16548_v27 = vrot.slane %v12961_v29, %v12878_v18  ;;  %v13275_v11 = vrot.slane %v2152_v56, %v12878_v18  ;;  %v2646_v60 = vsel %vm1229_vm6, %v2546_v22, 0.0 }
 0x28f   :  { %v2613_v57 = vadd.f32 %v2612_v51, %v2611_v9  ;;  %v2632_v51 = vsel %vm1229_vm6, %v2544_v52, 0.0  ;;  %v16550_v1 = vcombine.high %v12926_v46, %v12926_v46  ;;  %v2623_v29 = vrot.slane %v2622_v5, 1 }
 0x290   :  { %v2481_v0 = vadd.f32 %v16548_v27, %v1520_v43  ;;  %16549 = vst [vmem:[#allocation65_spill] sm:$0xff] %v13275_v11  ;;  %v11339_v10 = vpop.f32.mrf.mxu0  ;;  %v2608_v27 = vadd.f32 %v2607_v53, %v2606_v36  ;;  %v2547_v43 = vmax.f32 %v2483_v23, 0.0  ;;  %v13287_v35 = vrot.slane %v12935_v30, %v12863_v40 }
 0x291   :  { %v2614_v9 = vrot.slane %v2613_v57, 2  ;;  %v13283_v20 = vrot.slane %v16550_v1, %v12863_v40  ;;  %v13290_v22 = vrot.slane %v2105_v6, %v12878_v18  ;;  %v13293_v52 = vrot.slane %v2104_v3, %v12878_v18 }
 0x292   :  { %16552 = vst [vmem:[#allocation67_spill] sm:$0xff] %v13287_v35  ;;  %v2545_v48 = vmax.f32 %v2481_v0, 0.0  ;;  %v1533_v11 = vpop.f32.mrf.mxu0  ;;  %v2628_v24 = vrot.slane %v2627_v33, 2  ;;  %v2647_v46 = vrot.slane %v2646_v60, 4  ;;  %v2633_v1 = vrot.slane %v2632_v51, 4 }
 0x293   :  { %16551 = vst [vmem:[#allocation66_spill] sm:$0xff] %v13283_v20  ;;  %v2615_v56 = vadd.f32 %v2614_v9, %v2613_v57  ;;  %16553 = vst [vmem:[#allocation68_spill] sm:$0xff] %v13290_v22  ;;  %v16555_v53 = vcombine.high %v12935_v30, %v12935_v30  ;;  %v13302_v57 = vrot.slane %v2106_v12, %v12878_v18  ;;  %v2609_v58 = vrot.slane %v2608_v27, 1 }
 0x294   :  { %16554 = vst [vmem:[#allocation69_spill] sm:$0xff] %v13293_v52  ;;  %v11340_v23 = vpop.f32.mrf.mxu0  ;;  %v2154_v3 = vcombine.high %v13283_v20, %v13283_v20  ;;  %v2624_v9 = vadd.f32 %v2623_v29, %v2622_v5  ;;  %v2653_v52 = vsel %vm1229_vm6, %v2547_v43, 0.0  ;;  %v2153_v30 = vcombine.high %v13287_v35, %v13287_v35 }
 0x295   :  { %v13299_v36 = vrot.slane %v16555_v53, %v12863_v40  ;;  %16557 = vst [vmem:[#allocation71_spill] sm:$0xff] %v13302_v57  ;;  %v2616_v53 = vrot.slane %v2615_v56, 1  ;;  %v2639_v12 = vsel %vm1229_vm6, %v2545_v48, 0.0  ;;  %v2486_v40 = vadd.f32 %v11339_v10, %v13025_v34 }
 0x296   :  { %v1536_v57 = vpop.f32.mrf.mxu0  ;;  %v2629_v25 = vadd.f32 %v2628_v24, %v2627_v33  ;;  %v2648_v15 = vadd.f32 %v2647_v46, %v2646_v60  ;;  %v2634_v22 = vadd.f32 %v2633_v1, %v2632_v51  ;;  %v2654_v29 = vrot.slane %v2653_v52, 4 }
 0x297   :  { %16556 = vst [vmem:[#allocation70_spill] sm:$0xff] %v13299_v36  ;;  %v2155_v5 = vcombine.high %v13299_v36, %v13299_v36  ;;  %v2550_v43 = vmax.f32 %v2486_v40, 0.0  ;;  %v16558_v0 = vrot.slane %v12913_v49, %v12878_v18  ;;  %v3062_v48 = vpack.c.bf16 %v2624_v9, %v2624_v9 }
 0x298   :  { %v11343_v55 = vpop.f32.mrf.mxu0  ;;  %v2610_v10 = vadd.f32 %v2609_v58, %v2608_v27  ;;  %v2640_v17 = vrot.slane %v2639_v12, 4  ;;  %v13325_v33 = vrot.slane %v2154_v3, %v12878_v18  ;;  %v2617_v24 = vadd.f32 %v2616_v53, %v2615_v56 }
 0x299   :  { %v2484_v20 = vadd.f32 %v16558_v0, %v1533_v11  ;;  %v2674_v60 = vsel %vm1229_vm6, %v2550_v43, 0.0  ;;  %v2487_v40 = vadd.f32 %v11340_v23, %v13067_v47  ;;  %v2630_v1 = vrot.slane %v2629_v25, 1 }
 0x29a   :  { %16559 = vst [vmem:[#allocation72_spill] sm:$0xff] %v13325_v33  ;;  %v1549_v46 = vpop.f32.mrf.mxu0  ;;  %v2649_v49 = vrot.slane %v2648_v15, 2  ;;  %v2635_v11 = vrot.slane %v2634_v22, 2  ;;  %v13330_v0 = vrot.slane %v2153_v30, %v12878_v18  ;;  %v2655_v34 = vadd.f32 %v2654_v29, %v2653_v52 }
 0x29b   :  { %v2548_v51 = vmax.f32 %v2484_v20, 0.0  ;;  %v2675_v9 = vrot.slane %v2674_v60, 4  ;;  %v2551_v27 = vmax.f32 %v2487_v40, 0.0  ;;  %v3060_v6 = vpack.c.bf16 %v2610_v10, %v2610_v10 }
 0x29c   :  { %16560 = vst [vmem:[#allocation73_spill] sm:$0xff] %v13330_v0  ;;  %v11344_v3 = vpop.f32.mrf.mxu0  ;;  %v2641_v56 = vadd.f32 %v2640_v17, %v2639_v12  ;;  %v13334_v20 = vrot.slane %v2155_v5, %v12878_v18  ;;  %v3198_v47 = vunpack.c.l.b16 %v3062_v48  ;;  %v3061_v23 = vpack.c.bf16 %v2617_v24, %v2617_v24 }
 0x29d   :  { %v2660_v58 = vsel %vm1229_vm6, %v2548_v51, 0.0  ;;  %v2676_v53 = vadd.f32 %v2675_v9, %v2674_v60  ;;  %v2631_v30 = vadd.f32 %v2630_v1, %v2629_v25  ;;  %v2650_v35 = vadd.f32 %v2649_v49, %v2648_v15 }
 0x29e   :  { %16561 = vst [vmem:[#allocation74_spill] sm:$0xff] %v13334_v20  ;;  %v2661_v43 = vrot.slane %v2660_v58, 4  ;;  %v1552_v36 = vpop.f32.mrf.mxu0  ;;  %v2681_v52 = vsel %vm1229_vm6, %v2551_v27, 0.0  ;;  %v16562_v29 = vrot.slane %v12987_v41, %v12878_v18  ;;  %v2636_v10 = vadd.f32 %v2635_v11, %v2634_v22 }
 0x29f   :  { %v2656_v40 = vrot.slane %v2655_v34, 2  ;;  %v2682_v12 = vrot.slane %v2681_v52, 4  ;;  %v3196_v20 = vunpack.c.l.b16 %v3060_v6  ;;  %v2642_v48 = vrot.slane %v2641_v56, 2 }
 0x2a0   :  { %v2485_v51 = vadd.f32 %v16562_v29, %v1536_v57  ;;  %v2662_v17 = vadd.f32 %v2661_v43, %v2660_v58  ;;  %v11347_v5 = vpop.f32.mrf.mxu0  ;;  %v2490_v60 = vadd.f32 %v11343_v55, %v13070_v61  ;;  %v3197_v9 = vunpack.c.l.b16 %v3061_v23 }
 0x2a1   :  { %v2677_v25 = vrot.slane %v2676_v53, 2  ;;  %v2683_v1 = vadd.f32 %v2682_v12, %v2681_v52  ;;  %v16563_v22 = vrot.slane %v12990_v13, %v12878_v18  ;;  %v2491_v11 = vadd.f32 %v11344_v3, %v13081_v14 }
 0x2a2   :  { %v2549_v24 = vmax.f32 %v2485_v51, 0.0  ;;  %v2663_v15 = vrot.slane %v2662_v17, 2  ;;  %v1565_v49 = vpop.f32.mrf.mxu0  ;;  %v2554_v41 = vmax.f32 %v2490_v60, 0.0  ;;  %v2651_v6 = vrot.slane %v2650_v35, 1 }
 0x2a3   :  { %v2488_v57 = vadd.f32 %v16563_v22, %v1549_v46  ;;  %v2637_v58 = vrot.slane %v2636_v10, 1  ;;  %v2657_v43 = vadd.f32 %v2656_v40, %v2655_v34  ;;  %v2684_v29 = vrot.slane %v2683_v1, 2 }
 0x2a4   :  { %v2667_v27 = vsel %vm1229_vm6, %v2549_v24, 0.0  ;;  %v11348_v51 = vpop.f32.mrf.mxu0  ;;  %v3063_v55 = vpack.c.bf16 %v2631_v30, %v2631_v30  ;;  %v2643_v61 = vadd.f32 %v2642_v48, %v2641_v56  ;;  %v3261_v52 = vsel %vm3260_vm9, %v3197_v9, %v3196_v20 }
 0x2a5   :  { %v2668_v23 = vrot.slane %v2667_v27, 4  ;;  %v2552_v0 = vmax.f32 %v2488_v57, 0.0  ;;  %v2678_v12 = vadd.f32 %v2677_v25, %v2676_v53  ;;  %v2664_v24 = vadd.f32 %v2663_v15, %v2662_v17 }
 0x2a6   :  { %v2702_v60 = vsel %vm1229_vm6, %v2554_v41, 0.0  ;;  %v13348_v33 = vpop.f32.mrf.mxu0  ;;  %v2685_v13 = vadd.f32 %v2684_v29, %v2683_v1  ;;  %v2555_v14 = vmax.f32 %v2491_v11, 0.0  ;;  %v16564_v34 = vrot.slane %v12999_v4, %v12878_v18 }
 0x2a7   :  { %v2669_v46 = vadd.f32 %v2668_v23, %v2667_v27  ;;  %v2652_v40 = vadd.f32 %v2651_v6, %v2650_v35  ;;  %v2638_v30 = vadd.f32 %v2637_v58, %v2636_v10  ;;  %v2658_v56 = vrot.slane %v2657_v43, 1 }
 0x2a8   :  { %v2489_v3 = vadd.f32 %v16564_v34, %v1552_v36  ;;  %v2688_v48 = vsel %vm1229_vm6, %v2552_v0, 0.0  ;;  %v13354_v22 = vpop.f32.mrf.mxu0  ;;  %v3263_v20 = vsel %vm3262_vm10, %v3198_v47, %v3261_v52  ;;  %v2703_v17 = vrot.slane %v2702_v60, 4 }
 0x2a9   :  { %v2670_v53 = vrot.slane %v2669_v46, 2  ;;  %v3199_v25 = vunpack.c.l.b16 %v3063_v55  ;;  %v2644_v15 = vrot.slane %v2643_v61, 1  ;;  %v2679_v1 = vrot.slane %v2678_v12, 1 }
 0x2aa   :  { %v2553_v9 = vmax.f32 %v2489_v3, 0.0  ;;  %v13357_v27 = vpop.f32.mrf.mxu0  ;;  %v2665_v4 = vrot.slane %v2664_v24, 1  ;;  %v2686_v36 = vrot.slane %v2685_v13, 1  ;;  %v2689_v35 = vrot.slane %v2688_v48, 4 }
 0x2ab   :  { %v2709_v10 = vsel %vm1229_vm6, %v2555_v14, 0.0  ;;  %v3066_v41 = vpack.c.bf16 %v2652_v40, %v2652_v40  ;;  %v3064_v0 = vpack.c.bf16 %v2638_v30, %v2638_v30  ;;  %v3265_v57 = vsel %vm3264_vm11, %v3199_v25, %v3263_v20 }
 0x2ac   :  { %v2659_v11 = vadd.f32 %v2658_v56, %v2657_v43  ;;  %v13361_v47 = vpop.f32.mrf.mxu0  ;;  %v2671_v6 = vadd.f32 %v2670_v53, %v2669_v46  ;;  %v2704_v58 = vadd.f32 %v2703_v17, %v2702_v60  ;;  %v2695_v29 = vsel %vm1229_vm6, %v2553_v9, 0.0 }
 0x2ad   :  { %v2494_v55 = vadd.f32 %v11347_v5, %v13057_v37  ;;  %v2645_v23 = vadd.f32 %v2644_v15, %v2643_v61  ;;  %v2680_v52 = vadd.f32 %v2679_v1, %v2678_v12  ;;  %v2710_v34 = vrot.slane %v2709_v10, 4 }
 0x2ae   :  { %v16565_v3 = vrot.slane %v12884_v39, %v12878_v18  ;;  %v1584_v40 = vpop.f32.mrf.mxu0  ;;  %v2666_v30 = vadd.f32 %v2665_v4, %v2664_v24  ;;  %v2687_v16 = vadd.f32 %v2686_v36, %v2685_v13  ;;  %v2690_v20 = vadd.f32 %v2689_v35, %v2688_v48 }
 0x2af   :  { %v2558_v43 = vmax.f32 %v2494_v55, 0.0  ;;  %v3200_v56 = vunpack.c.l.b16 %v3064_v0  ;;  %v2696_v25 = vrot.slane %v2695_v29, 4  ;;  %v2495_v60 = vadd.f32 %v11348_v51, %v13084_v63 }
 0x2b0   :  { %v2492_v14 = vadd.f32 %v16565_v3, %v1565_v49  ;;  %v13369_v53 = vpop.f32.mrf.mxu0  ;;  %v3067_v37 = vpack.c.bf16 %v2659_v11, %v2659_v11  ;;  %v2672_v5 = vrot.slane %v2671_v6, 1  ;;  %v2705_v61 = vrot.slane %v2704_v58, 2 }
 0x2b1   :  { %v2730_v12 = vsel %vm1229_vm6, %v2558_v43, 0.0  ;;  %v3065_v17 = vpack.c.bf16 %v2645_v23, %v2645_v23  ;;  %v2711_v39 = vadd.f32 %v2710_v34, %v2709_v10  ;;  %v3070_v48 = vpack.c.bf16 %v2680_v52, %v2680_v52 }
 0x2b2   :  { %v2556_v46 = vmax.f32 %v2492_v14, 0.0  ;;  %v2731_v49 = vrot.slane %v2730_v12, 4  ;;  %v13373_v13 = vpop.f32.mrf.mxu0  ;;  %v3068_v9 = vpack.c.bf16 %v2666_v30, %v2666_v30  ;;  %v3071_v15 = vpack.c.bf16 %v2687_v16, %v2687_v16 }
 0x2b3   :  { %v2691_v1 = vrot.slane %v2690_v20, 2  ;;  %v13375_v4 = vunpack.c.l.b16 %v3066_v41  ;;  %v2697_v63 = vadd.f32 %v2696_v25, %v2695_v29  ;;  %v2559_v36 = vmax.f32 %v2495_v60, 0.0 }
 0x2b4   :  { %v2716_v24 = vsel %vm1229_vm6, %v2556_v46, 0.0  ;;  %v13377_v35 = vpop.f32.mrf.mxu0  ;;  %v13380_v0 = vsel %vm3266_vm12, %v3200_v56, %v3265_v57  ;;  %v13382_v10 = vunpack.c.l.b16 %v3067_v37  ;;  %v2673_v11 = vadd.f32 %v2672_v5, %v2671_v6 }
 0x2b5   :  { %v2717_v51 = vrot.slane %v2716_v24, 4  ;;  %v2706_v55 = vadd.f32 %v2705_v61, %v2704_v58  ;;  %v13384_v23 = vunpack.c.l.b16 %v3065_v17  ;;  %v2712_v52 = vrot.slane %v2711_v39, 2 }
 0x2b6   :  { %v2732_v34 = vadd.f32 %v2731_v49, %v2730_v12  ;;  %v2737_v16 = vsel %vm1229_vm6, %v2559_v36, 0.0  ;;  %v13387_v41 = vpop.f32.mrf.mxu0  ;;  %v13389_v29 = vunpack.c.l.b16 %v3070_v48  ;;  %v3204_v3 = vunpack.c.l.b16 %v3068_v9 }
 0x2b7   :  { %v13391_v14 = vunpack.c.l.b16 %v3071_v15  ;;  %v2692_v30 = vadd.f32 %v2691_v1, %v2690_v20  ;;  %v2698_v57 = vrot.slane %v2697_v63, 2  ;;  %v2718_v43 = vadd.f32 %v2717_v51, %v2716_v24 }
 0x2b8   :  { %v2738_v56 = vrot.slane %v2737_v16, 4  ;;  %v16566_v6 = vrot.slane %v13002_v50, %v12878_v18  ;;  %v13397_v25 = vpop.f32.mrf.mxu0  ;;  %v3069_v46 = vpack.c.bf16 %v2673_v11, %v2673_v11  ;;  %v2707_v60 = vrot.slane %v2706_v55, 1 }
 0x2b9   :  { %v2498_v37 = vadd.f32 %v13354_v22, %v13091_v31  ;;  %v16567_v5 = vrot.slane %v13012_v54, %v12878_v18  ;;  %v2713_v61 = vadd.f32 %v2712_v52, %v2711_v39  ;;  %v2733_v12 = vrot.slane %v2732_v34, 2 }
 0x2ba   :  { %v2493_v58 = vadd.f32 %v16566_v6, %v13348_v33  ;;  %v2739_v17 = vadd.f32 %v2738_v56, %v2737_v16  ;;  %v13405_v24 = vpop.f32.mrf.mxu0  ;;  %v2693_v50 = vrot.slane %v2692_v30, 1  ;;  %v2499_v9 = vadd.f32 %v13361_v47, %v13124_v7 }
 0x2bb   :  { %v2496_v20 = vadd.f32 %v16567_v5, %v13357_v27  ;;  %v2562_v33 = vmax.f32 %v2498_v37, 0.0  ;;  %v2699_v15 = vadd.f32 %v2698_v57, %v2697_v63  ;;  %v2719_v1 = vrot.slane %v2718_v43, 2 }
 0x2bc   :  { %v2557_v49 = vmax.f32 %v2493_v58, 0.0  ;;  %v16568_v54 = vrot.slane %v13044_v62, %v12878_v18  ;;  %v13413_v27 = vpop.f32.mrf.mxu0  ;;  %v3205_v39 = vunpack.c.l.b16 %v3069_v46  ;;  %v2734_v52 = vadd.f32 %v2733_v12, %v2732_v34 }
 0x2bd   :  { %v2560_v48 = vmax.f32 %v2496_v20, 0.0  ;;  %v2758_v36 = vsel %vm1229_vm6, %v2562_v33, 0.0  ;;  %v2740_v16 = vrot.slane %v2739_v17, 2  ;;  %v2708_v63 = vadd.f32 %v2707_v60, %v2706_v55 }
 0x2be   :  { %v2723_v31 = vsel %vm1229_vm6, %v2557_v49, 0.0  ;;  %v2497_v22 = vadd.f32 %v16568_v54, %v1584_v40  ;;  %v2759_v56 = vrot.slane %v2758_v36, 4  ;;  %v13417_v47 = vpop.f32.mrf.mxu0  ;;  %v2563_v6 = vmax.f32 %v2499_v9, 0.0 }
 0x2bf   :  { %v2724_v51 = vrot.slane %v2723_v31, 4  ;;  %v2744_v11 = vsel %vm1229_vm6, %v2560_v48, 0.0  ;;  %v2694_v62 = vadd.f32 %v2693_v50, %v2692_v30  ;;  %v2714_v40 = vrot.slane %v2713_v61, 1 }
 0x2c0   :  { %v2745_v7 = vrot.slane %v2744_v11, 4  ;;  %v2561_v58 = vmax.f32 %v2497_v22, 0.0  ;;  %v2720_v37 = vadd.f32 %v2719_v1, %v2718_v43  ;;  %v13419_v46 = vpop.f32.mrf.mxu0  ;;  %v2700_v20 = vrot.slane %v2699_v15, 1 }
 0x2c1   :  { %v2725_v57 = vadd.f32 %v2724_v51, %v2723_v31  ;;  %v2765_v33 = vsel %vm1229_vm6, %v2563_v6, 0.0  ;;  %v3274_v12 = vsel %vm3260_vm9, %v3205_v39, %v3204_v3  ;;  %v2735_v48 = vrot.slane %v2734_v52, 1 }
 0x2c2   :  { %v2746_v5 = vadd.f32 %v2745_v7, %v2744_v11  ;;  %v2751_v34 = vsel %vm1229_vm6, %v2561_v58, 0.0  ;;  %v2741_v54 = vadd.f32 %v2740_v16, %v2739_v17  ;;  %v2760_v55 = vadd.f32 %v2759_v56, %v2758_v36  ;;  %v13424_v60 = vpop.f32.mrf.mxu0 }
 0x2c3   :  { %v2726_v49 = vrot.slane %v2725_v57, 2  ;;  %v2752_v30 = vrot.slane %v2751_v34, 4  ;;  %v2502_v43 = vadd.f32 %v13369_v53, %v13113_v44  ;;  %v16569_v50 = vrot.slane %v12905_v26, %v12878_v18 }
 0x2c4   :  { %v2715_v31 = vadd.f32 %v2714_v40, %v2713_v61  ;;  %v2721_v22 = vrot.slane %v2720_v37, 1  ;;  %v2747_v51 = vrot.slane %v2746_v5, 2  ;;  %v2766_v11 = vrot.slane %v2765_v33, 4  ;;  %v13432_v3 = vpop.f32.mrf.mxu0 }
 0x2c5   :  { %v2727_v9 = vadd.f32 %v2726_v49, %v2725_v57  ;;  %v2500_v1 = vadd.f32 %v16569_v50, %v13373_v13  ;;  %v3074_v17 = vpack.c.bf16 %v2708_v63, %v2708_v63  ;;  %v3072_v39 = vpack.c.bf16 %v2694_v62, %v2694_v62 }
 0x2c6   :  { %v3275_v56 = vsel %vm3262_vm10, %v13389_v29, %v3274_v12  ;;  %v2701_v7 = vadd.f32 %v2700_v20, %v2699_v15  ;;  %v2753_v44 = vadd.f32 %v2752_v30, %v2751_v34  ;;  %v2566_v53 = vmax.f32 %v2502_v43, 0.0  ;;  %v13436_v57 = vpop.f32.mrf.mxu0 }
 0x2c7   :  { %v2728_v36 = vrot.slane %v2727_v9, 1  ;;  %v2564_v16 = vmax.f32 %v2500_v1, 0.0  ;;  %v2736_v26 = vadd.f32 %v2735_v48, %v2734_v52  ;;  %v2742_v13 = vrot.slane %v2741_v54, 1 }
 0x2c8   :  { %v2761_v61 = vrot.slane %v2760_v55, 2  ;;  %v3075_v58 = vpack.c.bf16 %v2715_v31, %v2715_v31  ;;  %v2722_v40 = vadd.f32 %v2721_v22, %v2720_v37  ;;  %v2748_v63 = vadd.f32 %v2747_v51, %v2746_v5  ;;  %v13439_v49 = vpop.f32.mrf.mxu0 }
 0x2c9   :  { %v2772_v6 = vsel %vm1229_vm6, %v2564_v16, 0.0  ;;  %v2767_v62 = vadd.f32 %v2766_v11, %v2765_v33  ;;  %v3208_v50 = vunpack.c.l.b16 %v3072_v39  ;;  %v3276_v29 = vsel %vm3264_vm11, %v13391_v14, %v3275_v56 }
 0x2ca   :  { %v2729_v15 = vadd.f32 %v2728_v36, %v2727_v9  ;;  %v2503_v20 = vadd.f32 %v13377_v35, %v13146_v38  ;;  %v3073_v52 = vpack.c.bf16 %v2701_v7, %v2701_v7  ;;  %v2754_v34 = vrot.slane %v2753_v44, 2  ;;  %v13446_v14 = vpop.f32.mrf.mxu0 }
 0x2cb   :  { %v2786_v12 = vsel %vm1229_vm6, %v2566_v53, 0.0  ;;  %v2773_v48 = vrot.slane %v2772_v6, 4  ;;  %v3078_v30 = vpack.c.bf16 %v2736_v26, %v2736_v26  ;;  %v2743_v37 = vadd.f32 %v2742_v13, %v2741_v54 }
 0x2cc   :  { %v2762_v5 = vadd.f32 %v2761_v61, %v2760_v55  ;;  %v2567_v33 = vmax.f32 %v2503_v20, 0.0  ;;  %v3210_v43 = vunpack.c.l.b16 %v3074_v17  ;;  %v3076_v1 = vpack.c.bf16 %v2722_v40, %v2722_v40 }
 0x2cd   :  { %v2749_v31 = vrot.slane %v2748_v63, 1  ;;  %v2768_v22 = vrot.slane %v2767_v62, 2  ;;  %v3211_v9 = vunpack.c.l.b16 %v3075_v58  ;;  %v3077_v51 = vpack.c.bf16 %v2729_v15, %v2729_v15  ;;  %v13460_v58 = vpop.f32.mrf.mxu0 }
 0x2ce   :  { %v2787_v38 = vrot.slane %v2786_v12, 4  ;;  %v2793_v35 = vsel %vm1229_vm6, %v2567_v33, 0.0  ;;  %v3277_v11 = vsel %vm3266_vm12, %v3208_v50, %v3276_v29  ;;  %v3209_v39 = vunpack.c.l.b16 %v3073_v52 }
 0x2cf   :  { %v2755_v36 = vadd.f32 %v2754_v34, %v2753_v44  ;;  %v2774_v16 = vadd.f32 %v2773_v48, %v2772_v6  ;;  %v13450_v54 = vunpack.c.l.b16 %v3078_v30  ;;  %v3079_v55 = vpack.c.bf16 %v2743_v37, %v2743_v37  ;;  %v13476_v48 = vpop.f32.mrf.mxu0 }
 0x2d0   :  { %v2763_v17 = vrot.slane %v2762_v5, 1  ;;  %v16570_v56 = vrot.slane %v13060_v19, %v12878_v18  ;;  %v3212_v53 = vunpack.c.l.b16 %v3076_v1  ;;  %v13456_v26 = vadd.f32 %v2749_v31, %v2748_v63 }
 0x2d1   :  { %v13458_v13 = vadd.f32 %v2768_v22, %v2767_v62  ;;  %v2794_v61 = vrot.slane %v2793_v35, 4  ;;  %v3213_v40 = vunpack.c.l.b16 %v3077_v51  ;;  %v2788_v44 = vadd.f32 %v2787_v38, %v2786_v12 }
 0x2d2   :  { %v2501_v7 = vadd.f32 %v16570_v56, %v13387_v41  ;;  %v2506_v50 = vadd.f32 %v13397_v25, %v13149_v8  ;;  %v2756_v29 = vrot.slane %v2755_v36, 1  ;;  %v2775_v15 = vrot.slane %v2774_v16, 2 }
 0x2d3   :  { %v3269_v19 = vsel %vm3268_vm13, %v13384_v23, %v13380_v0  ;;  %v3278_v41 = vsel %vm3268_vm13, %v3209_v39, %v3277_v11  ;;  %v13468_v63 = vunpack.c.l.b16 %v3079_v55  ;;  %v13470_v62 = vadd.f32 %v2763_v17, %v2762_v5  ;;  %v13481_v0 = vld [vmem:[%s16280_s10 + $0x18] sm:$0xff]  }
 0x2d4   :  { %v2565_v6 = vmax.f32 %v2501_v7, 0.0  ;;  %v2570_v52 = vmax.f32 %v2506_v50, 0.0  ;;  %v3080_v34 = vpack.c.bf16 %v13456_v26, %v13456_v26  ;;  %v2770_v8 = vrot.slane %v13458_v13, 1  ;;  %11409 = vmatprep.subr.bf16.mxu1 %v13481_v0 }
 0x2d5   :  { %v2795_v25 = vadd.f32 %v2794_v61, %v2793_v35  ;;  %v2789_v23 = vrot.slane %v2788_v44, 2  ;;  %v3271_v37 = vsel %vm3270_vm14, %v13375_v4, %v3269_v19  ;;  %v3279_v5 = vsel %vm3270_vm14, %v3210_v43, %v3278_v41 }
 0x2d6   :  { %v2779_v20 = vsel %vm1229_vm6, %v2565_v6, 0.0  ;;  %v2814_v30 = vsel %vm1229_vm6, %v2570_v52, 0.0  ;;  %v3281_v33 = vsel %vm3260_vm9, %v3213_v40, %v3212_v53  ;;  %v2776_v1 = vadd.f32 %v2775_v15, %v2774_v16  ;;  %v13496_v16 = vpop.f32.mrf.mxu0 }
 0x2d7   :  { %v2780_v12 = vrot.slane %v2779_v20, 4  ;;  %v2815_v22 = vrot.slane %v2814_v30, 4  ;;  %v2757_v51 = vadd.f32 %v2756_v29, %v2755_v36  ;;  %v3273_v38 = vsel %vm3272_vm15, %v13382_v10, %v3271_v37 }
 0x2d8   :  { %v3280_v35 = vsel %vm3272_vm15, %v3211_v9, %v3279_v5  ;;  %v16571_v11 = vrot.slane %v13064_v28, %v12878_v18  ;;  %v2796_v39 = vrot.slane %v2795_v25, 2  ;;  %v2507_v36 = vadd.f32 %v13413_v27, %v13156_v32 }
 0x2d9   :  { %v2781_v31 = vadd.f32 %v2780_v12, %v2779_v20  ;;  %v2816_v55 = vadd.f32 %v2815_v22, %v2814_v30  ;;  %v3323_v17 = vpack.c.b16 %v3280_v35, %v3273_v38  ;;  %v16572_v10 = vrot.slane %v13075_v42, %v12878_v18 }
 0x2da   :  { %v2504_v4 = vadd.f32 %v16571_v11, %v13405_v24  ;;  %v2510_v7 = vadd.f32 %v13419_v46, %v13133_v2  ;;  %v2790_v28 = vadd.f32 %v2789_v23, %v2788_v44  ;;  %v2777_v24 = vrot.slane %v2776_v1, 1  ;;  %v13514_v44 = vpop.f32.mrf.mxu0 }
 0x2db   :  { %v2782_v43 = vrot.slane %v2781_v31, 2  ;;  %v2505_v9 = vadd.f32 %v16572_v10, %v13417_v47  ;;  %11401 = vmatprep.mubr.msk.bf16.mxu1 %vm1229_vm6, %v3323_v17  ;;  %v16573_v26 = vrot.slane %v12958_v59, %v12878_v18  ;;  %v2571_v27 = vmax.f32 %v2507_v36, 0.0 }
 0x2dc   :  { %v2568_v56 = vmax.f32 %v2504_v4, 0.0  ;;  %v2574_v6 = vmax.f32 %v2510_v7, 0.0  ;;  %v3082_v42 = vpack.c.bf16 %v13470_v62, %v13470_v62  ;;  %v2797_v47 = vadd.f32 %v2796_v39, %v2795_v25 }
 0x2dd   :  { %v2783_v53 = vadd.f32 %v2782_v43, %v2781_v31  ;;  %v2508_v61 = vadd.f32 %v16573_v26, %v13424_v60  ;;  %v2569_v40 = vmax.f32 %v2505_v9, 0.0  ;;  %v2817_v50 = vrot.slane %v2816_v55, 2  ;;  %v13524_v31 = vpop.f32.mrf.mxu0 }
 0x2de   :  { %v2800_v32 = vsel %vm1229_vm6, %v2568_v56, 0.0  ;;  %v2821_v29 = vsel %vm1229_vm6, %v2571_v27, 0.0  ;;  %v3282_v60 = vsel %vm3262_vm10, %v13450_v54, %v3281_v33  ;;  %v3216_v19 = vunpack.c.l.b16 %v3080_v34 }
 0x2df   :  { %v2784_v2 = vrot.slane %v2783_v53, 1  ;;  %v2801_v46 = vrot.slane %v2800_v32, 4  ;;  %v2807_v15 = vsel %vm1229_vm6, %v2569_v40, 0.0  ;;  %v2572_v59 = vmax.f32 %v2508_v61, 0.0  ;;  %v13530_v17 = vpop.f32.mrf.mxu0 }
 0x2e0   :  { %v3081_v41 = vpack.c.bf16 %v2757_v51, %v2757_v51  ;;  %v2791_v52 = vrot.slane %v2790_v28, 1  ;;  %v2778_v12 = vadd.f32 %v2777_v24, %v2776_v1  ;;  %v2808_v62 = vrot.slane %v2807_v15, 4 }
 0x2e1   :  { %v2785_v20 = vadd.f32 %v2784_v2, %v2783_v53  ;;  %v2511_v25 = vadd.f32 %v13432_v3, %v13177_v21  ;;  %v2771_v23 = vadd.f32 %v2770_v8, %v13458_v13  ;;  %v2802_v30 = vadd.f32 %v2801_v46, %v2800_v32  ;;  %v13540_v2 = vpop.f32.mrf.mxu0 }
 0x2e2   :  { %v2822_v37 = vrot.slane %v2821_v29, 4  ;;  %v2842_v5 = vsel %vm1229_vm6, %v2574_v6, 0.0  ;;  %v2798_v22 = vrot.slane %v2797_v47, 1  ;;  %v2818_v38 = vadd.f32 %v2817_v50, %v2816_v55 }
 0x2e3   :  { %v2828_v54 = vsel %vm1229_vm6, %v2572_v59, 0.0  ;;  %v2575_v34 = vmax.f32 %v2511_v25, 0.0  ;;  %v3283_v33 = vsel %vm3264_vm11, %v13468_v63, %v3282_v60  ;;  %v3217_v1 = vunpack.c.l.b16 %v3081_v41 }
 0x2e4   :  { %v3085_v51 = vpack.c.bf16 %v2785_v20, %v2785_v20  ;;  %v2809_v35 = vadd.f32 %v2808_v62, %v2807_v15  ;;  %v2792_v21 = vadd.f32 %v2791_v52, %v2790_v28  ;;  %v3084_v3 = vpack.c.bf16 %v2778_v12, %v2778_v12 }
 0x2e5   :  { %v2843_v13 = vrot.slane %v2842_v5, 4  ;;  %v2849_v8 = vsel %vm1229_vm6, %v2575_v34, 0.0  ;;  %v3218_v11 = vunpack.c.l.b16 %v3082_v42  ;;  %v2803_v4 = vrot.slane %v2802_v30, 2  ;;  %v16575_v42 = vld [vmem:[#allocation56_spill] sm:$0xff] }
 0x2e6   :  { %v2823_v39 = vadd.f32 %v2822_v37, %v2821_v29  ;;  %v2829_v43 = vrot.slane %v2828_v54, 4  ;;  %v3284_v55 = vsel %vm3266_vm12, %v3216_v19, %v3283_v33  ;;  %v3083_v56 = vpack.c.bf16 %v2771_v23, %v2771_v23  ;;  %v13551_v23 = vpop.f32.mrf.mxu0  ;;  %v16576_v33 = vld [vmem:[#allocation50_spill] sm:$0xff] }
 0x2e7   :  { %v2799_v36 = vadd.f32 %v2798_v22, %v2797_v47  ;;  %v2819_v10 = vrot.slane %v2818_v38, 1  ;;  %v3285_v63 = vsel %vm3268_vm13, %v3217_v1, %v3284_v55  ;;  %v3221_v9 = vunpack.c.l.b16 %v3085_v51 }
 0x2e8   :  { %v2810_v7 = vrot.slane %v2809_v35, 2  ;;  %v2850_v28 = vrot.slane %v2849_v8, 4  ;;  %v3086_v24 = vpack.c.bf16 %v2792_v21, %v2792_v21  ;;  %v3220_v53 = vunpack.c.l.b16 %v3084_v3  ;;  %v16578_v3 = vld [vmem:[#allocation57_spill] sm:$0xff] }
 0x2e9   :  { %v2844_v26 = vadd.f32 %v2843_v13, %v2842_v5  ;;  %v16574_v61 = vrot.slane %v13098_v45, %v12878_v18  ;;  %v2804_v27 = vadd.f32 %v2803_v4, %v2802_v30  ;;  %v2824_v40 = vrot.slane %v2823_v39, 2 }
 0x2ea   :  { %v2830_v6 = vadd.f32 %v2829_v43, %v2828_v54  ;;  %v2514_v47 = vadd.f32 %v13439_v49, %v16575_v42  ;;  %v13542_v46 = vunpack.c.l.b16 %v3083_v56  ;;  %v3087_v50 = vpack.c.bf16 %v2799_v36, %v2799_v36  ;;  %v13567_v36 = vpop.f32.mrf.mxu0 }
 0x2eb   :  { %v2509_v32 = vadd.f32 %v16574_v61, %v13436_v57  ;;  %v13544_v29 = vadd.f32 %v2819_v10, %v2818_v38  ;;  %v3288_v59 = vsel %vm3260_vm9, %v3221_v9, %v3220_v53  ;;  %v2811_v60 = vadd.f32 %v2810_v7, %v2809_v35  ;;  %v16582_v53 = vld [vmem:[#allocation49_spill] sm:$0xff] }
 0x2ec   :  { %v2851_v19 = vadd.f32 %v2850_v28, %v2849_v8  ;;  %v2578_v45 = vmax.f32 %v2514_v47, 0.0  ;;  %v13548_v57 = vsel %vm3270_vm14, %v3218_v11, %v3285_v63  ;;  %v3222_v41 = vunpack.c.l.b16 %v3086_v24  ;;  %v16579_v8 = vld [vmem:[#allocation51_spill] sm:$0xff] }
 0x2ed   :  { %v2573_v15 = vmax.f32 %v2509_v32, 0.0  ;;  %v2845_v20 = vrot.slane %v2844_v26, 2  ;;  %v2805_v52 = vrot.slane %v2804_v27, 1  ;;  %v2825_v12 = vadd.f32 %v2824_v40, %v2823_v39 }
 0x2ee   :  { %v2831_v62 = vrot.slane %v2830_v6, 2  ;;  %v3223_v30 = vunpack.c.l.b16 %v3087_v50  ;;  %v3289_v37 = vsel %vm3262_vm10, %v3222_v41, %v3288_v59  ;;  %v3090_v5 = vpack.c.bf16 %v13544_v29, %v13544_v29 }
 0x2ef   :  { %v2835_v49 = vsel %vm1229_vm6, %v2573_v15, 0.0  ;;  %v2870_v22 = vsel %vm1229_vm6, %v2578_v45, 0.0  ;;  %v2812_v38 = vrot.slane %v2811_v60, 1  ;;  %v2852_v54 = vrot.slane %v2851_v19, 2 }
 0x2f0   :  { %v2836_v25 = vrot.slane %v2835_v49, 4  ;;  %v16577_v1 = vrot.slane %v16576_v33, %v12878_v18  ;;  %v2846_v35 = vadd.f32 %v2845_v20, %v2844_v26  ;;  %v2871_v21 = vrot.slane %v2870_v22, 4 }
 0x2f1   :  { %v2515_v13 = vadd.f32 %v13460_v58, %v16578_v3  ;;  %v16580_v11 = vrot.slane %v16579_v8, %v12878_v18  ;;  %v2806_v39 = vadd.f32 %v2805_v52, %v2804_v27  ;;  %v2826_v43 = vrot.slane %v2825_v12, 1 }
 0x2f2   :  { %v2837_v34 = vadd.f32 %v2836_v25, %v2835_v49  ;;  %v2512_v51 = vadd.f32 %v16577_v1, %v13446_v14  ;;  %v2832_v55 = vadd.f32 %v2831_v62, %v2830_v6  ;;  %v16581_v14 = vld [vmem:[#allocation54_spill] sm:$0xff]  ;;  %v2813_v28 = vadd.f32 %v2812_v38, %v2811_v60 }
 0x2f3   :  { %v2513_v4 = vadd.f32 %v16580_v11, %v13476_v48  ;;  %v2579_v63 = vmax.f32 %v2515_v13, 0.0  ;;  %v2518_v7 = vadd.f32 %v13496_v16, %v16581_v14  ;;  %v2853_v24 = vadd.f32 %v2852_v54, %v2851_v19  ;;  %v13578_v16 = vpop.f32.mrf.mxu0  ;;  %v16584_v62 = vld [vmem:[#allocation58_spill] sm:$0xff] }
 0x2f4   :  { %v2838_v56 = vrot.slane %v2837_v34, 2  ;;  %v2576_v10 = vmax.f32 %v2512_v51, 0.0  ;;  %v16583_v26 = vrot.slane %v16582_v53, %v12878_v18  ;;  %v2872_v61 = vadd.f32 %v2871_v21, %v2870_v22 }
 0x2f5   :  { %v2577_v9 = vmax.f32 %v2513_v4, 0.0  ;;  %v2877_v27 = vsel %vm1229_vm6, %v2579_v63, 0.0  ;;  %v2582_v40 = vmax.f32 %v2518_v7, 0.0  ;;  %v2847_v6 = vrot.slane %v2846_v35, 1  ;;  %v13584_v33 = vpop.f32.mrf.mxu0 }
 0x2f6   :  { %v2839_v58 = vadd.f32 %v2838_v56, %v2837_v34  ;;  %v2516_v48 = vadd.f32 %v16583_v26, %v13514_v44  ;;  %v2856_v32 = vsel %vm1229_vm6, %v2576_v10, 0.0  ;;  %v3088_v29 = vpack.c.bf16 %v2806_v39, %v2806_v39 }
 0x2f7   :  { %v2857_v47 = vrot.slane %v2856_v32, 4  ;;  %v2863_v50 = vsel %vm1229_vm6, %v2577_v9, 0.0  ;;  %v2833_v15 = vrot.slane %v2832_v55, 1  ;;  %v2878_v59 = vrot.slane %v2877_v27, 4  ;;  %v1693_v63 = vpop.f32.mrf.mxu0 }
 0x2f8   :  { %v2840_v42 = vrot.slane %v2839_v58, 1  ;;  %v2898_v60 = vsel %vm1229_vm6, %v2582_v40, 0.0  ;;  %v2827_v19 = vadd.f32 %v2826_v43, %v2825_v12  ;;  %v3089_v44 = vpack.c.bf16 %v2813_v28, %v2813_v28 }
 0x2f9   :  { %v2854_v45 = vrot.slane %v2853_v24, 1  ;;  %v2580_v41 = vmax.f32 %v2516_v48, 0.0  ;;  %v2873_v49 = vrot.slane %v2872_v61, 2  ;;  %v2864_v52 = vrot.slane %v2863_v50, 4 }
 0x2fa   :  { %v2841_v20 = vadd.f32 %v2840_v42, %v2839_v58  ;;  %v2519_v25 = vadd.f32 %v13524_v31, %v16584_v62  ;;  %v3290_v22 = vsel %vm3264_vm11, %v3223_v30, %v3289_v37  ;;  %v2858_v38 = vadd.f32 %v2857_v47, %v2856_v32  ;;  %v16587_v42 = vld [vmem:[#allocation62_spill] sm:$0xff] }
 0x2fb   :  { %v2879_v54 = vadd.f32 %v2878_v59, %v2877_v27  ;;  %v2899_v34 = vrot.slane %v2898_v60, 4  ;;  %v3224_v1 = vunpack.c.l.b16 %v3088_v29  ;;  %v2848_v51 = vadd.f32 %v2847_v6, %v2846_v35 }
 0x2fc   :  { %v2834_v21 = vadd.f32 %v2833_v15, %v2832_v55  ;;  %v2583_v12 = vmax.f32 %v2519_v25, 0.0  ;;  %v3091_v3 = vpack.c.bf16 %v2827_v19, %v2827_v19  ;;  %v3225_v13 = vunpack.c.l.b16 %v3089_v44 }
 0x2fd   :  { %v2855_v8 = vadd.f32 %v2854_v45, %v2853_v24  ;;  %v2884_v11 = vsel %vm1229_vm6, %v2580_v41, 0.0  ;;  %v3093_v4 = vpack.c.bf16 %v2841_v20, %v2841_v20  ;;  %v2874_v39 = vadd.f32 %v2873_v49, %v2872_v61  ;;  %v16585_v61 = vld [vmem:[#allocation52_spill] sm:$0xff] }
 0x2fe   :  { %v2865_v43 = vadd.f32 %v2864_v52, %v2863_v50  ;;  %v2905_v31 = vsel %vm1229_vm6, %v2583_v12, 0.0  ;;  %v3226_v30 = vunpack.c.l.b16 %v3090_v5  ;;  %v2859_v37 = vrot.slane %v2858_v38, 2  ;;  %v13596_v50 = vpop.f32.mrf.mxu0 }
 0x2ff   :  { %v2880_v56 = vrot.slane %v2879_v54, 2  ;;  %v2900_v10 = vadd.f32 %v2899_v34, %v2898_v60  ;;  %v3291_v9 = vsel %vm3266_vm12, %v3224_v1, %v3290_v22  ;;  %v3094_v35 = vpack.c.bf16 %v2848_v51, %v2848_v51 }
 0x300   :  { %v3092_v55 = vpack.c.bf16 %v2834_v21, %v2834_v21  ;;  %v2885_v14 = vrot.slane %v2884_v11, 4  ;;  %v3227_v7 = vunpack.c.l.b16 %v3091_v3  ;;  %v3292_v28 = vsel %vm3268_vm13, %v3225_v13, %v3291_v9  ;;  %v16593_v9 = vld [vmem:[#allocation59_spill] sm:$0xff] }
 0x301   :  { %v3095_v24 = vpack.c.bf16 %v2855_v8, %v2855_v8  ;;  %v2906_v58 = vrot.slane %v2905_v31, 4  ;;  %v3229_v53 = vunpack.c.l.b16 %v3093_v4  ;;  %v2875_v26 = vrot.slane %v2874_v39, 1 }
 0x302   :  { %v2866_v48 = vrot.slane %v2865_v43, 2  ;;  %v16586_v5 = vrot.slane %v16585_v61, %v12878_v18  ;;  %v2860_v27 = vadd.f32 %v2859_v37, %v2858_v38  ;;  %v2881_v40 = vadd.f32 %v2880_v56, %v2879_v54  ;;  %v13605_v38 = vpop.f32.mrf.mxu0 }
 0x303   :  { %v2901_v6 = vrot.slane %v2900_v10, 2  ;;  %v2522_v47 = vadd.f32 %v13540_v2, %v16587_v42  ;;  %v3230_v29 = vunpack.c.l.b16 %v3094_v35  ;;  %v3228_v15 = vunpack.c.l.b16 %v3092_v55 }
 0x304   :  { %v2517_v32 = vadd.f32 %v16586_v5, %v13530_v17  ;;  %v2886_v59 = vadd.f32 %v2885_v14, %v2884_v11  ;;  %v3293_v19 = vsel %vm3270_vm14, %v3226_v30, %v3292_v28  ;;  %v13599_v44 = vunpack.c.l.b16 %v3095_v24  ;;  %v16588_v11 = vld [vmem:[#allocation53_spill] sm:$0xff]  ;;  %v16591_v30 = vld [vmem:[#allocation55_spill] sm:$0xff]  ;;  %v13625_v55 = vpop.f32.mrf.mxu0 }
 0x305   :  { %v2907_v45 = vadd.f32 %v2906_v58, %v2905_v31  ;;  %v2586_v41 = vmax.f32 %v2522_v47, 0.0  ;;  %v3295_v17 = vsel %vm3260_vm9, %v3229_v53, %v3228_v15  ;;  %v13602_v20 = vadd.f32 %v2875_v26, %v2874_v39  ;;  %v16594_v28 = vld [vmem:[#allocation47_spill] sm:$0xff] }
 0x306   :  { %v2581_v60 = vmax.f32 %v2517_v32, 0.0  ;;  %v2867_v49 = vadd.f32 %v2866_v48, %v2865_v43  ;;  %v2861_v2 = vrot.slane %v2860_v27, 1  ;;  %v2882_v62 = vrot.slane %v2881_v40, 1  ;;  %v16590_v43 = vld [vmem:[#allocation63_spill] sm:$0xff]  ;;  %v13634_v47 = vpop.f32.mrf.mxu0 }
 0x307   :  { %v2902_v25 = vadd.f32 %v2901_v6, %v2900_v10  ;;  %v2887_v54 = vrot.slane %v2886_v59, 2  ;;  %v2926_v34 = vsel %vm1229_vm6, %v2586_v41, 0.0  ;;  %v3287_v1 = vsel %vm3272_vm15, %v13542_v46, %v13548_v57 }
 0x308   :  { %v2891_v52 = vsel %vm1229_vm6, %v2581_v60, 0.0  ;;  %v3294_v51 = vsel %vm3272_vm15, %v3227_v7, %v3293_v19  ;;  %v2908_v21 = vrot.slane %v2907_v45, 2  ;;  %v2927_v3 = vrot.slane %v2926_v34, 4 }
 0x309   :  { %v2892_v22 = vrot.slane %v2891_v52, 4  ;;  %v3324_v13 = vpack.c.b16 %v3294_v51, %v3287_v1  ;;  %v2868_v8 = vrot.slane %v2867_v49, 1  ;;  %v16589_v4 = vrot.slane %v16588_v11, %v12878_v18 }
 0x30a   :  { %v2523_v31 = vadd.f32 %v13567_v36, %v16590_v43  ;;  %v16592_v37 = vrot.slane %v16591_v30, %v12878_v18  ;;  %v2862_v57 = vadd.f32 %v2861_v2, %v2860_v27  ;;  %v2928_v10 = vadd.f32 %v2927_v3, %v2926_v34 }
 0x30b   :  { %v2893_v12 = vadd.f32 %v2892_v22, %v2891_v52  ;;  %v2520_v39 = vadd.f32 %v16589_v4, %v13551_v23  ;;  %11402 = vmatmul.mubr.msk.bf16.vlgmr.msra.gmra.mxu1 %vm1229_vm6, %v3324_v13  ;;  %v2526_v35 = vadd.f32 %v13584_v33, %v16593_v9  ;;  %v16595_v36 = vrot.slane %v16594_v28, %v12878_v18 }
 0x30c   :  { %v2521_v46 = vadd.f32 %v16592_v37, %v13578_v16  ;;  %v2587_v23 = vmax.f32 %v2523_v31, 0.0  ;;  %11410 = vmatpush3.bf16.msra.mxu1 %v13481_v0  ;;  %v2888_v16 = vadd.f32 %v2887_v54, %v2886_v59  ;;  %v2909_v58 = vadd.f32 %v2908_v21, %v2907_v45  ;;  %v16596_v54 = vld [vmem:[#allocation68_spill] sm:$0xff] }
 0x30d   :  { %v2894_v56 = vrot.slane %v2893_v12, 2  ;;  %v2584_v14 = vmax.f32 %v2520_v39, 0.0  ;;  %v2524_v24 = vadd.f32 %v16595_v36, %v1693_v63  ;;  %v2590_v26 = vmax.f32 %v2526_v35, 0.0 }
 0x30e   :  { %v2585_v7 = vmax.f32 %v2521_v46, 0.0  ;;  %v2903_v48 = vrot.slane %v2902_v25, 1  ;;  %v2929_v61 = vrot.slane %v2928_v10, 2  ;;  %v2933_v33 = vsel %vm1229_vm6, %v2587_v23, 0.0 }
 0x30f   :  { %v2895_v53 = vadd.f32 %v2894_v56, %v2893_v12  ;;  %v2912_v5 = vsel %vm1229_vm6, %v2584_v14, 0.0  ;;  %v2588_v42 = vmax.f32 %v2524_v24, 0.0  ;;  %v3296_v63 = vsel %vm3262_vm10, %v3230_v29, %v3295_v17  ;;  %v11384_v17 = vpop.f32.mrf.mxu0  ;;  %v16597_v24 = vld [vmem:[#allocation60_spill] sm:$0xff] }
 0x310   :  { %v2913_v27 = vrot.slane %v2912_v5, 4  ;;  %v2919_v6 = vsel %vm1229_vm6, %v2585_v7, 0.0  ;;  %v3098_v0 = vpack.c.bf16 %v13602_v20, %v13602_v20  ;;  %v2883_v15 = vadd.f32 %v2882_v62, %v2881_v40 }
 0x311   :  { %v2896_v32 = vrot.slane %v2895_v53, 1  ;;  %v2869_v59 = vadd.f32 %v2868_v8, %v2867_v49  ;;  %v2889_v60 = vrot.slane %v2888_v16, 1  ;;  %v2910_v19 = vrot.slane %v2909_v58, 1  ;;  %v1712_v37 = vpop.f32.mrf.mxu0 }
 0x312   :  { %v2934_v45 = vrot.slane %v2933_v33, 4  ;;  %v2954_v41 = vsel %vm1229_vm6, %v2590_v26, 0.0  ;;  %v3096_v52 = vpack.c.bf16 %v2862_v57, %v2862_v57  ;;  %v2930_v2 = vadd.f32 %v2929_v61, %v2928_v10 }
 0x313   :  { %v2920_v22 = vrot.slane %v2919_v6, 4  ;;  %v2527_v34 = vadd.f32 %v13596_v50, %v16596_v54  ;;  %v2904_v1 = vadd.f32 %v2903_v48, %v2902_v25  ;;  %v2897_v51 = vadd.f32 %v2896_v32, %v2895_v53  ;;  %v16599_v48 = vld [vmem:[#allocation69_spill] sm:$0xff] }
 0x314   :  { %v2914_v21 = vadd.f32 %v2913_v27, %v2912_v5  ;;  %v2940_v29 = vsel %vm1229_vm6, %v2588_v42, 0.0  ;;  %v3099_v20 = vpack.c.bf16 %v2883_v15, %v2883_v15  ;;  %v3097_v40 = vpack.c.bf16 %v2869_v59, %v2869_v59  ;;  %v11387_v5 = vpop.f32.mrf.mxu0 }
 0x315   :  { %v2955_v49 = vrot.slane %v2954_v41, 4  ;;  %v2591_v62 = vmax.f32 %v2527_v34, 0.0  ;;  %v13643_v12 = vunpack.c.l.b16 %v3098_v0  ;;  %v2890_v3 = vadd.f32 %v2889_v60, %v2888_v16  ;;  %v16600_v34 = vld [vmem:[#allocation61_spill] sm:$0xff] }
 0x316   :  { %v2911_v13 = vadd.f32 %v2910_v19, %v2909_v58  ;;  %v2935_v8 = vadd.f32 %v2934_v45, %v2933_v33  ;;  %v2931_v11 = vrot.slane %v2930_v2, 1  ;;  %v2921_v4 = vadd.f32 %v2920_v22, %v2919_v6 }
 0x317   :  { %v2941_v39 = vrot.slane %v2940_v29, 4  ;;  %v2961_v50 = vsel %vm1229_vm6, %v2591_v62, 0.0  ;;  %v3232_v25 = vunpack.c.l.b16 %v3096_v52  ;;  %v3297_v43 = vsel %vm3264_vm11, %v13599_v44, %v3296_v63  ;;  %v16603_v62 = vld [vmem:[#allocation64_spill] sm:$0xff] }
 0x318   :  { %v3101_v31 = vpack.c.bf16 %v2897_v51, %v2897_v51  ;;  %v2915_v30 = vrot.slane %v2914_v21, 2  ;;  %v13648_v46 = vunpack.c.l.b16 %v3099_v20  ;;  %v13650_v57 = vunpack.c.l.b16 %v3097_v40 }
 0x319   :  { %v3102_v56 = vpack.c.bf16 %v2904_v1, %v2904_v1  ;;  %v2956_v10 = vadd.f32 %v2955_v49, %v2954_v41  ;;  %v3100_v9 = vpack.c.bf16 %v2890_v3, %v2890_v3  ;;  %v3103_v35 = vpack.c.bf16 %v2911_v13, %v2911_v13 }
 0x31a   :  { %v2936_v14 = vrot.slane %v2935_v8, 2  ;;  %v2962_v23 = vrot.slane %v2961_v50, 4  ;;  %v2932_v7 = vadd.f32 %v2931_v11, %v2930_v2  ;;  %v2922_v28 = vrot.slane %v2921_v4, 2  ;;  %v1725_v2 = vpop.f32.mrf.mxu0 }
 0x31b   :  { %v2942_v36 = vadd.f32 %v2941_v39, %v2940_v29  ;;  %v16598_v44 = vrot.slane %v16597_v24, %v12878_v18  ;;  %v3237_v58 = vunpack.c.l.b16 %v3101_v31  ;;  %v2916_v53 = vadd.f32 %v2915_v30, %v2914_v21  ;;  %v16602_v21 = vld [vmem:[#allocation71_spill] sm:$0xff] }
 0x31c   :  { %v2963_v26 = vadd.f32 %v2962_v23, %v2961_v50  ;;  %v2530_v61 = vadd.f32 %v13625_v55, %v16599_v48  ;;  %v13659_v33 = vsel %vm3266_vm12, %v3232_v25, %v3297_v43  ;;  %v3238_v32 = vunpack.c.l.b16 %v3102_v56  ;;  %v16606_v50 = vld [vmem:[#allocation48_spill] sm:$0xff] }
 0x31d   :  { %v2525_v16 = vadd.f32 %v16598_v44, %v13605_v38  ;;  %v2957_v27 = vrot.slane %v2956_v10, 2  ;;  %v3236_v42 = vunpack.c.l.b16 %v3100_v9  ;;  %v13661_v63 = vunpack.c.l.b16 %v3103_v35 }
 0x31e   :  { %v2937_v0 = vadd.f32 %v2936_v14, %v2935_v8  ;;  %v2594_v15 = vmax.f32 %v2530_v61, 0.0  ;;  %v3106_v59 = vpack.c.bf16 %v2932_v7, %v2932_v7  ;;  %v2923_v38 = vadd.f32 %v2922_v28, %v2921_v4  ;;  %v16605_v4 = vld [vmem:[#allocation65_spill] sm:$0xff]  ;;  %v11388_v14 = vpop.f32.mrf.mxu0 }
 0x31f   :  { %v2589_v6 = vmax.f32 %v2525_v16, 0.0  ;;  %v2943_v60 = vrot.slane %v2942_v36, 2  ;;  %v3302_v45 = vsel %vm3260_vm9, %v3237_v58, %v3236_v42  ;;  %v2917_v55 = vrot.slane %v2916_v53, 1 }
 0x320   :  { %v2964_v41 = vrot.slane %v2963_v26, 2  ;;  %v2958_v22 = vadd.f32 %v2957_v27, %v2956_v10  ;;  %v2982_v54 = vsel %vm1229_vm6, %v2594_v15, 0.0  ;;  %v16601_v1 = vrot.slane %v16600_v34, %v12878_v18  ;;  %v1728_v15 = vpop.f32.mrf.mxu0 }
 0x321   :  { %v2947_v19 = vsel %vm1229_vm6, %v2589_v6, 0.0  ;;  %v2531_v29 = vadd.f32 %v11384_v17, %v16602_v21  ;;  %v2938_v20 = vrot.slane %v2937_v0, 1  ;;  %v2983_v49 = vrot.slane %v2982_v54, 4 }
 0x322   :  { %v2948_v52 = vrot.slane %v2947_v19, 4  ;;  %v2528_v51 = vadd.f32 %v16601_v1, %v13634_v47  ;;  %v16604_v3 = vrot.slane %v16603_v62, %v12878_v18  ;;  %v2534_v39 = vadd.f32 %v11387_v5, %v16605_v4 }
 0x323   :  { %v2595_v11 = vmax.f32 %v2531_v29, 0.0  ;;  %v16607_v25 = vrot.slane %v16606_v50, %v12878_v18  ;;  %v2944_v31 = vadd.f32 %v2943_v60, %v2942_v36  ;;  %v2965_v30 = vadd.f32 %v2964_v41, %v2963_v26 }
 0x324   :  { %v2949_v40 = vadd.f32 %v2948_v52, %v2947_v19  ;;  %v2529_v13 = vadd.f32 %v16604_v3, %v1712_v37  ;;  %v2592_v8 = vmax.f32 %v2528_v51, 0.0  ;;  %v2984_v17 = vadd.f32 %v2983_v49, %v2982_v54  ;;  %v16608_v19 = vld [vmem:[#allocation72_spill] sm:$0xff]  ;;  %v11391_v49 = vpop.f32.mrf.mxu0 }
 0x325   :  { %v2532_v43 = vadd.f32 %v16607_v25, %v1725_v2  ;;  %v2598_v9 = vmax.f32 %v2534_v39, 0.0  ;;  %v13679_v23 = vunpack.c.l.b16 %v3106_v59  ;;  %v2918_v37 = vadd.f32 %v2917_v55, %v2916_v53 }
 0x326   :  { %v2950_v47 = vrot.slane %v2949_v40, 2  ;;  %v2593_v56 = vmax.f32 %v2529_v13, 0.0  ;;  %v2968_v10 = vsel %vm1229_vm6, %v2592_v8, 0.0  ;;  %v2924_v7 = vrot.slane %v2923_v38, 1 }
 0x327   :  { %v2596_v35 = vmax.f32 %v2532_v43, 0.0  ;;  %v2969_v24 = vrot.slane %v2968_v10, 4  ;;  %v2989_v44 = vsel %vm1229_vm6, %v2595_v11, 0.0  ;;  %v3010_v16 = vsel %vm1229_vm6, %v2598_v9, 0.0 }
 0x328   :  { %v2951_v28 = vadd.f32 %v2950_v47, %v2949_v40  ;;  %v2939_v58 = vadd.f32 %v2938_v20, %v2937_v0  ;;  %v2959_v26 = vrot.slane %v2958_v22, 1  ;;  %v2945_v48 = vrot.slane %v2944_v31, 1  ;;  %v1741_v47 = vpop.f32.mrf.mxu0 }
 0x329   :  { %v2996_v36 = vsel %vm1229_vm6, %v2596_v35, 0.0  ;;  %v2975_v61 = vsel %vm1229_vm6, %v2593_v56, 0.0  ;;  %v2966_v5 = vrot.slane %v2965_v30, 1  ;;  %v2985_v27 = vrot.slane %v2984_v17, 2 }
 0x32a   :  { %v3011_v6 = vrot.slane %v3010_v16, 4  ;;  %v2997_v42 = vrot.slane %v2996_v36, 4  ;;  %v2925_v53 = vadd.f32 %v2924_v7, %v2923_v38  ;;  %v2952_v59 = vrot.slane %v2951_v28, 1 }
 0x32b   :  { %v2990_v60 = vrot.slane %v2989_v44, 4  ;;  %v2535_v55 = vadd.f32 %v11388_v14, %v16608_v19  ;;  %v3303_v41 = vsel %vm3262_vm10, %v3238_v32, %v3302_v45  ;;  %v3104_v52 = vpack.c.bf16 %v2918_v37, %v2918_v37 }
 0x32c   :  { %v2970_v2 = vadd.f32 %v2969_v24, %v2968_v10  ;;  %v2976_v54 = vrot.slane %v2975_v61, 4  ;;  %v2960_v0 = vadd.f32 %v2959_v26, %v2958_v22  ;;  %v3012_v34 = vadd.f32 %v3011_v6, %v3010_v16 }
 0x32d   :  { %v2998_v1 = vadd.f32 %v2997_v42, %v2996_v36  ;;  %v2599_v51 = vmax.f32 %v2535_v55, 0.0  ;;  %v3107_v21 = vpack.c.bf16 %v2939_v58, %v2939_v58  ;;  %v2946_v29 = vadd.f32 %v2945_v48, %v2944_v31  ;;  %v16611_v36 = vld [vmem:[#allocation73_spill] sm:$0xff] }
 0x32e   :  { %v2967_v20 = vadd.f32 %v2966_v5, %v2965_v30  ;;  %v2986_v40 = vadd.f32 %v2985_v27, %v2984_v17  ;;  %v3105_v62 = vpack.c.bf16 %v2925_v53, %v2925_v53  ;;  %v2953_v38 = vadd.f32 %v2952_v59, %v2951_v28  ;;  %v11392_v27 = vpop.f32.mrf.mxu0 }
 0x32f   :  { %v2991_v3 = vadd.f32 %v2990_v60, %v2989_v44  ;;  %v3017_v13 = vsel %vm1229_vm6, %v2599_v51, 0.0  ;;  %v3240_v8 = vunpack.c.l.b16 %v3104_v52  ;;  %v3304_v32 = vsel %vm3264_vm11, %v13661_v63, %v3303_v41  ;;  %v16609_v63 = vld [vmem:[#allocation66_spill] sm:$0xff]  ;;  %v16612_v51 = vld [vmem:[#allocation67_spill] sm:$0xff] }
 0x330   :  { %v2971_v45 = vrot.slane %v2970_v2, 2  ;;  %v2977_v11 = vadd.f32 %v2976_v54, %v2975_v61  ;;  %v3110_v22 = vpack.c.bf16 %v2960_v0, %v2960_v0  ;;  %v3013_v4 = vrot.slane %v3012_v34, 2 }
 0x331   :  { %v2999_v39 = vrot.slane %v2998_v1, 2  ;;  %v3018_v50 = vrot.slane %v3017_v13, 4  ;;  %v3243_v25 = vunpack.c.l.b16 %v3107_v21  ;;  %v3108_v43 = vpack.c.bf16 %v2946_v29, %v2946_v29 }
 0x332   :  { %v3111_v31 = vpack.c.bf16 %v2967_v20, %v2967_v20  ;;  %v2987_v30 = vrot.slane %v2986_v40, 1  ;;  %v3241_v56 = vunpack.c.l.b16 %v3105_v62  ;;  %v3109_v17 = vpack.c.bf16 %v2953_v38, %v2953_v38  ;;  %v1744_v20 = vpop.f32.mrf.mxu0 }
 0x333   :  { %v2992_v10 = vrot.slane %v2991_v3, 2  ;;  %v3019_v9 = vadd.f32 %v3018_v50, %v3017_v13  ;;  %v3305_v35 = vsel %vm3266_vm12, %v3240_v8, %v3304_v32  ;;  %v2972_v14 = vadd.f32 %v2971_v45, %v2970_v2 }
 0x334   :  { %v2978_v37 = vrot.slane %v2977_v11, 2  ;;  %v16610_v7 = vrot.slane %v16609_v63, %v12878_v18  ;;  %v13694_v24 = vunpack.c.l.b16 %v3110_v22  ;;  %v3014_v44 = vadd.f32 %v3013_v4, %v3012_v34 }
 0x335   :  { %v3000_v16 = vadd.f32 %v2999_v39, %v2998_v1  ;;  %v2538_v58 = vadd.f32 %v11391_v49, %v16611_v36  ;;  %v3244_v26 = vunpack.c.l.b16 %v3108_v43  ;;  %v13697_v48 = vunpack.c.l.b16 %v3111_v31 }
 0x336   :  { %v2533_v28 = vadd.f32 %v16610_v7, %v1728_v15  ;;  %v13699_v61 = vadd.f32 %v2987_v30, %v2986_v40  ;;  %v3245_v6 = vunpack.c.l.b16 %v3109_v17  ;;  %v13701_v42 = vadd.f32 %v2992_v10, %v2991_v3 }
 0x337   :  { %v3020_v53 = vrot.slane %v3019_v9, 2  ;;  %v2602_v59 = vmax.f32 %v2538_v58, 0.0  ;;  %v2973_v60 = vrot.slane %v2972_v14, 1  ;;  %v2979_v15 = vadd.f32 %v2978_v37, %v2977_v11  ;;  %v16615_v11 = vld [vmem:[#allocation70_spill] sm:$0xff] }
 0x338   :  { %v2597_v5 = vmax.f32 %v2533_v28, 0.0  ;;  %v3299_v55 = vsel %vm3268_vm13, %v13650_v57, %v13659_v33  ;;  %v3015_v41 = vrot.slane %v3014_v44, 1  ;;  %v3001_v52 = vrot.slane %v3000_v16, 1 }
 0x339   :  { %v3038_v54 = vsel %vm1229_vm6, %v2602_v59, 0.0  ;;  %v3300_v34 = vsel %vm3270_vm14, %v13643_v12, %v3299_v55  ;;  %v3306_v1 = vsel %vm3268_vm13, %v3241_v56, %v3305_v35  ;;  %v16613_v21 = vrot.slane %v16612_v51, %v12878_v18  ;;  %v16614_v12 = vld [vmem:[#allocation74_spill] sm:$0xff] }
 0x33a   :  { %v3003_v19 = vsel %vm1229_vm6, %v2597_v5, 0.0  ;;  %v3039_v0 = vrot.slane %v3038_v54, 4  ;;  %v3021_v40 = vadd.f32 %v3020_v53, %v3019_v9  ;;  %v3301_v57 = vsel %vm3272_vm15, %v13648_v46, %v3300_v34 }
 0x33b   :  { %v3004_v2 = vrot.slane %v3003_v19, 4  ;;  %v2536_v29 = vadd.f32 %v16613_v21, %v1741_v47  ;;  %v3307_v33 = vsel %vm3270_vm14, %v13679_v23, %v3306_v1  ;;  %v2539_v13 = vadd.f32 %v11392_v27, %v16614_v12 }
 0x33c   :  { %v3040_v62 = vadd.f32 %v3039_v0, %v3038_v54  ;;  %v3308_v38 = vsel %vm3272_vm15, %v3243_v25, %v3307_v33  ;;  %v2974_v8 = vadd.f32 %v2973_v60, %v2972_v14  ;;  %v16616_v22 = vrot.slane %v16615_v11, %v12878_v18 }
 0x33d   :  { %v3005_v49 = vadd.f32 %v3004_v2, %v3003_v19  ;;  %v2600_v3 = vmax.f32 %v2536_v29, 0.0  ;;  %v3325_v45 = vpack.c.b16 %v3308_v38, %v3301_v57  ;;  %v2980_v39 = vrot.slane %v2979_v15, 1 }
 0x33e   :  { %v2537_v4 = vadd.f32 %v16616_v22, %v1744_v20  ;;  %v3041_v50 = vrot.slane %v3040_v62, 2  ;;  %v2603_v43 = vmax.f32 %v2539_v13, 0.0  ;;  %v3002_v31 = vadd.f32 %v3001_v52, %v3000_v16 }
 0x33f   :  { %v3006_v32 = vrot.slane %v3005_v49, 2  ;;  %v3024_v46 = vsel %vm1229_vm6, %v2600_v3, 0.0  ;;  %11405 = vmatprep.mubr.msk.bf16.mxu1 %vm1229_vm6, %v3325_v45  ;;  %v3016_v47 = vadd.f32 %v3015_v41, %v3014_v44  ;;  %v3022_v56 = vrot.slane %v3021_v40, 1 }
 0x340   :  { %v3025_v25 = vrot.slane %v3024_v46, 4  ;;  %v2601_v30 = vmax.f32 %v2537_v4, 0.0  ;;  %v3042_v17 = vadd.f32 %v3041_v50, %v3040_v62  ;;  %v3045_v10 = vsel %vm1229_vm6, %v2603_v43, 0.0 }
 0x341   :  { %v3007_v23 = vadd.f32 %v3006_v32, %v3005_v49  ;;  %v3046_v14 = vrot.slane %v3045_v10, 4  ;;  %v3309_v63 = vsel %vm3260_vm9, %v3245_v6, %v3244_v26  ;;  %v2994_v7 = vrot.slane %v13701_v42, 1 }
 0x342   :  { %v3026_v35 = vadd.f32 %v3025_v25, %v3024_v46  ;;  %v3031_v37 = vsel %vm1229_vm6, %v2601_v30, 0.0  ;;  %v2981_v28 = vadd.f32 %v2980_v39, %v2979_v15  ;;  %v3116_v36 = vpack.c.bf16 %v3002_v31, %v3002_v31 }
 0x343   :  { %v3008_v9 = vrot.slane %v3007_v23, 1  ;;  %v3032_v16 = vrot.slane %v3031_v37, 4  ;;  %v3047_v27 = vadd.f32 %v3046_v14, %v3045_v10  ;;  %v3112_v44 = vpack.c.bf16 %v2974_v8, %v2974_v8  ;;  %v11996_v14 = vld [vmem:[%s16280_s10 + $0x8] sm:$0xff]  }
 0x344   :  { %v3027_v5 = vrot.slane %v3026_v35, 2  ;;  %v3118_v53 = vpack.c.bf16 %v3016_v47, %v3016_v47  ;;  %v3023_v59 = vadd.f32 %v3022_v56, %v3021_v40  ;;  %v3043_v55 = vrot.slane %v3042_v17, 1 }
 0x345   :  { %v3009_v58 = vadd.f32 %v3008_v9, %v3007_v23  ;;  %v3033_v60 = vadd.f32 %v3032_v16, %v3031_v37  ;;  %v3048_v52 = vrot.slane %v3047_v27, 2  ;;  %v3310_v2 = vsel %vm3262_vm10, %v13694_v24, %v3309_v63  ;;  %v11997_v63 = vld [vmem:[%s16280_s10] sm:$0xff]  }
 0x346   :  { %v3028_v41 = vadd.f32 %v3027_v5, %v3026_v35  ;;  %v2995_v26 = vadd.f32 %v2994_v7, %v13701_v42  ;;  %v3113_v6 = vpack.c.bf16 %v2981_v28, %v2981_v28  ;;  %v3252_v54 = vunpack.c.l.b16 %v3116_v36  ;;  %v11998_v7 = vld [vmem:[%s16281_s9 + $0x18] sm:$0xff]   ;;  %v3124_v28 = vld [vmem:[%s16282_s8] sm:$0x1] }
 0x347   :  { %v3117_v19 = vpack.c.bf16 %v3009_v58, %v3009_v58  ;;  %v3034_v15 = vrot.slane %v3033_v60, 2  ;;  %v3049_v1 = vadd.f32 %v3048_v52, %v3047_v27  ;;  %v3248_v51 = vunpack.c.l.b16 %v3112_v44  ;;  %v11999_v52 = vld [vmem:[%s16281_s9 + $0x10] sm:$0xff]  }
 0x348   :  { %v3029_v34 = vrot.slane %v3028_v41, 1  ;;  %v3254_v21 = vunpack.c.l.b16 %v3118_v53  ;;  %v3119_v29 = vpack.c.bf16 %v3023_v59, %v3023_v59  ;;  %v3044_v49 = vadd.f32 %v3043_v55, %v3042_v17 }
 0x349   :  { %v3253_v0 = vunpack.c.l.b16 %v3117_v19  ;;  %v3035_v20 = vadd.f32 %v3034_v15, %v3033_v60  ;;  %v3050_v33 = vrot.slane %v3049_v1, 1  ;;  %v3311_v24 = vsel %vm3264_vm11, %v13697_v48, %v3310_v2  ;;  %v12000_v2 = vld [vmem:[%s16281_s9 + $0x8] sm:$0xff]  }
 0x34a   :  { %v3030_v57 = vadd.f32 %v3029_v34, %v3028_v41  ;;  %v3249_v62 = vunpack.c.l.b16 %v3113_v6  ;;  %v3114_v38 = vpack.c.bf16 %v13699_v61, %v13699_v61  ;;  %v3255_v8 = vunpack.c.l.b16 %v3119_v29  ;;  %v11995_v61 = vld [vmem:[%s16280_s10 + $0x10] sm:$0xff]  }
 0x34b   :  { %v3316_v40 = vsel %vm3260_vm9, %v3253_v0, %v3252_v54  ;;  %v3036_v42 = vrot.slane %v3035_v20, 1  ;;  %v3051_v13 = vadd.f32 %v3050_v33, %v3049_v1  ;;  %v3312_v45 = vsel %vm3266_vm12, %v3248_v51, %v3311_v24  ;;  %11411 = vmatprep.subr.bf16.mxu1 %v11995_v61  ;;  %v16618_v33 = vld [vmem:[#allocation24_spill] sm:$0xff]  ;;  %v16619_v24 = vld [vmem:[#allocation30_spill] sm:$0xff] }
 0x34c   :  { %v3317_v3 = vsel %vm3262_vm10, %v3254_v21, %v3316_v40  ;;  %v3120_v12 = vpack.c.bf16 %v3030_v57, %v3030_v57  ;;  %v3115_v11 = vpack.c.bf16 %v2995_v26, %v2995_v26  ;;  %v3122_v22 = vpack.c.bf16 %v3044_v49, %v3044_v49  ;;  %11412 = vmatpush3.bf16.msra.mxu1 %v11995_v61  ;;  %v12001_v26 = vld [vmem:[%s16281_s9] sm:$0xff]   ;;  %v12003_v49 = vld [vmem:[%s16283_s12 + $0x10] sm:$0xff]   ;;  %v16617_v57 = vld [vmem:[#allocation23_spill] sm:$0xff] }
 0x34d   :  { %v3037_v32 = vadd.f32 %v3036_v42, %v3035_v20  ;;  %v3318_v39 = vsel %vm3264_vm11, %v3255_v8, %v3317_v3  ;;  %v3123_v50 = vpack.c.bf16 %v3051_v13, %v3051_v13  ;;  %v3313_v46 = vsel %vm3268_vm13, %v3249_v62, %v3312_v45  ;;  %11413 = vmatprep.subr.bf16.mxu1 %v11996_v14  ;;  %v12002_v20 = vld [vmem:[%s16283_s12 + $0x18] sm:$0xff]   ;;  %v16620_v62 = vld [vmem:[#allocation28_spill] sm:$0xff]  ;;  %v12004_v42 = vld [vmem:[%s16283_s12 + $0x8] sm:$0xff]  }
 0x34e   :  { %v3256_v4 = vunpack.c.l.b16 %v3120_v12  ;;  %v3250_v43 = vunpack.c.l.b16 %v3114_v38  ;;  %v3258_v23 = vunpack.c.l.b16 %v3122_v22  ;;  %v3251_v47 = vunpack.c.l.b16 %v3115_v11  ;;  %11441 = vmatprep.subr.bf16.mxu0 %v12002_v20  ;;  %v12005_v38 = vld [vmem:[%s16283_s12] sm:$0xff]  }
 0x34f   :  { %v3121_v48 = vpack.c.bf16 %v3037_v32, %v3037_v32  ;;  %v3259_v56 = vunpack.c.l.b16 %v3123_v50  ;;  %v3125_v16 = vmul.f32 8.0, %v3124_v28  ;;  %11442 = vmatpush3.bf16.msra.mxu0 %v12002_v20  ;;  %v10476_v61 = vld [vmem:[%s16284_s11] ss:$0 sm:$0xff] }
 0x350   :  { %v3319_v25 = vsel %vm3266_vm12, %v3256_v4, %v3318_v39  ;;  %v3314_v30 = vsel %vm3270_vm14, %v3250_v43, %v3313_v46  ;;  %11414 = vmatpush3.bf16.msra.mxu1 %v11996_v14  ;;  %11443 = vmatprep.subr.bf16.mxu0 %v12003_v49 }
 0x351   :  { %v3257_v31 = vunpack.c.l.b16 %v3121_v48  ;;  %v3315_v9 = vsel %vm3272_vm15, %v3251_v47, %v3314_v30  ;;  %11415 = vmatprep.subr.bf16.mxu1 %v11997_v63  ;;  %v3130_v5 = vrot.slane %v3125_v16, %v12878_v18 }
 0x353   :  { %v3320_v17 = vsel %vm3268_vm13, %v3257_v31, %v3319_v25  ;;  %11444 = vmatpush3.bf16.msra.mxu0 %v12003_v49 }
 0x354   :  { %v3321_v10 = vsel %vm3270_vm14, %v3258_v23, %v3320_v17  ;;  %11416 = vmatpush3.bf16.msra.mxu1 %v11997_v63  ;;  %11445 = vmatprep.subr.bf16.mxu0 %v12004_v42 }
 0x355   :  { %v3322_v35 = vsel %vm3272_vm15, %v3259_v56, %v3321_v10  ;;  %11425 = vmatprep.subr.bf16.mxu1 %v11998_v7 }
 0x356   :  { %v3326_v37 = vpack.c.b16 %v3322_v35, %v3315_v9 }
 0x357   :  { %11446 = vmatpush3.bf16.msra.mxu0 %v12004_v42 }
 0x358   :  { %11406 = vmatmul.mubr.msk.bf16.gmra.mxu1 %vm1229_vm6, %v3326_v37  ;;  %11447 = vmatprep.subr.bf16.mxu0 %v12005_v38 }
 0x35b   :  { %11448 = vmatpush3.bf16.msra.mxu0 %v12005_v38 }
 0x3cb   :  { %v11403_v36 = vpop.f32.mrf.mxu1 }
 0x3cc   :  { %v3406_v19 = vadd.f32 %v11403_v36, %v3130_v5 }
 0x3cd   :  { %v3397_v58 = vpop.f32.mrf.mxu1 }
 0x3ce   :  { %v3398_v59 = vadd.f32 %v3397_v58, %v3130_v5 }
 0x3cf   :  { %v11404_v27 = vpop.f32.mrf.mxu1 }
 0x3d0   :  { %v3409_v44 = vadd.f32 %v11404_v27, %v3130_v5 }
 0x3d1   :  { %v3400_v53 = vpop.f32.mrf.mxu1 }
 0x3d2   :  { %v3401_v60 = vadd.f32 %v3400_v53, %v3130_v5  ;;  %v3445_v41 = vpack.c.bf16 %v3409_v44, %v3406_v19  ;;  %v16621_v19 = vld [vmem:[#allocation18_spill] sm:$0xff] }
 0x3d4   :  { %v3444_v55 = vpack.c.bf16 %v3401_v60, %v3398_v59 }
 0x3d6   :  { %11417 = vmatprep.mubr.msk.bf16.mxu1 %vm1229_vm6, %v3444_v55 }
 0x3d7   :  { %11418 = vmatmul.mubr.msk.bf16.vlgmr.msra.gmra.mxu1 %vm1229_vm6, %v3445_v41 }
 0x3d8   :  { %11426 = vmatpush3.bf16.msra.mxu1 %v11998_v7 }
 0x3d9   :  { %11427 = vmatprep.subr.bf16.mxu1 %v11999_v52 }
 0x3dc   :  { %11428 = vmatpush3.bf16.msra.mxu1 %v11999_v52 }
 0x3dd   :  { %11429 = vmatprep.subr.bf16.mxu1 %v12000_v2 }
 0x3e0   :  { %11430 = vmatpush3.bf16.msra.mxu1 %v12000_v2 }
 0x3e1   :  { %11431 = vmatprep.subr.bf16.mxu1 %v12001_v26 }
 0x3e4   :  { %11432 = vmatpush3.bf16.msra.mxu1 %v12001_v26 }
 0x3e5   :  { %11961 = vmatprep.subr.bf16.mxu1 %v12002_v20 }
 0x418   :  { %v11407_v6 = vpop.f32.mrf.mxu1 }
 0x419   :  { %v3422_v21 = vadd.f32 %v11407_v6, %v3130_v5 }
 0x41a   :  { %v3413_v15 = vpop.f32.mrf.mxu1 }
 0x41b   :  { %v3414_v1 = vadd.f32 %v3413_v15, %v3130_v5  ;;  %v16622_v15 = vld [vmem:[#allocation3_spill] sm:$0xff] }
 0x41c   :  { %v11408_v54 = vpop.f32.mrf.mxu1 }
 0x41d   :  { %v3425_v0 = vadd.f32 %v11408_v54, %v3130_v5 }
 0x41e   :  { %v3416_v34 = vpop.f32.mrf.mxu1 }
 0x41f   :  { %v3417_v51 = vadd.f32 %v3416_v34, %v3130_v5  ;;  %v3447_v40 = vpack.c.bf16 %v3425_v0, %v3422_v21  ;;  %v10477_v0 = vld [vmem:[%s16285_s13] ss:$0 sm:$0xff] }
 0x421   :  { %v3446_v29 = vpack.c.bf16 %v3417_v51, %v3414_v1 }
 0x423   :  { %11421 = vmatprep.mubr.msk.bf16.mxu1 %vm1229_vm6, %v3446_v29 }
 0x424   :  { %11422 = vmatmul.mubr.msk.bf16.gmra.mxu1 %vm1229_vm6, %v3447_v40  ;;  %v16623_v40 = vld [vmem:[#allocation19_spill] sm:$0xff] }
 0x425   :  { %11433 = vmatprep.mubr.msk.bf16.mxu1 %vm1229_vm6, %v16617_v57  ;;  %v16625_v57 = vld [vmem:[#allocation20_spill] sm:$0xff] }
 0x42c   :  { %11434 = vmatmul.mubr.msk.bf16.vlgmr.msra.gmra.mxu1 %vm1229_vm6, %v16618_v33 }
 0x42d   :  { %11437 = vmatprep.mubr.msk.bf16.mxu1 %vm1229_vm6, %v16619_v24  ;;  %11965 = vmatpush3.bf16.msra.mxu1 %v12002_v20 }
 0x42e   :  { %11962 = vmatprep.subr.bf16.mxu1 %v12003_v49 }
 0x431   :  { %11966 = vmatpush3.bf16.msra.mxu1 %v12003_v49 }
 0x432   :  { %11963 = vmatprep.subr.bf16.mxu1 %v12004_v42 }
 0x434   :  { %11438 = vmatmul.mubr.msk.bf16.gmra.mxu1 %vm1229_vm6, %v16620_v62 }
 0x435   :  { %11967 = vmatpush3.bf16.msra.mxu1 %v12004_v42  ;;  %v16627_v42 = vld [vmem:[#allocation22_spill] sm:$0xff] }
 0x436   :  { %11964 = vmatprep.subr.bf16.mxu1 %v12005_v38 }
 0x439   :  { %11968 = vmatpush3.bf16.msra.mxu1 %v12005_v38 }
 0x497   :  { %v11419_v3 = vpop.f32.mrf.mxu1 }
 0x499   :  { %v3518_v12 = vpop.f32.mrf.mxu1 }
 0x49b   :  { %v11420_v13 = vpop.f32.mrf.mxu1 }
 0x49d   :  { %v3521_v8 = vpop.f32.mrf.mxu1 }
 0x4e4   :  { %v11423_v32 = vpop.f32.mrf.mxu1 }
 0x4e6   :  { %v3534_v45 = vpop.f32.mrf.mxu1 }
 0x4e8   :  { %v11424_v11 = vpop.f32.mrf.mxu1 }
 0x4ea   :  { %v3537_v22 = vpop.f32.mrf.mxu1 }
 0x4ec   :  { %v11435_v4 = vpop.f32.mrf.mxu1 }
 0x4ed   :  { %v3616_v48 = vadd.f32 %v11435_v4, %v11419_v3  ;;  %v16629_v3 = vld [vmem:[#allocation21_spill] sm:$0xff] }
 0x4ee   :  { %v3607_v39 = vpop.f32.mrf.mxu1 }
 0x4ef   :  { %v3608_v50 = vadd.f32 %v3607_v39, %v3518_v12  ;;  %v3647_v47 = vadd.f32 %v10476_v61, %v3616_v48  ;;  %v16632_v48 = vld [vmem:[#allocation25_spill] sm:$0xff] }
 0x4f0   :  { %v11436_v46 = vpop.f32.mrf.mxu1 }
 0x4f1   :  { %v3619_v43 = vadd.f32 %v11436_v46, %v11420_v13  ;;  %v3645_v23 = vadd.f32 %v10476_v61, %v3608_v50  ;;  %v3655_v63 = vmax.f32 %v3647_v47, 0.0 }
 0x4f2   :  { %v3610_v31 = vpop.f32.mrf.mxu1 }
 0x4f3   :  { %v3648_v25 = vadd.f32 %v10476_v61, %v3619_v43  ;;  %v3611_v30 = vadd.f32 %v3610_v31, %v3521_v8  ;;  %v3653_v35 = vmax.f32 %v3645_v23, 0.0  ;;  %v16635_v23 = vld [vmem:[#allocation26_spill] sm:$0xff] }
 0x4f4   :  { %v11439_v56 = vpop.f32.mrf.mxu1 }
 0x4f5   :  { %v3646_v17 = vadd.f32 %v10476_v61, %v3611_v30  ;;  %v3656_v10 = vmax.f32 %v3648_v25, 0.0  ;;  %v3632_v7 = vadd.f32 %v11439_v56, %v11423_v32  ;;  %v16637_v30 = vld [vmem:[#allocation27_spill] sm:$0xff] }
 0x4f6   :  { %v3623_v9 = vpop.f32.mrf.mxu1 }
 0x4f7   :  { %v3654_v14 = vmax.f32 %v3646_v17, 0.0  ;;  %v3624_v37 = vadd.f32 %v3623_v9, %v3534_v45  ;;  %v3670_v58 = vpack.c.bf16 %v3656_v10, %v3655_v63  ;;  %v3651_v59 = vadd.f32 %v10476_v61, %v3632_v7  ;;  %v16639_v9 = vld [vmem:[#allocation29_spill] sm:$0xff]  ;;  %v16642_v7 = vld [vmem:[#allocation2_spill] sm:$0xff] }
 0x4f8   :  { %v11440_v28 = vpop.f32.mrf.mxu1 }
 0x4f9   :  { %v3669_v16 = vpack.c.bf16 %v3654_v14, %v3653_v35  ;;  %v3635_v36 = vadd.f32 %v11440_v28, %v11424_v11  ;;  %v3649_v27 = vadd.f32 %v10476_v61, %v3624_v37  ;;  %v3659_v2 = vmax.f32 %v3651_v59, 0.0  ;;  %v16643_v28 = vld [vmem:[#allocation4_spill] sm:$0xff]  ;;  %v12008_v59 = vld [vmem:[%s16503_s2 + $0x28] sm:$0xff]  }
 0x4fa   :  { %v3626_v5 = vpop.f32.mrf.mxu1 }
 0x4fb   :  { %v3652_v44 = vadd.f32 %v10476_v61, %v3635_v36  ;;  %v3627_v53 = vadd.f32 %v3626_v5, %v3537_v22  ;;  %11449 = vmatprep.mubr.msk.bf16.mxu0 %vm1229_vm6, %v3669_v16  ;;  %v3657_v41 = vmax.f32 %v3649_v27, 0.0  ;;  %v12006_v36 = vld [vmem:[%s16503_s2 + $0x38] sm:$0xff]   ;;  %v16646_v27 = vld [vmem:[#allocation31_spill] sm:$0xff] }
 0x4fc   :  { %11450 = vmatmul.mubr.msk.bf16.vlgmr.msra.gmra.mxu0 %vm1229_vm6, %v3670_v58  ;;  %v12007_v58 = vld [vmem:[%s16503_s2 + $0x30] sm:$0xff]   ;;  %v16645_v5 = vld [vmem:[#allocation5_spill] sm:$0xff] }
 0x4fd   :  { %v3650_v60 = vadd.f32 %v10476_v61, %v3627_v53  ;;  %11495 = vmatprep.mubr.msk.bf16.mxu0 %vm702_vm4, %v16621_v19  ;;  %v3660_v55 = vmax.f32 %v3652_v44, 0.0  ;;  %v16647_v44 = vld [vmem:[#allocation6_spill] sm:$0xff]  ;;  %v16648_v53 = vld [vmem:[#allocation32_spill] sm:$0xff] }
 0x4ff   :  { %v3658_v52 = vmax.f32 %v3650_v60, 0.0  ;;  %v3672_v6 = vpack.c.bf16 %v3660_v55, %v3659_v2  ;;  %v12009_v60 = vld [vmem:[%s16503_s2 + $0x20] sm:$0xff]   ;;  %v16649_v55 = vld [vmem:[#allocation7_spill] sm:$0xff] }
 0x500   :  { %v16652_v2 = vld [vmem:[#allocation34_spill] sm:$0xff] }
 0x501   :  { %v3671_v26 = vpack.c.bf16 %v3658_v52, %v3657_v41  ;;  %v16650_v41 = vld [vmem:[#allocation33_spill] sm:$0xff]  ;;  %v16651_v52 = vld [vmem:[#allocation8_spill] sm:$0xff] }
 0x503   :  { %11453 = vmatprep.mubr.msk.bf16.mxu1 %vm1229_vm6, %v3671_v26  ;;  %v16653_v26 = vld [vmem:[#allocation9_spill] sm:$0xff] }
 0x504   :  { %11454 = vmatmul.mubr.msk.bf16.vlgmr.msra.gmra.mxu1 %vm1229_vm6, %v3672_v6  ;;  %v16654_v6 = vld [vmem:[#allocation35_spill] sm:$0xff] }
 0x505   :  { %11459 = vmatprep.mubr.msk.bf16.mxu1 %vm702_vm4, %v16622_v15 }
 0x5bc   :  { %v11451_v54 = vpop.f32.mrf.mxu0 }
 0x5bd   :  { %v3759_v21 = vadd.f32 %v11451_v54, %v10477_v0  ;;  %v16655_v54 = vld [vmem:[#allocation10_spill] sm:$0xff] }
 0x5be   :  { %v3750_v34 = vpop.f32.mrf.mxu0 }
 0x5bf   :  { %v3751_v1 = vadd.f32 %v10477_v0, %v3750_v34  ;;  %v13818_v38 = vadd.f32 %v3759_v21, %v16627_v42  ;;  %v12010_v34 = vld [vmem:[%s16508_s30 + $0x38] sm:$0xff]   ;;  %v16659_v21 = vld [vmem:[#allocation12_spill] sm:$0xff] }
 0x5c0   :  { %v11452_v51 = vpop.f32.mrf.mxu0  ;;  %v12011_v42 = vld [vmem:[%s16508_s30 + $0x30] sm:$0xff]  }
 0x5c1   :  { %v3762_v29 = vadd.f32 %v11452_v51, %v10477_v0  ;;  %v13812_v49 = vadd.f32 %v3751_v1, %v16623_v40  ;;  %16628 = vst [vmem:[#allocation57_spill] sm:$0xff] %v13818_v38  ;;  %v16397_v39 = vmax.f32 %v13818_v38, 0.0  ;;  %v16657_v1 = vld [vmem:[#allocation11_spill] sm:$0xff]  ;;  %v16658_v51 = vld [vmem:[#allocation37_spill] sm:$0xff] }
 0x5c2   :  { %v3753_v20 = vpop.f32.mrf.mxu0  ;;  %v16662_v40 = vld [vmem:[#allocation15_spill] sm:$0xff] }
 0x5c3   :  { %16624 = vst [vmem:[#allocation56_spill] sm:$0xff] %v13812_v49  ;;  %v13815_v33 = vadd.f32 %v3762_v29, %v16625_v57  ;;  %v3754_v24 = vadd.f32 %v10477_v0, %v3753_v20  ;;  %v16399_v32 = vmax.f32 %v13812_v49, 0.0  ;;  %v16660_v29 = vld [vmem:[#allocation13_spill] sm:$0xff]  ;;  %v16661_v20 = vld [vmem:[#allocation14_spill] sm:$0xff]  ;;  %v16663_v57 = vld [vmem:[#allocation16_spill] sm:$0xff] }
 0x5c4   :  { %v11455_v62 = vpop.f32.mrf.mxu1 }
 0x5c5   :  { %16626 = vst [vmem:[#allocation50_spill] sm:$0xff] %v13815_v33  ;;  %v13821_v12 = vadd.f32 %v3754_v24, %v16629_v3  ;;  %v3775_v13 = vadd.f32 %v11455_v62, %v10477_v0  ;;  %v16398_v45 = vmax.f32 %v13815_v33, 0.0  ;;  %v16664_v24 = vld [vmem:[#allocation17_spill] sm:$0xff]  ;;  %v16665_v62 = vld [vmem:[#allocation38_spill] sm:$0xff]  ;;  %v16666_v3 = vld [vmem:[#allocation39_spill] sm:$0xff] }
 0x5c6   :  { %v3766_v8 = vpop.f32.mrf.mxu1 }
 0x5c7   :  { %16630 = vst [vmem:[#allocation51_spill] sm:$0xff] %v13821_v12  ;;  %v16396_v11 = vmax.f32 %v13821_v12, 0.0  ;;  %v3767_v22 = vadd.f32 %v10477_v0, %v3766_v8  ;;  %v13834_v46 = vadd.f32 %v3775_v13, %v16632_v48  ;;  %v13840_v31 = vpack.c.bf16 %v16398_v45, %v16397_v39  ;;  %v16667_v13 = vld [vmem:[#allocation40_spill] sm:$0xff]  ;;  %v12012_v8 = vld [vmem:[%s16508_s30 + $0x28] sm:$0xff]   ;;  %v16669_v48 = vld [vmem:[#allocation42_spill] sm:$0xff] }
 0x5c8   :  { %v11456_v4 = vpop.f32.mrf.mxu1 }
 0x5c9   :  { %v13831_v50 = vpack.c.bf16 %v16396_v11, %v16399_v32  ;;  %16633 = vst [vmem:[#allocation49_spill] sm:$0xff] %v13834_v46  ;;  %v3778_v61 = vadd.f32 %v11456_v4, %v10477_v0  ;;  %16634 = vst [vmem:[#allocation58_spill] sm:$0xff] %v13840_v31  ;;  %v13843_v25 = vadd.f32 %v3767_v22, %v16635_v23  ;;  %v16395_v17 = vmax.f32 %v13834_v46, 0.0  ;;  %v12013_v22 = vld [vmem:[%s16508_s30 + $0x20] sm:$0xff]   ;;  %v16668_v4 = vld [vmem:[#allocation41_spill] sm:$0xff] }
 0x5ca   :  { %v3769_v43 = vpop.f32.mrf.mxu1  ;;  %v16672_v23 = vld [vmem:[#allocation45_spill] sm:$0xff] }
 0x5cb   :  { %16631 = vst [vmem:[#allocation54_spill] sm:$0xff] %v13831_v50  ;;  %16636 = vst [vmem:[#allocation52_spill] sm:$0xff] %v13843_v25  ;;  %v13846_v47 = vadd.f32 %v3778_v61, %v16637_v30  ;;  %v3770_v56 = vadd.f32 %v10477_v0, %v3769_v43  ;;  %11457 = vmatprep.subr.bf16.mxu1 %v13831_v50  ;;  %v16394_v14 = vmax.f32 %v13843_v25, 0.0  ;;  %v16656_v0 = vld [vmem:[#allocation36_spill] sm:$0xff]  ;;  %v16670_v61 = vld [vmem:[#allocation43_spill] sm:$0xff] }
 0x5cc   :  { %11458 = vmatpush3.bf16.msra.mxu1 %v13831_v50  ;;  %v16671_v43 = vld [vmem:[#allocation44_spill] sm:$0xff] }
 0x5cd   :  { %16638 = vst [vmem:[#allocation62_spill] sm:$0xff] %v13846_v47  ;;  %v16393_v10 = vmax.f32 %v13846_v47, 0.0  ;;  %v13853_v35 = vadd.f32 %v3770_v56, %v16639_v9  ;;  %11475 = vmatprep.subr.bf16.mxu1 %v13840_v31  ;;  %v12015_v25 = vld [vmem:[%s16279_s7 + $0x30] sm:$0xff]  }
 0x5cf   :  { %16640 = vst [vmem:[#allocation53_spill] sm:$0xff] %v13853_v35  ;;  %v13861_v37 = vpack.c.bf16 %v16393_v10, %v16395_v17  ;;  %v16392_v63 = vmax.f32 %v13853_v35, 0.0  ;;  %11460 = vmatmul.mubr.msk.bf16.vlgmr.msra.gmra.mxu1 %vm702_vm4, %v16642_v7 }
 0x5d0   :  { %11463 = vmatprep.mubr.msk.bf16.mxu1 %vm702_vm4, %v16643_v28  ;;  %11476 = vmatpush3.bf16.msra.mxu1 %v13840_v31 }
 0x5d1   :  { %16641 = vst [vmem:[#allocation63_spill] sm:$0xff] %v13861_v37  ;;  %v13873_v16 = vpack.c.bf16 %v16392_v63, %v16394_v14  ;;  %11511 = vmatprep.subr.bf16.mxu1 %v13861_v37 }
 0x5d3   :  { %16644 = vst [vmem:[#allocation55_spill] sm:$0xff] %v13873_v16  ;;  %11493 = vmatprep.subr.bf16.mxu0 %v13873_v16 }
 0x5d4   :  { %11494 = vmatpush3.bf16.msra.mxu0 %v13873_v16 }
 0x5d5   :  { %11529 = vmatprep.subr.bf16.mxu0 %v12006_v36 }
 0x5d7   :  { %11464 = vmatmul.mubr.msk.bf16.gmra.mxu1 %vm702_vm4, %v16645_v5  ;;  %11496 = vmatmul.mubr.msk.bf16.vlgmr.msra.gmra.mxu0 %vm702_vm4, %v16646_v27 }
 0x5d8   :  { %11467 = vmatprep.mubr.msk.bf16.mxu1 %vm702_vm4, %v16647_v44  ;;  %11499 = vmatprep.mubr.msk.bf16.mxu0 %vm702_vm4, %v16648_v53 }
 0x5d9   :  { %11530 = vmatpush3.bf16.msra.mxu0 %v12006_v36 }
 0x5da   :  { %11531 = vmatprep.subr.bf16.mxu0 %v12007_v58 }
 0x5dd   :  { %11532 = vmatpush3.bf16.msra.mxu0 %v12007_v58 }
 0x5de   :  { %11533 = vmatprep.subr.bf16.mxu0 %v12008_v59 }
 0x5df   :  { %11468 = vmatmul.mubr.msk.bf16.gmra.mxu1 %vm702_vm4, %v16649_v55  ;;  %11500 = vmatmul.mubr.msk.bf16.gmra.mxu0 %vm702_vm4, %v16650_v41 }
 0x5e0   :  { %11471 = vmatprep.mubr.msk.bf16.mxu1 %vm702_vm4, %v16651_v52  ;;  %11503 = vmatprep.mubr.msk.bf16.mxu0 %vm702_vm4, %v16652_v2 }
 0x5e1   :  { %11534 = vmatpush3.bf16.msra.mxu0 %v12008_v59 }
 0x5e2   :  { %11535 = vmatprep.subr.bf16.mxu0 %v12009_v60 }
 0x5e5   :  { %11536 = vmatpush3.bf16.msra.mxu0 %v12009_v60 }
 0x5e7   :  { %11472 = vmatmul.mubr.msk.bf16.gmra.mxu1 %vm702_vm4, %v16653_v26  ;;  %11504 = vmatmul.mubr.msk.bf16.gmra.mxu0 %vm702_vm4, %v16654_v6 }
 0x5e8   :  { %11477 = vmatprep.mubr.msk.bf16.mxu1 %vm702_vm4, %v16655_v54  ;;  %11507 = vmatprep.mubr.msk.bf16.mxu0 %vm702_vm4, %v16656_v0 }
 0x5ef   :  { %11478 = vmatmul.mubr.msk.bf16.vlgmr.msra.gmra.mxu1 %vm702_vm4, %v16657_v1  ;;  %11508 = vmatmul.mubr.msk.bf16.gmra.mxu0 %vm702_vm4, %v16658_v51 }
 0x5f0   :  { %11512 = vmatpush3.bf16.msra.mxu1 %v13861_v37  ;;  %11481 = vmatprep.mubr.msk.bf16.mxu1 %vm702_vm4, %v16659_v21 }
 0x5f1   :  { %11537 = vmatprep.mubr.msk.bf16.mxu0 %vm1229_vm6, %v13831_v50  ;;  %11545 = vmatprep.subr.bf16.mxu1 %v12010_v34 }
 0x5f7   :  { %11482 = vmatmul.mubr.msk.bf16.gmra.mxu1 %vm702_vm4, %v16660_v29  ;;  %11538 = vmatmul.mubr.msk.bf16.vlgmr.msra.gmra.mxu0 %vm1229_vm6, %v13840_v31 }
 0x5f8   :  { %11485 = vmatprep.mubr.msk.bf16.mxu1 %vm702_vm4, %v16661_v20  ;;  %11541 = vmatprep.mubr.msk.bf16.mxu0 %vm1229_vm6, %v13873_v16 }
 0x5ff   :  { %11486 = vmatmul.mubr.msk.bf16.gmra.mxu1 %vm702_vm4, %v16662_v40  ;;  %11542 = vmatmul.mubr.msk.bf16.gmra.mxu0 %vm1229_vm6, %v13861_v37 }
 0x600   :  { %11489 = vmatprep.mubr.msk.bf16.mxu1 %vm702_vm4, %v16663_v57 }
 0x607   :  { %11490 = vmatmul.mubr.msk.bf16.gmra.mxu1 %vm702_vm4, %v16664_v24 }
 0x608   :  { %11513 = vmatprep.mubr.msk.bf16.mxu1 %vm702_vm4, %v16665_v62 }
 0x60f   :  { %11514 = vmatmul.mubr.msk.bf16.vlgmr.msra.gmra.mxu1 %vm702_vm4, %v16666_v3 }
 0x610   :  { %11517 = vmatprep.mubr.msk.bf16.mxu1 %vm702_vm4, %v16667_v13  ;;  %11546 = vmatpush3.bf16.msra.mxu1 %v12010_v34 }
 0x611   :  { %11547 = vmatprep.subr.bf16.mxu1 %v12011_v42 }
 0x614   :  { %11548 = vmatpush3.bf16.msra.mxu1 %v12011_v42 }
 0x615   :  { %11549 = vmatprep.subr.bf16.mxu1 %v12012_v8 }
 0x617   :  { %11518 = vmatmul.mubr.msk.bf16.gmra.mxu1 %vm702_vm4, %v16668_v4 }
 0x618   :  { %11521 = vmatprep.mubr.msk.bf16.mxu1 %vm702_vm4, %v16669_v48  ;;  %11550 = vmatpush3.bf16.msra.mxu1 %v12012_v8 }
 0x619   :  { %11551 = vmatprep.subr.bf16.mxu1 %v12013_v22 }
 0x61c   :  { %11552 = vmatpush3.bf16.msra.mxu1 %v12013_v22 }
 0x61f   :  { %11522 = vmatmul.mubr.msk.bf16.gmra.mxu1 %vm702_vm4, %v16670_v61 }
 0x620   :  { %11525 = vmatprep.mubr.msk.bf16.mxu1 %vm702_vm4, %v16671_v43 }
 0x627   :  { %11526 = vmatmul.mubr.msk.bf16.gmra.mxu1 %vm702_vm4, %v16672_v23 }
 0x68f   :  { %v11461_v30 = vpop.f32.mrf.mxu1 }
 0x691   :  { %v3832_v56 = vpop.f32.mrf.mxu1 }
 0x693   :  { %v11462_v9 = vpop.f32.mrf.mxu1 }
 0x694   :  { %v4317_v59 = vpack.c.bf16 %v11462_v9, %v11461_v30 }
 0x695   :  { %v3835_v36 = vpop.f32.mrf.mxu1 }
 0x696   :  { %v4316_v58 = vpack.c.bf16 %v3835_v36, %v3832_v56 }
 0x697   :  { %v11465_v60 = vpop.f32.mrf.mxu1  ;;  %v13972_v36 = vpop.f32.mrf.mxu0 }
 0x698   :  { %11553 = vmatprep.mubr.msk.bf16.mxu1 %vm1229_vm6, %v4316_v58 }
 0x699   :  { %v3848_v34 = vpop.f32.mrf.mxu1  ;;  %11554 = vmatmul.mubr.msk.bf16.vlgmr.msra.gmra.mxu1 %vm1229_vm6, %v4317_v59 }
 0x69b   :  { %v11466_v42 = vpop.f32.mrf.mxu1 }
 0x69c   :  { %v4319_v63 = vpack.c.bf16 %v11466_v42, %v11465_v60  ;;  %v4028_v60 = vpop.f32.mrf.mxu0 }
 0x69d   :  { %v3851_v8 = vpop.f32.mrf.mxu1 }
 0x69e   :  { %v4318_v22 = vpack.c.bf16 %v3851_v8, %v3848_v34 }
 0x69f   :  { %v11469_v10 = vpop.f32.mrf.mxu1 }
 0x6a0   :  { %11557 = vmatprep.mubr.msk.bf16.mxu1 %vm1229_vm6, %v4318_v22 }
 0x6a1   :  { %v3864_v14 = vpop.f32.mrf.mxu1  ;;  %11558 = vmatmul.mubr.msk.bf16.gmra.mxu1 %vm1229_vm6, %v4319_v63  ;;  %v11498_v63 = vpop.f32.mrf.mxu0 }
 0x6a3   :  { %v11470_v17 = vpop.f32.mrf.mxu1 }
 0x6a4   :  { %v4321_v30 = vpack.c.bf16 %v11470_v17, %v11469_v10  ;;  %v4031_v17 = vpop.f32.mrf.mxu0 }
 0x6a5   :  { %v3867_v11 = vpop.f32.mrf.mxu1  ;;  %v4332_v13 = vpack.c.bf16 %v4031_v17, %v4028_v60 }
 0x6a6   :  { %v4320_v56 = vpack.c.bf16 %v3867_v11, %v3864_v14 }
 0x6a7   :  { %v11473_v9 = vpop.f32.mrf.mxu1 }
 0x6a8   :  { %11561 = vmatprep.mubr.msk.bf16.mxu1 %vm1229_vm6, %v4320_v56 }
 0x6a9   :  { %v3880_v58 = vpop.f32.mrf.mxu1  ;;  %11562 = vmatmul.mubr.msk.bf16.gmra.mxu1 %vm1229_vm6, %v4321_v30  ;;  %v11501_v30 = vpop.f32.mrf.mxu0 }
 0x6ab   :  { %v11474_v59 = vpop.f32.mrf.mxu1 }
 0x6ac   :  { %v4323_v8 = vpack.c.bf16 %v11474_v59, %v11473_v9 }
 0x6ad   :  { %v3883_v34 = vpop.f32.mrf.mxu1 }
 0x6ae   :  { %v4322_v42 = vpack.c.bf16 %v3883_v34, %v3880_v58  ;;  %v4044_v58 = vpop.f32.mrf.mxu0 }
 0x6af   :  { %v11479_v22 = vpop.f32.mrf.mxu1 }
 0x6b0   :  { %11565 = vmatprep.mubr.msk.bf16.mxu1 %vm1229_vm6, %v4322_v42 }
 0x6b1   :  { %v3930_v39 = vpop.f32.mrf.mxu1  ;;  %11566 = vmatmul.mubr.msk.bf16.gmra.mxu1 %vm1229_vm6, %v4323_v8  ;;  %v11502_v8 = vpop.f32.mrf.mxu0 }
 0x6b2   :  { %v4335_v60 = vpack.c.bf16 %v11502_v8, %v11501_v30 }
 0x6b3   :  { %v11480_v11 = vpop.f32.mrf.mxu1 }
 0x6b4   :  { %v4325_v56 = vpack.c.bf16 %v11480_v11, %v11479_v22  ;;  %v4047_v22 = vpop.f32.mrf.mxu0 }
 0x6b5   :  { %v3933_v10 = vpop.f32.mrf.mxu1 }
 0x6b6   :  { %v4324_v14 = vpack.c.bf16 %v3933_v10, %v3930_v39 }
 0x6b7   :  { %v11483_v45 = vpop.f32.mrf.mxu1 }
 0x6b8   :  { %11569 = vmatprep.mubr.msk.bf16.mxu1 %vm1229_vm6, %v4324_v14 }
 0x6b9   :  { %v3946_v32 = vpop.f32.mrf.mxu1  ;;  %11570 = vmatmul.mubr.msk.bf16.gmra.mxu1 %vm1229_vm6, %v4325_v56  ;;  %v11505_v56 = vpop.f32.mrf.mxu0 }
 0x6bb   :  { %v11484_v9 = vpop.f32.mrf.mxu1 }
 0x6bc   :  { %v4327_v42 = vpack.c.bf16 %v11484_v9, %v11483_v45  ;;  %v4060_v45 = vpop.f32.mrf.mxu0 }
 0x6bd   :  { %v3949_v59 = vpop.f32.mrf.mxu1 }
 0x6be   :  { %v4326_v34 = vpack.c.bf16 %v3949_v59, %v3946_v32 }
 0x6bf   :  { %v11487_v23 = vpop.f32.mrf.mxu1 }
 0x6c0   :  { %11573 = vmatprep.mubr.msk.bf16.mxu1 %vm1229_vm6, %v4326_v34 }
 0x6c1   :  { %v3962_v43 = vpop.f32.mrf.mxu1  ;;  %11574 = vmatmul.mubr.msk.bf16.gmra.mxu1 %vm1229_vm6, %v4327_v42  ;;  %v11506_v42 = vpop.f32.mrf.mxu0 }
 0x6c3   :  { %v11488_v39 = vpop.f32.mrf.mxu1 }
 0x6c4   :  { %v4329_v14 = vpack.c.bf16 %v11488_v39, %v11487_v23  ;;  %v4063_v23 = vpop.f32.mrf.mxu0 }
 0x6c5   :  { %v3965_v11 = vpop.f32.mrf.mxu1  ;;  %v4336_v17 = vpack.c.bf16 %v4063_v23, %v4060_v45 }
 0x6c6   :  { %v4328_v10 = vpack.c.bf16 %v3965_v11, %v3962_v43  ;;  %v4333_v11 = vpack.c.bf16 %v11498_v63, %v13972_v36  ;;  %v4337_v36 = vpack.c.bf16 %v11506_v42, %v11505_v56 }
 0x6c7   :  { %v11491_v61 = vpop.f32.mrf.mxu1 }
 0x6c8   :  { %11577 = vmatprep.mubr.msk.bf16.mxu1 %vm1229_vm6, %v4328_v10  ;;  %v4334_v10 = vpack.c.bf16 %v4047_v22, %v4044_v58 }
 0x6c9   :  { %v3978_v48 = vpop.f32.mrf.mxu1  ;;  %11578 = vmatmul.mubr.msk.bf16.gmra.mxu1 %vm1229_vm6, %v4329_v14  ;;  %v11509_v14 = vpop.f32.mrf.mxu0 }
 0x6cb   :  { %v11492_v32 = vpop.f32.mrf.mxu1 }
 0x6cc   :  { %v4331_v34 = vpack.c.bf16 %v11492_v32, %v11491_v61 }
 0x6cd   :  { %v3981_v9 = vpop.f32.mrf.mxu1 }
 0x6ce   :  { %v4330_v59 = vpack.c.bf16 %v3981_v9, %v3978_v48  ;;  %v4076_v48 = vpop.f32.mrf.mxu0 }
 0x6cf   :  { %v11515_v4 = vpop.f32.mrf.mxu1 }
 0x6d0   :  { %11581 = vmatprep.mubr.msk.bf16.mxu1 %vm1229_vm6, %v4330_v59  ;;  %v11510_v32 = vpop.f32.mrf.mxu0 }
 0x6d1   :  { %v4126_v3 = vpop.f32.mrf.mxu1  ;;  %11582 = vmatmul.mubr.msk.bf16.gmra.mxu1 %vm1229_vm6, %v4331_v34  ;;  %v4339_v34 = vpack.c.bf16 %v11510_v32, %v11509_v14  ;;  %v10527_v32 = vld [vmem:[%s16278_s6 + $0x1] ss:$0 sm:$0xff] }
 0x6d2   :  { %11585 = vmatprep.mubr.msk.bf16.mxu1 %vm1229_vm6, %v4332_v13  ;;  %v4079_v13 = vpop.f32.mrf.mxu0 }
 0x6d3   :  { %v11516_v43 = vpop.f32.mrf.mxu1  ;;  %v4338_v63 = vpack.c.bf16 %v4079_v13, %v4076_v48 }
 0x6d4   :  { %v4341_v45 = vpack.c.bf16 %v11516_v43, %v11515_v4 }
 0x6d5   :  { %v4129_v39 = vpop.f32.mrf.mxu1 }
 0x6d7   :  { %v11519_v62 = vpop.f32.mrf.mxu1 }
 0x6d9   :  { %11586 = vmatmul.mubr.msk.bf16.gmra.mxu1 %vm1229_vm6, %v4333_v11  ;;  %v4142_v61 = vpop.f32.mrf.mxu1  ;;  %v4340_v11 = vpack.c.bf16 %v4129_v39, %v4126_v3 }
 0x6da   :  { %11589 = vmatprep.mubr.msk.bf16.mxu1 %vm1229_vm6, %v4334_v10 }
 0x6db   :  { %v11520_v9 = vpop.f32.mrf.mxu1 }
 0x6dc   :  { %v4343_v42 = vpack.c.bf16 %v11520_v9, %v11519_v62  ;;  %v11539_v62 = vpop.f32.mrf.mxu0 }
 0x6dd   :  { %v4145_v59 = vpop.f32.mrf.mxu1  ;;  %v4285_v13 = vadd.f32 %v11539_v62, %v10527_v32 }
 0x6de   :  { %v4342_v23 = vpack.c.bf16 %v4145_v59, %v4142_v61  ;;  %v4276_v43 = vpop.f32.mrf.mxu0 }
 0x6df   :  { %v11523_v58 = vpop.f32.mrf.mxu1  ;;  %v4277_v59 = vadd.f32 %v10527_v32, %v4276_v43 }
 0x6e0   :  { %v11540_v61 = vpop.f32.mrf.mxu0 }
 0x6e1   :  { %11590 = vmatmul.mubr.msk.bf16.gmra.mxu1 %vm1229_vm6, %v4335_v60  ;;  %v4158_v22 = vpop.f32.mrf.mxu1 }
 0x6e2   :  { %11593 = vmatprep.mubr.msk.bf16.mxu1 %vm1229_vm6, %v4336_v17  ;;  %v4279_v17 = vpop.f32.mrf.mxu0 }
 0x6e3   :  { %v11524_v30 = vpop.f32.mrf.mxu1 }
 0x6e4   :  { %v4345_v39 = vpack.c.bf16 %v11524_v30, %v11523_v58  ;;  %v11543_v9 = vpop.f32.mrf.mxu0  ;;  %v4288_v58 = vadd.f32 %v11540_v61, %v10527_v32 }
 0x6e5   :  { %v4161_v8 = vpop.f32.mrf.mxu1 }
 0x6e6   :  { %v4344_v48 = vpack.c.bf16 %v4161_v8, %v4158_v22  ;;  %v4765_v22 = vcombine.high %v4277_v59, %v4277_v59  ;;  %v4280_v8 = vadd.f32 %v10527_v32, %v4279_v17 }
 0x6e7   :  { %v11527_v10 = vpop.f32.mrf.mxu1 }
 0x6e9   :  { %11594 = vmatmul.mubr.msk.bf16.gmra.mxu1 %vm1229_vm6, %v4337_v36  ;;  %v4174_v56 = vpop.f32.mrf.mxu1  ;;  %v4292_v36 = vpop.f32.mrf.mxu0 }
 0x6ea   :  { %11597 = vmatprep.mubr.msk.bf16.mxu1 %vm1229_vm6, %v4338_v63  ;;  %v4863_v63 = vcombine.high %v4285_v13, %v4285_v13 }
 0x6eb   :  { %v11528_v60 = vpop.f32.mrf.mxu1  ;;  %v11544_v30 = vpop.f32.mrf.mxu0 }
 0x6ec   :  { %v4347_v4 = vpack.c.bf16 %v11528_v60, %v11527_v10  ;;  %v4912_v10 = vcombine.high %v4288_v58, %v4288_v58 }
 0x6ed   :  { %v4177_v3 = vpop.f32.mrf.mxu1  ;;  %v4295_v60 = vpop.f32.mrf.mxu0 }
 0x6ee   :  { %v4346_v14 = vpack.c.bf16 %v4177_v3, %v4174_v56 }
 0x6f1   :  { %11598 = vmatmul.mubr.msk.bf16.gmra.mxu1 %vm1229_vm6, %v4339_v34  ;;  %v16673_v34 = vld [vmem:[#allocation46_spill] sm:$0xff] }
 0x6f2   :  { %11601 = vmatprep.mubr.msk.bf16.mxu1 %vm1229_vm6, %v4340_v11  ;;  %v4772_v11 = vrot.slane %v4277_v59, %v16673_v34  ;;  %v4779_v56 = vrot.slane %v4765_v22, %v16673_v34  ;;  %v14019_v3 = vrot.slane %v4288_v58, %v16673_v34  ;;  %v4821_v62 = vrot.slane %v4280_v8, %v16673_v34 }
 0x6f4   :  { %v4780_v59 = vcombine.high %v4772_v11, %v4772_v11  ;;  %v4927_v22 = vcombine.high %v14019_v3, %v14019_v3 }
 0x6f9   :  { %11602 = vmatmul.mubr.msk.bf16.gmra.mxu1 %vm1229_vm6, %v4341_v45  ;;  %v4301_v45 = vadd.f32 %v11543_v9, %v10527_v32  ;;  %v14031_v9 = vrot.slane %v4912_v10, %v16673_v34  ;;  %v14043_v10 = vrot.slane %v14019_v3, %v16673_v34 }
 0x6fa   :  { %11605 = vmatprep.mubr.msk.bf16.mxu1 %vm1229_vm6, %v4342_v23  ;;  %v14012_v23 = vrot.slane %v4863_v63, %v16673_v34 }
 0x6fb   :  { %v5059_v43 = vcombine.high %v4301_v45, %v4301_v45  ;;  %v4928_v61 = vcombine.high %v14031_v9, %v14031_v9  ;;  %v14192_v55 = vrot.slane %v14031_v9, %v16673_v34 }
 0x6fd   :  { %v14204_v44 = vrot.slane %v4928_v61, %v16673_v34 }
 0x6ff   :  { %16680 = vst [vmem:[#allocation61_spill] sm:$0xff] %v14204_v44 }
 0x701   :  { %11606 = vmatmul.mubr.msk.bf16.gmra.mxu1 %vm1229_vm6, %v4343_v42  ;;  %v14016_v42 = vrot.slane %v4772_v11, %v16673_v34  ;;  %v14046_v11 = vrot.slane %v5059_v43, %v16673_v34  ;;  %v14066_v43 = vrot.slane %v4780_v59, %v16673_v34 }
 0x702   :  { %11609 = vmatprep.mubr.msk.bf16.mxu1 %vm1229_vm6, %v4344_v48  ;;  %v4293_v48 = vadd.f32 %v10527_v32, %v4292_v36  ;;  %v4781_v36 = vcombine.high %v4779_v56, %v4779_v56 }
 0x703   :  { %v4810_v58 = vcombine.high %v14016_v42, %v14016_v42 }
 0x704   :  { %v4961_v63 = vcombine.high %v4293_v48, %v4293_v48  ;;  %v14088_v20 = vrot.slane %v4781_v36, %v16673_v34 }
 0x705   :  { %v14063_v57 = vrot.slane %v4810_v58, %v12878_v18 }
 0x706   :  { %v14060_v3 = vrot.slane %v4961_v63, %v16673_v34  ;;  %v4813_v54 = vcombine.high %v14088_v20, %v14088_v20 }
 0x708   :  { %v14163_v6 = vrot.slane %v4813_v54, %v12878_v18  ;;  %v14237_v35 = vrot.slane %v14060_v3, %v16673_v34 }
 0x709   :  { %11610 = vmatmul.mubr.msk.bf16.gmra.mxu1 %vm1229_vm6, %v4345_v39  ;;  %v4814_v39 = vcombine.high %v4280_v8, %v4280_v8  ;;  %v14039_v8 = vrot.slane %v4301_v45, %v16673_v34 }
 0x70a   :  { %11613 = vmatprep.mubr.msk.bf16.mxu1 %vm1229_vm6, %v4346_v14  ;;  %v4304_v14 = vadd.f32 %v11544_v30, %v10527_v32  ;;  %16682 = vst [vmem:[#allocation64_spill] sm:$0xff] %v14237_v35 }
 0x70b   :  { %v4828_v30 = vrot.slane %v4814_v39, %v16673_v34  ;;  %v14054_v39 = vrot.slane %v4821_v62, %v16673_v34 }
 0x70c   :  { %v14057_v45 = vrot.slane %v4304_v14, %v16673_v34 }
 0x70d   :  { %v4830_v40 = vcombine.high %v4828_v30, %v4828_v30  ;;  %v4859_v51 = vcombine.high %v14054_v39, %v14054_v39  ;;  %v14119_v1 = vrot.slane %v4828_v30, %v16673_v34 }
 0x70e   :  { %v14098_v29 = vrot.slane %v14057_v45, %v16673_v34 }
 0x70f   :  { %v14154_v30 = vrot.slane %v4859_v51, %v12878_v18  ;;  %v16679_v51 = vcombine.high %v14012_v23, %v14012_v23 }
 0x710   :  { %16677 = vst [vmem:[#allocation60_spill] sm:$0xff] %v14098_v29 }
 0x711   :  { %11614 = vmatmul.mubr.msk.bf16.gmra.mxu1 %vm1229_vm6, %v4347_v4  ;;  %v14173_v41 = vrot.slane %v16679_v51, %v16673_v34  ;;  %v14188_v51 = vrot.slane %v4927_v22, %v16673_v34  ;;  %v12014_v22 = vld [vmem:[%s16279_s7 + $0x38] sm:$0xff]  }
 0x712   :  { %11719 = vmatprep.mubr.msk.bf16.mxu1 %vm702_vm4, %v16621_v19  ;;  %v14009_v19 = vrot.slane %v4285_v13, %v16673_v34  ;;  %v4296_v13 = vadd.f32 %v10527_v32, %v4295_v60  ;;  %v4829_v32 = vcombine.high %v4821_v62, %v4821_v62  ;;  %v14049_v60 = vrot.slane %v4293_v48, %v16673_v34 }
 0x713   :  { %v14069_v48 = vrot.slane %v4779_v56, %v16673_v34  ;;  %11617 = vmatprep.subr.bf16.mxu0 %v12014_v22  ;;  %v4959_v7 = vcombine.high %v14188_v51, %v14188_v51 }
 0x714   :  { %v4878_v4 = vcombine.high %v14009_v19, %v14009_v19  ;;  %v14028_v17 = vrot.slane %v14009_v19, %v16673_v34  ;;  %v5108_v19 = vcombine.high %v4304_v14, %v4304_v14  ;;  %v5010_v24 = vcombine.high %v4296_v13, %v4296_v13  ;;  %11618 = vmatpush3.bf16.msra.mxu0 %v12014_v22 }
 0x715   :  { %v14075_v14 = vrot.slane %v14039_v8, %v16673_v34  ;;  %v4976_v59 = vcombine.high %v14049_v60, %v14049_v60  ;;  %v14085_v56 = vrot.slane %v4296_v13, %v16673_v34  ;;  %v14092_v62 = vrot.slane %v14049_v60, %v16673_v34  ;;  %11619 = vmatprep.subr.bf16.mxu0 %v12015_v25 }
 0x716   :  { %v14078_v63 = vrot.slane %v5108_v19, %v16673_v34  ;;  %v14101_v58 = vrot.slane %v5010_v24, %v16673_v34  ;;  %v4977_v13 = vcombine.high %v14060_v3, %v14060_v3  ;;  %v4812_v60 = vcombine.high %v14066_v43, %v14066_v43 }
 0x717   :  { %16674 = vst [vmem:[#allocation59_spill] sm:$0xff] %v14075_v14  ;;  %16676 = vst [vmem:[#allocation68_spill] sm:$0xff] %v14092_v62  ;;  %v4811_v21 = vcombine.high %v14069_v48, %v14069_v48  ;;  %v14116_v24 = vrot.slane %v4829_v32, %v16673_v34  ;;  %v14125_v0 = vrot.slane %v14085_v56, %v16673_v34 }
 0x718   :  { %16675 = vst [vmem:[#allocation47_spill] sm:$0xff] %v14078_v63  ;;  %v14130_v19 = vrot.slane %v4830_v40, %v16673_v34  ;;  %v14139_v36 = vrot.slane %v4878_v4, %v16673_v34  ;;  %v14142_v26 = vrot.slane %v4812_v60, %v12878_v18  ;;  %v14151_v32 = vrot.slane %v14012_v23, %v16673_v34 }
 0x719   :  { %16678 = vst [vmem:[#allocation69_spill] sm:$0xff] %v14125_v0  ;;  %v14145_v2 = vrot.slane %v4811_v21, %v12878_v18  ;;  %v4861_v4 = vcombine.high %v14116_v24, %v14116_v24  ;;  %v4860_v60 = vcombine.high %v14119_v1, %v14119_v1  ;;  %v4908_v21 = vcombine.high %v14028_v17, %v14028_v17 }
 0x71a   :  { %v4862_v52 = vcombine.high %v14130_v19, %v14130_v19  ;;  %v4910_v40 = vcombine.high %v14139_v36, %v14139_v36  ;;  %v4909_v23 = vcombine.high %v14151_v32, %v14151_v32  ;;  %v5006_v28 = vcombine.high %v14092_v62, %v14092_v62  ;;  %11620 = vmatpush3.bf16.msra.mxu0 %v12015_v25  ;;  %v12016_v25 = vld [vmem:[%s16279_s7 + $0x28] sm:$0xff]  }
 0x71b   :  { %v14195_v53 = vrot.slane %v4861_v4, %v12878_v18  ;;  %v14198_v54 = vrot.slane %v4860_v60, %v12878_v18  ;;  %v14201_v27 = vrot.slane %v4908_v21, %v12878_v18  ;;  %v4911_v4 = vcombine.high %v14173_v41, %v14173_v41  ;;  %11621 = vmatprep.subr.bf16.mxu0 %v12016_v25 }
 0x71c   :  { %v14210_v5 = vrot.slane %v4862_v52, %v12878_v18  ;;  %v4957_v60 = vcombine.high %v14043_v10, %v14043_v10  ;;  %v14219_v21 = vrot.slane %v4910_v40, %v12878_v18  ;;  %v14226_v52 = vrot.slane %v4976_v59, %v16673_v34 }
 0x71d   :  { %v14229_v9 = vrot.slane %v4909_v23, %v12878_v18  ;;  %v4958_v40 = vcombine.high %v14192_v55, %v14192_v55  ;;  %v4960_v23 = vcombine.high %v14204_v44, %v14204_v44  ;;  %v14246_v47 = vrot.slane %v4977_v13, %v16673_v34 }
 0x71e   :  { %16681 = vst [vmem:[#allocation71_spill] sm:$0xff] %v14226_v52  ;;  %v14252_v3 = vrot.slane %v4911_v4, %v12878_v18  ;;  %v14255_v22 = vrot.slane %v4957_v60, %v12878_v18  ;;  %v14264_v46 = vrot.slane %v5006_v28, %v12878_v18  ;;  %v5008_v12 = vcombine.high %v14226_v52, %v14226_v52 }
 0x71f   :  { %16683 = vst [vmem:[#allocation65_spill] sm:$0xff] %v14246_v47  ;;  %v5055_v4 = vcombine.high %v14125_v0, %v14125_v0  ;;  %v14271_v60 = vrot.slane %v4959_v7, %v12878_v18  ;;  %v14274_v61 = vrot.slane %v4958_v40, %v12878_v18  ;;  %v5007_v59 = vcombine.high %v14237_v35, %v14237_v35 }
 0x720   :  { %16684 = vst [vmem:[#allocation48_spill] sm:$0xff] %v14264_v46  ;;  %v16685_v28 = vcombine.high %v14085_v56, %v14085_v56  ;;  %v14285_v33 = vrot.slane %v4960_v23, %v12878_v18  ;;  %v5009_v49 = vcombine.high %v14246_v47, %v14246_v47  ;;  %v14303_v7 = vrot.slane %v14101_v58, %v16673_v34 }
 0x721   :  { %v14306_v15 = vrot.slane %v5008_v12, %v12878_v18  ;;  %v14311_v16 = vrot.slane %v5055_v4, %v12878_v18  ;;  %v14323_v12 = vrot.slane %v5007_v59, %v12878_v18  ;;  %11622 = vmatpush3.bf16.msra.mxu0 %v12016_v25  ;;  %v16698_v59 = vcombine.high %v14039_v8, %v14039_v8 }
 0x722   :  { %v14282_v13 = vrot.slane %v16685_v28, %v16673_v34  ;;  %16687 = vst [vmem:[#allocation66_spill] sm:$0xff] %v14303_v7  ;;  %v16692_v28 = vrot.slane %v14016_v42, %v12878_v18  ;;  %v14328_v50 = vrot.slane %v5009_v49, %v12878_v18  ;;  %v5104_v42 = vcombine.high %v14075_v14, %v14075_v14 }
 0x723   :  { %16688 = vst [vmem:[#allocation73_spill] sm:$0xff] %v14306_v15  ;;  %16689 = vst [vmem:[#allocation67_spill] sm:$0xff] %v14311_v16  ;;  %v5056_v49 = vcombine.high %v14303_v7, %v14303_v7 }
 0x724   :  { %16686 = vst [vmem:[#allocation72_spill] sm:$0xff] %v14282_v13  ;;  %16693 = vst [vmem:[#allocation70_spill] sm:$0xff] %v14323_v12  ;;  %v5057_v4 = vcombine.high %v14282_v13, %v14282_v13  ;;  %v14357_v7 = vrot.slane %v5104_v42, %v12878_v18 }
 0x725   :  { %16694 = vst [vmem:[#allocation23_spill] sm:$0xff] %v14328_v50 }
 0x726   :  { %v14354_v14 = vrot.slane %v5057_v4, %v12878_v18  ;;  %16697 = vst [vmem:[#allocation30_spill] sm:$0xff] %v14357_v7  ;;  %v14369_v4 = vrot.slane %v14046_v11, %v16673_v34 }
 0x728   :  { %16696 = vst [vmem:[#allocation24_spill] sm:$0xff] %v14354_v14  ;;  %16700 = vst [vmem:[#allocation18_spill] sm:$0xff] %v14369_v4 }
 0x759   :  { %v11555_v38 = vpop.f32.mrf.mxu1 }
 0x75a   :  { %v5479_v56 = vadd.f32 %v11555_v38, %v14063_v57  ;;  %v16690_v38 = vcombine.high %v14101_v58, %v14101_v58  ;;  %v12017_v58 = vld [vmem:[%s16279_s7 + $0x20] sm:$0xff]  }
 0x75b   :  { %v4502_v40 = vpop.f32.mrf.mxu1  ;;  %11623 = vmatprep.subr.bf16.mxu0 %v12017_v58 }
 0x75c   :  { %v14317_v57 = vrot.slane %v16690_v38, %v16673_v34  ;;  %v5543_v23 = vmax.f32 %v5479_v56, 0.0  ;;  %v5477_v31 = vadd.f32 %v16692_v28, %v4502_v40  ;;  %11624 = vmatpush3.bf16.msra.mxu0 %v12017_v58 }
 0x75d   :  { %v11556_v37 = vpop.f32.mrf.mxu1 }
 0x75e   :  { %16691 = vst [vmem:[#allocation74_spill] sm:$0xff] %v14317_v57  ;;  %v5619_v40 = vsel %vm1229_vm6, %v5543_v23, 0.0  ;;  %v5541_v25 = vmax.f32 %v5477_v31, 0.0  ;;  %v5480_v28 = vadd.f32 %v11556_v37, %v14142_v26  ;;  %v5058_v13 = vcombine.high %v14317_v57, %v14317_v57 }
 0x75f   :  { %v5620_v38 = vrot.slane %v5619_v40, 4  ;;  %v4505_v0 = vpop.f32.mrf.mxu1  ;;  %v16695_v37 = vrot.slane %v14066_v43, %v12878_v18 }
 0x760   :  { %v5605_v23 = vsel %vm1229_vm6, %v5541_v25, 0.0  ;;  %v5544_v31 = vmax.f32 %v5480_v28, 0.0  ;;  %v14363_v25 = vrot.slane %v16698_v59, %v16673_v34 }
 0x761   :  { %v5478_v26 = vadd.f32 %v16695_v37, %v4505_v0  ;;  %v5621_v63 = vadd.f32 %v5620_v38, %v5619_v40  ;;  %v5606_v16 = vrot.slane %v5605_v23, 4  ;;  %v11559_v56 = vpop.f32.mrf.mxu1  ;;  %v14372_v37 = vrot.slane %v5056_v49, %v12878_v18 }
 0x762   :  { %16699 = vst [vmem:[#allocation28_spill] sm:$0xff] %v14363_v25  ;;  %v5626_v28 = vsel %vm1229_vm6, %v5544_v31, 0.0  ;;  %v5483_v0 = vadd.f32 %v11559_v56, %v14145_v2  ;;  %v16702_v31 = vrot.slane %v14069_v48, %v12878_v18  ;;  %v14379_v2 = vrot.slane %v5058_v13, %v12878_v18 }
 0x763   :  { %v5542_v43 = vmax.f32 %v5478_v26, 0.0  ;;  %v5622_v58 = vrot.slane %v5621_v63, 2  ;;  %v5607_v40 = vadd.f32 %v5606_v16, %v5605_v23  ;;  %v5627_v38 = vrot.slane %v5626_v28, 4  ;;  %v4518_v42 = vpop.f32.mrf.mxu1  ;;  %16701 = vst [vmem:[#allocation19_spill] sm:$0xff] %v14372_v37 }
 0x764   :  { %v5547_v59 = vmax.f32 %v5483_v0, 0.0  ;;  %v5481_v26 = vadd.f32 %v16702_v31, %v4518_v42  ;;  %16703 = vst [vmem:[#allocation20_spill] sm:$0xff] %v14379_v2 }
 0x765   :  { %v5612_v8 = vsel %vm1229_vm6, %v5542_v43, 0.0  ;;  %v5623_v56 = vadd.f32 %v5622_v58, %v5621_v63  ;;  %v5608_v7 = vrot.slane %v5607_v40, 2  ;;  %v5628_v57 = vadd.f32 %v5627_v38, %v5626_v28  ;;  %v11560_v16 = vpop.f32.mrf.mxu1 }
 0x766   :  { %v5613_v14 = vrot.slane %v5612_v8, 4  ;;  %v5647_v23 = vsel %vm1229_vm6, %v5547_v59, 0.0  ;;  %v5545_v47 = vmax.f32 %v5481_v26, 0.0  ;;  %v5484_v49 = vadd.f32 %v11560_v16, %v14163_v6 }
 0x767   :  { %v16704_v43 = vcombine.high %v14046_v11, %v14046_v11  ;;  %v5609_v48 = vadd.f32 %v5608_v7, %v5607_v40  ;;  %v5629_v42 = vrot.slane %v5628_v57, 2  ;;  %v4521_v31 = vpop.f32.mrf.mxu1  ;;  %v5153_v63 = vcombine.high %v14098_v29, %v14098_v29 }
 0x768   :  { %v5614_v13 = vadd.f32 %v5613_v14, %v5612_v8  ;;  %v5648_v28 = vrot.slane %v5647_v23, 4  ;;  %v5633_v58 = vsel %vm1229_vm6, %v5545_v47, 0.0  ;;  %v5548_v38 = vmax.f32 %v5484_v49, 0.0 }
 0x769   :  { %v14387_v0 = vrot.slane %v16704_v43, %v16673_v34  ;;  %v16706_v6 = vrot.slane %v14088_v20, %v12878_v18  ;;  %v5624_v26 = vrot.slane %v5623_v56, 1  ;;  %v5630_v16 = vadd.f32 %v5629_v42, %v5628_v57  ;;  %v11563_v43 = vpop.f32.mrf.mxu1 }
 0x76a   :  { %v5615_v11 = vrot.slane %v5614_v13, 2  ;;  %v5106_v7 = vcombine.high %v14363_v25, %v14363_v25  ;;  %v5649_v14 = vadd.f32 %v5648_v28, %v5647_v23  ;;  %v5634_v40 = vrot.slane %v5633_v58, 4 }
 0x76b   :  { %16705 = vst [vmem:[#allocation22_spill] sm:$0xff] %v14387_v0  ;;  %v5482_v59 = vadd.f32 %v16706_v6, %v4521_v31  ;;  %v5654_v8 = vsel %vm1229_vm6, %v5548_v38, 0.0  ;;  %v5610_v37 = vrot.slane %v5609_v48, 1  ;;  %v5631_v50 = vrot.slane %v5630_v16, 1  ;;  %v4534_v49 = vpop.f32.mrf.mxu1 }
 0x76c   :  { %v5616_v47 = vadd.f32 %v5615_v11, %v5614_v13  ;;  %v5650_v31 = vrot.slane %v5649_v14, 2  ;;  %v5635_v6 = vadd.f32 %v5634_v40, %v5633_v58  ;;  %v5655_v57 = vrot.slane %v5654_v8, 4 }
 0x76d   :  { %v5546_v2 = vmax.f32 %v5482_v59, 0.0  ;;  %v11564_v12 = vpop.f32.mrf.mxu1  ;;  %v5105_v23 = vcombine.high %v14369_v4, %v14369_v4  ;;  %v5107_v13 = vcombine.high %v14387_v0, %v14387_v0  ;;  %v5625_v38 = vadd.f32 %v5624_v26, %v5623_v56 }
 0x76e   :  { %v5617_v35 = vrot.slane %v5616_v47, 1  ;;  %v5651_v59 = vadd.f32 %v5650_v31, %v5649_v14  ;;  %v5636_v11 = vrot.slane %v5635_v6, 2  ;;  %v5656_v20 = vadd.f32 %v5655_v57, %v5654_v8 }
 0x76f   :  { %v5640_v42 = vsel %vm1229_vm6, %v5546_v2, 0.0  ;;  %v5487_v40 = vadd.f32 %v11563_v43, %v14154_v30  ;;  %v4537_v2 = vpop.f32.mrf.mxu1  ;;  %v5611_v15 = vadd.f32 %v5610_v37, %v5609_v48  ;;  %v5632_v62 = vadd.f32 %v5631_v50, %v5630_v16 }
 0x770   :  { %v5618_v25 = vadd.f32 %v5617_v35, %v5616_v47  ;;  %v5641_v58 = vrot.slane %v5640_v42, 4  ;;  %v5652_v46 = vrot.slane %v5651_v59, 1  ;;  %v14411_v28 = vrot.slane %v5153_v63, %v12878_v18 }
 0x771   :  { %v5637_v4 = vadd.f32 %v5636_v11, %v5635_v6  ;;  %v5551_v44 = vmax.f32 %v5487_v40, 0.0  ;;  %v16708_v56 = vrot.slane %v14054_v39, %v12878_v18  ;;  %v11567_v35 = vpop.f32.mrf.mxu1  ;;  %v14417_v14 = vrot.slane %v5106_v7, %v12878_v18 }
 0x772   :  { %16707 = vst [vmem:[#allocation21_spill] sm:$0xff] %v14411_v28  ;;  %v6064_v30 = vpack.c.bf16 %v5625_v38, %v5625_v38  ;;  %v6063_v43 = vpack.c.bf16 %v5618_v25, %v5618_v25  ;;  %v5657_v8 = vrot.slane %v5656_v20, 2  ;;  %v14420_v37 = vrot.slane %v5105_v23, %v12878_v18 }
 0x773   :  { %v5485_v26 = vadd.f32 %v16708_v56, %v4534_v49  ;;  %v5642_v50 = vadd.f32 %v5641_v58, %v5640_v42  ;;  %v5675_v48 = vsel %vm1229_vm6, %v5551_v44, 0.0  ;;  %v5488_v16 = vadd.f32 %v11564_v12, %v14195_v53  ;;  %v4550_v47 = vpop.f32.mrf.mxu1 }
 0x774   :  { %v6062_v31 = vpack.c.bf16 %v5611_v15, %v5611_v15  ;;  %v6065_v39 = vpack.c.bf16 %v5632_v62, %v5632_v62  ;;  %v5653_v49 = vadd.f32 %v5652_v46, %v5651_v59  ;;  %v5638_v6 = vrot.slane %v5637_v4, 1 }
 0x775   :  { %v5549_v63 = vmax.f32 %v5485_v26, 0.0  ;;  %v5676_v57 = vrot.slane %v5675_v48, 4  ;;  %v5552_v38 = vmax.f32 %v5488_v16, 0.0  ;;  %v11568_v23 = vpop.f32.mrf.mxu1  ;;  %v6200_v11 = vunpack.c.l.b16 %v6063_v43 }
 0x776   :  { %v5658_v42 = vadd.f32 %v5657_v8, %v5656_v20  ;;  %v14428_v44 = vrot.slane %v5107_v13, %v12878_v18  ;;  %v16710_v15 = vcombine.high %v14057_v45, %v14057_v45  ;;  %v6201_v46 = vunpack.c.l.b16 %v6064_v30 }
 0x777   :  { %v5661_v25 = vsel %vm1229_vm6, %v5549_v63, 0.0  ;;  %v5643_v62 = vrot.slane %v5642_v50, 2  ;;  %v5677_v12 = vadd.f32 %v5676_v57, %v5675_v48  ;;  %v4553_v58 = vpop.f32.mrf.mxu1  ;;  %v6199_v40 = vunpack.c.l.b16 %v6062_v31 }
 0x778   :  { %16709 = vst [vmem:[#allocation25_spill] sm:$0xff] %v14428_v44  ;;  %v14434_v53 = vrot.slane %v16710_v15, %v16673_v34  ;;  %v5662_v59 = vrot.slane %v5661_v25, 4  ;;  %v6202_v56 = vunpack.c.l.b16 %v6065_v39  ;;  %v5682_v26 = vsel %vm1229_vm6, %v5552_v38, 0.0 }
 0x779   :  { %v16711_v20 = vrot.slane %v14116_v24, %v12878_v18  ;;  %v6068_v43 = vpack.c.bf16 %v5653_v49, %v5653_v49  ;;  %v5639_v8 = vadd.f32 %v5638_v6, %v5637_v4  ;;  %v5683_v16 = vrot.slane %v5682_v26, 4  ;;  %v11571_v45 = vpop.f32.mrf.mxu1 }
 0x77a   :  { %v5663_v63 = vadd.f32 %v5662_v59, %v5661_v25  ;;  %v6263_v15 = vsel %vm3260_vm9, %v6200_v11, %v6199_v40  ;;  %v5659_v30 = vrot.slane %v5658_v42, 1  ;;  %v5491_v48 = vadd.f32 %v11567_v35, %v14198_v54 }
 0x77b   :  { %v5486_v13 = vadd.f32 %v16711_v20, %v4537_v2  ;;  %v5644_v57 = vadd.f32 %v5643_v62, %v5642_v50  ;;  %v5678_v31 = vrot.slane %v5677_v12, 2  ;;  %v5684_v52 = vadd.f32 %v5683_v16, %v5682_v26  ;;  %v4566_v38 = vpop.f32.mrf.mxu1 }
 0x77c   :  { %v5664_v39 = vrot.slane %v5663_v63, 2  ;;  %v5555_v24 = vmax.f32 %v5491_v48, 0.0  ;;  %v16712_v4 = vrot.slane %v14119_v1, %v12878_v18  ;;  %v5492_v49 = vadd.f32 %v11568_v23, %v14210_v5 }
 0x77d   :  { %v5550_v7 = vmax.f32 %v5486_v13, 0.0  ;;  %v6264_v6 = vsel %vm3262_vm10, %v6201_v46, %v6263_v15  ;;  %v14448_v25 = vunpack.c.l.b16 %v6068_v43  ;;  %v6066_v11 = vpack.c.bf16 %v5639_v8, %v5639_v8  ;;  %v11572_v35 = vpop.f32.mrf.mxu1 }
 0x77e   :  { %v5489_v2 = vadd.f32 %v16712_v4, %v4550_v47  ;;  %v5685_v54 = vrot.slane %v5684_v52, 2  ;;  %v5703_v62 = vsel %vm1229_vm6, %v5555_v24, 0.0  ;;  %v5556_v40 = vmax.f32 %v5492_v49, 0.0 }
 0x77f   :  { %v5668_v29 = vsel %vm1229_vm6, %v5550_v7, 0.0  ;;  %v5679_v7 = vadd.f32 %v5678_v31, %v5677_v12  ;;  %v5665_v26 = vadd.f32 %v5664_v39, %v5663_v63  ;;  %v5704_v13 = vrot.slane %v5703_v62, 4  ;;  %v14451_v1 = vpop.f32.mrf.mxu1 }
 0x780   :  { %v5669_v50 = vrot.slane %v5668_v29, 4  ;;  %v5553_v59 = vmax.f32 %v5489_v2, 0.0  ;;  %v5686_v20 = vadd.f32 %v5685_v54, %v5684_v52  ;;  %v5710_v23 = vsel %vm1229_vm6, %v5556_v40, 0.0 }
 0x781   :  { %v16713_v46 = vrot.slane %v14130_v19, %v12878_v18  ;;  %v6265_v8 = vsel %vm3264_vm11, %v6202_v56, %v6264_v6  ;;  %v5660_v16 = vadd.f32 %v5659_v30, %v5658_v42  ;;  %v5645_v15 = vrot.slane %v5644_v57, 1  ;;  %v14459_v12 = vpop.f32.mrf.mxu1 }
 0x782   :  { %v5670_v47 = vadd.f32 %v5669_v50, %v5668_v29  ;;  %v5689_v5 = vsel %vm1229_vm6, %v5553_v59, 0.0  ;;  %v5705_v48 = vadd.f32 %v5704_v13, %v5703_v62  ;;  %v5711_v31 = vrot.slane %v5710_v23, 4 }
 0x783   :  { %v5490_v43 = vadd.f32 %v16713_v46, %v4553_v58  ;;  %v5690_v63 = vrot.slane %v5689_v5, 4  ;;  %v5680_v29 = vrot.slane %v5679_v7, 1  ;;  %v5666_v24 = vrot.slane %v5665_v26, 1  ;;  %v14461_v49 = vpop.f32.mrf.mxu1 }
 0x784   :  { %v5671_v52 = vrot.slane %v5670_v47, 2  ;;  %v5687_v4 = vrot.slane %v5686_v20, 1  ;;  %v5706_v2 = vrot.slane %v5705_v48, 2  ;;  %v5712_v58 = vadd.f32 %v5711_v31, %v5710_v23 }
 0x785   :  { %v5554_v39 = vmax.f32 %v5490_v43, 0.0  ;;  %v5691_v19 = vadd.f32 %v5690_v63, %v5689_v5  ;;  %v6203_v42 = vunpack.c.l.b16 %v6066_v11  ;;  %v6069_v30 = vpack.c.bf16 %v5660_v16, %v5660_v16  ;;  %v14464_v62 = vpop.f32.mrf.mxu1 }
 0x786   :  { %v5672_v54 = vadd.f32 %v5671_v52, %v5670_v47  ;;  %v5707_v6 = vadd.f32 %v5706_v2, %v5705_v48  ;;  %v5713_v13 = vrot.slane %v5712_v58, 2  ;;  %v5495_v46 = vadd.f32 %v11571_v45, %v14201_v27 }
 0x787   :  { %v5696_v56 = vsel %vm1229_vm6, %v5554_v39, 0.0  ;;  %v5692_v40 = vrot.slane %v5691_v19, 2  ;;  %v5646_v43 = vadd.f32 %v5645_v15, %v5644_v57  ;;  %v5681_v28 = vadd.f32 %v5680_v29, %v5679_v7  ;;  %v4585_v23 = vpop.f32.mrf.mxu1 }
 0x788   :  { %v5697_v50 = vrot.slane %v5696_v56, 4  ;;  %v5673_v59 = vrot.slane %v5672_v54, 1  ;;  %v5708_v0 = vrot.slane %v5707_v6, 1  ;;  %v16714_v47 = vrot.slane %v14028_v17, %v12878_v18 }
 0x789   :  { %v5667_v52 = vadd.f32 %v5666_v24, %v5665_v26  ;;  %v5688_v11 = vadd.f32 %v5687_v4, %v5686_v20  ;;  %v5559_v48 = vmax.f32 %v5495_v46, 0.0  ;;  %v5693_v31 = vadd.f32 %v5692_v40, %v5691_v19  ;;  %v14471_v44 = vpop.f32.mrf.mxu1 }
 0x78a   :  { %v5493_v5 = vadd.f32 %v16714_v47, %v4566_v38  ;;  %v5698_v16 = vadd.f32 %v5697_v50, %v5696_v56  ;;  %v5674_v63 = vadd.f32 %v5673_v59, %v5672_v54  ;;  %v5496_v2 = vadd.f32 %v11572_v35, %v14219_v21 }
 0x78b   :  { %v14474_v27 = vsel %vm3266_vm12, %v6203_v42, %v6265_v8  ;;  %v5709_v45 = vadd.f32 %v5708_v0, %v5707_v6  ;;  %v5714_v57 = vadd.f32 %v5713_v13, %v5712_v58  ;;  %v5731_v17 = vsel %vm1229_vm6, %v5559_v48, 0.0  ;;  %v14478_v15 = vpop.f32.mrf.mxu1 }
 0x78c   :  { %v5557_v39 = vmax.f32 %v5493_v5, 0.0  ;;  %v6067_v38 = vpack.c.bf16 %v5646_v43, %v5646_v43  ;;  %v6072_v7 = vpack.c.bf16 %v5681_v28, %v5681_v28  ;;  %v5732_v26 = vrot.slane %v5731_v17, 4 }
 0x78d   :  { %v6070_v29 = vpack.c.bf16 %v5667_v52, %v5667_v52  ;;  %v6073_v24 = vpack.c.bf16 %v5688_v11, %v5688_v11  ;;  %v5699_v4 = vrot.slane %v5698_v16, 2  ;;  %v6071_v35 = vpack.c.bf16 %v5674_v63, %v5674_v63  ;;  %v14480_v56 = vpop.f32.mrf.mxu1 }
 0x78e   :  { %v5717_v20 = vsel %vm1229_vm6, %v5557_v39, 0.0  ;;  %v5694_v54 = vrot.slane %v5693_v31, 1  ;;  %v5733_v19 = vadd.f32 %v5732_v26, %v5731_v17  ;;  %v5560_v8 = vmax.f32 %v5496_v2, 0.0 }
 0x78f   :  { %v5718_v21 = vrot.slane %v5717_v20, 4  ;;  %v14482_v0 = vunpack.c.l.b16 %v6069_v30  ;;  %v6076_v58 = vpack.c.bf16 %v5709_v45, %v5709_v45  ;;  %v5715_v42 = vrot.slane %v5714_v57, 1  ;;  %v14487_v13 = vpop.f32.mrf.mxu1 }
 0x790   :  { %v14484_v6 = vunpack.c.l.b16 %v6067_v38  ;;  %v6209_v50 = vunpack.c.l.b16 %v6072_v7  ;;  %v5734_v59 = vrot.slane %v5733_v19, 2  ;;  %v5738_v40 = vsel %vm1229_vm6, %v5560_v8, 0.0 }
 0x791   :  { %v5719_v28 = vadd.f32 %v5718_v21, %v5717_v20  ;;  %v6207_v46 = vunpack.c.l.b16 %v6070_v29  ;;  %v14489_v43 = vunpack.c.l.b16 %v6073_v24  ;;  %v5700_v47 = vadd.f32 %v5699_v4, %v5698_v16  ;;  %v14495_v39 = vpop.f32.mrf.mxu1 }
 0x792   :  { %v6208_v52 = vunpack.c.l.b16 %v6071_v35  ;;  %v5695_v11 = vadd.f32 %v5694_v54, %v5693_v31  ;;  %v5739_v30 = vrot.slane %v5738_v40, 4  ;;  %v16715_v48 = vrot.slane %v14139_v36, %v12878_v18 }
 0x793   :  { %v5720_v5 = vrot.slane %v5719_v28, 2  ;;  %v14497_v2 = vunpack.c.l.b16 %v6076_v58  ;;  %v14499_v45 = vadd.f32 %v5715_v42, %v5714_v57  ;;  %v5499_v17 = vadd.f32 %v14459_v12, %v14229_v9  ;;  %v14507_v36 = vpop.f32.mrf.mxu1 }
 0x794   :  { %v5494_v63 = vadd.f32 %v16715_v48, %v14451_v1  ;;  %v16716_v16 = vrot.slane %v14151_v32, %v12878_v18  ;;  %v5735_v38 = vadd.f32 %v5734_v59, %v5733_v19  ;;  %v5740_v26 = vadd.f32 %v5739_v30, %v5738_v40 }
 0x795   :  { %v5721_v7 = vadd.f32 %v5720_v5, %v5719_v28  ;;  %v5701_v1 = vrot.slane %v5700_v47, 1  ;;  %v5563_v29 = vmax.f32 %v5499_v17, 0.0  ;;  %v5500_v57 = vadd.f32 %v14464_v62, %v14252_v3  ;;  %v14516_v21 = vpop.f32.mrf.mxu1 }
 0x796   :  { %v5497_v31 = vadd.f32 %v16716_v16, %v14461_v49  ;;  %v5558_v20 = vmax.f32 %v5494_v63, 0.0  ;;  %v6270_v4 = vsel %vm3260_vm9, %v6208_v52, %v6207_v46  ;;  %v5741_v9 = vrot.slane %v5740_v26, 2 }
 0x797   :  { %v16717_v32 = vrot.slane %v14173_v41, %v12878_v18  ;;  %v6074_v35 = vpack.c.bf16 %v5695_v11, %v5695_v11  ;;  %v5759_v19 = vsel %vm1229_vm6, %v5563_v29, 0.0  ;;  %v5736_v58 = vrot.slane %v5735_v38, 1  ;;  %v14520_v28 = vpop.f32.mrf.mxu1 }
 0x798   :  { %v5561_v24 = vmax.f32 %v5497_v31, 0.0  ;;  %v5724_v12 = vsel %vm1229_vm6, %v5558_v20, 0.0  ;;  %v5722_v42 = vrot.slane %v5721_v7, 1  ;;  %v5760_v3 = vrot.slane %v5759_v19, 4 }
 0x799   :  { %v5498_v49 = vadd.f32 %v16717_v32, %v4585_v23  ;;  %v5725_v54 = vrot.slane %v5724_v12, 4  ;;  %v6271_v59 = vsel %vm3262_vm10, %v6209_v50, %v6270_v4  ;;  %v5564_v46 = vmax.f32 %v5500_v57, 0.0  ;;  %v14525_v30 = vpop.f32.mrf.mxu1 }
 0x79a   :  { %v5745_v8 = vsel %vm1229_vm6, %v5561_v24, 0.0  ;;  %v14523_v23 = vadd.f32 %v5701_v1, %v5700_v47  ;;  %v5742_v5 = vadd.f32 %v5741_v9, %v5740_v26  ;;  %v5761_v52 = vadd.f32 %v5760_v3, %v5759_v19 }
 0x79b   :  { %v5746_v62 = vrot.slane %v5745_v8, 4  ;;  %v5726_v40 = vadd.f32 %v5725_v54, %v5724_v12  ;;  %v5562_v41 = vmax.f32 %v5498_v49, 0.0  ;;  %v6211_v48 = vunpack.c.l.b16 %v6074_v35  ;;  %v14529_v24 = vpop.f32.mrf.mxu1 }
 0x79c   :  { %v5766_v17 = vsel %vm1229_vm6, %v5564_v46, 0.0  ;;  %v5737_v31 = vadd.f32 %v5736_v58, %v5735_v38  ;;  %v5723_v20 = vadd.f32 %v5722_v42, %v5721_v7  ;;  %v5503_v26 = vadd.f32 %v14471_v44, %v14255_v22 }
 0x79d   :  { %v5747_v11 = vadd.f32 %v5746_v62, %v5745_v8  ;;  %v5727_v63 = vrot.slane %v5726_v40, 2  ;;  %v5752_v16 = vsel %vm1229_vm6, %v5562_v41, 0.0  ;;  %v5767_v50 = vrot.slane %v5766_v17, 4  ;;  %v14537_v38 = vpop.f32.mrf.mxu1 }
 0x79e   :  { %v5753_v47 = vrot.slane %v5752_v16, 4  ;;  %v16718_v1 = vrot.slane %v14043_v10, %v12878_v18  ;;  %v5743_v9 = vrot.slane %v5742_v5, 1  ;;  %v5762_v12 = vrot.slane %v5761_v52, 2 }
 0x79f   :  { %v5748_v29 = vrot.slane %v5747_v11, 2  ;;  %v5728_v57 = vadd.f32 %v5727_v63, %v5726_v40  ;;  %v5768_v49 = vadd.f32 %v5767_v50, %v5766_v17  ;;  %v5567_v54 = vmax.f32 %v5503_v26, 0.0  ;;  %v14541_v42 = vpop.f32.mrf.mxu1 }
 0x7a0   :  { %v5501_v4 = vadd.f32 %v16718_v1, %v14478_v15  ;;  %v5754_v35 = vadd.f32 %v5753_v47, %v5752_v16  ;;  %v6272_v8 = vsel %vm3264_vm11, %v14489_v43, %v6271_v59  ;;  %v6080_v58 = vpack.c.bf16 %v5737_v31, %v5737_v31 }
 0x7a1   :  { %v5749_v32 = vadd.f32 %v5748_v29, %v5747_v11  ;;  %v5729_v7 = vrot.slane %v5728_v57, 1  ;;  %v6078_v22 = vpack.c.bf16 %v5723_v20, %v5723_v20  ;;  %v5787_v3 = vsel %vm1229_vm6, %v5567_v54, 0.0  ;;  %v14545_v63 = vpop.f32.mrf.mxu1 }
 0x7a2   :  { %v5565_v19 = vmax.f32 %v5501_v4, 0.0  ;;  %v5755_v15 = vrot.slane %v5754_v35, 2  ;;  %v5744_v40 = vadd.f32 %v5743_v9, %v5742_v5  ;;  %v5763_v46 = vadd.f32 %v5762_v12, %v5761_v52 }
 0x7a3   :  { %v5750_v44 = vrot.slane %v5749_v32, 1  ;;  %v5730_v10 = vadd.f32 %v5729_v7, %v5728_v57  ;;  %v5769_v41 = vrot.slane %v5768_v49, 2  ;;  %v5788_v11 = vrot.slane %v5787_v3, 4  ;;  %v14551_v12 = vpop.f32.mrf.mxu1 }
 0x7a4   :  { %v5773_v62 = vsel %vm1229_vm6, %v5565_v19, 0.0  ;;  %v5756_v16 = vadd.f32 %v5755_v15, %v5754_v35  ;;  %v5504_v59 = vadd.f32 %v14480_v56, %v14271_v60  ;;  %v6075_v31 = vpack.c.bf16 %v14523_v23, %v14523_v23 }
 0x7a5   :  { %v6079_v17 = vpack.c.bf16 %v5730_v10, %v5730_v10  ;;  %v5774_v43 = vrot.slane %v5773_v62, 4  ;;  %v6217_v20 = vunpack.c.l.b16 %v6080_v58  ;;  %v5751_v29 = vadd.f32 %v5750_v44, %v5749_v32 }
 0x7a6   :  { %v5789_v50 = vadd.f32 %v5788_v11, %v5787_v3  ;;  %v6215_v57 = vunpack.c.l.b16 %v6078_v22  ;;  %v5568_v52 = vmax.f32 %v5504_v59, 0.0  ;;  %v6081_v26 = vpack.c.bf16 %v5744_v40, %v5744_v40 }
 0x7a7   :  { %v6216_v47 = vunpack.c.l.b16 %v6079_v17  ;;  %v5775_v5 = vadd.f32 %v5774_v43, %v5773_v62  ;;  %v5764_v1 = vrot.slane %v5763_v46, 1  ;;  %v5770_v4 = vadd.f32 %v5769_v41, %v5768_v49 }
 0x7a8   :  { %v5790_v9 = vrot.slane %v5789_v50, 2  ;;  %v5757_v35 = vrot.slane %v5756_v16, 1  ;;  %v5794_v56 = vsel %vm1229_vm6, %v5568_v52, 0.0  ;;  %v6273_v23 = vsel %vm3266_vm12, %v6211_v48, %v6272_v8  ;;  %v14565_v48 = vpop.f32.mrf.mxu1 }
 0x7a9   :  { %v6277_v7 = vsel %vm3260_vm9, %v6216_v47, %v6215_v57  ;;  %v5776_v60 = vrot.slane %v5775_v5, 2  ;;  %v6077_v32 = vpack.c.bf16 %v14499_v45, %v14499_v45  ;;  %v6082_v54 = vpack.c.bf16 %v5751_v29, %v5751_v29 }
 0x7aa   :  { %v5795_v19 = vrot.slane %v5794_v56, 4  ;;  %v6278_v58 = vsel %vm3262_vm10, %v6217_v20, %v6277_v7  ;;  %v5791_v22 = vadd.f32 %v5790_v9, %v5789_v50  ;;  %v16719_v44 = vrot.slane %v14188_v51, %v12878_v18  ;;  %v14582_v57 = vpop.f32.mrf.mxu1 }
 0x7ab   :  { %v5777_v49 = vadd.f32 %v5776_v60, %v5775_v5  ;;  %v6212_v15 = vunpack.c.l.b16 %v6075_v31  ;;  %v6218_v3 = vunpack.c.l.b16 %v6081_v26  ;;  %v14563_v62 = vadd.f32 %v5764_v1, %v5763_v46 }
 0x7ac   :  { %v5502_v10 = vadd.f32 %v16719_v44, %v14487_v13  ;;  %v5796_v40 = vadd.f32 %v5795_v19, %v5794_v56  ;;  %v5771_v8 = vrot.slane %v5770_v4, 1  ;;  %v5758_v45 = vadd.f32 %v5757_v35, %v5756_v16  ;;  %v14576_v13 = vld [vmem:[%s16280_s10 + $0x38] sm:$0xff]   ;;  %v14602_v19 = vpop.f32.mrf.mxu1 }
 0x7ad   :  { %v5507_v11 = vadd.f32 %v14495_v39, %v14274_v61  ;;  %v6219_v17 = vunpack.c.l.b16 %v6082_v54  ;;  %v6279_v43 = vsel %vm3264_vm11, %v6218_v3, %v6278_v58  ;;  %v6267_v51 = vsel %vm3268_vm13, %v14484_v6, %v14474_v27  ;;  %11633 = vmatprep.subr.bf16.mxu0 %v14576_v13  ;;  %v16723_v3 = vld [vmem:[#allocation48_spill] sm:$0xff] }
 0x7ae   :  { %v5566_v41 = vmax.f32 %v5502_v10, 0.0  ;;  %v5797_v59 = vrot.slane %v5796_v40, 2  ;;  %v5792_v46 = vrot.slane %v5791_v22, 1  ;;  %v5778_v31 = vrot.slane %v5777_v49, 1 }
 0x7af   :  { %v5571_v20 = vmax.f32 %v5507_v11, 0.0  ;;  %v6214_v29 = vunpack.c.l.b16 %v6077_v32  ;;  %v6084_v61 = vpack.c.bf16 %v14563_v62, %v14563_v62  ;;  %v6274_v50 = vsel %vm3268_vm13, %v6212_v15, %v6273_v23 }
 0x7b0   :  { %v5780_v16 = vsel %vm1229_vm6, %v5566_v41, 0.0  ;;  %v14585_v27 = vadd.f32 %v5771_v8, %v5770_v4  ;;  %v6083_v6 = vpack.c.bf16 %v5758_v45, %v5758_v45  ;;  %v6268_v5 = vsel %vm3270_vm14, %v14448_v25, %v6267_v51  ;;  %v16724_v41 = vld [vmem:[#allocation68_spill] sm:$0xff] }
 0x7b1   :  { %v5781_v39 = vrot.slane %v5780_v16, 4  ;;  %v5815_v47 = vsel %vm1229_vm6, %v5571_v20, 0.0  ;;  %v6280_v52 = vsel %vm3266_vm12, %v6219_v17, %v6279_v43  ;;  %v5798_v26 = vadd.f32 %v5797_v59, %v5796_v40  ;;  %v14618_v59 = vpop.f32.mrf.mxu1 }
 0x7b2   :  { %v5816_v9 = vrot.slane %v5815_v47, 4  ;;  %v14591_v7 = vadd.f32 %v5792_v46, %v5791_v22  ;;  %v5779_v35 = vadd.f32 %v5778_v31, %v5777_v49  ;;  %v6275_v60 = vsel %vm3270_vm14, %v14497_v2, %v6274_v50  ;;  %v16721_v2 = vld [vmem:[#allocation61_spill] sm:$0xff] }
 0x7b3   :  { %v5782_v1 = vadd.f32 %v5781_v39, %v5780_v16  ;;  %v16720_v4 = vrot.slane %v14192_v55, %v12878_v18  ;;  %v6269_v25 = vsel %vm3272_vm15, %v14482_v0, %v6268_v5  ;;  %v6276_v54 = vsel %vm3272_vm15, %v6214_v29, %v6275_v60 }
 0x7b4   :  { %v5817_v32 = vadd.f32 %v5816_v9, %v5815_v47  ;;  %v6319_v58 = vpack.c.b16 %v6276_v54, %v6269_v25  ;;  %v5508_v49 = vadd.f32 %v14516_v21, %v14285_v33  ;;  %v16722_v44 = vrot.slane %v16721_v2, %v12878_v18  ;;  %v16726_v47 = vld [vmem:[#allocation73_spill] sm:$0xff] }
 0x7b5   :  { %v5505_v56 = vadd.f32 %v16720_v4, %v14507_v36  ;;  %v5783_v23 = vrot.slane %v5782_v1, 2  ;;  %v5799_v36 = vrot.slane %v5798_v26, 1  ;;  %v5511_v0 = vadd.f32 %v14525_v30, %v16723_v3  ;;  %v14627_v4 = vpop.f32.mrf.mxu1 }
 0x7b6   :  { %v5506_v55 = vadd.f32 %v16722_v44, %v14520_v28  ;;  %v5818_v15 = vrot.slane %v5817_v32, 2  ;;  %11625 = vmatprep.mubr.msk.bf16.mxu0 %vm1229_vm6, %v6319_v58  ;;  %v5572_v8 = vmax.f32 %v5508_v49, 0.0  ;;  %v16725_v33 = vrot.slane %v16724_v41, %v12878_v18 }
 0x7b7   :  { %v5569_v22 = vmax.f32 %v5505_v56, 0.0  ;;  %v5784_v10 = vadd.f32 %v5783_v23, %v5782_v1  ;;  %v6220_v11 = vunpack.c.l.b16 %v6083_v6  ;;  %v6086_v17 = vpack.c.bf16 %v5779_v35, %v5779_v35 }
 0x7b8   :  { %v5570_v45 = vmax.f32 %v5506_v55, 0.0  ;;  %v5509_v21 = vadd.f32 %v16725_v33, %v14529_v24  ;;  %v5819_v51 = vadd.f32 %v5818_v15, %v5817_v32  ;;  %v5822_v30 = vsel %vm1229_vm6, %v5572_v8, 0.0  ;;  %v14634_v15 = vpop.f32.mrf.mxu1 }
 0x7b9   :  { %v5801_v40 = vsel %vm1229_vm6, %v5569_v22, 0.0  ;;  %v5785_v28 = vrot.slane %v5784_v10, 1  ;;  %v5575_v31 = vmax.f32 %v5511_v0, 0.0  ;;  %v5823_v29 = vrot.slane %v5822_v30, 4 }
 0x7ba   :  { %v5802_v43 = vrot.slane %v5801_v40, 4  ;;  %v5808_v46 = vsel %vm1229_vm6, %v5570_v45, 0.0  ;;  %v5573_v39 = vmax.f32 %v5509_v21, 0.0  ;;  %v6088_v50 = vpack.c.bf16 %v14591_v7, %v14591_v7 }
 0x7bb   :  { %v5786_v16 = vadd.f32 %v5785_v28, %v5784_v10  ;;  %v5800_v24 = vadd.f32 %v5799_v36, %v5798_v26  ;;  %v5809_v6 = vrot.slane %v5808_v46, 4  ;;  %v5512_v5 = vadd.f32 %v14537_v38, %v16726_v47 }
 0x7bc   :  { %v5803_v20 = vadd.f32 %v5802_v43, %v5801_v40  ;;  %v5824_v35 = vadd.f32 %v5823_v29, %v5822_v30  ;;  %v5843_v60 = vsel %vm1229_vm6, %v5575_v31, 0.0  ;;  %v6223_v56 = vunpack.c.l.b16 %v6086_v17 }
 0x7bd   :  { %v6087_v1 = vpack.c.bf16 %v5786_v16, %v5786_v16  ;;  %v5820_v23 = vrot.slane %v5819_v51, 1  ;;  %v5810_v32 = vadd.f32 %v5809_v6, %v5808_v46  ;;  %v5576_v25 = vmax.f32 %v5512_v5, 0.0  ;;  %v16729_v16 = vld [vmem:[#allocation70_spill] sm:$0xff] }
 0x7be   :  { %v5804_v9 = vrot.slane %v5803_v20, 2  ;;  %v5825_v22 = vrot.slane %v5824_v35, 2  ;;  %v5829_v26 = vsel %vm1229_vm6, %v5573_v39, 0.0  ;;  %v6089_v7 = vpack.c.bf16 %v5800_v24, %v5800_v24 }
 0x7bf   :  { %v6224_v54 = vunpack.c.l.b16 %v6087_v1  ;;  %v5811_v49 = vrot.slane %v5810_v32, 2  ;;  %v5844_v2 = vrot.slane %v5843_v60, 4  ;;  %v5850_v38 = vsel %vm1229_vm6, %v5576_v25, 0.0 }
 0x7c0   :  { %v5805_v58 = vadd.f32 %v5804_v9, %v5803_v20  ;;  %v6085_v44 = vpack.c.bf16 %v14585_v27, %v14585_v27  ;;  %v6281_v55 = vsel %vm3268_vm13, %v6220_v11, %v6280_v52  ;;  %v5826_v10 = vadd.f32 %v5825_v22, %v5824_v35  ;;  %v16727_v27 = vld [vmem:[#allocation71_spill] sm:$0xff]  ;;  %v14644_v20 = vpop.f32.mrf.mxu1 }
 0x7c1   :  { %v6284_v3 = vsel %vm3260_vm9, %v6224_v54, %v6223_v56  ;;  %v5821_v0 = vadd.f32 %v5820_v23, %v5819_v51  ;;  %v5812_v40 = vadd.f32 %v5811_v49, %v5810_v32  ;;  %v5830_v8 = vrot.slane %v5829_v26, 4  ;;  %v16730_v49 = vld [vmem:[#allocation64_spill] sm:$0xff] }
 0x7c2   :  { %v5806_v36 = vrot.slane %v5805_v58, 1  ;;  %v6225_v45 = vunpack.c.l.b16 %v6088_v50  ;;  %v5827_v33 = vrot.slane %v5826_v10, 1  ;;  %v5851_v21 = vrot.slane %v5850_v38, 4  ;;  %v14652_v25 = vpop.f32.mrf.mxu1 }
 0x7c3   :  { %v6226_v17 = vunpack.c.l.b16 %v6089_v7  ;;  %v5813_v28 = vrot.slane %v5812_v40, 1  ;;  %v5845_v43 = vadd.f32 %v5844_v2, %v5843_v60  ;;  %v16728_v52 = vrot.slane %v16727_v27, %v12878_v18 }
 0x7c4   :  { %v5807_v41 = vadd.f32 %v5806_v36, %v5805_v58  ;;  %v6285_v30 = vsel %vm3262_vm10, %v6225_v45, %v6284_v3  ;;  %v5828_v31 = vadd.f32 %v5827_v33, %v5826_v10  ;;  %v5515_v51 = vadd.f32 %v14545_v63, %v16729_v16  ;;  %v16732_v10 = vld [vmem:[#allocation23_spill] sm:$0xff] }
 0x7c5   :  { %v5510_v11 = vadd.f32 %v16728_v52, %v14541_v42  ;;  %v6092_v29 = vpack.c.bf16 %v5821_v0, %v5821_v0  ;;  %v5814_v39 = vadd.f32 %v5813_v28, %v5812_v40  ;;  %v5831_v50 = vadd.f32 %v5830_v8, %v5829_v26  ;;  %v16735_v16 = vld [vmem:[#allocation67_spill] sm:$0xff] }
 0x7c6   :  { %v6090_v46 = vpack.c.bf16 %v5807_v41, %v5807_v41  ;;  %v6221_v6 = vunpack.c.l.b16 %v6084_v61  ;;  %v5852_v5 = vadd.f32 %v5851_v21, %v5850_v38  ;;  %v5579_v42 = vmax.f32 %v5515_v51, 0.0  ;;  %v14665_v41 = vpop.f32.mrf.mxu1 }
 0x7c7   :  { %v5574_v24 = vmax.f32 %v5510_v11, 0.0  ;;  %v6286_v1 = vsel %vm3264_vm11, %v6226_v17, %v6285_v30  ;;  %v6093_v9 = vpack.c.bf16 %v5828_v31, %v5828_v31  ;;  %v6091_v35 = vpack.c.bf16 %v5814_v39, %v5814_v39 }
 0x7c8   :  { %v6227_v47 = vunpack.c.l.b16 %v6090_v46  ;;  %v6222_v63 = vunpack.c.l.b16 %v6085_v44  ;;  %v6282_v56 = vsel %vm3270_vm14, %v6221_v6, %v6281_v55  ;;  %v5846_v23 = vrot.slane %v5845_v43, 2  ;;  %v14677_v6 = vpop.f32.mrf.mxu1 }
 0x7c9   :  { %v5836_v60 = vsel %vm1229_vm6, %v5574_v24, 0.0  ;;  %v6229_v54 = vunpack.c.l.b16 %v6092_v29  ;;  %v6228_v58 = vunpack.c.l.b16 %v6091_v35  ;;  %v5832_v62 = vrot.slane %v5831_v50, 2 }
 0x7ca   :  { %v5837_v32 = vrot.slane %v5836_v60, 4  ;;  %v5871_v61 = vsel %vm1229_vm6, %v5579_v42, 0.0  ;;  %v6287_v22 = vsel %vm3266_vm12, %v6227_v47, %v6286_v1  ;;  %v5853_v26 = vrot.slane %v5852_v5, 2  ;;  %v16737_v1 = vld [vmem:[#allocation69_spill] sm:$0xff] }
 0x7cb   :  { %v16731_v2 = vrot.slane %v16730_v49, %v12878_v18  ;;  %v6283_v44 = vsel %vm3272_vm15, %v6222_v63, %v6282_v56  ;;  %v6230_v55 = vunpack.c.l.b16 %v6093_v9  ;;  %v6288_v36 = vsel %vm3268_vm13, %v6228_v58, %v6287_v22 }
 0x7cc   :  { %v5838_v7 = vadd.f32 %v5837_v32, %v5836_v60  ;;  %v5516_v3 = vadd.f32 %v14565_v48, %v16732_v10  ;;  %v6289_v0 = vsel %vm3270_vm14, %v6229_v54, %v6288_v36  ;;  %v5847_v40 = vadd.f32 %v5846_v23, %v5845_v43 }
 0x7cd   :  { %v5513_v38 = vadd.f32 %v16731_v2, %v14551_v12  ;;  %v5872_v45 = vrot.slane %v5871_v61, 4  ;;  %v6290_v33 = vsel %vm3272_vm15, %v6230_v55, %v6289_v0  ;;  %v16733_v12 = vld [vmem:[#allocation65_spill] sm:$0xff]  ;;  %v5833_v11 = vadd.f32 %v5832_v62, %v5831_v50  ;;  %v16740_v62 = vld [vmem:[#allocation24_spill] sm:$0xff] }
 0x7ce   :  { %v5839_v8 = vrot.slane %v5838_v7, 2  ;;  %v5580_v17 = vmax.f32 %v5516_v3, 0.0  ;;  %v16734_v28 = vrot.slane %v16733_v12, %v12878_v18  ;;  %v6320_v52 = vpack.c.b16 %v6290_v33, %v6283_v44 }
 0x7cf   :  { %v5577_v21 = vmax.f32 %v5513_v38, 0.0  ;;  %v5854_v30 = vadd.f32 %v5853_v26, %v5852_v5  ;;  %v5519_v51 = vadd.f32 %v14602_v19, %v16735_v16  ;;  %v5873_v39 = vadd.f32 %v5872_v45, %v5871_v61 }
 0x7d0   :  { %v5514_v27 = vadd.f32 %v16734_v28, %v14582_v57  ;;  %v5840_v48 = vadd.f32 %v5839_v8, %v5838_v7  ;;  %v5878_v43 = vsel %vm1229_vm6, %v5580_v17, 0.0  ;;  %11626 = vmatmul.mubr.msk.bf16.vlgmr.msra.gmra.mxu0 %vm1229_vm6, %v6320_v52  ;;  %v16736_v57 = vld [vmem:[#allocation47_spill] sm:$0xff]  ;;  %v16738_v9 = vrot.slane %v16737_v1, %v12878_v18 }
 0x7d1   :  { %v5857_v46 = vsel %vm1229_vm6, %v5577_v21, 0.0  ;;  %v14681_v50 = vrot.slane %v16736_v57, %v16673_v34  ;;  %v5879_v47 = vrot.slane %v5878_v43, 4  ;;  %v5583_v42 = vmax.f32 %v5519_v51, 0.0  ;;  %11634 = vmatpush3.bf16.msra.mxu0 %v14576_v13 }
 0x7d2   :  { %v5578_v31 = vmax.f32 %v5514_v27, 0.0  ;;  %v5841_v29 = vrot.slane %v5840_v48, 1  ;;  %v5858_v24 = vrot.slane %v5857_v46, 4  ;;  %v5517_v19 = vadd.f32 %v16738_v9, %v14618_v59  ;;  %v14697_v59 = vpop.f32.mrf.mxu1 }
 0x7d3   :  { %v5848_v35 = vrot.slane %v5847_v40, 1  ;;  %v5834_v60 = vrot.slane %v5833_v11, 1  ;;  %v5855_v63 = vrot.slane %v5854_v30, 1  ;;  %v16739_v56 = vcombine.high %v16736_v57, %v16736_v57 }
 0x7d4   :  { %v5864_v5 = vsel %vm1229_vm6, %v5578_v31, 0.0  ;;  %v5859_v32 = vadd.f32 %v5858_v24, %v5857_v46  ;;  %v5581_v58 = vmax.f32 %v5517_v19, 0.0  ;;  %v5520_v61 = vadd.f32 %v14627_v4, %v16740_v62  ;;  %v14710_v12 = vpop.f32.mrf.mxu1 }
 0x7d5   :  { %v14693_v23 = vrot.slane %v16739_v56, %v16673_v34  ;;  %v5865_v54 = vrot.slane %v5864_v5, 4  ;;  %v5842_v22 = vadd.f32 %v5841_v29, %v5840_v48  ;;  %v5874_v26 = vrot.slane %v5873_v39, 2  ;;  %v16741_v29 = vld [vmem:[#allocation72_spill] sm:$0xff] }
 0x7d6   :  { %v5155_v13 = vcombine.high %v14434_v53, %v14434_v53  ;;  %v5388_v7 = vrot.slane %v14434_v53, %v12878_v18  ;;  %v5880_v49 = vadd.f32 %v5879_v47, %v5878_v43  ;;  %v5899_v2 = vsel %vm1229_vm6, %v5583_v42, 0.0  ;;  %v16743_v42 = vld [vmem:[#allocation19_spill] sm:$0xff]  ;;  %v14728_v9 = vpop.f32.mrf.mxu1 }
 0x7d7   :  { %v5584_v38 = vmax.f32 %v5520_v61, 0.0  ;;  %v5154_v44 = vcombine.high %v14681_v50, %v14681_v50  ;;  %v5849_v55 = vadd.f32 %v5848_v35, %v5847_v40  ;;  %v5835_v36 = vadd.f32 %v5834_v60, %v5833_v11 }
 0x7d8   :  { %v5885_v4 = vsel %vm1229_vm6, %v5581_v58, 0.0  ;;  %v5400_v10 = vrot.slane %v14681_v50, %v12878_v18  ;;  %v5856_v3 = vadd.f32 %v5855_v63, %v5854_v30  ;;  %v5860_v0 = vrot.slane %v5859_v32, 2 }
 0x7d9   :  { %v5866_v8 = vadd.f32 %v5865_v54, %v5864_v5  ;;  %v5906_v45 = vsel %vm1229_vm6, %v5584_v38, 0.0  ;;  %v6095_v33 = vpack.c.bf16 %v5842_v22, %v5842_v22  ;;  %v5875_v21 = vadd.f32 %v5874_v26, %v5873_v39 }
 0x7da   :  { %v5900_v17 = vrot.slane %v5899_v2, 4  ;;  %v5156_v28 = vcombine.high %v14693_v23, %v14693_v23  ;;  %v5881_v40 = vrot.slane %v5880_v49, 2  ;;  %v5886_v27 = vrot.slane %v5885_v4, 4 }
 0x7db   :  { %v14715_v52 = vrot.slane %v5155_v13, %v12878_v18  ;;  %v5404_v11 = vrot.slane %v14693_v23, %v12878_v18  ;;  %v6096_v30 = vpack.c.bf16 %v5849_v55, %v5849_v55  ;;  %v6094_v48 = vpack.c.bf16 %v5835_v36, %v5835_v36  ;;  %v16744_v36 = vld [vmem:[#allocation66_spill] sm:$0xff] }
 0x7dc   :  { %v5907_v46 = vrot.slane %v5906_v45, 4  ;;  %v14720_v43 = vrot.slane %v5154_v44, %v12878_v18  ;;  %v6097_v31 = vpack.c.bf16 %v5856_v3, %v5856_v3  ;;  %v5861_v16 = vadd.f32 %v5860_v0, %v5859_v32 }
 0x7dd   :  { %v5867_v51 = vrot.slane %v5866_v8, 2  ;;  %v16742_v39 = vrot.slane %v16741_v29, %v12878_v18  ;;  %v6232_v57 = vunpack.c.l.b16 %v6095_v33  ;;  %v5876_v47 = vrot.slane %v5875_v21, 1  ;;  %v16746_v33 = vld [vmem:[#allocation20_spill] sm:$0xff] }
 0x7de   :  { %v5901_v5 = vadd.f32 %v5900_v17, %v5899_v2  ;;  %v5523_v1 = vadd.f32 %v14644_v20, %v16743_v42  ;;  %v5882_v19 = vadd.f32 %v5881_v40, %v5880_v49  ;;  %v5887_v35 = vadd.f32 %v5886_v27, %v5885_v4  ;;  %v14739_v2 = vpop.f32.mrf.mxu1  ;;  %v16747_v27 = vld [vmem:[#allocation74_spill] sm:$0xff] }
 0x7df   :  { %v5518_v24 = vadd.f32 %v16742_v39, %v14634_v15  ;;  %v14731_v63 = vrot.slane %v5156_v28, %v12878_v18  ;;  %v6233_v56 = vunpack.c.l.b16 %v6096_v30  ;;  %v6231_v32 = vunpack.c.l.b16 %v6094_v48 }
 0x7e0   :  { %v5908_v54 = vadd.f32 %v5907_v46, %v5906_v45  ;;  %v5587_v58 = vmax.f32 %v5523_v1, 0.0  ;;  %v14733_v62 = vunpack.c.l.b16 %v6097_v31  ;;  %v5862_v15 = vrot.slane %v5861_v16, 1  ;;  %v14752_v39 = vpop.f32.mrf.mxu1 }
 0x7e1   :  { %v5582_v60 = vmax.f32 %v5518_v24, 0.0  ;;  %v5868_v61 = vadd.f32 %v5867_v51, %v5866_v8  ;;  %v6291_v20 = vsel %vm3260_vm9, %v6232_v57, %v6231_v32  ;;  %v14737_v26 = vadd.f32 %v5876_v47, %v5875_v21  ;;  %v16749_v47 = vld [vmem:[#allocation30_spill] sm:$0xff] }
 0x7e2   :  { %v5902_v13 = vrot.slane %v5901_v5, 2  ;;  %v5883_v38 = vrot.slane %v5882_v19, 1  ;;  %v5888_v44 = vrot.slane %v5887_v35, 2  ;;  %v5927_v55 = vsel %vm1229_vm6, %v5587_v58, 0.0 }
 0x7e3   :  { %v5892_v22 = vsel %vm1229_vm6, %v5582_v60, 0.0  ;;  %v16745_v4 = vrot.slane %v16744_v36, %v12878_v18  ;;  %v5909_v0 = vrot.slane %v5908_v54, 2  ;;  %v5928_v45 = vrot.slane %v5927_v55, 4 }
 0x7e4   :  { %v5893_v49 = vrot.slane %v5892_v22, 4  ;;  %v5524_v21 = vadd.f32 %v14665_v41, %v16746_v33  ;;  %v5863_v17 = vadd.f32 %v5862_v15, %v5861_v16  ;;  %v5869_v28 = vrot.slane %v5868_v61, 1 }
 0x7e5   :  { %v5521_v3 = vadd.f32 %v16745_v4, %v14652_v25  ;;  %v16748_v30 = vrot.slane %v16747_v27, %v12878_v18  ;;  %v5903_v46 = vadd.f32 %v5902_v13, %v5901_v5  ;;  %v5929_v51 = vadd.f32 %v5928_v45, %v5927_v55  ;;  %v16750_v5 = vld [vmem:[#allocation59_spill] sm:$0xff]  ;;  %v14763_v55 = vpop.f32.mrf.mxu1 }
 0x7e6   :  { %v5894_v8 = vadd.f32 %v5893_v49, %v5892_v22  ;;  %v5588_v29 = vmax.f32 %v5524_v21, 0.0  ;;  %v5889_v25 = vadd.f32 %v5888_v44, %v5887_v35  ;;  %v5527_v41 = vadd.f32 %v14697_v59, %v16749_v47 }
 0x7e7   :  { %v5585_v40 = vmax.f32 %v5521_v3, 0.0  ;;  %v5522_v48 = vadd.f32 %v16748_v30, %v14677_v6  ;;  %v5910_v16 = vadd.f32 %v5909_v0, %v5908_v54  ;;  %v5930_v1 = vrot.slane %v5929_v51, 2 }
 0x7e8   :  { %v5895_v31 = vrot.slane %v5894_v8, 2  ;;  %v6098_v32 = vpack.c.bf16 %v5863_v17, %v5863_v17  ;;  %v5884_v58 = vadd.f32 %v5883_v38, %v5882_v19  ;;  %v5591_v6 = vmax.f32 %v5527_v41, 0.0 }
 0x7e9   :  { %v5913_v24 = vsel %vm1229_vm6, %v5585_v40, 0.0  ;;  %v5586_v57 = vmax.f32 %v5522_v48, 0.0  ;;  %v16751_v15 = vrot.slane %v16750_v5, %v12878_v18  ;;  %v5934_v49 = vsel %vm1229_vm6, %v5588_v29, 0.0 }
 0x7ea   :  { %v5896_v42 = vadd.f32 %v5895_v31, %v5894_v8  ;;  %v5914_v60 = vrot.slane %v5913_v24, 4  ;;  %v6292_v59 = vsel %vm3262_vm10, %v6233_v56, %v6291_v20  ;;  %v6100_v54 = vpack.c.bf16 %v14737_v26, %v14737_v26  ;;  %v11608_v20 = vpop.f32.mrf.mxu1 }
 0x7eb   :  { %v5525_v22 = vadd.f32 %v16751_v15, %v14710_v12  ;;  %v5920_v44 = vsel %vm1229_vm6, %v5586_v57, 0.0  ;;  %v5890_v19 = vrot.slane %v5889_v25, 1  ;;  %v5904_v36 = vrot.slane %v5903_v46, 1 }
 0x7ec   :  { %v5897_v13 = vrot.slane %v5896_v42, 1  ;;  %v5915_v35 = vadd.f32 %v5914_v60, %v5913_v24  ;;  %v5911_v4 = vrot.slane %v5910_v16, 1  ;;  %v5931_v3 = vadd.f32 %v5930_v1, %v5929_v51 }
 0x7ed   :  { %v5589_v38 = vmax.f32 %v5525_v22, 0.0  ;;  %v5955_v12 = vsel %vm1229_vm6, %v5591_v6, 0.0  ;;  %v5935_v8 = vrot.slane %v5934_v49, 4  ;;  %v5921_v45 = vrot.slane %v5920_v44, 4 }
 0x7ee   :  { %v5898_v0 = vadd.f32 %v5897_v13, %v5896_v42  ;;  %v5528_v33 = vadd.f32 %v14728_v9, %v14417_v14  ;;  %v6235_v21 = vunpack.c.l.b16 %v6098_v32  ;;  %v6101_v17 = vpack.c.bf16 %v5884_v58, %v5884_v58  ;;  %v4713_v42 = vpop.f32.mrf.mxu1  ;;  %v16752_v13 = vld [vmem:[#allocation28_spill] sm:$0xff] }
 0x7ef   :  { %v5870_v40 = vadd.f32 %v5869_v28, %v5868_v61  ;;  %v5916_v56 = vrot.slane %v5915_v35, 2  ;;  %v5891_v27 = vadd.f32 %v5890_v19, %v5889_v25  ;;  %v5956_v26 = vrot.slane %v5955_v12, 4 }
 0x7f0   :  { %v5941_v30 = vsel %vm1229_vm6, %v5589_v38, 0.0  ;;  %v5592_v48 = vmax.f32 %v5528_v33, 0.0  ;;  %v6293_v31 = vsel %vm3264_vm11, %v14733_v62, %v6292_v59  ;;  %v5905_v51 = vadd.f32 %v5904_v36, %v5903_v46  ;;  %v11611_v38 = vpop.f32.mrf.mxu1 }
 0x7f1   :  { %v5912_v29 = vadd.f32 %v5911_v4, %v5910_v16  ;;  %v5932_v24 = vrot.slane %v5931_v3, 1  ;;  %v6103_v57 = vpack.c.bf16 %v5898_v0, %v5898_v0  ;;  %v5936_v47 = vadd.f32 %v5935_v8, %v5934_v49 }
 0x7f2   :  { %v5922_v41 = vadd.f32 %v5921_v45, %v5920_v44  ;;  %v5962_v14 = vsel %vm1229_vm6, %v5592_v48, 0.0  ;;  %v14775_v9 = vunpack.c.l.b16 %v6100_v54  ;;  %v6099_v61 = vpack.c.bf16 %v5870_v40, %v5870_v40 }
 0x7f3   :  { %v5917_v28 = vadd.f32 %v5916_v56, %v5915_v35  ;;  %v5942_v25 = vrot.slane %v5941_v30, 4  ;;  %v14778_v1 = vsel %vm3266_vm12, %v6235_v21, %v6293_v31  ;;  %v14780_v60 = vunpack.c.l.b16 %v6101_v17  ;;  %v16754_v31 = vld [vmem:[#allocation18_spill] sm:$0xff] }
 0x7f4   :  { %v6102_v62 = vpack.c.bf16 %v5891_v27, %v5891_v27  ;;  %v5957_v46 = vadd.f32 %v5956_v26, %v5955_v12  ;;  %v6104_v16 = vpack.c.bf16 %v5905_v51, %v5905_v51  ;;  %v6105_v32 = vpack.c.bf16 %v5912_v29, %v5912_v29  ;;  %v4726_v26 = vpop.f32.mrf.mxu1 }
 0x7f5   :  { %v14782_v58 = vadd.f32 %v5932_v24, %v5931_v3  ;;  %v5963_v6 = vrot.slane %v5962_v14, 4  ;;  %v6240_v5 = vunpack.c.l.b16 %v6103_v57  ;;  %v5937_v15 = vrot.slane %v5936_v47, 2  ;;  %v16756_v24 = vld [vmem:[#allocation25_spill] sm:$0xff] }
 0x7f6   :  { %v5923_v22 = vrot.slane %v5922_v41, 2  ;;  %v16753_v35 = vrot.slane %v16752_v13, %v12878_v18  ;;  %v14788_v44 = vunpack.c.l.b16 %v6099_v61  ;;  %v5918_v59 = vrot.slane %v5917_v28, 1 }
 0x7f7   :  { %v5943_v54 = vadd.f32 %v5942_v25, %v5941_v30  ;;  %v5531_v19 = vadd.f32 %v14752_v39, %v14420_v37  ;;  %v6239_v36 = vunpack.c.l.b16 %v6102_v62  ;;  %v5958_v4 = vrot.slane %v5957_v46, 2  ;;  %v16759_v25 = vld [vmem:[#allocation21_spill] sm:$0xff] }
 0x7f8   :  { %v5526_v49 = vadd.f32 %v16753_v35, %v14739_v2  ;;  %v5964_v3 = vadd.f32 %v5963_v6, %v5962_v14  ;;  %v6241_v0 = vunpack.c.l.b16 %v6104_v16  ;;  %v6242_v8 = vunpack.c.l.b16 %v6105_v32 }
 0x7f9   :  { %v6108_v45 = vpack.c.bf16 %v14782_v58, %v14782_v58  ;;  %v5595_v33 = vmax.f32 %v5531_v19, 0.0  ;;  %v6298_v2 = vsel %vm3260_vm9, %v6240_v5, %v6239_v36  ;;  %v5938_v21 = vadd.f32 %v5937_v15, %v5936_v47 }
 0x7fa   :  { %v5590_v12 = vmax.f32 %v5526_v49, 0.0  ;;  %v5924_v17 = vadd.f32 %v5923_v22, %v5922_v41  ;;  %v5919_v56 = vadd.f32 %v5918_v59, %v5917_v28  ;;  %v5944_v27 = vrot.slane %v5943_v54, 2  ;;  %v16757_v41 = vld [vmem:[#allocation22_spill] sm:$0xff]  ;;  %v16760_v59 = vld [vmem:[#allocation60_spill] sm:$0xff] }
 0x7fb   :  { %v5983_v39 = vsel %vm1229_vm6, %v5595_v33, 0.0  ;;  %v5959_v30 = vadd.f32 %v5958_v4, %v5957_v46  ;;  %v5965_v48 = vrot.slane %v5964_v3, 2  ;;  %v16755_v51 = vrot.slane %v16754_v31, %v12878_v18 }
 0x7fc   :  { %v5948_v40 = vsel %vm1229_vm6, %v5590_v12, 0.0  ;;  %v5532_v57 = vadd.f32 %v11608_v20, %v16756_v24  ;;  %v5984_v47 = vrot.slane %v5983_v39, 4  ;;  %v16758_v61 = vrot.slane %v16757_v41, %v12878_v18 }
 0x7fd   :  { %v5949_v37 = vrot.slane %v5948_v40, 4  ;;  %v5529_v29 = vadd.f32 %v16755_v51, %v14763_v55  ;;  %v5535_v62 = vadd.f32 %v11611_v38, %v16759_v25  ;;  %v6299_v16 = vsel %vm3262_vm10, %v6241_v0, %v6298_v2  ;;  %v11612_v55 = vpop.f32.mrf.mxu1 }
 0x7fe   :  { %v5530_v28 = vadd.f32 %v16758_v61, %v4713_v42  ;;  %v5939_v32 = vrot.slane %v5938_v21, 1  ;;  %v5596_v6 = vmax.f32 %v5532_v57, 0.0  ;;  %v5945_v5 = vadd.f32 %v5944_v27, %v5943_v54 }
 0x7ff   :  { %v5950_v14 = vadd.f32 %v5949_v37, %v5948_v40  ;;  %v5593_v46 = vmax.f32 %v5529_v29, 0.0  ;;  %v5599_v13 = vmax.f32 %v5535_v62, 0.0  ;;  %v6106_v35 = vpack.c.bf16 %v5919_v56, %v5919_v56  ;;  %v4729_v31 = vpop.f32.mrf.mxu1 }
 0x800   :  { %v5594_v22 = vmax.f32 %v5530_v28, 0.0  ;;  %v5925_v20 = vrot.slane %v5924_v17, 1  ;;  %v16761_v19 = vrot.slane %v16760_v59, %v12878_v18  ;;  %v5966_v36 = vadd.f32 %v5965_v48, %v5964_v3 }
 0x801   :  { %v5951_v15 = vrot.slane %v5950_v14, 2  ;;  %v5969_v49 = vsel %vm1229_vm6, %v5593_v46, 0.0  ;;  %v5985_v4 = vadd.f32 %v5984_v47, %v5983_v39  ;;  %v5990_v12 = vsel %vm1229_vm6, %v5596_v6, 0.0 }
 0x802   :  { %v5533_v42 = vadd.f32 %v16761_v19, %v4726_v26  ;;  %v5970_v0 = vrot.slane %v5969_v49, 4  ;;  %v5976_v54 = vsel %vm1229_vm6, %v5594_v22, 0.0  ;;  %v6011_v33 = vsel %vm1229_vm6, %v5599_v13, 0.0 }
 0x803   :  { %v5952_v38 = vadd.f32 %v5951_v15, %v5950_v14  ;;  %v5940_v40 = vadd.f32 %v5939_v32, %v5938_v21  ;;  %v5960_v56 = vrot.slane %v5959_v30, 1  ;;  %v5946_v27 = vrot.slane %v5945_v5, 1  ;;  %v11615_v32 = vpop.f32.mrf.mxu1 }
 0x804   :  { %v5597_v2 = vmax.f32 %v5533_v42, 0.0  ;;  %v5926_v51 = vadd.f32 %v5925_v20, %v5924_v17  ;;  %v5977_v29 = vrot.slane %v5976_v54, 4  ;;  %v6012_v24 = vrot.slane %v6011_v33, 4 }
 0x805   :  { %v5953_v37 = vrot.slane %v5952_v38, 1  ;;  %v5967_v26 = vrot.slane %v5966_v36, 1  ;;  %v5986_v39 = vrot.slane %v5985_v4, 2  ;;  %v5991_v48 = vrot.slane %v5990_v12, 4  ;;  %v4742_v19 = vpop.f32.mrf.mxu1 }
 0x806   :  { %v5997_v3 = vsel %vm1229_vm6, %v5597_v2, 0.0  ;;  %v6300_v14 = vsel %vm3264_vm11, %v6242_v8, %v6299_v16  ;;  %v5971_v41 = vadd.f32 %v5970_v0, %v5969_v49  ;;  %v5536_v61 = vadd.f32 %v11612_v55, %v14715_v52 }
 0x807   :  { %v5998_v57 = vrot.slane %v5997_v3, 4  ;;  %v5954_v47 = vadd.f32 %v5953_v37, %v5952_v38  ;;  %v6243_v21 = vunpack.c.l.b16 %v6106_v35  ;;  %v5961_v28 = vadd.f32 %v5960_v56, %v5959_v30 }
 0x808   :  { %v5947_v25 = vadd.f32 %v5946_v27, %v5945_v5  ;;  %v5978_v62 = vadd.f32 %v5977_v29, %v5976_v54  ;;  %v6109_v17 = vpack.c.bf16 %v5940_v40, %v5940_v40  ;;  %v6013_v46 = vadd.f32 %v6012_v24, %v6011_v33  ;;  %v11616_v29 = vpop.f32.mrf.mxu1 }
 0x809   :  { %v5999_v6 = vadd.f32 %v5998_v57, %v5997_v3  ;;  %v5600_v15 = vmax.f32 %v5536_v61, 0.0  ;;  %v6107_v22 = vpack.c.bf16 %v5926_v51, %v5926_v51  ;;  %v5968_v13 = vadd.f32 %v5967_v26, %v5966_v36 }
 0x80a   :  { %v5987_v20 = vadd.f32 %v5986_v39, %v5985_v4  ;;  %v5992_v59 = vadd.f32 %v5991_v48, %v5990_v12  ;;  %v6245_v8 = vunpack.c.l.b16 %v6108_v45  ;;  %v6111_v16 = vpack.c.bf16 %v5954_v47, %v5954_v47 }
 0x80b   :  { %v5972_v49 = vrot.slane %v5971_v41, 2  ;;  %v6018_v52 = vsel %vm1229_vm6, %v5600_v15, 0.0  ;;  %v6301_v30 = vsel %vm3266_vm12, %v6243_v21, %v6300_v14  ;;  %v6112_v5 = vpack.c.bf16 %v5961_v28, %v5961_v28 }
 0x80c   :  { %v6110_v55 = vpack.c.bf16 %v5947_v25, %v5947_v25  ;;  %v5979_v35 = vrot.slane %v5978_v62, 2  ;;  %v6246_v42 = vunpack.c.l.b16 %v6109_v17  ;;  %v6014_v38 = vrot.slane %v6013_v46, 2  ;;  %v4745_v25 = vpop.f32.mrf.mxu1 }
 0x80d   :  { %v6000_v0 = vrot.slane %v5999_v6, 2  ;;  %v6019_v36 = vrot.slane %v6018_v52, 4  ;;  %v6244_v4 = vunpack.c.l.b16 %v6107_v22  ;;  %v6113_v12 = vpack.c.bf16 %v5968_v13, %v5968_v13 }
 0x80e   :  { %v5988_v54 = vrot.slane %v5987_v20, 1  ;;  %v5993_v33 = vrot.slane %v5992_v59, 2  ;;  %v6248_v58 = vunpack.c.l.b16 %v6111_v16  ;;  %v5973_v45 = vadd.f32 %v5972_v49, %v5971_v41 }
 0x80f   :  { %v6020_v2 = vadd.f32 %v6019_v36, %v6018_v52  ;;  %v5534_v40 = vadd.f32 %v5388_v7, %v4729_v31  ;;  %v14825_v56 = vunpack.c.l.b16 %v6112_v5  ;;  %v6247_v27 = vunpack.c.l.b16 %v6110_v55 }
 0x810   :  { %v5980_v37 = vadd.f32 %v5979_v35, %v5978_v62  ;;  %v5539_v51 = vadd.f32 %v11615_v32, %v14720_v43  ;;  %v6015_v24 = vadd.f32 %v6014_v38, %v6013_v46  ;;  %v6001_v3 = vadd.f32 %v6000_v0, %v5999_v6 }
 0x811   :  { %v6021_v26 = vrot.slane %v6020_v2, 2  ;;  %v5598_v39 = vmax.f32 %v5534_v40, 0.0  ;;  %v14828_v48 = vunpack.c.l.b16 %v6113_v12  ;;  %v14830_v57 = vadd.f32 %v5988_v54, %v5987_v20 }
 0x812   :  { %v5603_v14 = vmax.f32 %v5539_v51, 0.0  ;;  %v6295_v53 = vsel %vm3268_vm13, %v14788_v44, %v14778_v1  ;;  %v6305_v7 = vsel %vm3260_vm9, %v6248_v58, %v6247_v27  ;;  %v5974_v31 = vrot.slane %v5973_v45, 1  ;;  %v12019_v1 = vld [vmem:[%s16280_s10 + $0x30] sm:$0xff]  }
 0x813   :  { %v14836_v47 = vadd.f32 %v5993_v33, %v5992_v59  ;;  %v6004_v43 = vsel %vm1229_vm6, %v5598_v39, 0.0  ;;  %v5981_v41 = vrot.slane %v5980_v37, 1  ;;  %v6296_v28 = vsel %vm3270_vm14, %v14775_v9, %v6295_v53  ;;  %11635 = vmatprep.subr.bf16.mxu0 %v12019_v1 }
 0x814   :  { %v6005_v61 = vrot.slane %v6004_v43, 4  ;;  %v6039_v21 = vsel %vm1229_vm6, %v5603_v14, 0.0  ;;  %v6016_v62 = vrot.slane %v6015_v24, 1  ;;  %v6002_v32 = vrot.slane %v6001_v3, 1  ;;  %11636 = vmatpush3.bf16.msra.mxu0 %v12019_v1 }
 0x815   :  { %v6022_v17 = vadd.f32 %v6021_v26, %v6020_v2  ;;  %v6040_v46 = vrot.slane %v6039_v21, 4  ;;  %v6302_v6 = vsel %vm3268_vm13, %v6244_v4, %v6301_v30  ;;  %v5537_v15 = vadd.f32 %v5400_v10, %v4742_v19  ;;  %v12021_v2 = vld [vmem:[%s16280_s10 + $0x20] sm:$0xff]  }
 0x816   :  { %v6006_v44 = vadd.f32 %v6005_v61, %v6004_v43  ;;  %v5540_v22 = vadd.f32 %v11616_v29, %v14731_v63  ;;  %v6297_v9 = vsel %vm3272_vm15, %v14780_v60, %v6296_v28  ;;  %v6303_v20 = vsel %vm3270_vm14, %v6245_v8, %v6302_v6 }
 0x817   :  { %v6041_v13 = vadd.f32 %v6040_v46, %v6039_v21  ;;  %v5538_v59 = vadd.f32 %v5404_v11, %v4745_v25  ;;  %v6304_v49 = vsel %vm3272_vm15, %v6246_v42, %v6303_v20  ;;  %v5601_v52 = vmax.f32 %v5537_v15, 0.0  ;;  %v12020_v42 = vld [vmem:[%s16280_s10 + $0x28] sm:$0xff]  }
 0x818   :  { %v6007_v16 = vrot.slane %v6006_v44, 2  ;;  %v5604_v30 = vmax.f32 %v5540_v22, 0.0  ;;  %v5975_v50 = vadd.f32 %v5974_v31, %v5973_v45  ;;  %v6321_v63 = vpack.c.b16 %v6304_v49, %v6297_v9  ;;  %11637 = vmatprep.subr.bf16.mxu0 %v12020_v42 }
 0x819   :  { %v6042_v10 = vrot.slane %v6041_v13, 2  ;;  %v5602_v5 = vmax.f32 %v5538_v59, 0.0  ;;  %v6003_v55 = vadd.f32 %v6002_v32, %v6001_v3  ;;  %v6025_v60 = vsel %vm1229_vm6, %v5601_v52, 0.0  ;;  %11638 = vmatpush3.bf16.msra.mxu0 %v12020_v42 }
 0x81a   :  { %v6008_v35 = vadd.f32 %v6007_v16, %v6006_v44  ;;  %v6046_v8 = vsel %vm1229_vm6, %v5604_v30, 0.0  ;;  %v5982_v19 = vadd.f32 %v5981_v41, %v5980_v37  ;;  %v6023_v23 = vrot.slane %v6022_v17, 1  ;;  %11629 = vmatprep.mubr.msk.bf16.mxu0 %vm1229_vm6, %v6321_v63  ;;  %11639 = vmatprep.subr.bf16.mxu0 %v12021_v2 }
 0x81b   :  { %v6026_v11 = vrot.slane %v6025_v60, 4  ;;  %v6047_v38 = vrot.slane %v6046_v8, 4  ;;  %v6017_v0 = vadd.f32 %v6016_v62, %v6015_v24  ;;  %v6043_v4 = vadd.f32 %v6042_v10, %v6041_v13 }
 0x81c   :  { %v6009_v36 = vrot.slane %v6008_v35, 1  ;;  %v6032_v12 = vsel %vm1229_vm6, %v5602_v5, 0.0  ;;  %v5995_v54 = vrot.slane %v14836_v47, 1  ;;  %v6306_v40 = vsel %vm3262_vm10, %v14825_v56, %v6305_v7 }
 0x81d   :  { %v6027_v33 = vadd.f32 %v6026_v11, %v6025_v60  ;;  %v6048_v58 = vadd.f32 %v6047_v38, %v6046_v8  ;;  %v6033_v45 = vrot.slane %v6032_v12, 4  ;;  %v6114_v27 = vpack.c.bf16 %v5975_v50, %v5975_v50  ;;  %11640 = vmatpush3.bf16.msra.mxu0 %v12021_v2 }
 0x81e   :  { %v6118_v37 = vpack.c.bf16 %v6003_v55, %v6003_v55  ;;  %v6010_v51 = vadd.f32 %v6009_v36, %v6008_v35  ;;  %v6024_v29 = vadd.f32 %v6023_v23, %v6022_v17  ;;  %v6115_v39 = vpack.c.bf16 %v5982_v19, %v5982_v19 }
 0x81f   :  { %v6028_v24 = vrot.slane %v6027_v33, 2  ;;  %v6049_v3 = vrot.slane %v6048_v58, 2  ;;  %v6034_v26 = vadd.f32 %v6033_v45, %v6032_v12  ;;  %v6120_v14 = vpack.c.bf16 %v6017_v0, %v6017_v0  ;;  %v12022_v12 = vld [vmem:[%s16281_s9 + $0x38] sm:$0xff]  }
 0x820   :  { %v6119_v53 = vpack.c.bf16 %v6010_v51, %v6010_v51  ;;  %v6044_v31 = vrot.slane %v6043_v4, 1  ;;  %v5996_v43 = vadd.f32 %v5995_v54, %v14836_v47  ;;  %v6251_v28 = vunpack.c.l.b16 %v6114_v27  ;;  %11649 = vmatprep.subr.bf16.mxu0 %v12022_v12  ;;  %v10588_v54 = vld [vmem:[%s16282_s8 + $0x1] sm:$0x1] }
 0x821   :  { %v6029_v41 = vadd.f32 %v6028_v24, %v6027_v33  ;;  %v6050_v61 = vadd.f32 %v6049_v3, %v6048_v58  ;;  %v6035_v21 = vrot.slane %v6034_v26, 2  ;;  %v6307_v56 = vsel %vm3264_vm11, %v14828_v48, %v6306_v40 }
 0x822   :  { %v6255_v7 = vunpack.c.l.b16 %v6118_v37  ;;  %v6256_v25 = vunpack.c.l.b16 %v6119_v53  ;;  %v6121_v62 = vpack.c.bf16 %v6024_v29, %v6024_v29  ;;  %v6252_v1 = vunpack.c.l.b16 %v6115_v39  ;;  %v12023_v39 = vld [vmem:[%s16281_s9 + $0x30] sm:$0xff]   ;;  %v12025_v53 = vld [vmem:[%s16281_s9 + $0x20] sm:$0xff]  }
 0x823   :  { %v6030_v32 = vrot.slane %v6029_v41, 1  ;;  %v6051_v17 = vrot.slane %v6050_v61, 1  ;;  %v6036_v46 = vadd.f32 %v6035_v21, %v6034_v26  ;;  %v6257_v44 = vunpack.c.l.b16 %v6120_v14  ;;  %v12024_v14 = vld [vmem:[%s16281_s9 + $0x28] sm:$0xff]  }
 0x824   :  { %v6312_v6 = vsel %vm3260_vm9, %v6256_v25, %v6255_v7  ;;  %v6045_v15 = vadd.f32 %v6044_v31, %v6043_v4  ;;  %v6116_v9 = vpack.c.bf16 %v14830_v57, %v14830_v57  ;;  %v6308_v20 = vsel %vm3266_vm12, %v6251_v28, %v6307_v56 }
 0x825   :  { %v6031_v47 = vadd.f32 %v6030_v32, %v6029_v41  ;;  %v6052_v22 = vadd.f32 %v6051_v17, %v6050_v61  ;;  %v6037_v13 = vrot.slane %v6036_v46, 1  ;;  %v6313_v48 = vsel %vm3262_vm10, %v6257_v44, %v6312_v6  ;;  %v16762_v32 = vld [vmem:[#allocation54_spill] sm:$0xff]  ;;  %v12026_v44 = vld [vmem:[%s16283_s12 + $0x38] sm:$0xff]   ;;  %v12027_v6 = vld [vmem:[%s16283_s12 + $0x30] sm:$0xff]  }
 0x826   :  { %v6258_v59 = vunpack.c.l.b16 %v6121_v62  ;;  %v6117_v52 = vpack.c.bf16 %v5996_v43, %v5996_v43  ;;  %v6309_v30 = vsel %vm3268_vm13, %v6252_v1, %v6308_v20  ;;  %v6124_v50 = vpack.c.bf16 %v6045_v15, %v6045_v15  ;;  %v16763_v17 = vld [vmem:[#allocation58_spill] sm:$0xff]  ;;  %v16765_v1 = vld [vmem:[#allocation63_spill] sm:$0xff] }
 0x827   :  { %v6122_v16 = vpack.c.bf16 %v6031_v47, %v6031_v47  ;;  %v6038_v49 = vadd.f32 %v6037_v13, %v6036_v46  ;;  %v6125_v5 = vpack.c.bf16 %v6052_v22, %v6052_v22  ;;  %v6253_v35 = vunpack.c.l.b16 %v6116_v9  ;;  %v16764_v46 = vld [vmem:[#allocation55_spill] sm:$0xff]  ;;  %v12029_v47 = vld [vmem:[%s16283_s12 + $0x20] sm:$0xff]  }
 0x828   :  { %v6314_v63 = vsel %vm3264_vm11, %v6258_v59, %v6313_v48  ;;  %v6261_v8 = vunpack.c.l.b16 %v6124_v50  ;;  %v6254_v23 = vunpack.c.l.b16 %v6117_v52  ;;  %v6128_v33 = vmul.f32 8.0, %v10588_v54  ;;  %v12028_v15 = vld [vmem:[%s16283_s12 + $0x28] sm:$0xff]  }
 0x829   :  { %v6259_v10 = vunpack.c.l.b16 %v6122_v16  ;;  %v6123_v55 = vpack.c.bf16 %v6038_v49, %v6038_v49  ;;  %v6310_v19 = vsel %vm3270_vm14, %v6253_v35, %v6309_v30  ;;  %v6262_v11 = vunpack.c.l.b16 %v6125_v5  ;;  %v10630_v5 = vld [vmem:[%s16284_s11 + $0x1] ss:$0 sm:$0xff] }
 0x82a   :  { %v6311_v0 = vsel %vm3272_vm15, %v6254_v23, %v6310_v19  ;;  %v6133_v2 = vrot.slane %v6128_v33, %v12878_v18 }
 0x82b   :  { %v6260_v60 = vunpack.c.l.b16 %v6123_v55  ;;  %v6315_v57 = vsel %vm3266_vm12, %v6259_v10, %v6314_v63 }
 0x82d   :  { %v6316_v38 = vsel %vm3268_vm13, %v6260_v60, %v6315_v57 }
 0x82e   :  { %v6317_v42 = vsel %vm3270_vm14, %v6261_v8, %v6316_v38 }
 0x82f   :  { %v6318_v36 = vsel %vm3272_vm15, %v6262_v11, %v6317_v42 }
 0x830   :  { %v6322_v4 = vpack.c.b16 %v6318_v36, %v6311_v0 }
 0x832   :  { %11630 = vmatmul.mubr.msk.bf16.gmra.mxu0 %vm1229_vm6, %v6322_v4 }
 0x890   :  { %v11627_v58 = vpop.f32.mrf.mxu0 }
 0x891   :  { %v6402_v24 = vadd.f32 %v11627_v58, %v6133_v2 }
 0x892   :  { %v6393_v45 = vpop.f32.mrf.mxu0 }
 0x893   :  { %v6394_v51 = vadd.f32 %v6393_v45, %v6133_v2 }
 0x894   :  { %v11628_v40 = vpop.f32.mrf.mxu0 }
 0x895   :  { %v6405_v27 = vadd.f32 %v11628_v40, %v6133_v2 }
 0x896   :  { %v6396_v37 = vpop.f32.mrf.mxu0 }
 0x897   :  { %v6397_v29 = vadd.f32 %v6396_v37, %v6133_v2  ;;  %v6443_v26 = vpack.c.bf16 %v6405_v27, %v6402_v24 }
 0x899   :  { %v6442_v3 = vpack.c.bf16 %v6397_v29, %v6394_v51 }
 0x89b   :  { %11641 = vmatprep.mubr.msk.bf16.mxu0 %vm1229_vm6, %v6442_v3 }
 0x89c   :  { %11642 = vmatmul.mubr.msk.bf16.vlgmr.msra.gmra.mxu0 %vm1229_vm6, %v6443_v26 }
 0x89d   :  { %11650 = vmatpush3.bf16.msra.mxu0 %v12022_v12 }
 0x89e   :  { %11651 = vmatprep.subr.bf16.mxu0 %v12023_v39 }
 0x8a1   :  { %11652 = vmatpush3.bf16.msra.mxu0 %v12023_v39 }
 0x8a2   :  { %11653 = vmatprep.subr.bf16.mxu0 %v12024_v14 }
 0x8a5   :  { %11654 = vmatpush3.bf16.msra.mxu0 %v12024_v14 }
 0x8a6   :  { %11655 = vmatprep.subr.bf16.mxu0 %v12025_v53 }
 0x8a9   :  { %11656 = vmatpush3.bf16.msra.mxu0 %v12025_v53 }
 0x8aa   :  { %11665 = vmatprep.subr.bf16.mxu0 %v12026_v44 }
 0x8f2   :  { %v11631_v31 = vpop.f32.mrf.mxu0 }
 0x8f3   :  { %v6418_v7 = vadd.f32 %v11631_v31, %v6133_v2 }
 0x8f4   :  { %v6409_v43 = vpop.f32.mrf.mxu0 }
 0x8f5   :  { %v6410_v28 = vadd.f32 %v6409_v43, %v6133_v2  ;;  %v16766_v43 = vld [vmem:[#allocation3_spill] sm:$0xff] }
 0x8f6   :  { %v11632_v41 = vpop.f32.mrf.mxu0 }
 0x8f7   :  { %v6421_v61 = vadd.f32 %v11632_v41, %v6133_v2 }
 0x8f8   :  { %v6412_v21 = vpop.f32.mrf.mxu0 }
 0x8f9   :  { %v6413_v56 = vadd.f32 %v6412_v21, %v6133_v2  ;;  %v6445_v62 = vpack.c.bf16 %v6421_v61, %v6418_v7  ;;  %v10640_v61 = vld [vmem:[%s16285_s13 + $0x1] ss:$0 sm:$0xff] }
 0x8fb   :  { %v6444_v25 = vpack.c.bf16 %v6413_v56, %v6410_v28 }
 0x8fd   :  { %11645 = vmatprep.mubr.msk.bf16.mxu0 %vm1229_vm6, %v6444_v25 }
 0x8fe   :  { %11646 = vmatmul.mubr.msk.bf16.gmra.mxu0 %vm1229_vm6, %v6445_v62 }
 0x8ff   :  { %11657 = vmatprep.mubr.msk.bf16.mxu0 %vm1229_vm6, %v16762_v32  ;;  %v16767_v32 = vld [vmem:[#allocation56_spill] sm:$0xff] }
 0x906   :  { %11658 = vmatmul.mubr.msk.bf16.vlgmr.msra.gmra.mxu0 %vm1229_vm6, %v16763_v17  ;;  %v16768_v17 = vmax.f32 %v16767_v32, 0.0  ;;  %v16808_v32 = vld [vmem:[#allocation36_spill] sm:$0xff] }
 0x907   :  { %11661 = vmatprep.mubr.msk.bf16.mxu0 %vm1229_vm6, %v16764_v46  ;;  %11666 = vmatpush3.bf16.msra.mxu0 %v12026_v44 }
 0x908   :  { %11667 = vmatprep.subr.bf16.mxu0 %v12027_v6 }
 0x90b   :  { %11668 = vmatpush3.bf16.msra.mxu0 %v12027_v6 }
 0x90c   :  { %11669 = vmatprep.subr.bf16.mxu0 %v12028_v15 }
 0x90e   :  { %11662 = vmatmul.mubr.msk.bf16.gmra.mxu0 %vm1229_vm6, %v16765_v1  ;;  %v16770_v1 = vld [vmem:[#allocation50_spill] sm:$0xff] }
 0x90f   :  { %11670 = vmatpush3.bf16.msra.mxu0 %v12028_v15  ;;  %v16771_v44 = vmax.f32 %v16770_v1, 0.0  ;;  %v16809_v1 = vld [vmem:[#allocation11_spill] sm:$0xff] }
 0x910   :  { %11671 = vmatprep.subr.bf16.mxu0 %v12029_v47 }
 0x913   :  { %11672 = vmatpush3.bf16.msra.mxu0 %v12029_v47 }
 0x95c   :  { %v11643_v22 = vpop.f32.mrf.mxu0 }
 0x95e   :  { %v6516_v13 = vpop.f32.mrf.mxu0 }
 0x960   :  { %v11644_v9 = vpop.f32.mrf.mxu0 }
 0x962   :  { %v6519_v48 = vpop.f32.mrf.mxu0 }
 0x9be   :  { %v11647_v20 = vpop.f32.mrf.mxu0 }
 0x9c0   :  { %v6532_v59 = vpop.f32.mrf.mxu0 }
 0x9c2   :  { %v11648_v16 = vpop.f32.mrf.mxu0 }
 0x9c4   :  { %v6535_v49 = vpop.f32.mrf.mxu0 }
 0x9c6   :  { %v11659_v52 = vpop.f32.mrf.mxu0 }
 0x9c7   :  { %v6614_v10 = vadd.f32 %v11659_v52, %v11643_v22  ;;  %v16773_v22 = vld [vmem:[#allocation57_spill] sm:$0xff] }
 0x9c8   :  { %v6605_v30 = vpop.f32.mrf.mxu0 }
 0x9c9   :  { %v6606_v50 = vadd.f32 %v6605_v30, %v6516_v13  ;;  %v6646_v19 = vadd.f32 %v10630_v5, %v6614_v10  ;;  %v16774_v13 = vmax.f32 %v16773_v22, 0.0  ;;  %v16813_v22 = vld [vmem:[#allocation14_spill] sm:$0xff] }
 0x9ca   :  { %v11660_v63 = vpop.f32.mrf.mxu0 }
 0x9cb   :  { %v6617_v55 = vadd.f32 %v11660_v63, %v11644_v9  ;;  %v6644_v60 = vadd.f32 %v10630_v5, %v6606_v50  ;;  %v6654_v12 = vmax.f32 %v6646_v19, 0.0 }
 0x9cc   :  { %v6608_v35 = vpop.f32.mrf.mxu0 }
 0x9cd   :  { %v6647_v8 = vadd.f32 %v10630_v5, %v6617_v55  ;;  %v6609_v57 = vadd.f32 %v6608_v35, %v6519_v48  ;;  %v6652_v0 = vmax.f32 %v6644_v60, 0.0  ;;  %v16776_v48 = vld [vmem:[#allocation51_spill] sm:$0xff]  ;;  %v16780_v35 = vld [vmem:[#allocation49_spill] sm:$0xff] }
 0x9ce   :  { %v11663_v23 = vpop.f32.mrf.mxu0  ;;  %v16781_v60 = vmax.f32 %v16780_v35, 0.0  ;;  %v12036_v35 = vld [vmem:[%s16508_s30 + $0x48] sm:$0xff]  }
 0x9cf   :  { %v6645_v11 = vadd.f32 %v10630_v5, %v6609_v57  ;;  %v6655_v38 = vmax.f32 %v6647_v8, 0.0  ;;  %v6630_v54 = vadd.f32 %v11663_v23, %v11647_v20  ;;  %v16777_v20 = vmax.f32 %v16776_v48, 0.0  ;;  %v16815_v48 = vld [vmem:[#allocation16_spill] sm:$0xff] }
 0x9d0   :  { %v6621_v42 = vpop.f32.mrf.mxu0 }
 0x9d1   :  { %v6653_v36 = vmax.f32 %v6645_v11, 0.0  ;;  %v6622_v4 = vadd.f32 %v6621_v42, %v6532_v59  ;;  %v6670_v2 = vpack.c.bf16 %v6655_v38, %v6654_v12  ;;  %v6650_v29 = vadd.f32 %v10630_v5, %v6630_v54  ;;  %v16784_v11 = vld [vmem:[#allocation52_spill] sm:$0xff] }
 0x9d2   :  { %v11664_v33 = vpop.f32.mrf.mxu0  ;;  %v16785_v38 = vmax.f32 %v16784_v11, 0.0  ;;  %v16822_v11 = vld [vmem:[#allocation43_spill] sm:$0xff] }
 0x9d3   :  { %v6669_v58 = vpack.c.bf16 %v6653_v36, %v6652_v0  ;;  %v6633_v45 = vadd.f32 %v11664_v33, %v11648_v16  ;;  %v6648_v27 = vadd.f32 %v10630_v5, %v6622_v4  ;;  %v6658_v14 = vmax.f32 %v6650_v29, 0.0  ;;  %v16787_v0 = vld [vmem:[#allocation62_spill] sm:$0xff]  ;;  %v16795_v29 = vld [vmem:[#allocation4_spill] sm:$0xff] }
 0x9d4   :  { %v6624_v40 = vpop.f32.mrf.mxu0  ;;  %v16788_v36 = vmax.f32 %v16787_v0, 0.0  ;;  %v16824_v0 = vld [vmem:[#allocation45_spill] sm:$0xff] }
 0x9d5   :  { %v6651_v37 = vadd.f32 %v10630_v5, %v6633_v45  ;;  %v6625_v51 = vadd.f32 %v6624_v40, %v6535_v49  ;;  %11673 = vmatprep.mubr.msk.bf16.mxu0 %vm1229_vm6, %v6669_v58  ;;  %v6656_v26 = vmax.f32 %v6648_v27, 0.0  ;;  %v16790_v58 = vld [vmem:[#allocation53_spill] sm:$0xff] }
 0x9d6   :  { %11674 = vmatmul.mubr.msk.bf16.vlgmr.msra.gmra.mxu0 %vm1229_vm6, %v6670_v2  ;;  %v16791_v45 = vmax.f32 %v16790_v58, 0.0 }
 0x9d7   :  { %v6649_v24 = vadd.f32 %v10630_v5, %v6625_v51  ;;  %v6659_v3 = vmax.f32 %v6651_v37, 0.0  ;;  %v16794_v51 = vld [vmem:[#allocation2_spill] sm:$0xff] }
 0x9d9   :  { %v6657_v39 = vmax.f32 %v6649_v24, 0.0  ;;  %v6672_v31 = vpack.c.bf16 %v6659_v3, %v6658_v14  ;;  %v12030_v3 = vld [vmem:[%s16503_s2 + $0x58] sm:$0xff]   ;;  %v16798_v14 = vld [vmem:[#allocation31_spill] sm:$0xff] }
 0x9db   :  { %v6671_v53 = vpack.c.bf16 %v6657_v39, %v6656_v26  ;;  %v12031_v26 = vld [vmem:[%s16503_s2 + $0x50] sm:$0xff]   ;;  %v16797_v39 = vld [vmem:[#allocation5_spill] sm:$0xff] }
 0x9dd   :  { %11677 = vmatprep.mubr.msk.bf16.mxu0 %vm1229_vm6, %v6671_v53  ;;  %v16799_v53 = vld [vmem:[#allocation6_spill] sm:$0xff] }
 0x9de   :  { %11678 = vmatmul.mubr.msk.bf16.gmra.mxu0 %vm1229_vm6, %v6672_v31  ;;  %v16800_v31 = vld [vmem:[#allocation32_spill] sm:$0xff] }
 0x9df   :  { %11683 = vmatprep.mubr.msk.bf16.mxu0 %vm702_vm4, %v16766_v43  ;;  %v12032_v43 = vld [vmem:[%s16503_s2 + $0x48] sm:$0xff]  }
 0xa96   :  { %v11675_v41 = vpop.f32.mrf.mxu0 }
 0xa97   :  { %v6760_v7 = vadd.f32 %v11675_v41, %v10640_v61  ;;  %v12033_v41 = vld [vmem:[%s16503_s2 + $0x40] sm:$0xff]  }
 0xa98   :  { %v6751_v21 = vpop.f32.mrf.mxu0 }
 0xa99   :  { %v6752_v28 = vadd.f32 %v10640_v61, %v6751_v21  ;;  %v14949_v9 = vadd.f32 %v6760_v7, %v16774_v13  ;;  %v16802_v21 = vld [vmem:[#allocation33_spill] sm:$0xff]  ;;  %v16814_v13 = vld [vmem:[#allocation15_spill] sm:$0xff] }
 0xa9a   :  { %v11676_v56 = vpop.f32.mrf.mxu0  ;;  %v16805_v7 = vld [vmem:[#allocation9_spill] sm:$0xff] }
 0xa9b   :  { %v6763_v25 = vadd.f32 %v11676_v56, %v10640_v61  ;;  %v14941_v46 = vadd.f32 %v6752_v28, %v16768_v17  ;;  %16775 = vst [vmem:[#allocation29_spill] sm:$0xff] %v14949_v9  ;;  %v16433_v5 = vmax.f32 %v14949_v9, 0.0  ;;  %v16803_v28 = vld [vmem:[#allocation8_spill] sm:$0xff]  ;;  %v16804_v56 = vld [vmem:[#allocation34_spill] sm:$0xff]  ;;  %v12034_v17 = vld [vmem:[%s16508_s30 + $0x58] sm:$0xff]  }
 0xa9c   :  { %v6754_v62 = vpop.f32.mrf.mxu0 }
 0xa9d   :  { %16769 = vst [vmem:[#allocation26_spill] sm:$0xff] %v14941_v46  ;;  %v14945_v6 = vadd.f32 %v6763_v25, %v16771_v44  ;;  %v6755_v15 = vadd.f32 %v10640_v61, %v6754_v62  ;;  %v16435_v52 = vmax.f32 %v14941_v46, 0.0  ;;  %v16806_v25 = vld [vmem:[#allocation35_spill] sm:$0xff]  ;;  %v16807_v62 = vld [vmem:[#allocation10_spill] sm:$0xff]  ;;  %v16810_v44 = vld [vmem:[#allocation37_spill] sm:$0xff] }
 0xa9e   :  { %v11679_v47 = vpop.f32.mrf.mxu0 }
 0xa9f   :  { %16772 = vst [vmem:[#allocation27_spill] sm:$0xff] %v14945_v6  ;;  %v14953_v59 = vadd.f32 %v6755_v15, %v16777_v20  ;;  %v6776_v16 = vadd.f32 %v11679_v47, %v10640_v61  ;;  %v16434_v30 = vmax.f32 %v14945_v6, 0.0  ;;  %v16811_v15 = vld [vmem:[#allocation12_spill] sm:$0xff]  ;;  %v16812_v47 = vld [vmem:[#allocation13_spill] sm:$0xff] }
 0xaa0   :  { %v6767_v49 = vpop.f32.mrf.mxu0  ;;  %v16816_v20 = vld [vmem:[#allocation17_spill] sm:$0xff] }
 0xaa1   :  { %16778 = vst [vmem:[#allocation46_spill] sm:$0xff] %v14953_v59  ;;  %v16432_v50 = vmax.f32 %v14953_v59, 0.0  ;;  %v6768_v10 = vadd.f32 %v10640_v61, %v6767_v49  ;;  %v14967_v8 = vadd.f32 %v6776_v16, %v16781_v60  ;;  %v14973_v23 = vpack.c.bf16 %v16434_v30, %v16433_v5  ;;  %v16817_v16 = vld [vmem:[#allocation38_spill] sm:$0xff]  ;;  %v12035_v49 = vld [vmem:[%s16508_s30 + $0x50] sm:$0xff]  }
 0xaa2   :  { %v11680_v63 = vpop.f32.mrf.mxu0  ;;  %v12037_v60 = vld [vmem:[%s16508_s30 + $0x40] sm:$0xff]  }
 0xaa3   :  { %v14963_v55 = vpack.c.bf16 %v16432_v50, %v16435_v52  ;;  %16782 = vst [vmem:[#allocation48_spill] sm:$0xff] %v14967_v8  ;;  %v6779_v57 = vadd.f32 %v11680_v63, %v10640_v61  ;;  %16783 = vst [vmem:[#allocation68_spill] sm:$0xff] %v14973_v23  ;;  %v14977_v42 = vadd.f32 %v6768_v10, %v16785_v38  ;;  %v16429_v54 = vmax.f32 %v14967_v8, 0.0  ;;  %v16818_v10 = vld [vmem:[#allocation39_spill] sm:$0xff]  ;;  %v16819_v63 = vld [vmem:[#allocation40_spill] sm:$0xff] }
 0xaa4   :  { %v6770_v19 = vpop.f32.mrf.mxu0  ;;  %v16823_v38 = vld [vmem:[#allocation44_spill] sm:$0xff] }
 0xaa5   :  { %16779 = vst [vmem:[#allocation61_spill] sm:$0xff] %v14963_v55  ;;  %16786 = vst [vmem:[#allocation73_spill] sm:$0xff] %v14977_v42  ;;  %v14981_v4 = vadd.f32 %v6779_v57, %v16788_v36  ;;  %v6771_v12 = vadd.f32 %v10640_v61, %v6770_v19  ;;  %11681 = vmatprep.subr.bf16.mxu0 %v14963_v55  ;;  %v16431_v40 = vmax.f32 %v14977_v42, 0.0  ;;  %v16801_v61 = vld [vmem:[#allocation7_spill] sm:$0xff]  ;;  %v16820_v57 = vld [vmem:[#allocation41_spill] sm:$0xff] }
 0xaa6   :  { %11682 = vmatpush3.bf16.msra.mxu0 %v14963_v55  ;;  %v16821_v19 = vld [vmem:[#allocation42_spill] sm:$0xff]  ;;  %v12039_v8 = vld [vmem:[%s16279_s7 + $0x50] sm:$0xff]  }
 0xaa7   :  { %16789 = vst [vmem:[#allocation71_spill] sm:$0xff] %v14981_v4  ;;  %v16430_v33 = vmax.f32 %v14981_v4, 0.0  ;;  %v14989_v2 = vadd.f32 %v6771_v12, %v16791_v45  ;;  %11699 = vmatprep.subr.bf16.mxu0 %v14973_v23 }
 0xaa9   :  { %16792 = vst [vmem:[#allocation70_spill] sm:$0xff] %v14989_v2  ;;  %v14997_v27 = vpack.c.bf16 %v16430_v33, %v16429_v54  ;;  %v16428_v37 = vmax.f32 %v14989_v2, 0.0  ;;  %11684 = vmatmul.mubr.msk.bf16.vlgmr.msra.gmra.mxu0 %vm702_vm4, %v16794_v51 }
 0xaaa   :  { %11687 = vmatprep.mubr.msk.bf16.mxu0 %vm702_vm4, %v16795_v29  ;;  %11700 = vmatpush3.bf16.msra.mxu0 %v14973_v23 }
 0xaab   :  { %16793 = vst [vmem:[#allocation64_spill] sm:$0xff] %v14997_v27  ;;  %v15009_v24 = vpack.c.bf16 %v16428_v37, %v16431_v40  ;;  %11735 = vmatprep.subr.bf16.mxu0 %v14997_v27 }
 0xaad   :  { %16796 = vst [vmem:[#allocation23_spill] sm:$0xff] %v15009_v24  ;;  %11717 = vmatprep.subr.bf16.mxu1 %v15009_v24 }
 0xaae   :  { %11718 = vmatpush3.bf16.msra.mxu1 %v15009_v24 }
 0xaaf   :  { %11753 = vmatprep.subr.bf16.mxu1 %v12030_v3 }
 0xab1   :  { %11688 = vmatmul.mubr.msk.bf16.gmra.mxu0 %vm702_vm4, %v16797_v39  ;;  %11720 = vmatmul.mubr.msk.bf16.vlgmr.msra.gmra.mxu1 %vm702_vm4, %v16798_v14 }
 0xab2   :  { %11691 = vmatprep.mubr.msk.bf16.mxu0 %vm702_vm4, %v16799_v53  ;;  %11723 = vmatprep.mubr.msk.bf16.mxu1 %vm702_vm4, %v16800_v31 }
 0xab3   :  { %11754 = vmatpush3.bf16.msra.mxu1 %v12030_v3 }
 0xab4   :  { %11755 = vmatprep.subr.bf16.mxu1 %v12031_v26 }
 0xab7   :  { %11756 = vmatpush3.bf16.msra.mxu1 %v12031_v26 }
 0xab8   :  { %11757 = vmatprep.subr.bf16.mxu1 %v12032_v43 }
 0xab9   :  { %11692 = vmatmul.mubr.msk.bf16.gmra.mxu0 %vm702_vm4, %v16801_v61  ;;  %11724 = vmatmul.mubr.msk.bf16.gmra.mxu1 %vm702_vm4, %v16802_v21 }
 0xaba   :  { %11695 = vmatprep.mubr.msk.bf16.mxu0 %vm702_vm4, %v16803_v28  ;;  %11727 = vmatprep.mubr.msk.bf16.mxu1 %vm702_vm4, %v16804_v56 }
 0xabb   :  { %11758 = vmatpush3.bf16.msra.mxu1 %v12032_v43 }
 0xabc   :  { %11759 = vmatprep.subr.bf16.mxu1 %v12033_v41 }
 0xabf   :  { %11760 = vmatpush3.bf16.msra.mxu1 %v12033_v41 }
 0xac1   :  { %11696 = vmatmul.mubr.msk.bf16.gmra.mxu0 %vm702_vm4, %v16805_v7  ;;  %11728 = vmatmul.mubr.msk.bf16.gmra.mxu1 %vm702_vm4, %v16806_v25 }
 0xac2   :  { %11701 = vmatprep.mubr.msk.bf16.mxu0 %vm702_vm4, %v16807_v62  ;;  %11731 = vmatprep.mubr.msk.bf16.mxu1 %vm702_vm4, %v16808_v32 }
 0xac9   :  { %11702 = vmatmul.mubr.msk.bf16.vlgmr.msra.gmra.mxu0 %vm702_vm4, %v16809_v1  ;;  %11732 = vmatmul.mubr.msk.bf16.gmra.mxu1 %vm702_vm4, %v16810_v44 }
 0xaca   :  { %11736 = vmatpush3.bf16.msra.mxu0 %v14997_v27  ;;  %11705 = vmatprep.mubr.msk.bf16.mxu0 %vm702_vm4, %v16811_v15 }
 0xacb   :  { %11761 = vmatprep.mubr.msk.bf16.mxu1 %vm1229_vm6, %v14963_v55  ;;  %11769 = vmatprep.subr.bf16.mxu0 %v12034_v17 }
 0xad1   :  { %11706 = vmatmul.mubr.msk.bf16.gmra.mxu0 %vm702_vm4, %v16812_v47  ;;  %11762 = vmatmul.mubr.msk.bf16.vlgmr.msra.gmra.mxu1 %vm1229_vm6, %v14973_v23 }
 0xad2   :  { %11709 = vmatprep.mubr.msk.bf16.mxu0 %vm702_vm4, %v16813_v22  ;;  %11765 = vmatprep.mubr.msk.bf16.mxu1 %vm1229_vm6, %v15009_v24 }
 0xad9   :  { %11710 = vmatmul.mubr.msk.bf16.gmra.mxu0 %vm702_vm4, %v16814_v13  ;;  %11766 = vmatmul.mubr.msk.bf16.gmra.mxu1 %vm1229_vm6, %v14997_v27 }
 0xada   :  { %11713 = vmatprep.mubr.msk.bf16.mxu0 %vm702_vm4, %v16815_v48 }
 0xae1   :  { %11714 = vmatmul.mubr.msk.bf16.gmra.mxu0 %vm702_vm4, %v16816_v20 }
 0xae2   :  { %11737 = vmatprep.mubr.msk.bf16.mxu0 %vm702_vm4, %v16817_v16 }
 0xae9   :  { %11738 = vmatmul.mubr.msk.bf16.vlgmr.msra.gmra.mxu0 %vm702_vm4, %v16818_v10 }
 0xaea   :  { %11741 = vmatprep.mubr.msk.bf16.mxu0 %vm702_vm4, %v16819_v63  ;;  %11770 = vmatpush3.bf16.msra.mxu0 %v12034_v17 }
 0xaeb   :  { %11771 = vmatprep.subr.bf16.mxu0 %v12035_v49 }
 0xaee   :  { %11772 = vmatpush3.bf16.msra.mxu0 %v12035_v49 }
 0xaef   :  { %11773 = vmatprep.subr.bf16.mxu0 %v12036_v35 }
 0xaf1   :  { %11742 = vmatmul.mubr.msk.bf16.gmra.mxu0 %vm702_vm4, %v16820_v57 }
 0xaf2   :  { %11745 = vmatprep.mubr.msk.bf16.mxu0 %vm702_vm4, %v16821_v19  ;;  %11774 = vmatpush3.bf16.msra.mxu0 %v12036_v35 }
 0xaf3   :  { %11775 = vmatprep.subr.bf16.mxu0 %v12037_v60 }
 0xaf6   :  { %11776 = vmatpush3.bf16.msra.mxu0 %v12037_v60 }
 0xaf9   :  { %11746 = vmatmul.mubr.msk.bf16.gmra.mxu0 %vm702_vm4, %v16822_v11 }
 0xafa   :  { %11749 = vmatprep.mubr.msk.bf16.mxu0 %vm702_vm4, %v16823_v38 }
 0xb01   :  { %11750 = vmatmul.mubr.msk.bf16.gmra.mxu0 %vm702_vm4, %v16824_v0  ;;  %vm10235_vm4 = vcmask 64512  }
 0xb69   :  { %v11685_v36 = vpop.f32.mrf.mxu0 }
 0xb6b   :  { %v6833_v12 = vpop.f32.mrf.mxu0 }
 0xb6d   :  { %v11686_v58 = vpop.f32.mrf.mxu0 }
 0xb6e   :  { %v7318_v29 = vpack.c.bf16 %v11686_v58, %v11685_v36 }
 0xb6f   :  { %v6836_v45 = vpop.f32.mrf.mxu0 }
 0xb70   :  { %v7317_v51 = vpack.c.bf16 %v6836_v45, %v6833_v12 }
 0xb71   :  { %v11689_v3 = vpop.f32.mrf.mxu0  ;;  %v15108_v25 = vpop.f32.mrf.mxu1 }
 0xb72   :  { %11777 = vmatprep.mubr.msk.bf16.mxu0 %vm1229_vm6, %v7317_v51 }
 0xb73   :  { %v6849_v26 = vpop.f32.mrf.mxu0  ;;  %11778 = vmatmul.mubr.msk.bf16.vlgmr.msra.gmra.mxu0 %vm1229_vm6, %v7318_v29  ;;  %v7029_v17 = vpop.f32.mrf.mxu1 }
 0xb75   :  { %v11690_v39 = vpop.f32.mrf.mxu0  ;;  %v11722_v22 = vpop.f32.mrf.mxu1 }
 0xb76   :  { %v7320_v31 = vpack.c.bf16 %v11690_v39, %v11689_v3 }
 0xb77   :  { %v6852_v14 = vpop.f32.mrf.mxu0  ;;  %v7032_v20 = vpop.f32.mrf.mxu1 }
 0xb78   :  { %v7319_v53 = vpack.c.bf16 %v6852_v14, %v6849_v26 }
 0xb79   :  { %v11693_v43 = vpop.f32.mrf.mxu0  ;;  %v11725_v35 = vpop.f32.mrf.mxu1 }
 0xb7a   :  { %11781 = vmatprep.mubr.msk.bf16.mxu0 %vm1229_vm6, %v7319_v53 }
 0xb7b   :  { %v6865_v41 = vpop.f32.mrf.mxu0  ;;  %11782 = vmatmul.mubr.msk.bf16.gmra.mxu0 %vm1229_vm6, %v7320_v31  ;;  %v7045_v19 = vpop.f32.mrf.mxu1 }
 0xb7d   :  { %v11694_v61 = vpop.f32.mrf.mxu0  ;;  %v11726_v12 = vpop.f32.mrf.mxu1 }
 0xb7e   :  { %v7322_v56 = vpack.c.bf16 %v11694_v61, %v11693_v43 }
 0xb7f   :  { %v6868_v21 = vpop.f32.mrf.mxu0  ;;  %v7048_v51 = vpop.f32.mrf.mxu1 }
 0xb80   :  { %v7321_v28 = vpack.c.bf16 %v6868_v21, %v6865_v41 }
 0xb81   :  { %v11697_v7 = vpop.f32.mrf.mxu0  ;;  %v11729_v14 = vpop.f32.mrf.mxu1 }
 0xb82   :  { %11785 = vmatprep.mubr.msk.bf16.mxu0 %vm1229_vm6, %v7321_v28 }
 0xb83   :  { %v6881_v62 = vpop.f32.mrf.mxu0  ;;  %11786 = vmatmul.mubr.msk.bf16.gmra.mxu0 %vm1229_vm6, %v7322_v56  ;;  %v7061_v43 = vpop.f32.mrf.mxu1  ;;  %v7333_v56 = vpack.c.bf16 %v7032_v20, %v7029_v17 }
 0xb85   :  { %v11698_v32 = vpop.f32.mrf.mxu0 }
 0xb86   :  { %v7324_v15 = vpack.c.bf16 %v11698_v32, %v11697_v7  ;;  %v11730_v7 = vpop.f32.mrf.mxu1 }
 0xb87   :  { %v6884_v1 = vpop.f32.mrf.mxu0 }
 0xb88   :  { %v7323_v44 = vpack.c.bf16 %v6884_v1, %v6881_v62  ;;  %v7064_v1 = vpop.f32.mrf.mxu1 }
 0xb89   :  { %v11703_v47 = vpop.f32.mrf.mxu0 }
 0xb8a   :  { %11789 = vmatprep.mubr.msk.bf16.mxu0 %vm1229_vm6, %v7323_v44 }
 0xb8b   :  { %v6931_v13 = vpop.f32.mrf.mxu0  ;;  %11790 = vmatmul.mubr.msk.bf16.gmra.mxu0 %vm1229_vm6, %v7324_v15  ;;  %v7334_v15 = vpack.c.bf16 %v11722_v22, %v15108_v25  ;;  %v7338_v25 = vpack.c.bf16 %v11730_v7, %v11729_v14 }
 0xb8d   :  { %v11704_v48 = vpop.f32.mrf.mxu0 }
 0xb8e   :  { %v7326_v10 = vpack.c.bf16 %v11704_v48, %v11703_v47  ;;  %v7335_v47 = vpack.c.bf16 %v7048_v51, %v7045_v19 }
 0xb8f   :  { %v6934_v16 = vpop.f32.mrf.mxu0 }
 0xb90   :  { %v7325_v49 = vpack.c.bf16 %v6934_v16, %v6931_v13  ;;  %v11733_v13 = vpop.f32.mrf.mxu1  ;;  %v7336_v16 = vpack.c.bf16 %v11726_v12, %v11725_v35 }
 0xb91   :  { %v11707_v63 = vpop.f32.mrf.mxu0 }
 0xb92   :  { %11793 = vmatprep.mubr.msk.bf16.mxu0 %vm1229_vm6, %v7325_v49  ;;  %v7077_v17 = vpop.f32.mrf.mxu1  ;;  %v7337_v49 = vpack.c.bf16 %v7064_v1, %v7061_v43 }
 0xb93   :  { %v6947_v60 = vpop.f32.mrf.mxu0  ;;  %11794 = vmatmul.mubr.msk.bf16.gmra.mxu0 %vm1229_vm6, %v7326_v10 }
 0xb94   :  { %v11734_v10 = vpop.f32.mrf.mxu1 }
 0xb95   :  { %v11708_v57 = vpop.f32.mrf.mxu0 }
 0xb96   :  { %v7328_v0 = vpack.c.bf16 %v11708_v57, %v11707_v63 }
 0xb97   :  { %v6950_v11 = vpop.f32.mrf.mxu0 }
 0xb98   :  { %v7327_v38 = vpack.c.bf16 %v6950_v11, %v6947_v60  ;;  %v7080_v60 = vpop.f32.mrf.mxu1 }
 0xb99   :  { %v11711_v36 = vpop.f32.mrf.mxu0  ;;  %v7339_v22 = vpack.c.bf16 %v7080_v60, %v7077_v17 }
 0xb9a   :  { %11797 = vmatprep.mubr.msk.bf16.mxu0 %vm1229_vm6, %v7327_v38  ;;  %v7340_v38 = vpack.c.bf16 %v11734_v10, %v11733_v13  ;;  %v11763_v43 = vpop.f32.mrf.mxu1 }
 0xb9b   :  { %v6963_v58 = vpop.f32.mrf.mxu0  ;;  %11798 = vmatmul.mubr.msk.bf16.gmra.mxu0 %vm1229_vm6, %v7328_v0 }
 0xb9d   :  { %v11712_v45 = vpop.f32.mrf.mxu0 }
 0xb9e   :  { %v7330_v26 = vpack.c.bf16 %v11712_v45, %v11711_v36 }
 0xb9f   :  { %v6966_v29 = vpop.f32.mrf.mxu0 }
 0xba0   :  { %v7329_v3 = vpack.c.bf16 %v6966_v29, %v6963_v58 }
 0xba1   :  { %v11715_v39 = vpop.f32.mrf.mxu0 }
 0xba2   :  { %11801 = vmatprep.mubr.msk.bf16.mxu0 %vm1229_vm6, %v7329_v3 }
 0xba3   :  { %v6979_v53 = vpop.f32.mrf.mxu0  ;;  %11802 = vmatmul.mubr.msk.bf16.gmra.mxu0 %vm1229_vm6, %v7330_v26 }
 0xba5   :  { %v11716_v31 = vpop.f32.mrf.mxu0 }
 0xba6   :  { %v7332_v21 = vpack.c.bf16 %v11716_v31, %v11715_v39 }
 0xba7   :  { %v6982_v41 = vpop.f32.mrf.mxu0 }
 0xba8   :  { %v7331_v61 = vpack.c.bf16 %v6982_v41, %v6979_v53  ;;  %v7277_v41 = vpop.f32.mrf.mxu1 }
 0xba9   :  { %v11739_v28 = vpop.f32.mrf.mxu0 }
 0xbaa   :  { %11805 = vmatprep.mubr.msk.bf16.mxu0 %vm1229_vm6, %v7331_v61  ;;  %v11764_v61 = vpop.f32.mrf.mxu1 }
 0xbab   :  { %v7127_v62 = vpop.f32.mrf.mxu0  ;;  %11806 = vmatmul.mubr.msk.bf16.gmra.mxu0 %vm1229_vm6, %v7332_v21 }
 0xbac   :  { %11809 = vmatprep.mubr.msk.bf16.mxu0 %vm1229_vm6, %v7333_v56  ;;  %v7280_v21 = vpop.f32.mrf.mxu1 }
 0xbad   :  { %v11740_v32 = vpop.f32.mrf.mxu0 }
 0xbae   :  { %v7342_v12 = vpack.c.bf16 %v11740_v32, %v11739_v28  ;;  %v10690_v28 = vld [vmem:[%s16278_s6 + $0x2] ss:$0 sm:$0xff]  ;;  %v11767_v56 = vpop.f32.mrf.mxu1 }
 0xbaf   :  { %v7130_v44 = vpop.f32.mrf.mxu0  ;;  %v7286_v7 = vadd.f32 %v11763_v43, %v10690_v28 }
 0xbb0   :  { %v7341_v0 = vpack.c.bf16 %v7130_v44, %v7127_v62  ;;  %v7278_v62 = vadd.f32 %v10690_v28, %v7277_v41  ;;  %v7293_v32 = vpop.f32.mrf.mxu1  ;;  %v7289_v44 = vadd.f32 %v11764_v61, %v10690_v28 }
 0xbb1   :  { %v11743_v48 = vpop.f32.mrf.mxu0  ;;  %v7864_v1 = vcombine.high %v7286_v7, %v7286_v7  ;;  %v15143_v17 = vrot.slane %v7286_v7, %v16673_v34  ;;  %v7294_v60 = vadd.f32 %v10690_v28, %v7293_v32 }
 0xbb2   :  { %v11768_v13 = vpop.f32.mrf.mxu1 }
 0xbb3   :  { %11810 = vmatmul.mubr.msk.bf16.gmra.mxu0 %vm1229_vm6, %v7334_v15  ;;  %v7143_v20 = vpop.f32.mrf.mxu0  ;;  %v7766_v15 = vcombine.high %v7278_v62, %v7278_v62  ;;  %v15183_v61 = vrot.slane %v7294_v60, %v16673_v34 }
 0xbb4   :  { %11813 = vmatprep.mubr.msk.bf16.mxu0 %vm1229_vm6, %v7335_v47  ;;  %v7773_v47 = vrot.slane %v7278_v62, %v16673_v34 }
 0xbb5   :  { %v11744_v63 = vpop.f32.mrf.mxu0  ;;  %v7780_v10 = vrot.slane %v7766_v15, %v16673_v34 }
 0xbb6   :  { %v7344_v29 = vpack.c.bf16 %v11744_v63, %v11743_v48  ;;  %v7281_v48 = vadd.f32 %v10690_v28, %v7280_v21  ;;  %v15150_v63 = vrot.slane %v7773_v47, %v16673_v34 }
 0xbb7   :  { %v7146_v57 = vpop.f32.mrf.mxu0 }
 0xbb8   :  { %v7343_v58 = vpack.c.bf16 %v7146_v57, %v7143_v20  ;;  %v7302_v20 = vadd.f32 %v11767_v56, %v10690_v28  ;;  %v7296_v57 = vpop.f32.mrf.mxu1 }
 0xbb9   :  { %v11747_v19 = vpop.f32.mrf.mxu0 }
 0xbbb   :  { %11814 = vmatmul.mubr.msk.bf16.gmra.mxu0 %vm1229_vm6, %v7336_v16  ;;  %v7159_v11 = vpop.f32.mrf.mxu0  ;;  %v15146_v16 = vrot.slane %v7864_v1, %v16673_v34 }
 0xbbc   :  { %11817 = vmatprep.mubr.msk.bf16.mxu0 %vm1229_vm6, %v7337_v49  ;;  %v7913_v49 = vcombine.high %v7289_v44, %v7289_v44 }
 0xbbd   :  { %v11748_v35 = vpop.f32.mrf.mxu0  ;;  %v15285_v5 = vrot.slane %v15146_v16, %v16673_v34 }
 0xbbe   :  { %v7346_v14 = vpack.c.bf16 %v11748_v35, %v11747_v19  ;;  %v7305_v19 = vadd.f32 %v11768_v13, %v10690_v28  ;;  %v7880_v35 = vcombine.high %v15146_v16, %v15146_v16 }
 0xbbf   :  { %v7162_v36 = vpop.f32.mrf.mxu0  ;;  %v7910_v16 = vcombine.high %v15285_v5, %v15285_v5 }
 0xbc0   :  { %v7345_v3 = vpack.c.bf16 %v7162_v36, %v7159_v11  ;;  %v7879_v11 = vcombine.high %v15143_v17, %v15143_v17  ;;  %v15162_v36 = vrot.slane %v15143_v17, %v16673_v34  ;;  %v15191_v56 = vrot.slane %v7305_v19, %v16673_v34 }
 0xbc1   :  { %v11751_v45 = vpop.f32.mrf.mxu0 }
 0xbc2   :  { %v15273_v33 = vrot.slane %v7879_v11, %v16673_v34 }
 0xbc3   :  { %11818 = vmatmul.mubr.msk.bf16.gmra.mxu0 %vm1229_vm6, %v7338_v25  ;;  %v7175_v51 = vpop.f32.mrf.mxu0  ;;  %v15153_v25 = vrot.slane %v7289_v44, %v16673_v34  ;;  %v15203_v44 = vrot.slane %v7780_v10, %v16673_v34 }
 0xbc4   :  { %11821 = vmatprep.mubr.msk.bf16.mxu0 %vm1229_vm6, %v7339_v22  ;;  %v7815_v22 = vcombine.high %v7281_v48, %v7281_v48 }
 0xbc5   :  { %v11752_v26 = vpop.f32.mrf.mxu0 }
 0xbc6   :  { %v7348_v31 = vpack.c.bf16 %v11752_v26, %v11751_v45  ;;  %v7781_v45 = vcombine.high %v7773_v47, %v7773_v47  ;;  %v7928_v26 = vcombine.high %v15153_v25, %v15153_v25 }
 0xbc7   :  { %v7178_v39 = vpop.f32.mrf.mxu0 }
 0xbc8   :  { %v7347_v53 = vpack.c.bf16 %v7178_v39, %v7175_v51  ;;  %v7782_v51 = vcombine.high %v7780_v10, %v7780_v10  ;;  %v7829_v39 = vrot.slane %v7815_v22, %v16673_v34  ;;  %v15200_v1 = vrot.slane %v7781_v45, %v16673_v34 }
 0xbc9   :  { %v7911_v45 = vcombine.high %v15273_v33, %v15273_v33 }
 0xbca   :  { %v7831_v15 = vcombine.high %v7829_v39, %v7829_v39  ;;  %v15222_v10 = vrot.slane %v7782_v51, %v16673_v34 }
 0xbcb   :  { %11822 = vmatmul.mubr.msk.bf16.gmra.mxu0 %vm1229_vm6, %v7340_v38  ;;  %v7822_v38 = vrot.slane %v7281_v48, %v16673_v34 }
 0xbcc   :  { %11825 = vmatprep.mubr.msk.bf16.mxu0 %vm1229_vm6, %v7341_v0  ;;  %v8060_v0 = vcombine.high %v7302_v20, %v7302_v20  ;;  %v15264_v37 = vrot.slane %v7831_v15, %v16673_v34 }
 0xbcd   :  { %v7830_v43 = vcombine.high %v7822_v38, %v7822_v38 }
 0xbce   :  { %v15180_v41 = vrot.slane %v8060_v0, %v16673_v34  ;;  %v7813_v0 = vcombine.high %v15200_v1, %v15200_v1 }
 0xbd0   :  { %v15276_v40 = vrot.slane %v7813_v0, %v12878_v18 }
 0xbd3   :  { %11826 = vmatmul.mubr.msk.bf16.gmra.mxu0 %vm1229_vm6, %v7342_v12  ;;  %v15165_v12 = vrot.slane %v7913_v49, %v16673_v34 }
 0xbd4   :  { %11829 = vmatprep.mubr.msk.bf16.mxu0 %vm1229_vm6, %v7343_v58  ;;  %v7297_v58 = vadd.f32 %v10690_v28, %v7296_v57  ;;  %v15188_v28 = vrot.slane %v7822_v38, %v16673_v34  ;;  %v7863_v57 = vcombine.high %v15264_v37, %v15264_v37 }
 0xbd5   :  { %v7929_v21 = vcombine.high %v15165_v12, %v15165_v12  ;;  %v15326_v15 = vrot.slane %v15165_v12, %v16673_v34  ;;  %v15363_v12 = vrot.slane %v7910_v16, %v12878_v18 }
 0xbd6   :  { %v8011_v7 = vcombine.high %v7297_v58, %v7297_v58  ;;  %v15219_v49 = vrot.slane %v7297_v58, %v16673_v34  ;;  %v7812_v58 = vcombine.high %v15203_v44, %v15203_v44  ;;  %v7860_v51 = vcombine.high %v15188_v28, %v15188_v28 }
 0xbd7   :  { %v15338_v54 = vrot.slane %v7929_v21, %v16673_v34 }
 0xbd8   :  { %v15235_v22 = vrot.slane %v8011_v7, %v16673_v34  ;;  %v7814_v7 = vcombine.high %v15222_v10, %v15222_v10  ;;  %v15279_v50 = vrot.slane %v7812_v58, %v12878_v18  ;;  %v15288_v30 = vrot.slane %v7860_v51, %v12878_v18 }
 0xbd9   :  { %v7909_v58 = vcombine.high %v15162_v36, %v15162_v36  ;;  %v15307_v51 = vrot.slane %v7880_v35, %v16673_v34  ;;  %v15322_v35 = vrot.slane %v7928_v26, %v16673_v34  ;;  %16830 = vst [vmem:[#allocation72_spill] sm:$0xff] %v15338_v54  ;;  %v12038_v26 = vld [vmem:[%s16279_s7 + $0x58] sm:$0xff]   ;;  %v7961_v16 = vcombine.high %v15338_v54, %v15338_v54 }
 0xbda   :  { %v15297_v52 = vrot.slane %v7814_v7, %v12878_v18  ;;  %11841 = vmatprep.subr.bf16.mxu1 %v12038_v26 }
 0xbdb   :  { %11830 = vmatmul.mubr.msk.bf16.gmra.mxu0 %vm1229_vm6, %v7344_v29  ;;  %v7962_v29 = vcombine.high %v7294_v60, %v7294_v60  ;;  %v15226_v60 = vrot.slane %v15183_v61, %v16673_v34  ;;  %v15335_v47 = vrot.slane %v7909_v58, %v12878_v18  ;;  %v15353_v58 = vrot.slane %v7911_v45, %v12878_v18 }
 0xbdc   :  { %11833 = vmatprep.mubr.msk.bf16.mxu0 %vm1229_vm6, %v7345_v3  ;;  %v7811_v3 = vcombine.high %v15150_v63, %v15150_v63  ;;  %v7959_v45 = vcombine.high %v15326_v15, %v15326_v15  ;;  %11842 = vmatpush3.bf16.msra.mxu1 %v12038_v26  ;;  %v15419_v9 = vrot.slane %v7961_v16, %v12878_v18 }
 0xbdd   :  { %v15194_v62 = vrot.slane %v7962_v29, %v16673_v34  ;;  %16827 = vst [vmem:[#allocation47_spill] sm:$0xff] %v15226_v60  ;;  %v15250_v29 = vrot.slane %v7830_v43, %v16673_v34  ;;  %v8007_v38 = vcombine.high %v15226_v60, %v15226_v60  ;;  %v7960_v43 = vcombine.high %v15322_v35, %v15322_v35 }
 0xbde   :  { %v15197_v32 = vrot.slane %v7811_v3, %v12878_v18  ;;  %v15253_v3 = vrot.slane %v7829_v39, %v16673_v34  ;;  %v15344_v39 = vrot.slane %v7863_v57, %v12878_v18  ;;  %11843 = vmatprep.subr.bf16.mxu1 %v12039_v8  ;;  %v15408_v21 = vrot.slane %v7959_v45, %v12878_v18 }
 0xbdf   :  { %v7862_v11 = vcombine.high %v15250_v29, %v15250_v29  ;;  %v15398_v4 = vrot.slane %v8007_v38, %v12878_v18  ;;  %v16835_v38 = vcombine.high %v15219_v49, %v15219_v49 }
 0xbe0   :  { %v7861_v0 = vcombine.high %v15253_v3, %v15253_v3  ;;  %11844 = vmatpush3.bf16.msra.mxu1 %v12039_v8  ;;  %v12040_v8 = vld [vmem:[%s16279_s7 + $0x48] sm:$0xff]  }
 0xbe1   :  { %v15329_v17 = vrot.slane %v7862_v11, %v12878_v18  ;;  %v7912_v11 = vcombine.high %v15307_v51, %v15307_v51  ;;  %16834 = vst [vmem:[#allocation74_spill] sm:$0xff] %v15398_v4  ;;  %11845 = vmatprep.subr.bf16.mxu1 %v12040_v8 }
 0xbe2   :  { %v15332_v7 = vrot.slane %v7861_v0, %v12878_v18 }
 0xbe3   :  { %11834 = vmatmul.mubr.msk.bf16.gmra.mxu0 %vm1229_vm6, %v7346_v14  ;;  %v15173_v14 = vrot.slane %v7302_v20, %v16673_v34  ;;  %v7977_v20 = vcombine.high %v15183_v61, %v15183_v61  ;;  %v15259_v61 = vrot.slane %v15219_v49, %v16673_v34 }
 0xbe4   :  { %11837 = vmatprep.mubr.msk.bf16.mxu0 %vm1229_vm6, %v7347_v53  ;;  %v8109_v53 = vcombine.high %v7305_v19, %v7305_v19  ;;  %v7978_v19 = vcombine.high %v15194_v62, %v15194_v62  ;;  %11846 = vmatpush3.bf16.msra.mxu1 %v12040_v8 }
 0xbe5   :  { %v15209_v13 = vrot.slane %v15173_v14, %v16673_v34  ;;  %16829 = vst [vmem:[#allocation24_spill] sm:$0xff] %v15259_v61  ;;  %v15360_v57 = vrot.slane %v7977_v20, %v16673_v34 }
 0xbe6   :  { %v15212_v48 = vrot.slane %v8109_v53, %v16673_v34  ;;  %v15371_v53 = vrot.slane %v15194_v62, %v16673_v34  ;;  %v15380_v2 = vrot.slane %v7978_v19, %v16673_v34  ;;  %v15386_v62 = vrot.slane %v7912_v11, %v12878_v18 }
 0xbe7   :  { %16825 = vst [vmem:[#allocation65_spill] sm:$0xff] %v15209_v13  ;;  %16831 = vst [vmem:[#allocation19_spill] sm:$0xff] %v15360_v57  ;;  %v8009_v42 = vcombine.high %v15360_v57, %v15360_v57  ;;  %v8056_v11 = vcombine.high %v15259_v61, %v15259_v61  ;;  %v15416_v19 = vrot.slane %v16835_v38, %v16673_v34 }
 0xbe8   :  { %16826 = vst [vmem:[#allocation67_spill] sm:$0xff] %v15212_v48  ;;  %16832 = vst [vmem:[#allocation66_spill] sm:$0xff] %v15371_v53  ;;  %v8008_v20 = vcombine.high %v15371_v53, %v15371_v53  ;;  %v8010_v6 = vcombine.high %v15380_v2, %v15380_v2  ;;  %v16842_v38 = vrot.slane %v15150_v63, %v12878_v18 }
 0xbe9   :  { %16833 = vst [vmem:[#allocation20_spill] sm:$0xff] %v15380_v2  ;;  %16836 = vst [vmem:[#allocation30_spill] sm:$0xff] %v15416_v19  ;;  %v15440_v46 = vrot.slane %v8009_v42, %v12878_v18  ;;  %v15445_v24 = vrot.slane %v8056_v11, %v12878_v18  ;;  %v8058_v11 = vcombine.high %v15416_v19, %v15416_v19 }
 0xbea   :  { %v15457_v42 = vrot.slane %v8008_v20, %v12878_v18  ;;  %v15462_v55 = vrot.slane %v8010_v6, %v12878_v18  ;;  %v8105_v63 = vcombine.high %v15209_v13, %v15209_v13  ;;  %v16848_v20 = vcombine.high %v15173_v14, %v15173_v14 }
 0xbeb   :  { %11838 = vmatmul.mubr.msk.bf16.gmra.mxu0 %vm1229_vm6, %v7348_v31  ;;  %v15177_v31 = vrot.slane %v15153_v25, %v16673_v34  ;;  %v15232_v25 = vrot.slane %v15191_v56, %v16673_v34  ;;  %16838 = vst [vmem:[#allocation28_spill] sm:$0xff] %v15440_v46  ;;  %16839 = vst [vmem:[#allocation18_spill] sm:$0xff] %v15445_v24  ;;  %v15488_v13 = vrot.slane %v8058_v11, %v12878_v18 }
 0xbec   :  { %16843 = vst [vmem:[#allocation22_spill] sm:$0xff] %v15457_v42  ;;  %16844 = vst [vmem:[#allocation21_spill] sm:$0xff] %v15462_v55  ;;  %v15503_v11 = vrot.slane %v15180_v41, %v16673_v34 }
 0xbed   :  { %16828 = vst [vmem:[#allocation69_spill] sm:$0xff] %v15232_v25  ;;  %v7958_v0 = vcombine.high %v15177_v31, %v15177_v31  ;;  %16846 = vst [vmem:[#allocation60_spill] sm:$0xff] %v15488_v13 }
 0xbee   :  { %16850 = vst [vmem:[#allocation55_spill] sm:$0xff] %v15503_v11 }
 0xbef   :  { %v15389_v26 = vrot.slane %v7958_v0, %v12878_v18  ;;  %v15405_v0 = vrot.slane %v7960_v43, %v12878_v18  ;;  %v15437_v43 = vrot.slane %v15235_v22, %v16673_v34 }
 0xbf1   :  { %16837 = vst [vmem:[#allocation59_spill] sm:$0xff] %v15437_v43  ;;  %v8057_v6 = vcombine.high %v15437_v43, %v15437_v43  ;;  %v15491_v43 = vrot.slane %v8105_v63, %v12878_v18 }
 0xbf3   :  { %16847 = vst [vmem:[#allocation54_spill] sm:$0xff] %v15491_v43 }
 0xc33   :  { %v11779_v59 = vpop.f32.mrf.mxu0 }
 0xc34   :  { %v8480_v49 = vadd.f32 %v11779_v59, %v15197_v32  ;;  %v16840_v59 = vcombine.high %v15235_v22, %v15235_v22  ;;  %v12041_v22 = vld [vmem:[%s16279_s7 + $0x40] sm:$0xff]  }
 0xc35   :  { %v7503_v45 = vpop.f32.mrf.mxu0  ;;  %11847 = vmatprep.subr.bf16.mxu1 %v12041_v22 }
 0xc36   :  { %v15451_v32 = vrot.slane %v16840_v59, %v16673_v34  ;;  %v8544_v16 = vmax.f32 %v8480_v49, 0.0  ;;  %v8478_v23 = vadd.f32 %v16842_v38, %v7503_v45  ;;  %11848 = vmatpush3.bf16.msra.mxu1 %v12041_v22 }
 0xc37   :  { %v11780_v27 = vpop.f32.mrf.mxu0 }
 0xc38   :  { %16841 = vst [vmem:[#allocation25_spill] sm:$0xff] %v15451_v32  ;;  %v8620_v45 = vsel %vm1229_vm6, %v8544_v16, 0.0  ;;  %v8542_v8 = vmax.f32 %v8478_v23, 0.0  ;;  %v8481_v38 = vadd.f32 %v11780_v27, %v15276_v40  ;;  %v8059_v19 = vcombine.high %v15451_v32, %v15451_v32 }
 0xc39   :  { %v8621_v59 = vrot.slane %v8620_v45, 4  ;;  %v7506_v61 = vpop.f32.mrf.mxu0  ;;  %v16845_v40 = vrot.slane %v15200_v1, %v12878_v18 }
 0xc3a   :  { %v8606_v16 = vsel %vm1229_vm6, %v8542_v8, 0.0  ;;  %v8545_v23 = vmax.f32 %v8481_v38, 0.0  ;;  %v15497_v8 = vrot.slane %v16848_v20, %v16673_v34 }
 0xc3b   :  { %v8479_v27 = vadd.f32 %v16845_v40, %v7506_v61  ;;  %v8622_v48 = vadd.f32 %v8621_v59, %v8620_v45  ;;  %v8607_v24 = vrot.slane %v8606_v16, 4  ;;  %v11783_v49 = vpop.f32.mrf.mxu0  ;;  %v15506_v40 = vrot.slane %v8057_v6, %v12878_v18 }
 0xc3c   :  { %16849 = vst [vmem:[#allocation58_spill] sm:$0xff] %v15497_v8  ;;  %v8627_v38 = vsel %vm1229_vm6, %v8545_v23, 0.0  ;;  %v8484_v61 = vadd.f32 %v11783_v49, %v15279_v50  ;;  %v16852_v23 = vrot.slane %v15203_v44, %v12878_v18  ;;  %v15513_v50 = vrot.slane %v8059_v19, %v12878_v18 }
 0xc3d   :  { %v8543_v1 = vmax.f32 %v8479_v27, 0.0  ;;  %v8623_v22 = vrot.slane %v8622_v48, 2  ;;  %v8608_v45 = vadd.f32 %v8607_v24, %v8606_v16  ;;  %v8628_v59 = vrot.slane %v8627_v38, 4  ;;  %v7519_v63 = vpop.f32.mrf.mxu0  ;;  %16851 = vst [vmem:[#allocation63_spill] sm:$0xff] %v15506_v40 }
 0xc3e   :  { %v8548_v20 = vmax.f32 %v8484_v61, 0.0  ;;  %v8482_v27 = vadd.f32 %v16852_v23, %v7519_v63  ;;  %16853 = vst [vmem:[#allocation3_spill] sm:$0xff] %v15513_v50 }
 0xc3f   :  { %v8613_v14 = vsel %vm1229_vm6, %v8543_v1, 0.0  ;;  %v8624_v49 = vadd.f32 %v8623_v22, %v8622_v48  ;;  %v8609_v43 = vrot.slane %v8608_v45, 2  ;;  %v8629_v32 = vadd.f32 %v8628_v59, %v8627_v38  ;;  %v11784_v24 = vpop.f32.mrf.mxu0 }
 0xc40   :  { %v8614_v13 = vrot.slane %v8613_v14, 4  ;;  %v8648_v16 = vsel %vm1229_vm6, %v8548_v20, 0.0  ;;  %v8546_v2 = vmax.f32 %v8482_v27, 0.0  ;;  %v8485_v6 = vadd.f32 %v11784_v24, %v15297_v52 }
 0xc41   :  { %v16854_v1 = vcombine.high %v15180_v41, %v15180_v41  ;;  %v8610_v44 = vadd.f32 %v8609_v43, %v8608_v45  ;;  %v8630_v63 = vrot.slane %v8629_v32, 2  ;;  %v7522_v23 = vpop.f32.mrf.mxu0  ;;  %v8154_v48 = vcombine.high %v15232_v25, %v15232_v25 }
 0xc42   :  { %v8615_v19 = vadd.f32 %v8614_v13, %v8613_v14  ;;  %v8649_v38 = vrot.slane %v8648_v16, 4  ;;  %v8634_v22 = vsel %vm1229_vm6, %v8546_v2, 0.0  ;;  %v8549_v59 = vmax.f32 %v8485_v6, 0.0 }
 0xc43   :  { %v15521_v61 = vrot.slane %v16854_v1, %v16673_v34  ;;  %v16856_v52 = vrot.slane %v15222_v10, %v12878_v18  ;;  %v8625_v27 = vrot.slane %v8624_v49, 1  ;;  %v8631_v24 = vadd.f32 %v8630_v63, %v8629_v32  ;;  %v11787_v1 = vpop.f32.mrf.mxu0 }
 0xc44   :  { %v8616_v41 = vrot.slane %v8615_v19, 2  ;;  %v8107_v43 = vcombine.high %v15497_v8, %v15497_v8  ;;  %v8650_v13 = vadd.f32 %v8649_v38, %v8648_v16  ;;  %v8635_v45 = vrot.slane %v8634_v22, 4 }
 0xc45   :  { %16855 = vst [vmem:[#allocation56_spill] sm:$0xff] %v15521_v61  ;;  %v8483_v20 = vadd.f32 %v16856_v52, %v7522_v23  ;;  %v8655_v14 = vsel %vm1229_vm6, %v8549_v59, 0.0  ;;  %v8611_v40 = vrot.slane %v8610_v44, 1  ;;  %v8632_v55 = vrot.slane %v8631_v24, 1  ;;  %v7535_v6 = vpop.f32.mrf.mxu0 }
 0xc46   :  { %v8617_v2 = vadd.f32 %v8616_v41, %v8615_v19  ;;  %v8651_v23 = vrot.slane %v8650_v13, 2  ;;  %v8636_v52 = vadd.f32 %v8635_v45, %v8634_v22  ;;  %v8656_v32 = vrot.slane %v8655_v14, 4 }
 0xc47   :  { %v8547_v50 = vmax.f32 %v8483_v20, 0.0  ;;  %v11788_v42 = vpop.f32.mrf.mxu0  ;;  %v8106_v16 = vcombine.high %v15503_v11, %v15503_v11  ;;  %v8108_v19 = vcombine.high %v15521_v61, %v15521_v61  ;;  %v8626_v59 = vadd.f32 %v8625_v27, %v8624_v49 }
 0xc48   :  { %v8618_v53 = vrot.slane %v8617_v2, 1  ;;  %v8652_v20 = vadd.f32 %v8651_v23, %v8650_v13  ;;  %v8637_v41 = vrot.slane %v8636_v52, 2  ;;  %v8657_v10 = vadd.f32 %v8656_v32, %v8655_v14 }
 0xc49   :  { %v8641_v63 = vsel %vm1229_vm6, %v8547_v50, 0.0  ;;  %v8488_v45 = vadd.f32 %v11787_v1, %v15288_v30  ;;  %v7538_v50 = vpop.f32.mrf.mxu0  ;;  %v8612_v46 = vadd.f32 %v8611_v40, %v8610_v44  ;;  %v8633_v60 = vadd.f32 %v8632_v55, %v8631_v24 }
 0xc4a   :  { %v8619_v8 = vadd.f32 %v8618_v53, %v8617_v2  ;;  %v8642_v22 = vrot.slane %v8641_v63, 4  ;;  %v8653_v4 = vrot.slane %v8652_v20, 1  ;;  %v15545_v38 = vrot.slane %v8154_v48, %v12878_v18 }
 0xc4b   :  { %v8638_v11 = vadd.f32 %v8637_v41, %v8636_v52  ;;  %v8552_v54 = vmax.f32 %v8488_v45, 0.0  ;;  %v16858_v49 = vrot.slane %v15188_v28, %v12878_v18  ;;  %v11791_v53 = vpop.f32.mrf.mxu0  ;;  %v15551_v13 = vrot.slane %v8107_v43, %v12878_v18 }
 0xc4c   :  { %16857 = vst [vmem:[#allocation50_spill] sm:$0xff] %v15545_v38  ;;  %v9065_v30 = vpack.c.bf16 %v8626_v59, %v8626_v59  ;;  %v9064_v1 = vpack.c.bf16 %v8619_v8, %v8619_v8  ;;  %v8658_v14 = vrot.slane %v8657_v10, 2  ;;  %v15554_v40 = vrot.slane %v8106_v16, %v12878_v18 }
 0xc4d   :  { %v8486_v27 = vadd.f32 %v16858_v49, %v7535_v6  ;;  %v8643_v55 = vadd.f32 %v8642_v22, %v8641_v63  ;;  %v8676_v44 = vsel %vm1229_vm6, %v8552_v54, 0.0  ;;  %v8489_v24 = vadd.f32 %v11788_v42, %v15329_v17  ;;  %v7551_v2 = vpop.f32.mrf.mxu0 }
 0xc4e   :  { %v9063_v23 = vpack.c.bf16 %v8612_v46, %v8612_v46  ;;  %v9066_v28 = vpack.c.bf16 %v8633_v60, %v8633_v60  ;;  %v8654_v6 = vadd.f32 %v8653_v4, %v8652_v20  ;;  %v8639_v52 = vrot.slane %v8638_v11, 1 }
 0xc4f   :  { %v8550_v48 = vmax.f32 %v8486_v27, 0.0  ;;  %v8677_v32 = vrot.slane %v8676_v44, 4  ;;  %v8553_v59 = vmax.f32 %v8489_v24, 0.0  ;;  %v11792_v16 = vpop.f32.mrf.mxu0  ;;  %v9201_v41 = vunpack.c.l.b16 %v9064_v1 }
 0xc50   :  { %v8659_v63 = vadd.f32 %v8658_v14, %v8657_v10  ;;  %v15562_v54 = vrot.slane %v8108_v19, %v12878_v18  ;;  %v16860_v46 = vcombine.high %v15191_v56, %v15191_v56  ;;  %v9202_v4 = vunpack.c.l.b16 %v9065_v30 }
 0xc51   :  { %v8662_v8 = vsel %vm1229_vm6, %v8550_v48, 0.0  ;;  %v8644_v60 = vrot.slane %v8643_v55, 2  ;;  %v8678_v42 = vadd.f32 %v8677_v32, %v8676_v44  ;;  %v7554_v22 = vpop.f32.mrf.mxu0  ;;  %v9200_v45 = vunpack.c.l.b16 %v9063_v23 }
 0xc52   :  { %16859 = vst [vmem:[#allocation57_spill] sm:$0xff] %v15562_v54  ;;  %v15568_v17 = vrot.slane %v16860_v46, %v16673_v34  ;;  %v8663_v20 = vrot.slane %v8662_v8, 4  ;;  %v9203_v49 = vunpack.c.l.b16 %v9066_v28  ;;  %v8683_v27 = vsel %vm1229_vm6, %v8553_v59, 0.0 }
 0xc53   :  { %v16861_v10 = vrot.slane %v15250_v29, %v12878_v18  ;;  %v9069_v1 = vpack.c.bf16 %v8654_v6, %v8654_v6  ;;  %v8640_v14 = vadd.f32 %v8639_v52, %v8638_v11  ;;  %v8684_v24 = vrot.slane %v8683_v27, 4  ;;  %v11795_v56 = vpop.f32.mrf.mxu0 }
 0xc54   :  { %v8664_v48 = vadd.f32 %v8663_v20, %v8662_v8  ;;  %v9264_v46 = vsel %vm3260_vm9, %v9201_v41, %v9200_v45  ;;  %v8660_v30 = vrot.slane %v8659_v63, 1  ;;  %v8492_v44 = vadd.f32 %v11791_v53, %v15332_v7 }
 0xc55   :  { %v8487_v19 = vadd.f32 %v16861_v10, %v7538_v50  ;;  %v8645_v32 = vadd.f32 %v8644_v60, %v8643_v55  ;;  %v8679_v23 = vrot.slane %v8678_v42, 2  ;;  %v8685_v57 = vadd.f32 %v8684_v24, %v8683_v27  ;;  %v7567_v59 = vpop.f32.mrf.mxu0 }
 0xc56   :  { %v8665_v28 = vrot.slane %v8664_v48, 2  ;;  %v8556_v29 = vmax.f32 %v8492_v44, 0.0  ;;  %v16862_v11 = vrot.slane %v15253_v3, %v12878_v18  ;;  %v8493_v6 = vadd.f32 %v11792_v16, %v15344_v39 }
 0xc57   :  { %v8551_v43 = vmax.f32 %v8487_v19, 0.0  ;;  %v9265_v52 = vsel %vm3262_vm10, %v9202_v4, %v9264_v46  ;;  %v15582_v8 = vunpack.c.l.b16 %v9069_v1  ;;  %v9067_v41 = vpack.c.bf16 %v8640_v14, %v8640_v14  ;;  %v11796_v53 = vpop.f32.mrf.mxu0 }
 0xc58   :  { %v8490_v50 = vadd.f32 %v16862_v11, %v7551_v2  ;;  %v8686_v7 = vrot.slane %v8685_v57, 2  ;;  %v8704_v60 = vsel %vm1229_vm6, %v8556_v29, 0.0  ;;  %v8557_v45 = vmax.f32 %v8493_v6, 0.0 }
 0xc59   :  { %v8669_v25 = vsel %vm1229_vm6, %v8551_v43, 0.0  ;;  %v8680_v43 = vadd.f32 %v8679_v23, %v8678_v42  ;;  %v8666_v27 = vadd.f32 %v8665_v28, %v8664_v48  ;;  %v8705_v19 = vrot.slane %v8704_v60, 4  ;;  %v15585_v3 = vpop.f32.mrf.mxu0 }
 0xc5a   :  { %v8670_v55 = vrot.slane %v8669_v25, 4  ;;  %v8554_v20 = vmax.f32 %v8490_v50, 0.0  ;;  %v8687_v10 = vadd.f32 %v8686_v7, %v8685_v57  ;;  %v8711_v16 = vsel %vm1229_vm6, %v8557_v45, 0.0 }
 0xc5b   :  { %v16863_v4 = vrot.slane %v15264_v37, %v12878_v18  ;;  %v9266_v14 = vsel %vm3264_vm11, %v9203_v49, %v9265_v52  ;;  %v8661_v24 = vadd.f32 %v8660_v30, %v8659_v63  ;;  %v8646_v46 = vrot.slane %v8645_v32, 1  ;;  %v15593_v42 = vpop.f32.mrf.mxu0 }
 0xc5c   :  { %v8671_v2 = vadd.f32 %v8670_v55, %v8669_v25  ;;  %v8690_v39 = vsel %vm1229_vm6, %v8554_v20, 0.0  ;;  %v8706_v44 = vadd.f32 %v8705_v19, %v8704_v60  ;;  %v8712_v23 = vrot.slane %v8711_v16, 4 }
 0xc5d   :  { %v8491_v1 = vadd.f32 %v16863_v4, %v7554_v22  ;;  %v8691_v48 = vrot.slane %v8690_v39, 4  ;;  %v8681_v25 = vrot.slane %v8680_v43, 1  ;;  %v8667_v29 = vrot.slane %v8666_v27, 1  ;;  %v15595_v6 = vpop.f32.mrf.mxu0 }
 0xc5e   :  { %v8672_v57 = vrot.slane %v8671_v2, 2  ;;  %v8688_v11 = vrot.slane %v8687_v10, 1  ;;  %v8707_v50 = vrot.slane %v8706_v44, 2  ;;  %v8713_v22 = vadd.f32 %v8712_v23, %v8711_v16 }
 0xc5f   :  { %v8555_v28 = vmax.f32 %v8491_v1, 0.0  ;;  %v8692_v37 = vadd.f32 %v8691_v48, %v8690_v39  ;;  %v9204_v63 = vunpack.c.l.b16 %v9067_v41  ;;  %v9070_v30 = vpack.c.bf16 %v8661_v24, %v8661_v24  ;;  %v15598_v60 = vpop.f32.mrf.mxu0 }
 0xc60   :  { %v8673_v7 = vadd.f32 %v8672_v57, %v8671_v2  ;;  %v8708_v52 = vadd.f32 %v8707_v50, %v8706_v44  ;;  %v8714_v19 = vrot.slane %v8713_v22, 2  ;;  %v8496_v4 = vadd.f32 %v11795_v56, %v15335_v47 }
 0xc61   :  { %v8697_v49 = vsel %vm1229_vm6, %v8555_v28, 0.0  ;;  %v8693_v45 = vrot.slane %v8692_v37, 2  ;;  %v8647_v1 = vadd.f32 %v8646_v46, %v8645_v32  ;;  %v8682_v38 = vadd.f32 %v8681_v25, %v8680_v43  ;;  %v7586_v16 = vpop.f32.mrf.mxu0 }
 0xc62   :  { %v8698_v55 = vrot.slane %v8697_v49, 4  ;;  %v8674_v20 = vrot.slane %v8673_v7, 1  ;;  %v8709_v61 = vrot.slane %v8708_v52, 1  ;;  %v16864_v2 = vrot.slane %v15162_v36, %v12878_v18 }
 0xc63   :  { %v8668_v57 = vadd.f32 %v8667_v29, %v8666_v27  ;;  %v8689_v41 = vadd.f32 %v8688_v11, %v8687_v10  ;;  %v8560_v44 = vmax.f32 %v8496_v4, 0.0  ;;  %v8694_v23 = vadd.f32 %v8693_v45, %v8692_v37  ;;  %v15605_v54 = vpop.f32.mrf.mxu0 }
 0xc64   :  { %v8494_v39 = vadd.f32 %v16864_v2, %v7567_v59  ;;  %v8699_v24 = vadd.f32 %v8698_v55, %v8697_v49  ;;  %v8675_v48 = vadd.f32 %v8674_v20, %v8673_v7  ;;  %v8497_v50 = vadd.f32 %v11796_v53, %v15353_v58 }
 0xc65   :  { %v15608_v47 = vsel %vm3266_vm12, %v9204_v63, %v9266_v14  ;;  %v8710_v56 = vadd.f32 %v8709_v61, %v8708_v52  ;;  %v8715_v32 = vadd.f32 %v8714_v19, %v8713_v22  ;;  %v8732_v36 = vsel %vm1229_vm6, %v8560_v44, 0.0  ;;  %v15612_v46 = vpop.f32.mrf.mxu0 }
 0xc66   :  { %v8558_v28 = vmax.f32 %v8494_v39, 0.0  ;;  %v9068_v59 = vpack.c.bf16 %v8647_v1, %v8647_v1  ;;  %v9073_v43 = vpack.c.bf16 %v8682_v38, %v8682_v38  ;;  %v8733_v27 = vrot.slane %v8732_v36, 4 }
 0xc67   :  { %v9071_v25 = vpack.c.bf16 %v8668_v57, %v8668_v57  ;;  %v9074_v29 = vpack.c.bf16 %v8689_v41, %v8689_v41  ;;  %v8700_v11 = vrot.slane %v8699_v24, 2  ;;  %v9072_v53 = vpack.c.bf16 %v8675_v48, %v8675_v48  ;;  %v15614_v49 = vpop.f32.mrf.mxu0 }
 0xc68   :  { %v8718_v10 = vsel %vm1229_vm6, %v8558_v28, 0.0  ;;  %v8695_v7 = vrot.slane %v8694_v23, 1  ;;  %v8734_v37 = vadd.f32 %v8733_v27, %v8732_v36  ;;  %v8561_v14 = vmax.f32 %v8497_v50, 0.0 }
 0xc69   :  { %v8719_v58 = vrot.slane %v8718_v10, 4  ;;  %v15616_v61 = vunpack.c.l.b16 %v9070_v30  ;;  %v9077_v22 = vpack.c.bf16 %v8710_v56, %v8710_v56  ;;  %v8716_v63 = vrot.slane %v8715_v32, 1  ;;  %v15621_v19 = vpop.f32.mrf.mxu0 }
 0xc6a   :  { %v15618_v52 = vunpack.c.l.b16 %v9068_v59  ;;  %v9210_v55 = vunpack.c.l.b16 %v9073_v43  ;;  %v8735_v20 = vrot.slane %v8734_v37, 2  ;;  %v8739_v45 = vsel %vm1229_vm6, %v8561_v14, 0.0 }
 0xc6b   :  { %v8720_v38 = vadd.f32 %v8719_v58, %v8718_v10  ;;  %v9208_v4 = vunpack.c.l.b16 %v9071_v25  ;;  %v15623_v1 = vunpack.c.l.b16 %v9074_v29  ;;  %v8701_v2 = vadd.f32 %v8700_v11, %v8699_v24  ;;  %v15629_v28 = vpop.f32.mrf.mxu0 }
 0xc6c   :  { %v9209_v57 = vunpack.c.l.b16 %v9072_v53  ;;  %v8696_v41 = vadd.f32 %v8695_v7, %v8694_v23  ;;  %v8740_v30 = vrot.slane %v8739_v45, 4  ;;  %v16865_v44 = vrot.slane %v15273_v33, %v12878_v18 }
 0xc6d   :  { %v8721_v39 = vrot.slane %v8720_v38, 2  ;;  %v15631_v50 = vunpack.c.l.b16 %v9077_v22  ;;  %v15633_v56 = vadd.f32 %v8716_v63, %v8715_v32  ;;  %v8500_v36 = vadd.f32 %v15593_v42, %v15363_v12  ;;  %v15641_v33 = vpop.f32.mrf.mxu0 }
 0xc6e   :  { %v8495_v48 = vadd.f32 %v16865_v44, %v15585_v3  ;;  %v16866_v24 = vrot.slane %v15285_v5, %v12878_v18  ;;  %v8736_v59 = vadd.f32 %v8735_v20, %v8734_v37  ;;  %v8741_v27 = vadd.f32 %v8740_v30, %v8739_v45 }
 0xc6f   :  { %v8722_v43 = vadd.f32 %v8721_v39, %v8720_v38  ;;  %v8702_v3 = vrot.slane %v8701_v2, 1  ;;  %v8564_v25 = vmax.f32 %v8500_v36, 0.0  ;;  %v8501_v32 = vadd.f32 %v15598_v60, %v15386_v62  ;;  %v15650_v58 = vpop.f32.mrf.mxu0 }
 0xc70   :  { %v8498_v23 = vadd.f32 %v16866_v24, %v15595_v6  ;;  %v8559_v10 = vmax.f32 %v8495_v48, 0.0  ;;  %v9271_v11 = vsel %vm3260_vm9, %v9209_v57, %v9208_v4  ;;  %v8742_v12 = vrot.slane %v8741_v27, 2 }
 0xc71   :  { %v16867_v5 = vrot.slane %v15307_v51, %v12878_v18  ;;  %v9075_v53 = vpack.c.bf16 %v8696_v41, %v8696_v41  ;;  %v8760_v37 = vsel %vm1229_vm6, %v8564_v25, 0.0  ;;  %v8737_v22 = vrot.slane %v8736_v59, 1  ;;  %v15654_v38 = vpop.f32.mrf.mxu0 }
 0xc72   :  { %v8562_v29 = vmax.f32 %v8498_v23, 0.0  ;;  %v8725_v42 = vsel %vm1229_vm6, %v8559_v10, 0.0  ;;  %v8723_v63 = vrot.slane %v8722_v43, 1  ;;  %v8761_v62 = vrot.slane %v8760_v37, 4 }
 0xc73   :  { %v8499_v6 = vadd.f32 %v16867_v5, %v7586_v16  ;;  %v8726_v7 = vrot.slane %v8725_v42, 4  ;;  %v9272_v20 = vsel %vm3262_vm10, %v9210_v55, %v9271_v11  ;;  %v8565_v4 = vmax.f32 %v8501_v32, 0.0  ;;  %v15659_v30 = vpop.f32.mrf.mxu0 }
 0xc74   :  { %v8746_v14 = vsel %vm1229_vm6, %v8562_v29, 0.0  ;;  %v15657_v16 = vadd.f32 %v8702_v3, %v8701_v2  ;;  %v8743_v39 = vadd.f32 %v8742_v12, %v8741_v27  ;;  %v8762_v57 = vadd.f32 %v8761_v62, %v8760_v37 }
 0xc75   :  { %v8747_v60 = vrot.slane %v8746_v14, 4  ;;  %v8727_v45 = vadd.f32 %v8726_v7, %v8725_v42  ;;  %v8563_v51 = vmax.f32 %v8499_v6, 0.0  ;;  %v9212_v44 = vunpack.c.l.b16 %v9075_v53  ;;  %v15663_v29 = vpop.f32.mrf.mxu0 }
 0xc76   :  { %v8767_v36 = vsel %vm1229_vm6, %v8565_v4, 0.0  ;;  %v8738_v23 = vadd.f32 %v8737_v22, %v8736_v59  ;;  %v8724_v10 = vadd.f32 %v8723_v63, %v8722_v43  ;;  %v8504_v27 = vadd.f32 %v15605_v54, %v15389_v26 }
 0xc77   :  { %v8748_v41 = vadd.f32 %v8747_v60, %v8746_v14  ;;  %v8728_v48 = vrot.slane %v8727_v45, 2  ;;  %v8753_v24 = vsel %vm1229_vm6, %v8563_v51, 0.0  ;;  %v8768_v55 = vrot.slane %v8767_v36, 4  ;;  %v15671_v59 = vpop.f32.mrf.mxu0 }
 0xc78   :  { %v8754_v2 = vrot.slane %v8753_v24, 4  ;;  %v16868_v3 = vrot.slane %v15177_v31, %v12878_v18  ;;  %v8744_v12 = vrot.slane %v8743_v39, 1  ;;  %v8763_v42 = vrot.slane %v8762_v57, 2 }
 0xc79   :  { %v8749_v25 = vrot.slane %v8748_v41, 2  ;;  %v8729_v32 = vadd.f32 %v8728_v48, %v8727_v45  ;;  %v8769_v6 = vadd.f32 %v8768_v55, %v8767_v36  ;;  %v8568_v7 = vmax.f32 %v8504_v27, 0.0  ;;  %v15675_v63 = vpop.f32.mrf.mxu0 }
 0xc7a   :  { %v8502_v11 = vadd.f32 %v16868_v3, %v15612_v46  ;;  %v8755_v53 = vadd.f32 %v8754_v2, %v8753_v24  ;;  %v9273_v14 = vsel %vm3264_vm11, %v15623_v1, %v9272_v20  ;;  %v9081_v22 = vpack.c.bf16 %v8738_v23, %v8738_v23 }
 0xc7b   :  { %v8750_v5 = vadd.f32 %v8749_v25, %v8748_v41  ;;  %v8730_v43 = vrot.slane %v8729_v32, 1  ;;  %v9079_v26 = vpack.c.bf16 %v8724_v10, %v8724_v10  ;;  %v8788_v62 = vsel %vm1229_vm6, %v8568_v7, 0.0  ;;  %v15679_v48 = vpop.f32.mrf.mxu0 }
 0xc7c   :  { %v8566_v37 = vmax.f32 %v8502_v11, 0.0  ;;  %v8756_v46 = vrot.slane %v8755_v53, 2  ;;  %v8745_v45 = vadd.f32 %v8744_v12, %v8743_v39  ;;  %v8764_v4 = vadd.f32 %v8763_v42, %v8762_v57 }
 0xc7d   :  { %v8751_v54 = vrot.slane %v8750_v5, 1  ;;  %v8731_v31 = vadd.f32 %v8730_v43, %v8729_v32  ;;  %v8770_v51 = vrot.slane %v8769_v6, 2  ;;  %v8789_v41 = vrot.slane %v8788_v62, 4  ;;  %v15685_v42 = vpop.f32.mrf.mxu0 }
 0xc7e   :  { %v8774_v60 = vsel %vm1229_vm6, %v8566_v37, 0.0  ;;  %v8757_v24 = vadd.f32 %v8756_v46, %v8755_v53  ;;  %v8505_v20 = vadd.f32 %v15614_v49, %v15405_v0  ;;  %v9076_v23 = vpack.c.bf16 %v15657_v16, %v15657_v16 }
 0xc7f   :  { %v9080_v36 = vpack.c.bf16 %v8731_v31, %v8731_v31  ;;  %v8775_v1 = vrot.slane %v8774_v60, 4  ;;  %v9218_v10 = vunpack.c.l.b16 %v9081_v22  ;;  %v8752_v25 = vadd.f32 %v8751_v54, %v8750_v5 }
 0xc80   :  { %v8790_v55 = vadd.f32 %v8789_v41, %v8788_v62  ;;  %v9216_v32 = vunpack.c.l.b16 %v9079_v26  ;;  %v8569_v57 = vmax.f32 %v8505_v20, 0.0  ;;  %v9082_v27 = vpack.c.bf16 %v8745_v45, %v8745_v45 }
 0xc81   :  { %v9217_v2 = vunpack.c.l.b16 %v9080_v36  ;;  %v8776_v39 = vadd.f32 %v8775_v1, %v8774_v60  ;;  %v8765_v3 = vrot.slane %v8764_v4, 1  ;;  %v8771_v11 = vadd.f32 %v8770_v51, %v8769_v6 }
 0xc82   :  { %v8791_v12 = vrot.slane %v8790_v55, 2  ;;  %v8758_v53 = vrot.slane %v8757_v24, 1  ;;  %v8795_v49 = vsel %vm1229_vm6, %v8569_v57, 0.0  ;;  %v9274_v16 = vsel %vm3266_vm12, %v9212_v44, %v9273_v14  ;;  %v15699_v44 = vpop.f32.mrf.mxu0 }
 0xc83   :  { %v9278_v43 = vsel %vm3260_vm9, %v9217_v2, %v9216_v32  ;;  %v8777_v0 = vrot.slane %v8776_v39, 2  ;;  %v9078_v5 = vpack.c.bf16 %v15633_v56, %v15633_v56  ;;  %v9083_v7 = vpack.c.bf16 %v8752_v25, %v8752_v25 }
 0xc84   :  { %v8796_v37 = vrot.slane %v8795_v49, 4  ;;  %v9279_v22 = vsel %vm3262_vm10, %v9218_v10, %v9278_v43  ;;  %v8792_v26 = vadd.f32 %v8791_v12, %v8790_v55  ;;  %v16869_v54 = vrot.slane %v15322_v35, %v12878_v18  ;;  %v15716_v32 = vpop.f32.mrf.mxu0 }
 0xc85   :  { %v8778_v6 = vadd.f32 %v8777_v0, %v8776_v39  ;;  %v9213_v46 = vunpack.c.l.b16 %v9076_v23  ;;  %v9219_v62 = vunpack.c.l.b16 %v9082_v27  ;;  %v15697_v60 = vadd.f32 %v8765_v3, %v8764_v4 }
 0xc86   :  { %v8503_v31 = vadd.f32 %v16869_v54, %v15621_v19  ;;  %v8797_v45 = vadd.f32 %v8796_v37, %v8795_v49  ;;  %v8772_v14 = vrot.slane %v8771_v11, 1  ;;  %v8759_v56 = vadd.f32 %v8758_v53, %v8757_v24  ;;  %v15710_v19 = vld [vmem:[%s16280_s10 + $0x58] sm:$0xff]   ;;  %v15736_v37 = vpop.f32.mrf.mxu0 }
 0xc87   :  { %v8508_v41 = vadd.f32 %v15629_v28, %v15408_v21  ;;  %v9220_v36 = vunpack.c.l.b16 %v9083_v7  ;;  %v9280_v1 = vsel %vm3264_vm11, %v9219_v62, %v9279_v22  ;;  %v9268_v35 = vsel %vm3268_vm13, %v15618_v52, %v15608_v47  ;;  %11857 = vmatprep.subr.bf16.mxu1 %v15710_v19  ;;  %v16873_v62 = vld [vmem:[#allocation74_spill] sm:$0xff] }
 0xc88   :  { %v8567_v51 = vmax.f32 %v8503_v31, 0.0  ;;  %v8798_v20 = vrot.slane %v8797_v45, 2  ;;  %v8793_v4 = vrot.slane %v8792_v26, 1  ;;  %v8779_v23 = vrot.slane %v8778_v6, 1 }
 0xc89   :  { %v8572_v10 = vmax.f32 %v8508_v41, 0.0  ;;  %v9215_v25 = vunpack.c.l.b16 %v9078_v5  ;;  %v9085_v21 = vpack.c.bf16 %v15697_v60, %v15697_v60  ;;  %v9275_v55 = vsel %vm3268_vm13, %v9213_v46, %v9274_v16 }
 0xc8a   :  { %v8781_v24 = vsel %vm1229_vm6, %v8567_v51, 0.0  ;;  %v15719_v47 = vadd.f32 %v8772_v14, %v8771_v11  ;;  %v9084_v52 = vpack.c.bf16 %v8759_v56, %v8759_v56  ;;  %v9269_v39 = vsel %vm3270_vm14, %v15582_v8, %v9268_v35  ;;  %v16874_v51 = vld [vmem:[#allocation47_spill] sm:$0xff] }
 0xc8b   :  { %v8782_v28 = vrot.slane %v8781_v24, 4  ;;  %v8816_v2 = vsel %vm1229_vm6, %v8572_v10, 0.0  ;;  %v9281_v57 = vsel %vm3266_vm12, %v9220_v36, %v9280_v1  ;;  %v8799_v27 = vadd.f32 %v8798_v20, %v8797_v45  ;;  %v15752_v20 = vpop.f32.mrf.mxu0 }
 0xc8c   :  { %v8817_v12 = vrot.slane %v8816_v2, 4  ;;  %v15725_v43 = vadd.f32 %v8793_v4, %v8792_v26  ;;  %v8780_v53 = vadd.f32 %v8779_v23, %v8778_v6  ;;  %v9276_v0 = vsel %vm3270_vm14, %v15631_v50, %v9275_v55  ;;  %v16871_v50 = vld [vmem:[#allocation72_spill] sm:$0xff] }
 0xc8d   :  { %v8783_v3 = vadd.f32 %v8782_v28, %v8781_v24  ;;  %v16870_v11 = vrot.slane %v15326_v15, %v12878_v18  ;;  %v9270_v8 = vsel %vm3272_vm15, %v15616_v61, %v9269_v39  ;;  %v9277_v7 = vsel %vm3272_vm15, %v9215_v25, %v9276_v0 }
 0xc8e   :  { %v8818_v5 = vadd.f32 %v8817_v12, %v8816_v2  ;;  %v9320_v22 = vpack.c.b16 %v9277_v7, %v9270_v8  ;;  %v8509_v6 = vadd.f32 %v15650_v58, %v15419_v9  ;;  %v16872_v54 = vrot.slane %v16871_v50, %v12878_v18  ;;  %v16876_v2 = vld [vmem:[#allocation28_spill] sm:$0xff] }
 0xc8f   :  { %v8506_v49 = vadd.f32 %v16870_v11, %v15641_v33  ;;  %v8784_v16 = vrot.slane %v8783_v3, 2  ;;  %v8800_v33 = vrot.slane %v8799_v27, 1  ;;  %v8512_v61 = vadd.f32 %v15659_v30, %v16873_v62  ;;  %v15761_v11 = vpop.f32.mrf.mxu0 }
 0xc90   :  { %v8507_v15 = vadd.f32 %v16872_v54, %v15654_v38  ;;  %v8819_v46 = vrot.slane %v8818_v5, 2  ;;  %11849 = vmatprep.mubr.msk.bf16.mxu1 %vm1229_vm6, %v9320_v22  ;;  %v8573_v14 = vmax.f32 %v8509_v6, 0.0  ;;  %v16875_v9 = vrot.slane %v16874_v51, %v12878_v18 }
 0xc91   :  { %v8570_v26 = vmax.f32 %v8506_v49, 0.0  ;;  %v8785_v31 = vadd.f32 %v8784_v16, %v8783_v3  ;;  %v9221_v41 = vunpack.c.l.b16 %v9084_v52  ;;  %v9087_v36 = vpack.c.bf16 %v8780_v53, %v8780_v53 }
 0xc92   :  { %v8571_v56 = vmax.f32 %v8507_v15, 0.0  ;;  %v8510_v58 = vadd.f32 %v16875_v9, %v15663_v29  ;;  %v8820_v35 = vadd.f32 %v8819_v46, %v8818_v5  ;;  %v8823_v30 = vsel %vm1229_vm6, %v8573_v14, 0.0  ;;  %v15768_v46 = vpop.f32.mrf.mxu0 }
 0xc93   :  { %v8802_v45 = vsel %vm1229_vm6, %v8570_v26, 0.0  ;;  %v8786_v38 = vrot.slane %v8785_v31, 1  ;;  %v8576_v23 = vmax.f32 %v8512_v61, 0.0  ;;  %v8824_v25 = vrot.slane %v8823_v30, 4 }
 0xc94   :  { %v8803_v1 = vrot.slane %v8802_v45, 4  ;;  %v8809_v4 = vsel %vm1229_vm6, %v8571_v56, 0.0  ;;  %v8574_v28 = vmax.f32 %v8510_v58, 0.0  ;;  %v9089_v55 = vpack.c.bf16 %v15725_v43, %v15725_v43 }
 0xc95   :  { %v8787_v24 = vadd.f32 %v8786_v38, %v8785_v31  ;;  %v8801_v29 = vadd.f32 %v8800_v33, %v8799_v27  ;;  %v8810_v52 = vrot.slane %v8809_v4, 4  ;;  %v8513_v39 = vadd.f32 %v15671_v59, %v16876_v2 }
 0xc96   :  { %v8804_v10 = vadd.f32 %v8803_v1, %v8802_v45  ;;  %v8825_v53 = vadd.f32 %v8824_v25, %v8823_v30  ;;  %v8844_v0 = vsel %vm1229_vm6, %v8576_v23, 0.0  ;;  %v9224_v49 = vunpack.c.l.b16 %v9087_v36 }
 0xc97   :  { %v9088_v3 = vpack.c.bf16 %v8787_v24, %v8787_v24  ;;  %v8821_v16 = vrot.slane %v8820_v35, 1  ;;  %v8811_v5 = vadd.f32 %v8810_v52, %v8809_v4  ;;  %v8577_v8 = vmax.f32 %v8513_v39, 0.0  ;;  %v16879_v24 = vld [vmem:[#allocation22_spill] sm:$0xff] }
 0xc98   :  { %v8805_v12 = vrot.slane %v8804_v10, 2  ;;  %v8826_v26 = vrot.slane %v8825_v53, 2  ;;  %v8830_v27 = vsel %vm1229_vm6, %v8574_v28, 0.0  ;;  %v9090_v43 = vpack.c.bf16 %v8801_v29, %v8801_v29 }
 0xc99   :  { %v9225_v7 = vunpack.c.l.b16 %v9088_v3  ;;  %v8812_v6 = vrot.slane %v8811_v5, 2  ;;  %v8845_v50 = vrot.slane %v8844_v0, 4  ;;  %v8851_v59 = vsel %vm1229_vm6, %v8577_v8, 0.0 }
 0xc9a   :  { %v8806_v22 = vadd.f32 %v8805_v12, %v8804_v10  ;;  %v9086_v54 = vpack.c.bf16 %v15719_v47, %v15719_v47  ;;  %v9282_v15 = vsel %vm3268_vm13, %v9221_v41, %v9281_v57  ;;  %v8827_v31 = vadd.f32 %v8826_v26, %v8825_v53  ;;  %v16877_v47 = vld [vmem:[#allocation19_spill] sm:$0xff]  ;;  %v15778_v10 = vpop.f32.mrf.mxu0 }
 0xc9b   :  { %v9285_v62 = vsel %vm3260_vm9, %v9225_v7, %v9224_v49  ;;  %v8822_v61 = vadd.f32 %v8821_v16, %v8820_v35  ;;  %v8813_v45 = vadd.f32 %v8812_v6, %v8811_v5  ;;  %v8831_v14 = vrot.slane %v8830_v27, 4  ;;  %v16880_v6 = vld [vmem:[#allocation66_spill] sm:$0xff] }
 0xc9c   :  { %v8807_v33 = vrot.slane %v8806_v22, 1  ;;  %v9226_v56 = vunpack.c.l.b16 %v9089_v55  ;;  %v8828_v9 = vrot.slane %v8827_v31, 1  ;;  %v8852_v58 = vrot.slane %v8851_v59, 4  ;;  %v15786_v8 = vpop.f32.mrf.mxu0 }
 0xc9d   :  { %v9227_v36 = vunpack.c.l.b16 %v9090_v43  ;;  %v8814_v38 = vrot.slane %v8813_v45, 1  ;;  %v8846_v1 = vadd.f32 %v8845_v50, %v8844_v0  ;;  %v16878_v57 = vrot.slane %v16877_v47, %v12878_v18 }
 0xc9e   :  { %v8808_v51 = vadd.f32 %v8807_v33, %v8806_v22  ;;  %v9286_v30 = vsel %vm3262_vm10, %v9226_v56, %v9285_v62  ;;  %v8829_v23 = vadd.f32 %v8828_v9, %v8827_v31  ;;  %v8516_v35 = vadd.f32 %v15679_v48, %v16879_v24  ;;  %v16882_v31 = vld [vmem:[#allocation21_spill] sm:$0xff]  ;;  %v16885_v24 = vld [vmem:[#allocation18_spill] sm:$0xff] }
 0xc9f   :  { %v8511_v41 = vadd.f32 %v16878_v57, %v15675_v63  ;;  %v9093_v25 = vpack.c.bf16 %v8822_v61, %v8822_v61  ;;  %v8815_v28 = vadd.f32 %v8814_v38, %v8813_v45  ;;  %v8832_v55 = vadd.f32 %v8831_v14, %v8830_v27 }
 0xca0   :  { %v9091_v4 = vpack.c.bf16 %v8808_v51, %v8808_v51  ;;  %v9222_v52 = vunpack.c.l.b16 %v9085_v21  ;;  %v8853_v39 = vadd.f32 %v8852_v58, %v8851_v59  ;;  %v8580_v63 = vmax.f32 %v8516_v35, 0.0  ;;  %v15799_v51 = vpop.f32.mrf.mxu0 }
 0xca1   :  { %v8575_v29 = vmax.f32 %v8511_v41, 0.0  ;;  %v9287_v3 = vsel %vm3264_vm11, %v9227_v36, %v9286_v30  ;;  %v9094_v12 = vpack.c.bf16 %v8829_v23, %v8829_v23  ;;  %v9092_v53 = vpack.c.bf16 %v8815_v28, %v8815_v28 }
 0xca2   :  { %v9228_v2 = vunpack.c.l.b16 %v9091_v4  ;;  %v9223_v48 = vunpack.c.l.b16 %v9086_v54  ;;  %v9283_v49 = vsel %vm3270_vm14, %v9222_v52, %v9282_v15  ;;  %v8847_v16 = vrot.slane %v8846_v1, 2  ;;  %v15811_v52 = vpop.f32.mrf.mxu0 }
 0xca3   :  { %v8837_v0 = vsel %vm1229_vm6, %v8575_v29, 0.0  ;;  %v9230_v7 = vunpack.c.l.b16 %v9093_v25  ;;  %v9229_v22 = vunpack.c.l.b16 %v9092_v53  ;;  %v8833_v60 = vrot.slane %v8832_v55, 2 }
 0xca4   :  { %v8838_v5 = vrot.slane %v8837_v0, 4  ;;  %v8872_v21 = vsel %vm1229_vm6, %v8580_v63, 0.0  ;;  %v9288_v26 = vsel %vm3266_vm12, %v9228_v2, %v9287_v3  ;;  %v8854_v27 = vrot.slane %v8853_v39, 2  ;;  %v16887_v3 = vld [vmem:[#allocation24_spill] sm:$0xff] }
 0xca5   :  { %v16881_v50 = vrot.slane %v16880_v6, %v12878_v18  ;;  %v9284_v54 = vsel %vm3272_vm15, %v9223_v48, %v9283_v49  ;;  %v9231_v15 = vunpack.c.l.b16 %v9094_v12  ;;  %v9289_v33 = vsel %vm3268_vm13, %v9229_v22, %v9288_v26 }
 0xca6   :  { %v8839_v43 = vadd.f32 %v8838_v5, %v8837_v0  ;;  %v8517_v62 = vadd.f32 %v15699_v44, %v16882_v31  ;;  %v9290_v61 = vsel %vm3270_vm14, %v9230_v7, %v9289_v33  ;;  %v8848_v45 = vadd.f32 %v8847_v16, %v8846_v1 }
 0xca7   :  { %v8514_v59 = vadd.f32 %v16881_v50, %v15685_v42  ;;  %v8873_v56 = vrot.slane %v8872_v21, 4  ;;  %v9291_v9 = vsel %vm3272_vm15, %v9231_v15, %v9290_v61  ;;  %v16883_v42 = vld [vmem:[#allocation20_spill] sm:$0xff]  ;;  %v8834_v41 = vadd.f32 %v8833_v60, %v8832_v55 }
 0xca8   :  { %v8840_v14 = vrot.slane %v8839_v43, 2  ;;  %v8581_v36 = vmax.f32 %v8517_v62, 0.0  ;;  %v16884_v38 = vrot.slane %v16883_v42, %v12878_v18  ;;  %v9321_v57 = vpack.c.b16 %v9291_v9, %v9284_v54  ;;  %v16890_v60 = vld [vmem:[#allocation60_spill] sm:$0xff] }
 0xca9   :  { %v8578_v58 = vmax.f32 %v8514_v59, 0.0  ;;  %v8855_v30 = vadd.f32 %v8854_v27, %v8853_v39  ;;  %v8520_v35 = vadd.f32 %v15736_v37, %v16885_v24  ;;  %v8874_v28 = vadd.f32 %v8873_v56, %v8872_v21 }
 0xcaa   :  { %v8515_v47 = vadd.f32 %v16884_v38, %v15716_v32  ;;  %v8841_v44 = vadd.f32 %v8840_v14, %v8839_v43  ;;  %v8879_v1 = vsel %vm1229_vm6, %v8581_v36, 0.0  ;;  %11850 = vmatmul.mubr.msk.bf16.vlgmr.msra.gmra.mxu1 %vm1229_vm6, %v9321_v57  ;;  %v16886_v32 = vld [vmem:[#allocation67_spill] sm:$0xff]  ;;  %v16888_v12 = vrot.slane %v16887_v3, %v12878_v18 }
 0xcab   :  { %v8858_v4 = vsel %vm1229_vm6, %v8578_v58, 0.0  ;;  %v15815_v55 = vrot.slane %v16886_v32, %v16673_v34  ;;  %v8880_v2 = vrot.slane %v8879_v1, 4  ;;  %v8584_v63 = vmax.f32 %v8520_v35, 0.0  ;;  %11858 = vmatpush3.bf16.msra.mxu1 %v15710_v19  ;;  %v16891_v35 = vld [vmem:[#allocation30_spill] sm:$0xff] }
 0xcac   :  { %v8579_v23 = vmax.f32 %v8515_v47, 0.0  ;;  %v8842_v25 = vrot.slane %v8841_v44, 1  ;;  %v8859_v29 = vrot.slane %v8858_v4, 4  ;;  %v8518_v37 = vadd.f32 %v16888_v12, %v15752_v20  ;;  %v15831_v20 = vpop.f32.mrf.mxu0 }
 0xcad   :  { %v8849_v53 = vrot.slane %v8848_v45, 1  ;;  %v8835_v0 = vrot.slane %v8834_v41, 1  ;;  %v8856_v48 = vrot.slane %v8855_v30, 1  ;;  %v16889_v49 = vcombine.high %v16886_v32, %v16886_v32 }
 0xcae   :  { %v8865_v39 = vsel %vm1229_vm6, %v8579_v23, 0.0  ;;  %v8860_v5 = vadd.f32 %v8859_v29, %v8858_v4  ;;  %v8582_v22 = vmax.f32 %v8518_v37, 0.0  ;;  %v8521_v21 = vadd.f32 %v15761_v11, %v16890_v60  ;;  %v15844_v36 = vpop.f32.mrf.mxu0 }
 0xcaf   :  { %v15827_v16 = vrot.slane %v16889_v49, %v16673_v34  ;;  %v8866_v7 = vrot.slane %v8865_v39, 4  ;;  %v8843_v26 = vadd.f32 %v8842_v25, %v8841_v44  ;;  %v8875_v27 = vrot.slane %v8874_v28, 2 }
 0xcb0   :  { %v8156_v19 = vcombine.high %v15568_v17, %v15568_v17  ;;  %v8389_v43 = vrot.slane %v15568_v17, %v12878_v18  ;;  %v8881_v6 = vadd.f32 %v8880_v2, %v8879_v1  ;;  %v8900_v34 = vsel %vm1229_vm6, %v8584_v63, 0.0  ;;  %v15862_v3 = vpop.f32.mrf.mxu0 }
 0xcb1   :  { %v8585_v50 = vmax.f32 %v8521_v21, 0.0  ;;  %v8155_v59 = vcombine.high %v15815_v55, %v15815_v55  ;;  %v8850_v54 = vadd.f32 %v8849_v53, %v8848_v45  ;;  %v8836_v15 = vadd.f32 %v8835_v0, %v8834_v41 }
 0xcb2   :  { %v8886_v11 = vsel %vm1229_vm6, %v8582_v22, 0.0  ;;  %v8401_v33 = vrot.slane %v15815_v55, %v12878_v18  ;;  %v8857_v31 = vadd.f32 %v8856_v48, %v8855_v30  ;;  %v8861_v62 = vrot.slane %v8860_v5, 2 }
 0xcb3   :  { %v8867_v61 = vadd.f32 %v8866_v7, %v8865_v39  ;;  %v8907_v14 = vsel %vm1229_vm6, %v8585_v50, 0.0  ;;  %v9096_v56 = vpack.c.bf16 %v8843_v26, %v8843_v26  ;;  %v8876_v9 = vadd.f32 %v8875_v27, %v8874_v28  ;;  %v16893_v39 = vld [vmem:[#allocation63_spill] sm:$0xff] }
 0xcb4   :  { %v8901_v58 = vrot.slane %v8900_v34, 4  ;;  %v8157_v42 = vcombine.high %v15827_v16, %v15827_v16  ;;  %v8882_v45 = vrot.slane %v8881_v6, 2  ;;  %v8887_v38 = vrot.slane %v8886_v11, 4 }
 0xcb5   :  { %v15849_v47 = vrot.slane %v8156_v19, %v12878_v18  ;;  %v8405_v57 = vrot.slane %v15827_v16, %v12878_v18  ;;  %v9097_v41 = vpack.c.bf16 %v8850_v54, %v8850_v54  ;;  %v9095_v30 = vpack.c.bf16 %v8836_v15, %v8836_v15  ;;  %v16894_v54 = vld [vmem:[#allocation59_spill] sm:$0xff] }
 0xcb6   :  { %v8908_v44 = vrot.slane %v8907_v14, 4  ;;  %v15854_v4 = vrot.slane %v8155_v59, %v12878_v18  ;;  %v9098_v1 = vpack.c.bf16 %v8857_v31, %v8857_v31  ;;  %v8862_v23 = vadd.f32 %v8861_v62, %v8860_v5 }
 0xcb7   :  { %v8868_v24 = vrot.slane %v8867_v61, 2  ;;  %v16892_v25 = vrot.slane %v16891_v35, %v12878_v18  ;;  %v9233_v29 = vunpack.c.l.b16 %v9096_v56  ;;  %v8877_v32 = vrot.slane %v8876_v9, 1 }
 0xcb8   :  { %v8902_v2 = vadd.f32 %v8901_v58, %v8900_v34  ;;  %v8524_v63 = vadd.f32 %v15778_v10, %v16893_v39  ;;  %v8883_v12 = vadd.f32 %v8882_v45, %v8881_v6  ;;  %v8888_v37 = vadd.f32 %v8887_v38, %v8886_v11  ;;  %v15873_v6 = vpop.f32.mrf.mxu0  ;;  %v16897_v45 = vld [vmem:[#allocation25_spill] sm:$0xff] }
 0xcb9   :  { %v8519_v28 = vadd.f32 %v16892_v25, %v15768_v46  ;;  %v15865_v0 = vrot.slane %v8157_v42, %v12878_v18  ;;  %v9234_v48 = vunpack.c.l.b16 %v9097_v41  ;;  %v9232_v49 = vunpack.c.l.b16 %v9095_v30 }
 0xcba   :  { %v8909_v5 = vadd.f32 %v8908_v44, %v8907_v14  ;;  %v8588_v7 = vmax.f32 %v8524_v63, 0.0  ;;  %v15867_v22 = vunpack.c.l.b16 %v9098_v1  ;;  %v8863_v46 = vrot.slane %v8862_v23, 1  ;;  %v16896_v14 = vld [vmem:[#allocation3_spill] sm:$0xff]  ;;  %v15886_v35 = vpop.f32.mrf.mxu0 }
 0xcbb   :  { %v8583_v53 = vmax.f32 %v8519_v28, 0.0  ;;  %v8869_v60 = vadd.f32 %v8868_v24, %v8867_v61  ;;  %v9292_v10 = vsel %vm3260_vm9, %v9233_v29, %v9232_v49  ;;  %v15871_v26 = vadd.f32 %v8877_v32, %v8876_v9  ;;  %v16899_v29 = vld [vmem:[#allocation54_spill] sm:$0xff] }
 0xcbc   :  { %v8903_v27 = vrot.slane %v8902_v2, 2  ;;  %v8884_v34 = vrot.slane %v8883_v12, 1  ;;  %v8889_v50 = vrot.slane %v8888_v37, 2  ;;  %v8928_v59 = vsel %vm1229_vm6, %v8588_v7, 0.0 }
 0xcbd   :  { %v8893_v21 = vsel %vm1229_vm6, %v8583_v53, 0.0  ;;  %v16895_v15 = vrot.slane %v16894_v54, %v12878_v18  ;;  %v8910_v31 = vrot.slane %v8909_v5, 2  ;;  %v8929_v61 = vrot.slane %v8928_v59, 4 }
 0xcbe   :  { %v8894_v19 = vrot.slane %v8893_v21, 4  ;;  %v8525_v56 = vadd.f32 %v15799_v51, %v16896_v14  ;;  %v8864_v9 = vadd.f32 %v8863_v46, %v8862_v23  ;;  %v8870_v58 = vrot.slane %v8869_v60, 1 }
 0xcbf   :  { %v8522_v11 = vadd.f32 %v16895_v15, %v15786_v8  ;;  %v16898_v38 = vrot.slane %v16897_v45, %v12878_v18  ;;  %v8904_v30 = vadd.f32 %v8903_v27, %v8902_v2  ;;  %v8930_v1 = vadd.f32 %v8929_v61, %v8928_v59  ;;  %v16900_v2 = vld [vmem:[#allocation65_spill] sm:$0xff] }
 0xcc0   :  { %v8895_v62 = vadd.f32 %v8894_v19, %v8893_v21  ;;  %v8589_v24 = vmax.f32 %v8525_v56, 0.0  ;;  %v8890_v8 = vadd.f32 %v8889_v50, %v8888_v37  ;;  %v8528_v51 = vadd.f32 %v15831_v20, %v16899_v29  ;;  %v15897_v50 = vpop.f32.mrf.mxu0 }
 0xcc1   :  { %v8586_v42 = vmax.f32 %v8522_v11, 0.0  ;;  %v8523_v41 = vadd.f32 %v16898_v38, %v15811_v52  ;;  %v8911_v23 = vadd.f32 %v8910_v31, %v8909_v5  ;;  %v8931_v39 = vrot.slane %v8930_v1, 2 }
 0xcc2   :  { %v8896_v44 = vrot.slane %v8895_v62, 2  ;;  %v9099_v53 = vpack.c.bf16 %v8864_v9, %v8864_v9  ;;  %v8885_v49 = vadd.f32 %v8884_v34, %v8883_v12  ;;  %v8592_v52 = vmax.f32 %v8528_v51, 0.0 }
 0xcc3   :  { %v8914_v25 = vsel %vm1229_vm6, %v8586_v42, 0.0  ;;  %v8587_v28 = vmax.f32 %v8523_v41, 0.0  ;;  %v16901_v7 = vrot.slane %v16900_v2, %v12878_v18  ;;  %v8935_v27 = vsel %vm1229_vm6, %v8589_v24, 0.0 }
 0xcc4   :  { %v8897_v32 = vadd.f32 %v8896_v44, %v8895_v62  ;;  %v8915_v63 = vrot.slane %v8914_v25, 4  ;;  %v9293_v20 = vsel %vm3262_vm10, %v9234_v48, %v9292_v10  ;;  %v9101_v5 = vpack.c.bf16 %v15871_v26, %v15871_v26  ;;  %v11832_v10 = vpop.f32.mrf.mxu0 }
 0xcc5   :  { %v8526_v46 = vadd.f32 %v16901_v7, %v15844_v36  ;;  %v8921_v19 = vsel %vm1229_vm6, %v8587_v28, 0.0  ;;  %v8891_v12 = vrot.slane %v8890_v8, 1  ;;  %v8905_v59 = vrot.slane %v8904_v30, 1 }
 0xcc6   :  { %v8898_v21 = vrot.slane %v8897_v32, 1  ;;  %v8916_v37 = vadd.f32 %v8915_v63, %v8914_v25  ;;  %v8912_v54 = vrot.slane %v8911_v23, 1  ;;  %v8932_v15 = vadd.f32 %v8931_v39, %v8930_v1  ;;  %v7714_v51 = vpop.f32.mrf.mxu0 }
 0xcc7   :  { %v8590_v34 = vmax.f32 %v8526_v46, 0.0  ;;  %v8956_v36 = vsel %vm1229_vm6, %v8592_v52, 0.0  ;;  %v8936_v31 = vrot.slane %v8935_v27, 4  ;;  %v8922_v62 = vrot.slane %v8921_v19, 4  ;;  %v16902_v46 = vld [vmem:[#allocation58_spill] sm:$0xff] }
 0xcc8   :  { %v8899_v11 = vadd.f32 %v8898_v21, %v8897_v32  ;;  %v8529_v61 = vadd.f32 %v15862_v3, %v15551_v13  ;;  %v9236_v14 = vunpack.c.l.b16 %v9099_v53  ;;  %v9102_v56 = vpack.c.bf16 %v8885_v49, %v8885_v49 }
 0xcc9   :  { %v8871_v9 = vadd.f32 %v8870_v58, %v8869_v60  ;;  %v8917_v48 = vrot.slane %v8916_v37, 2  ;;  %v8892_v42 = vadd.f32 %v8891_v12, %v8890_v8  ;;  %v8957_v26 = vrot.slane %v8956_v36, 4  ;;  %v11835_v12 = vpop.f32.mrf.mxu0 }
 0xcca   :  { %v8942_v45 = vsel %vm1229_vm6, %v8590_v34, 0.0  ;;  %v8593_v38 = vmax.f32 %v8529_v61, 0.0  ;;  %v9294_v41 = vsel %vm3264_vm11, %v15867_v22, %v9293_v20  ;;  %v8906_v44 = vadd.f32 %v8905_v59, %v8904_v30 }
 0xccb   :  { %v8913_v1 = vadd.f32 %v8912_v54, %v8911_v23  ;;  %v8933_v24 = vrot.slane %v8932_v15, 1  ;;  %v9104_v25 = vpack.c.bf16 %v8899_v11, %v8899_v11  ;;  %v8937_v28 = vadd.f32 %v8936_v31, %v8935_v27 }
 0xccc   :  { %v8923_v29 = vadd.f32 %v8922_v62, %v8921_v19  ;;  %v8963_v13 = vsel %vm1229_vm6, %v8593_v38, 0.0  ;;  %v15909_v3 = vunpack.c.l.b16 %v9101_v5  ;;  %v9100_v60 = vpack.c.bf16 %v8871_v9, %v8871_v9  ;;  %v16904_v38 = vld [vmem:[#allocation55_spill] sm:$0xff] }
 0xccd   :  { %v8918_v58 = vadd.f32 %v8917_v48, %v8916_v37  ;;  %v8943_v8 = vrot.slane %v8942_v45, 4  ;;  %v15912_v32 = vsel %vm3266_vm12, %v9236_v14, %v9294_v41  ;;  %v15914_v39 = vunpack.c.l.b16 %v9102_v56 }
 0xcce   :  { %v9103_v22 = vpack.c.bf16 %v8892_v42, %v8892_v42  ;;  %v8958_v30 = vadd.f32 %v8957_v26, %v8956_v36  ;;  %v9105_v23 = vpack.c.bf16 %v8906_v44, %v8906_v44  ;;  %v9106_v63 = vpack.c.bf16 %v8913_v1, %v8913_v1  ;;  %v7727_v42 = vpop.f32.mrf.mxu0  ;;  %v16906_v1 = vld [vmem:[#allocation57_spill] sm:$0xff] }
 0xccf   :  { %v15916_v53 = vadd.f32 %v8933_v24, %v8932_v15  ;;  %v8964_v49 = vrot.slane %v8963_v13, 4  ;;  %v9241_v52 = vunpack.c.l.b16 %v9104_v25  ;;  %v8938_v2 = vrot.slane %v8937_v28, 2 }
 0xcd0   :  { %v8924_v7 = vrot.slane %v8923_v29, 2  ;;  %v16903_v21 = vrot.slane %v16902_v46, %v12878_v18  ;;  %v15922_v27 = vunpack.c.l.b16 %v9100_v60  ;;  %v8919_v19 = vrot.slane %v8918_v58, 1 }
 0xcd1   :  { %v8944_v20 = vadd.f32 %v8943_v8, %v8942_v45  ;;  %v8532_v5 = vadd.f32 %v15886_v35, %v15554_v40  ;;  %v9240_v34 = vunpack.c.l.b16 %v9103_v22  ;;  %v8959_v59 = vrot.slane %v8958_v30, 2 }
 0xcd2   :  { %v8527_v37 = vadd.f32 %v16903_v21, %v15873_v6  ;;  %v8965_v54 = vadd.f32 %v8964_v49, %v8963_v13  ;;  %v9242_v36 = vunpack.c.l.b16 %v9105_v23  ;;  %v9243_v11 = vunpack.c.l.b16 %v9106_v63 }
 0xcd3   :  { %v9109_v31 = vpack.c.bf16 %v15916_v53, %v15916_v53  ;;  %v8596_v62 = vmax.f32 %v8532_v5, 0.0  ;;  %v9299_v6 = vsel %vm3260_vm9, %v9241_v52, %v9240_v34  ;;  %v8939_v61 = vadd.f32 %v8938_v2, %v8937_v28 }
 0xcd4   :  { %v8591_v15 = vmax.f32 %v8527_v37, 0.0  ;;  %v8925_v14 = vadd.f32 %v8924_v7, %v8923_v29  ;;  %v8920_v9 = vadd.f32 %v8919_v19, %v8918_v58  ;;  %v8945_v48 = vrot.slane %v8944_v20, 2  ;;  %v16907_v29 = vld [vmem:[#allocation56_spill] sm:$0xff]  ;;  %v16909_v58 = vld [vmem:[#allocation50_spill] sm:$0xff]  ;;  %v16910_v37 = vld [vmem:[#allocation69_spill] sm:$0xff] }
 0xcd5   :  { %v8984_v35 = vsel %vm1229_vm6, %v8596_v62, 0.0  ;;  %v8960_v26 = vadd.f32 %v8959_v59, %v8958_v30  ;;  %v8966_v45 = vrot.slane %v8965_v54, 2  ;;  %v16905_v41 = vrot.slane %v16904_v38, %v12878_v18 }
 0xcd6   :  { %v8949_v56 = vsel %vm1229_vm6, %v8591_v15, 0.0  ;;  %v8533_v24 = vadd.f32 %v11832_v10, %v16906_v1  ;;  %v8985_v28 = vrot.slane %v8984_v35, 4  ;;  %v16908_v13 = vrot.slane %v16907_v29, %v12878_v18 }
 0xcd7   :  { %v8950_v40 = vrot.slane %v8949_v56, 4  ;;  %v8530_v44 = vadd.f32 %v16905_v41, %v15897_v50  ;;  %v8536_v8 = vadd.f32 %v11835_v12, %v16909_v58  ;;  %v9300_v22 = vsel %vm3262_vm10, %v9242_v36, %v9299_v6  ;;  %v11836_v50 = vpop.f32.mrf.mxu0 }
 0xcd8   :  { %v8531_v60 = vadd.f32 %v16908_v13, %v7714_v51  ;;  %v8940_v23 = vrot.slane %v8939_v61, 1  ;;  %v8597_v63 = vmax.f32 %v8533_v24, 0.0  ;;  %v8946_v49 = vadd.f32 %v8945_v48, %v8944_v20 }
 0xcd9   :  { %v8951_v25 = vadd.f32 %v8950_v40, %v8949_v56  ;;  %v8594_v30 = vmax.f32 %v8530_v44, 0.0  ;;  %v8600_v7 = vmax.f32 %v8536_v8, 0.0  ;;  %v9107_v46 = vpack.c.bf16 %v8920_v9, %v8920_v9  ;;  %v7730_v40 = vpop.f32.mrf.mxu0 }
 0xcda   :  { %v8595_v2 = vmax.f32 %v8531_v60, 0.0  ;;  %v8926_v10 = vrot.slane %v8925_v14, 1  ;;  %v16911_v19 = vrot.slane %v16910_v37, %v12878_v18  ;;  %v8967_v5 = vadd.f32 %v8966_v45, %v8965_v54 }
 0xcdb   :  { %v8952_v52 = vrot.slane %v8951_v25, 2  ;;  %v8970_v21 = vsel %vm1229_vm6, %v8594_v30, 0.0  ;;  %v8986_v34 = vadd.f32 %v8985_v28, %v8984_v35  ;;  %v8991_v59 = vsel %vm1229_vm6, %v8597_v63, 0.0  ;;  %v11839_v8 = vpop.f32.mrf.mxu0 }
 0xcdc   :  { %v8534_v51 = vadd.f32 %v16911_v19, %v7727_v42  ;;  %v8971_v15 = vrot.slane %v8970_v21, 4  ;;  %v8977_v20 = vsel %vm1229_vm6, %v8595_v2, 0.0  ;;  %v9012_v36 = vsel %vm1229_vm6, %v8600_v7, 0.0 }
 0xcdd   :  { %v8953_v12 = vadd.f32 %v8952_v52, %v8951_v25  ;;  %v8941_v6 = vadd.f32 %v8940_v23, %v8939_v61  ;;  %v8961_v56 = vrot.slane %v8960_v26, 1  ;;  %v8947_v9 = vrot.slane %v8946_v49, 1  ;;  %v7743_v37 = vpop.f32.mrf.mxu0 }
 0xcde   :  { %v8598_v62 = vmax.f32 %v8534_v51, 0.0  ;;  %v8927_v38 = vadd.f32 %v8926_v10, %v8925_v14  ;;  %v8978_v41 = vrot.slane %v8977_v20, 4  ;;  %v9013_v44 = vrot.slane %v9012_v36, 4 }
 0xcdf   :  { %v8954_v48 = vrot.slane %v8953_v12, 1  ;;  %v8968_v42 = vrot.slane %v8967_v5, 1  ;;  %v8987_v35 = vrot.slane %v8986_v34, 2  ;;  %v8992_v45 = vrot.slane %v8991_v59, 4 }
 0xce0   :  { %v8998_v54 = vsel %vm1229_vm6, %v8598_v62, 0.0  ;;  %v9301_v24 = vsel %vm3264_vm11, %v9243_v11, %v9300_v22  ;;  %v8972_v28 = vadd.f32 %v8971_v15, %v8970_v21  ;;  %v8537_v29 = vadd.f32 %v11836_v50, %v15849_v47 }
 0xce1   :  { %v8999_v1 = vrot.slane %v8998_v54, 4  ;;  %v8955_v25 = vadd.f32 %v8954_v48, %v8953_v12  ;;  %v9244_v61 = vunpack.c.l.b16 %v9107_v46  ;;  %v8962_v13 = vadd.f32 %v8961_v56, %v8960_v26 }
 0xce2   :  { %v8948_v60 = vadd.f32 %v8947_v9, %v8946_v49  ;;  %v8979_v58 = vadd.f32 %v8978_v41, %v8977_v20  ;;  %v9110_v14 = vpack.c.bf16 %v8941_v6, %v8941_v6  ;;  %v9014_v23 = vadd.f32 %v9013_v44, %v9012_v36 }
 0xce3   :  { %v9000_v30 = vadd.f32 %v8999_v1, %v8998_v54  ;;  %v8601_v63 = vmax.f32 %v8537_v29, 0.0  ;;  %v9108_v52 = vpack.c.bf16 %v8927_v38, %v8927_v38  ;;  %v8969_v2 = vadd.f32 %v8968_v42, %v8967_v5  ;;  %v11840_v38 = vpop.f32.mrf.mxu0 }
 0xce4   :  { %v8988_v7 = vadd.f32 %v8987_v35, %v8986_v34  ;;  %v8993_v10 = vadd.f32 %v8992_v45, %v8991_v59  ;;  %v9246_v11 = vunpack.c.l.b16 %v9109_v31  ;;  %v9112_v22 = vpack.c.bf16 %v8955_v25, %v8955_v25 }
 0xce5   :  { %v8973_v21 = vrot.slane %v8972_v28, 2  ;;  %v9019_v47 = vsel %vm1229_vm6, %v8601_v63, 0.0  ;;  %v9302_v26 = vsel %vm3266_vm12, %v9244_v61, %v9301_v24  ;;  %v9113_v49 = vpack.c.bf16 %v8962_v13, %v8962_v13  ;;  %v7746_v13 = vpop.f32.mrf.mxu0 }
 0xce6   :  { %v9111_v50 = vpack.c.bf16 %v8948_v60, %v8948_v60  ;;  %v8980_v46 = vrot.slane %v8979_v58, 2  ;;  %v9247_v19 = vunpack.c.l.b16 %v9110_v14  ;;  %v9015_v51 = vrot.slane %v9014_v23, 2 }
 0xce7   :  { %v9001_v12 = vrot.slane %v9000_v30, 2  ;;  %v9020_v5 = vrot.slane %v9019_v47, 4  ;;  %v9245_v34 = vunpack.c.l.b16 %v9108_v52  ;;  %v9114_v59 = vpack.c.bf16 %v8969_v2, %v8969_v2 }
 0xce8   :  { %v8989_v15 = vrot.slane %v8988_v7, 1  ;;  %v8994_v20 = vrot.slane %v8993_v10, 2  ;;  %v9249_v53 = vunpack.c.l.b16 %v9112_v22  ;;  %v8974_v31 = vadd.f32 %v8973_v21, %v8972_v28 }
 0xce9   :  { %v9021_v36 = vadd.f32 %v9020_v5, %v9019_v47  ;;  %v8535_v62 = vadd.f32 %v8389_v43, %v7730_v40  ;;  %v15959_v6 = vunpack.c.l.b16 %v9113_v49  ;;  %v9248_v56 = vunpack.c.l.b16 %v9111_v50 }
 0xcea   :  { %v8981_v9 = vadd.f32 %v8980_v46, %v8979_v58  ;;  %v8540_v48 = vadd.f32 %v11839_v8, %v15854_v4  ;;  %v9016_v41 = vadd.f32 %v9015_v51, %v9014_v23  ;;  %v9002_v44 = vadd.f32 %v9001_v12, %v9000_v30 }
 0xceb   :  { %v9022_v54 = vrot.slane %v9021_v36, 2  ;;  %v8599_v42 = vmax.f32 %v8535_v62, 0.0  ;;  %v15962_v35 = vunpack.c.l.b16 %v9114_v59  ;;  %v15964_v45 = vadd.f32 %v8989_v15, %v8988_v7 }
 0xcec   :  { %v8604_v1 = vmax.f32 %v8540_v48, 0.0  ;;  %v9296_v17 = vsel %vm3268_vm13, %v15922_v27, %v15912_v32  ;;  %v9306_v43 = vsel %vm3260_vm9, %v9249_v53, %v9248_v56  ;;  %v8975_v40 = vrot.slane %v8974_v31, 1  ;;  %v12043_v32 = vld [vmem:[%s16280_s10 + $0x50] sm:$0xff]  }
 0xced   :  { %v15970_v24 = vadd.f32 %v8994_v20, %v8993_v10  ;;  %v9005_v4 = vsel %vm1229_vm6, %v8599_v42, 0.0  ;;  %v8982_v25 = vrot.slane %v8981_v9, 1  ;;  %v9297_v61 = vsel %vm3270_vm14, %v15909_v3, %v9296_v17  ;;  %11859 = vmatprep.subr.bf16.mxu1 %v12043_v32 }
 0xcee   :  { %v9006_v28 = vrot.slane %v9005_v4, 4  ;;  %v9040_v29 = vsel %vm1229_vm6, %v8604_v1, 0.0  ;;  %v9017_v60 = vrot.slane %v9016_v41, 1  ;;  %v9003_v58 = vrot.slane %v9002_v44, 1  ;;  %11860 = vmatpush3.bf16.msra.mxu1 %v12043_v32 }
 0xcef   :  { %v9023_v8 = vadd.f32 %v9022_v54, %v9021_v36  ;;  %v9041_v14 = vrot.slane %v9040_v29, 4  ;;  %v9303_v23 = vsel %vm3268_vm13, %v9245_v34, %v9302_v26  ;;  %v8538_v30 = vadd.f32 %v8401_v33, %v7743_v37 }
 0xcf0   :  { %v9007_v27 = vadd.f32 %v9006_v28, %v9005_v4  ;;  %v8541_v63 = vadd.f32 %v11840_v38, %v15865_v0  ;;  %v9298_v3 = vsel %vm3272_vm15, %v15914_v39, %v9297_v61  ;;  %v9304_v2 = vsel %vm3270_vm14, %v9246_v11, %v9303_v23 }
 0xcf1   :  { %v9042_v52 = vadd.f32 %v9041_v14, %v9040_v29  ;;  %v8539_v7 = vadd.f32 %v8405_v57, %v7746_v13  ;;  %v9305_v22 = vsel %vm3272_vm15, %v9247_v19, %v9304_v2  ;;  %v8602_v21 = vmax.f32 %v8538_v30, 0.0  ;;  %v12044_v19 = vld [vmem:[%s16280_s10 + $0x48] sm:$0xff]  }
 0xcf2   :  { %v9008_v10 = vrot.slane %v9007_v27, 2  ;;  %v8605_v47 = vmax.f32 %v8541_v63, 0.0  ;;  %v8976_v55 = vadd.f32 %v8975_v40, %v8974_v31  ;;  %v9322_v0 = vpack.c.b16 %v9305_v22, %v9298_v3  ;;  %11861 = vmatprep.subr.bf16.mxu1 %v12044_v19  ;;  %v12045_v31 = vld [vmem:[%s16280_s10 + $0x40] sm:$0xff]  }
 0xcf3   :  { %v9043_v33 = vrot.slane %v9042_v52, 2  ;;  %v8603_v26 = vmax.f32 %v8539_v7, 0.0  ;;  %v9004_v49 = vadd.f32 %v9003_v58, %v9002_v44  ;;  %v9026_v39 = vsel %vm1229_vm6, %v8602_v21, 0.0  ;;  %11862 = vmatpush3.bf16.msra.mxu1 %v12044_v19 }
 0xcf4   :  { %v9009_v50 = vadd.f32 %v9008_v10, %v9007_v27  ;;  %v9047_v11 = vsel %vm1229_vm6, %v8605_v47, 0.0  ;;  %v8983_v46 = vadd.f32 %v8982_v25, %v8981_v9  ;;  %v9024_v16 = vrot.slane %v9023_v8, 1  ;;  %11853 = vmatprep.mubr.msk.bf16.mxu1 %vm1229_vm6, %v9322_v0  ;;  %11863 = vmatprep.subr.bf16.mxu1 %v12045_v31 }
 0xcf5   :  { %v9027_v57 = vrot.slane %v9026_v39, 4  ;;  %v9048_v37 = vrot.slane %v9047_v11, 4  ;;  %v9018_v51 = vadd.f32 %v9017_v60, %v9016_v41  ;;  %v9044_v5 = vadd.f32 %v9043_v33, %v9042_v52 }
 0xcf6   :  { %v9010_v12 = vrot.slane %v9009_v50, 1  ;;  %v9033_v34 = vsel %vm1229_vm6, %v8603_v26, 0.0  ;;  %v8996_v59 = vrot.slane %v15970_v24, 1  ;;  %v9307_v36 = vsel %vm3262_vm10, %v15959_v6, %v9306_v43 }
 0xcf7   :  { %v9028_v15 = vadd.f32 %v9027_v57, %v9026_v39  ;;  %v9049_v20 = vadd.f32 %v9048_v37, %v9047_v11  ;;  %v9034_v53 = vrot.slane %v9033_v34, 4  ;;  %v9115_v62 = vpack.c.bf16 %v8976_v55, %v8976_v55  ;;  %11864 = vmatpush3.bf16.msra.mxu1 %v12045_v31 }
 0xcf8   :  { %v9119_v56 = vpack.c.bf16 %v9004_v49, %v9004_v49  ;;  %v9011_v9 = vadd.f32 %v9010_v12, %v9009_v50  ;;  %v9025_v48 = vadd.f32 %v9024_v16, %v9023_v8  ;;  %v9116_v54 = vpack.c.bf16 %v8983_v46, %v8983_v46 }
 0xcf9   :  { %v9029_v38 = vrot.slane %v9028_v15, 2  ;;  %v9050_v41 = vrot.slane %v9049_v20, 2  ;;  %v9035_v44 = vadd.f32 %v9034_v53, %v9033_v34  ;;  %v9121_v42 = vpack.c.bf16 %v9018_v51, %v9018_v51  ;;  %v10751_v34 = vld [vmem:[%s16282_s8 + $0x2] sm:$0x1] }
 0xcfa   :  { %v9120_v1 = vpack.c.bf16 %v9011_v9, %v9011_v9  ;;  %v9045_v17 = vrot.slane %v9044_v5, 1  ;;  %v8997_v40 = vadd.f32 %v8996_v59, %v15970_v24  ;;  %v9252_v29 = vunpack.c.l.b16 %v9115_v62 }
 0xcfb   :  { %v9030_v4 = vadd.f32 %v9029_v38, %v9028_v15  ;;  %v9051_v25 = vadd.f32 %v9050_v41, %v9049_v20  ;;  %v9036_v28 = vrot.slane %v9035_v44, 2  ;;  %v9308_v6 = vsel %vm3264_vm11, %v15962_v35, %v9307_v36 }
 0xcfc   :  { %v9256_v43 = vunpack.c.l.b16 %v9119_v56  ;;  %v9257_v61 = vunpack.c.l.b16 %v9120_v1  ;;  %v9122_v13 = vpack.c.bf16 %v9025_v48, %v9025_v48  ;;  %v9253_v14 = vunpack.c.l.b16 %v9116_v54  ;;  %v12049_v54 = vld [vmem:[%s16281_s9 + $0x40] sm:$0xff]  }
 0xcfd   :  { %v9031_v60 = vrot.slane %v9030_v4, 1  ;;  %v9052_v58 = vrot.slane %v9051_v25, 1  ;;  %v9037_v8 = vadd.f32 %v9036_v28, %v9035_v44  ;;  %v9258_v32 = vunpack.c.l.b16 %v9121_v42  ;;  %v12047_v44 = vld [vmem:[%s16281_s9 + $0x50] sm:$0xff]  }
 0xcfe   :  { %v9313_v27 = vsel %vm3260_vm9, %v9257_v61, %v9256_v43  ;;  %v9046_v23 = vadd.f32 %v9045_v17, %v9044_v5  ;;  %v9117_v52 = vpack.c.bf16 %v15964_v45, %v15964_v45  ;;  %v9309_v3 = vsel %vm3266_vm12, %v9252_v29, %v9308_v6  ;;  %v12046_v5 = vld [vmem:[%s16281_s9 + $0x58] sm:$0xff]  }
 0xcff   :  { %v9032_v24 = vadd.f32 %v9031_v60, %v9030_v4  ;;  %v9053_v30 = vadd.f32 %v9052_v58, %v9051_v25  ;;  %v9038_v63 = vrot.slane %v9037_v8, 1  ;;  %v9314_v35 = vsel %vm3262_vm10, %v9258_v32, %v9313_v27  ;;  %11873 = vmatprep.subr.bf16.mxu1 %v12046_v5  ;;  %v16912_v61 = vld [vmem:[#allocation61_spill] sm:$0xff]  ;;  %v16914_v60 = vld [vmem:[#allocation23_spill] sm:$0xff]  ;;  %v16915_v58 = vld [vmem:[#allocation64_spill] sm:$0xff] }
 0xd00   :  { %v9259_v2 = vunpack.c.l.b16 %v9122_v13  ;;  %v9118_v22 = vpack.c.bf16 %v8997_v40, %v8997_v40  ;;  %v9310_v21 = vsel %vm3268_vm13, %v9253_v14, %v9309_v3  ;;  %v9125_v47 = vpack.c.bf16 %v9046_v23, %v9046_v23  ;;  %v16913_v13 = vld [vmem:[#allocation68_spill] sm:$0xff]  ;;  %v12052_v32 = vld [vmem:[%s16283_s12 + $0x48] sm:$0xff]   ;;  %v12053_v27 = vld [vmem:[%s16283_s12 + $0x40] sm:$0xff]  }
 0xd01   :  { %v9123_v7 = vpack.c.bf16 %v9032_v24, %v9032_v24  ;;  %v9039_v10 = vadd.f32 %v9038_v63, %v9037_v8  ;;  %v9126_v0 = vpack.c.bf16 %v9053_v30, %v9053_v30  ;;  %v9254_v49 = vunpack.c.l.b16 %v9117_v52  ;;  %v12050_v8 = vld [vmem:[%s16283_s12 + $0x58] sm:$0xff]   ;;  %v12051_v14 = vld [vmem:[%s16283_s12 + $0x50] sm:$0xff]  }
 0xd02   :  { %v9315_v33 = vsel %vm3264_vm11, %v9259_v2, %v9314_v35  ;;  %v9262_v39 = vunpack.c.l.b16 %v9125_v47  ;;  %v9255_v46 = vunpack.c.l.b16 %v9118_v22  ;;  %v9129_v59 = vmul.f32 8.0, %v10751_v34 }
 0xd03   :  { %v9260_v55 = vunpack.c.l.b16 %v9123_v7  ;;  %v9124_v26 = vpack.c.bf16 %v9039_v10, %v9039_v10  ;;  %v9311_v11 = vsel %vm3270_vm14, %v9254_v49, %v9310_v21  ;;  %v9263_v16 = vunpack.c.l.b16 %v9126_v0 }
 0xd04   :  { %v9312_v19 = vsel %vm3272_vm15, %v9255_v46, %v9311_v11  ;;  %v9134_v53 = vrot.slane %v9129_v59, %v12878_v18  ;;  %v12048_v18 = vld [vmem:[%s16281_s9 + $0x48] sm:$0xff]  }
 0xd05   :  { %v9261_v50 = vunpack.c.l.b16 %v9124_v26  ;;  %v9316_v45 = vsel %vm3266_vm12, %v9260_v55, %v9315_v33  ;;  %v10793_v55 = vld [vmem:[%s16284_s11 + $0x2] ss:$0 sm:$0xff] }
 0xd07   :  { %v9317_v57 = vsel %vm3268_vm13, %v9261_v50, %v9316_v45 }
 0xd08   :  { %v9318_v37 = vsel %vm3270_vm14, %v9262_v39, %v9317_v57 }
 0xd09   :  { %v9319_v51 = vsel %vm3272_vm15, %v9263_v16, %v9318_v37 }
 0xd0a   :  { %v9323_v12 = vpack.c.b16 %v9319_v51, %v9312_v19 }
 0xd0c   :  { %11854 = vmatmul.mubr.msk.bf16.gmra.mxu1 %vm1229_vm6, %v9323_v12 }
 0xd6a   :  { %v11851_v15 = vpop.f32.mrf.mxu1 }
 0xd6b   :  { %v9403_v48 = vadd.f32 %v11851_v15, %v9134_v53 }
 0xd6c   :  { %v9394_v20 = vpop.f32.mrf.mxu1 }
 0xd6d   :  { %v9395_v56 = vadd.f32 %v9394_v20, %v9134_v53 }
 0xd6e   :  { %v11852_v31 = vpop.f32.mrf.mxu1 }
 0xd6f   :  { %v9406_v36 = vadd.f32 %v11852_v31, %v9134_v53 }
 0xd70   :  { %v9397_v62 = vpop.f32.mrf.mxu1 }
 0xd71   :  { %v9398_v9 = vadd.f32 %v9397_v62, %v9134_v53  ;;  %v9444_v41 = vpack.c.bf16 %v9406_v36, %v9403_v48 }
 0xd73   :  { %v9443_v38 = vpack.c.bf16 %v9398_v9, %v9395_v56 }
 0xd75   :  { %11865 = vmatprep.mubr.msk.bf16.mxu1 %vm1229_vm6, %v9443_v38 }
 0xd76   :  { %11866 = vmatmul.mubr.msk.bf16.vlgmr.msra.gmra.mxu1 %vm1229_vm6, %v9444_v41 }
 0xd77   :  { %11874 = vmatpush3.bf16.msra.mxu1 %v12046_v5 }
 0xd78   :  { %11875 = vmatprep.subr.bf16.mxu1 %v12047_v44 }
 0xd7b   :  { %11876 = vmatpush3.bf16.msra.mxu1 %v12047_v44 }
 0xd7c   :  { %11877 = vmatprep.subr.bf16.mxu1 %v12048_v18 }
 0xd7f   :  { %11878 = vmatpush3.bf16.msra.mxu1 %v12048_v18 }
 0xd80   :  { %11879 = vmatprep.subr.bf16.mxu1 %v12049_v54 }
 0xd83   :  { %11880 = vmatpush3.bf16.msra.mxu1 %v12049_v54  ;;  %v12054_v54 = vld [vmem:[%s16286_s14 + $0x18] sm:$0xff]  }
 0xd84   :  { %11889 = vmatprep.subr.bf16.mxu1 %v12050_v8 }
 0xdcc   :  { %v11855_v42 = vpop.f32.mrf.mxu1 }
 0xdcd   :  { %v9419_v29 = vadd.f32 %v11855_v42, %v9134_v53  ;;  %v12055_v42 = vld [vmem:[%s16286_s14 + $0x10] sm:$0xff]  }
 0xdce   :  { %v9410_v1 = vpop.f32.mrf.mxu1 }
 0xdcf   :  { %v9411_v25 = vadd.f32 %v9410_v1, %v9134_v53  ;;  %v12056_v1 = vld [vmem:[%s16286_s14 + $0x8] sm:$0xff]  }
 0xdd0   :  { %v11856_v17 = vpop.f32.mrf.mxu1 }
 0xdd1   :  { %v9422_v40 = vadd.f32 %v11856_v17, %v9134_v53  ;;  %v12057_v17 = vld [vmem:[%s16286_s14] sm:$0xff]  }
 0xdd2   :  { %v9413_v4 = vpop.f32.mrf.mxu1 }
 0xdd3   :  { %v9414_v28 = vadd.f32 %v9413_v4, %v9134_v53  ;;  %v9446_v43 = vpack.c.bf16 %v9422_v40, %v9419_v29  ;;  %v12058_v40 = vld [vmem:[%s16287_s16 + $0x38] sm:$0xff]  }
 0xdd5   :  { %v9445_v6 = vpack.c.bf16 %v9414_v28, %v9411_v25  ;;  %v10803_v25 = vld [vmem:[%s16285_s13 + $0x2] ss:$0 sm:$0xff]  ;;  %s12073_s13 = smov 64  }
 0xdd7   :  { %11869 = vmatprep.mubr.msk.bf16.mxu1 %vm1229_vm6, %v9445_v6 }
 0xdd8   :  { %11870 = vmatmul.mubr.msk.bf16.gmra.mxu1 %vm1229_vm6, %v9446_v43 }
 0xdd9   :  { %11881 = vmatprep.mubr.msk.bf16.mxu1 %vm1229_vm6, %v16912_v61 }
 0xde0   :  { %11882 = vmatmul.mubr.msk.bf16.vlgmr.msra.gmra.mxu1 %vm1229_vm6, %v16913_v13 }
 0xde1   :  { %11885 = vmatprep.mubr.msk.bf16.mxu1 %vm1229_vm6, %v16914_v60  ;;  %11890 = vmatpush3.bf16.msra.mxu1 %v12050_v8  ;;  %v16916_v60 = vld [vmem:[#allocation26_spill] sm:$0xff] }
 0xde2   :  { %11891 = vmatprep.subr.bf16.mxu1 %v12051_v14 }
 0xde5   :  { %11892 = vmatpush3.bf16.msra.mxu1 %v12051_v14  ;;  %v16918_v14 = vld [vmem:[#allocation27_spill] sm:$0xff] }
 0xde6   :  { %11893 = vmatprep.subr.bf16.mxu1 %v12052_v32 }
 0xde8   :  { %11886 = vmatmul.mubr.msk.bf16.gmra.mxu1 %vm1229_vm6, %v16915_v58  ;;  %v16917_v58 = vmax.f32 %v16916_v60, 0.0 }
 0xde9   :  { %11894 = vmatpush3.bf16.msra.mxu1 %v12052_v32  ;;  %v16919_v32 = vmax.f32 %v16918_v14, 0.0 }
 0xdea   :  { %11895 = vmatprep.subr.bf16.mxu1 %v12053_v27 }
 0xded   :  { %11896 = vmatpush3.bf16.msra.mxu1 %v12053_v27 }
 0xdee   :  { %11905 = vmatprep.subr.bf16.mxu1 %v12054_v54 }
 0xe36   :  { %v11867_v23 = vpop.f32.mrf.mxu1 }
 0xe38   :  { %v9517_v24 = vpop.f32.mrf.mxu1 }
 0xe3a   :  { %v11868_v30 = vpop.f32.mrf.mxu1 }
 0xe3c   :  { %v9520_v63 = vpop.f32.mrf.mxu1 }
 0xe98   :  { %v11871_v52 = vpop.f32.mrf.mxu1 }
 0xe9a   :  { %v9533_v35 = vpop.f32.mrf.mxu1 }
 0xe9c   :  { %v11872_v3 = vpop.f32.mrf.mxu1 }
 0xe9e   :  { %v9536_v2 = vpop.f32.mrf.mxu1 }
 0xea0   :  { %v11883_v7 = vpop.f32.mrf.mxu1 }
 0xea1   :  { %v9615_v21 = vadd.f32 %v11883_v7, %v11867_v23 }
 0xea2   :  { %v9606_v10 = vpop.f32.mrf.mxu1 }
 0xea3   :  { %v9607_v22 = vadd.f32 %v9606_v10, %v9517_v24  ;;  %v9647_v39 = vadd.f32 %v10793_v55, %v9615_v21  ;;  %v16920_v24 = vld [vmem:[#allocation29_spill] sm:$0xff] }
 0xea4   :  { %v11884_v47 = vpop.f32.mrf.mxu1 }
 0xea5   :  { %v9618_v33 = vadd.f32 %v11884_v47, %v11868_v30  ;;  %v9645_v26 = vadd.f32 %v10793_v55, %v9607_v22  ;;  %v9655_v51 = vmax.f32 %v9647_v39, 0.0  ;;  %v16921_v30 = vmax.f32 %v16920_v24, 0.0 }
 0xea6   :  { %v9609_v0 = vpop.f32.mrf.mxu1 }
 0xea7   :  { %v9648_v49 = vadd.f32 %v10793_v55, %v9618_v33  ;;  %v9610_v50 = vadd.f32 %v9609_v0, %v9520_v63  ;;  %v9653_v57 = vmax.f32 %v9645_v26, 0.0 }
 0xea8   :  { %v11887_v45 = vpop.f32.mrf.mxu1 }
 0xea9   :  { %v9646_v11 = vadd.f32 %v10793_v55, %v9610_v50  ;;  %v9656_v46 = vmax.f32 %v9648_v49, 0.0  ;;  %v9631_v12 = vadd.f32 %v11887_v45, %v11871_v52  ;;  %v12059_v45 = vld [vmem:[%s16287_s16 + $0x30] sm:$0xff]  }
 0xeaa   :  { %v9622_v16 = vpop.f32.mrf.mxu1 }
 0xeab   :  { %v9654_v37 = vmax.f32 %v9646_v11, 0.0  ;;  %v9623_v19 = vadd.f32 %v9622_v16, %v9533_v35  ;;  %v9671_v15 = vpack.c.bf16 %v9656_v46, %v9655_v51  ;;  %v9651_v62 = vadd.f32 %v10793_v55, %v9631_v12  ;;  %v16922_v35 = vld [vmem:[#allocation46_spill] sm:$0xff]  ;;  %v16924_v11 = vld [vmem:[#allocation73_spill] sm:$0xff]  ;;  %v16928_v12 = vld [vmem:[#allocation48_spill] sm:$0xff] }
 0xeac   :  { %v11888_v5 = vpop.f32.mrf.mxu1  ;;  %v16925_v46 = vmax.f32 %v16924_v11, 0.0  ;;  %v12068_v11 = vld [vmem:[%s16288_s18 + $0x8] sm:$0xff]  }
 0xead   :  { %v9670_v34 = vpack.c.bf16 %v9654_v37, %v9653_v57  ;;  %v9634_v59 = vadd.f32 %v11888_v5, %v11872_v3  ;;  %v9649_v53 = vadd.f32 %v10793_v55, %v9623_v19  ;;  %v9659_v41 = vmax.f32 %v9651_v62, 0.0  ;;  %v16926_v57 = vld [vmem:[#allocation71_spill] sm:$0xff] }
 0xeae   :  { %v9625_v20 = vpop.f32.mrf.mxu1  ;;  %v16923_v3 = vmax.f32 %v16922_v35, 0.0  ;;  %v16927_v37 = vmax.f32 %v16926_v57, 0.0  ;;  %v16929_v5 = vmax.f32 %v16928_v12, 0.0  ;;  %v10821_v57 = vld [vmem:[%s16290_s17] ss:$0 sm:$0xff] }
 0xeaf   :  { %v9652_v31 = vadd.f32 %v10793_v55, %v9634_v59  ;;  %v9626_v36 = vadd.f32 %v9625_v20, %v9536_v2  ;;  %11897 = vmatprep.mubr.msk.bf16.mxu1 %vm1229_vm6, %v9670_v34  ;;  %v9657_v48 = vmax.f32 %v9649_v53, 0.0  ;;  %v16930_v59 = vld [vmem:[#allocation70_spill] sm:$0xff] }
 0xeb0   :  { %11898 = vmatmul.mubr.msk.bf16.vlgmr.msra.gmra.mxu1 %vm1229_vm6, %v9671_v15  ;;  %v16931_v15 = vmax.f32 %v16930_v59, 0.0 }
 0xeb1   :  { %v9650_v56 = vadd.f32 %v10793_v55, %v9626_v36  ;;  %v9660_v9 = vmax.f32 %v9652_v31, 0.0  ;;  %11906 = vmatpush3.bf16.msra.mxu1 %v12054_v54  ;;  %v12060_v31 = vld [vmem:[%s16287_s16 + $0x28] sm:$0xff]   ;;  %v12065_v54 = vld [vmem:[%s16287_s16] sm:$0xff]  }
 0xeb2   :  { %11907 = vmatprep.subr.bf16.mxu1 %v12055_v42 }
 0xeb3   :  { %v9658_v38 = vmax.f32 %v9650_v56, 0.0  ;;  %v9673_v18 = vpack.c.bf16 %v9660_v9, %v9659_v41  ;;  %v12062_v41 = vld [vmem:[%s16287_s16 + $0x18] sm:$0xff]  }
 0xeb5   :  { %v9672_v44 = vpack.c.bf16 %v9658_v38, %v9657_v48  ;;  %11908 = vmatpush3.bf16.msra.mxu1 %v12055_v42  ;;  %v12061_v38 = vld [vmem:[%s16287_s16 + $0x20] sm:$0xff]   ;;  %v12066_v42 = vld [vmem:[%s16288_s18 + $0x18] sm:$0xff]  }
 0xeb6   :  { %11909 = vmatprep.subr.bf16.mxu1 %v12056_v1 }
 0xeb7   :  { %11901 = vmatprep.mubr.msk.bf16.mxu1 %vm1229_vm6, %v9672_v44  ;;  %v12063_v44 = vld [vmem:[%s16287_s16 + $0x10] sm:$0xff]  }
 0xeb8   :  { %11902 = vmatmul.mubr.msk.bf16.gmra.mxu1 %vm1229_vm6, %v9673_v18  ;;  %v12064_v18 = vld [vmem:[%s16287_s16 + $0x8] sm:$0xff]  }
 0xeb9   :  { %11910 = vmatpush3.bf16.msra.mxu1 %v12056_v1 }
 0xeba   :  { %11911 = vmatprep.subr.bf16.mxu1 %v12057_v17 }
 0xebd   :  { %11912 = vmatpush3.bf16.msra.mxu1 %v12057_v17 }
 0xebe   :  { %11921 = vmatprep.subr.bf16.mxu1 %v12058_v40 }
 0xf70   :  { %v11899_v4 = vpop.f32.mrf.mxu1 }
 0xf71   :  { %v9761_v6 = vadd.f32 %v11899_v4, %v10803_v25 }
 0xf72   :  { %v9752_v28 = vpop.f32.mrf.mxu1 }
 0xf73   :  { %v9753_v29 = vadd.f32 %v10803_v25, %v9752_v28  ;;  %v16096_v63 = vadd.f32 %v9761_v6, %v16921_v30 }
 0xf74   :  { %v11900_v43 = vpop.f32.mrf.mxu1 }
 0xf75   :  { %v9764_v61 = vadd.f32 %v11900_v43, %v10803_v25  ;;  %v16088_v8 = vadd.f32 %v9753_v29, %v16917_v58  ;;  %v9793_v55 = vmax.f32 %v16096_v63, 0.0 }
 0xf76   :  { %v9755_v13 = vpop.f32.mrf.mxu1 }
 0xf77   :  { %v16092_v27 = vadd.f32 %v9764_v61, %v16919_v32  ;;  %v9756_v23 = vadd.f32 %v10803_v25, %v9755_v13  ;;  %v9791_v22 = vmax.f32 %v16088_v8, 0.0 }
 0xf78   :  { %v11903_v52 = vpop.f32.mrf.mxu1 }
 0xf79   :  { %v16100_v2 = vadd.f32 %v9756_v23, %v16923_v3  ;;  %v9794_v7 = vmax.f32 %v16092_v27, 0.0  ;;  %v9777_v33 = vadd.f32 %v11903_v52, %v10803_v25 }
 0xf7a   :  { %v9768_v10 = vpop.f32.mrf.mxu1 }
 0xf7b   :  { %v9792_v21 = vmax.f32 %v16100_v2, 0.0  ;;  %v9769_v47 = vadd.f32 %v10803_v25, %v9768_v10  ;;  %v9808_v50 = vpack.c.bf16 %v9794_v7, %v9793_v55  ;;  %v16128_v34 = vadd.f32 %v9777_v33, %v16929_v5 }
 0xf7c   :  { %v11904_v0 = vpop.f32.mrf.mxu1 }
 0xf7d   :  { %v9807_v26 = vpack.c.bf16 %v9792_v21, %v9791_v22  ;;  %v9780_v49 = vadd.f32 %v11904_v0, %v10803_v25  ;;  %v16119_v16 = vadd.f32 %v9769_v47, %v16925_v46  ;;  %v9797_v56 = vmax.f32 %v16128_v34, 0.0  ;;  %v12069_v46 = vld [vmem:[%s16288_s18] sm:$0xff]  }
 0xf7e   :  { %v9771_v39 = vpop.f32.mrf.mxu1  ;;  %v10830_v34 = vld [vmem:[%s16292_s19] ss:$0 sm:$0xff] }
 0xf7f   :  { %v16123_v19 = vadd.f32 %v9780_v49, %v16927_v37  ;;  %v9772_v51 = vadd.f32 %v10803_v25, %v9771_v39  ;;  %11913 = vmatprep.mubr.msk.bf16.mxu1 %vm1229_vm6, %v9807_v26  ;;  %v9795_v36 = vmax.f32 %v16119_v16, 0.0 }
 0xf80   :  { %11914 = vmatmul.mubr.msk.bf16.vlgmr.msra.gmra.mxu1 %vm1229_vm6, %v9808_v50 }
 0xf81   :  { %v16133_v20 = vadd.f32 %v9772_v51, %v16931_v15  ;;  %11922 = vmatpush3.bf16.msra.mxu1 %v12058_v40  ;;  %v9798_v53 = vmax.f32 %v16123_v19, 0.0  ;;  %v10812_v40 = vld [vmem:[%s16289_s15] ss:$0 sm:$0xff] }
 0xf82   :  { %11923 = vmatprep.subr.bf16.mxu1 %v12059_v45 }
 0xf83   :  { %v9796_v62 = vmax.f32 %v16133_v20, 0.0  ;;  %v9810_v48 = vpack.c.bf16 %v9798_v53, %v9797_v56 }
 0xf85   :  { %v9809_v9 = vpack.c.bf16 %v9796_v62, %v9795_v36  ;;  %11924 = vmatpush3.bf16.msra.mxu1 %v12059_v45  ;;  %v12067_v45 = vld [vmem:[%s16288_s18 + $0x10] sm:$0xff]  }
 0xf86   :  { %11925 = vmatprep.subr.bf16.mxu1 %v12060_v31 }
 0xf87   :  { %11917 = vmatprep.mubr.msk.bf16.mxu1 %vm1229_vm6, %v9809_v9 }
 0xf88   :  { %11918 = vmatmul.mubr.msk.bf16.gmra.mxu1 %vm1229_vm6, %v9810_v48 }
 0xf89   :  { %11926 = vmatpush3.bf16.msra.mxu1 %v12060_v31 }
 0xf8a   :  { %11927 = vmatprep.subr.bf16.mxu1 %v12061_v38 }
 0xf8d   :  { %11928 = vmatpush3.bf16.msra.mxu1 %v12061_v38 }
 0xf8e   :  { %11929 = vmatprep.subr.bf16.mxu1 %v12062_v41 }
 0xf91   :  { %11930 = vmatpush3.bf16.msra.mxu1 %v12062_v41 }
 0xf92   :  { %11931 = vmatprep.subr.bf16.mxu1 %v12063_v44 }
 0xf95   :  { %11932 = vmatpush3.bf16.msra.mxu1 %v12063_v44 }
 0xf96   :  { %11933 = vmatprep.subr.bf16.mxu1 %v12064_v18 }
 0xf99   :  { %11934 = vmatpush3.bf16.msra.mxu1 %v12064_v18 }
 0xf9a   :  { %11935 = vmatprep.subr.bf16.mxu1 %v12065_v54 }
 0xf9d   :  { %11936 = vmatpush3.bf16.msra.mxu1 %v12065_v54 }
 0xf9e   :  { %11945 = vmatprep.subr.bf16.mxu1 %v12066_v42 }
0x1040   :  { %v11915_v1 = vpop.f32.mrf.mxu1 }
0x1041   :  { %v9897_v29 = vadd.f32 %v11915_v1, %v10812_v40 }
0x1042   :  { %v9888_v17 = vpop.f32.mrf.mxu1 }
0x1043   :  { %v9889_v25 = vadd.f32 %v10812_v40, %v9888_v17  ;;  %v9921_v14 = vmax.f32 %v9897_v29, 0.0 }
0x1044   :  { %v11916_v4 = vpop.f32.mrf.mxu1 }
0x1045   :  { %v9900_v28 = vadd.f32 %v11916_v4, %v10812_v40  ;;  %v9919_v60 = vmax.f32 %v9889_v25, 0.0 }
0x1046   :  { %v9891_v6 = vpop.f32.mrf.mxu1 }
0x1047   :  { %v9892_v43 = vadd.f32 %v10812_v40, %v9891_v6  ;;  %v9922_v61 = vmax.f32 %v9900_v28, 0.0 }
0x1048   :  { %v11919_v13 = vpop.f32.mrf.mxu1 }
0x1049   :  { %v9920_v58 = vmax.f32 %v9892_v43, 0.0  ;;  %v9944_v24 = vpack.c.bf16 %v9922_v61, %v9921_v14  ;;  %v9913_v3 = vadd.f32 %v11919_v13, %v10812_v40 }
0x104a   :  { %v9904_v32 = vpop.f32.mrf.mxu1 }
0x104b   :  { %v9943_v23 = vpack.c.bf16 %v9920_v58, %v9919_v60  ;;  %v9905_v52 = vadd.f32 %v10812_v40, %v9904_v32  ;;  %v9925_v49 = vmax.f32 %v9913_v3, 0.0 }
0x104c   :  { %v11920_v30 = vpop.f32.mrf.mxu1 }
0x104d   :  { %v9916_v35 = vadd.f32 %v11920_v30, %v10812_v40  ;;  %11937 = vmatprep.mubr.bf16.mxu1 %v9943_v23  ;;  %v9923_v0 = vmax.f32 %v9905_v52, 0.0 }
0x104e   :  { %v9907_v10 = vpop.f32.mrf.mxu1  ;;  %11938 = vmatmul.mubr.bf16.vlgmr.msra.gmra.mxu1 %v9944_v24 }
0x104f   :  { %v9908_v47 = vadd.f32 %v10812_v40, %v9907_v10  ;;  %11946 = vmatpush3.bf16.msra.mxu1 %v12066_v42  ;;  %v9926_v33 = vmax.f32 %v9916_v35, 0.0 }
0x1050   :  { %11947 = vmatprep.subr.bf16.mxu1 %v12067_v45 }
0x1051   :  { %v9924_v26 = vmax.f32 %v9908_v47, 0.0  ;;  %v9946_v39 = vpack.c.bf16 %v9926_v33, %v9925_v49 }
0x1053   :  { %v9945_v50 = vpack.c.bf16 %v9924_v26, %v9923_v0  ;;  %11948 = vmatpush3.bf16.msra.mxu1 %v12067_v45 }
0x1054   :  { %11949 = vmatprep.subr.bf16.mxu1 %v12068_v11 }
0x1055   :  { %11941 = vmatprep.mubr.bf16.mxu1 %v9945_v50 }
0x1056   :  { %11942 = vmatmul.mubr.bf16.gmra.mxu1 %v9946_v39 }
0x1057   :  { %11950 = vmatpush3.bf16.msra.mxu1 %v12068_v11 }
0x1058   :  { %11951 = vmatprep.subr.bf16.mxu1 %v12069_v46 }
0x105b   :  { %11952 = vmatpush3.bf16.msra.mxu1 %v12069_v46 }
0x110e   :  { %v11939_v37 = vpop.f32.mrf.mxu1 }
0x110f   :  { %v10045_v51 = vadd.f32 %v11939_v37, %v10821_v57 }
0x1110   :  { %v10036_v12 = vpop.f32.mrf.mxu1 }
0x1111   :  { %10079 = vrot.lane.b32.xlu0 %v10045_v51, %s12073_s13  ;;  %v10037_v59 = vadd.f32 %v10821_v57, %v10036_v12 }
0x1112   :  { %v11940_v5 = vpop.f32.mrf.mxu1 }
0x1113   :  { %v10048_v15 = vadd.f32 %v11940_v5, %v10821_v57 }
0x1114   :  { %v10039_v31 = vpop.f32.mrf.mxu1 }
0x1115   :  { %v10040_v9 = vadd.f32 %v10821_v57, %v10039_v31  ;;  %10081 = vrot.lane.b32.xlu1 %v10048_v15, %s12073_s13  ;;  %10075 = vrot.lane.b32.xlu0 %v10037_v59, %s12073_s13  ;;  %v10124_v41 = vpack.c.bf16 %v10048_v15, %v10045_v51 }
0x1116   :  { %v11943_v48 = vpop.f32.mrf.mxu1 }
0x1117   :  { %v10123_v38 = vpack.c.bf16 %v10040_v9, %v10037_v59  ;;  %v10061_v17 = vadd.f32 %v11943_v48, %v10821_v57 }
0x1118   :  { %v10052_v44 = vpop.f32.mrf.mxu1 }
0x1119   :  { %v10053_v18 = vadd.f32 %v10821_v57, %v10052_v44  ;;  %10077 = vrot.lane.b32.xlu1 %v10040_v9, %s12073_s13  ;;  %11953 = vmatprep.mubr.msk.bf16.mxu1 %vm1229_vm6, %v10123_v38 }
0x111a   :  { %v11944_v54 = vpop.f32.mrf.mxu1  ;;  %11954 = vmatmul.mubr.msk.bf16.vlgmr.msra.gmra.mxu1 %vm1229_vm6, %v10124_v41 }
0x111b   :  { %10083 = vrot.lane.b32.xlu0 %v10053_v18, %s12073_s13  ;;  %v10064_v42 = vadd.f32 %v11944_v54, %v10821_v57 }
0x111c   :  { %v10055_v1 = vpop.f32.mrf.mxu1 }
0x111d   :  { %v10056_v40 = vadd.f32 %v10821_v57, %v10055_v1  ;;  %v10126_v25 = vpack.c.bf16 %v10064_v42, %v10061_v17 }
0x111f   :  { %v10125_v4 = vpack.c.bf16 %v10056_v40, %v10053_v18  ;;  %10085 = vrot.lane.b32.xlu1 %v10056_v40, %s12073_s13  ;;  %10087 = vrot.lane.b32.xlu0 %v10061_v17, %s12073_s13 }
0x1121   :  { %11957 = vmatprep.mubr.msk.bf16.mxu1 %vm1229_vm6, %v10125_v4 }
0x1122   :  { %11958 = vmatmul.mubr.msk.bf16.gmra.mxu1 %vm1229_vm6, %v10126_v25 }
0x1123   :  { %10089 = vrot.lane.b32.xlu1 %v10064_v42, %s12073_s13 }
0x1183   :  { %v10080_v28 = vpop.permute.xlu0 %10079 }
0x1184   :  { %v10101_v29 = vsel %vm1229_vm6, %v9793_v55, %v10080_v28 }
0x1185   :  { %10109 = vst [vmem:[%s16291_s20 + $0x10] sm:$0xff] %v10101_v29 }
0x1187   :  { %v10082_v6 = vpop.permute.xlu1 %10081  ;;  %v10076_v43 = vpop.permute.xlu0 %10075 }
0x1188   :  { %v10102_v61 = vsel %vm1229_vm6, %v9794_v7, %v10082_v6  ;;  %v10099_v13 = vsel %vm1229_vm6, %v9791_v22, %v10076_v43 }
0x1189   :  { %10110 = vst [vmem:[%s16291_s20 + $0x18] sm:$0xff] %v10102_v61  ;;  %10107 = vst [vmem:[%s16291_s20] sm:$0xff] %v10099_v13 }
0x118b   :  { %v10078_v63 = vpop.permute.xlu1 %10077 }
0x118c   :  { %v10100_v55 = vsel %vm1229_vm6, %v9792_v21, %v10078_v63 }
0x118d   :  { %10108 = vst [vmem:[%s16291_s20 + $0x8] sm:$0xff] %v10100_v55  ;;  %v10084_v8 = vpop.permute.xlu0 %10083 }
0x118e   :  { %v10103_v27 = vsel %vm1229_vm6, %v9795_v36, %v10084_v8 }
0x118f   :  { %10111 = vst [vmem:[%s16291_s20 + $0x20] sm:$0xff] %v10103_v27 }
0x1191   :  { %v10086_v7 = vpop.permute.xlu1 %10085  ;;  %v10088_v22 = vpop.permute.xlu0 %10087 }
0x1192   :  { %v10104_v2 = vsel %vm1229_vm6, %v9796_v62, %v10086_v7  ;;  %v10105_v21 = vsel %vm1229_vm6, %v9797_v56, %v10088_v22 }
0x1193   :  { %10112 = vst [vmem:[%s16291_s20 + $0x28] sm:$0xff] %v10104_v2  ;;  %10113 = vst [vmem:[%s16291_s20 + $0x30] sm:$0xff] %v10105_v21 }
0x1195   :  { %v10090_v16 = vpop.permute.xlu1 %10089 }
0x1196   :  { %v10106_v36 = vsel %vm1229_vm6, %v9798_v53, %v10090_v16 }
0x1197   :  { %10114 = vst [vmem:[%s16291_s20 + $0x38] sm:$0xff] %v10106_v36 }
0x11da   :  { %v11955_v20 = vpop.f32.mrf.mxu1 }
0x11db   :  { %v10213_v62 = vadd.f32 %v11955_v20, %v10830_v34 }
0x11dc   :  { %v10204_v56 = vpop.f32.mrf.mxu1 }
0x11dd   :  { %10238 = vst.msk [vmem:[%s16293_s21 + $0x10] sm:$0xff] %vm10235_vm4, %v10213_v62  ;;  %v10205_v19 = vadd.f32 %v10830_v34, %v10204_v56 }
0x11de   :  { %v11956_v60 = vpop.f32.mrf.mxu1 }
0x11df   :  { %10236 = vst.msk [vmem:[%s16293_s21] sm:$0xff] %vm10235_vm4, %v10205_v19  ;;  %v10216_v53 = vadd.f32 %v11956_v60, %v10830_v34 }
0x11e0   :  { %v10207_v58 = vpop.f32.mrf.mxu1 }
0x11e1   :  { %10239 = vst.msk [vmem:[%s16293_s21 + $0x18] sm:$0xff] %vm10235_vm4, %v10216_v53  ;;  %v10208_v14 = vadd.f32 %v10830_v34, %v10207_v58 }
0x11e2   :  { %v11959_v32 = vpop.f32.mrf.mxu1 }
0x11e3   :  { %10237 = vst.msk [vmem:[%s16293_s21 + $0x8] sm:$0xff] %vm10235_vm4, %v10208_v14  ;;  %v10229_v23 = vadd.f32 %v11959_v32, %v10830_v34 }
0x11e4   :  { %v10220_v24 = vpop.f32.mrf.mxu1 }
0x11e5   :  { %10242 = vst.msk [vmem:[%s16293_s21 + $0x30] sm:$0xff] %vm10235_vm4, %v10229_v23  ;;  %v10221_v30 = vadd.f32 %v10830_v34, %v10220_v24 }
0x11e6   :  { %v11960_v52 = vpop.f32.mrf.mxu1 }
0x11e7   :  { %10240 = vst.msk [vmem:[%s16293_s21 + $0x20] sm:$0xff] %vm10235_vm4, %v10221_v30  ;;  %v10232_v35 = vadd.f32 %v11960_v52, %v10830_v34 }
0x11e8   :  { %v10223_v3 = vpop.f32.mrf.mxu1 }
0x11e9   :  { %10243 = vst.msk [vmem:[%s16293_s21 + $0x38] sm:$0xff] %vm10235_vm4, %v10232_v35  ;;  %v10224_v10 = vadd.f32 %v10830_v34, %v10223_v3 }
0x11eb   :  { %10241 = vst.msk [vmem:[%s16293_s21 + $0x28] sm:$0xff] %vm10235_vm4, %v10224_v10 }

</bundles_post_ra>
